<compile_context>
chip_gen: v6e
topology: v6e:2x2x1
jax: 0.10.0
libtpu: 0.0.40
codegen_flags: <defaults>
</compile_context>

<pallas_src>
import numpy as np
import jax
import jax.numpy as jnp
from jax.experimental import pallas as pl
from jax.experimental.pallas import tpu as pltpu

# ----------------------------- model constants ------------------------------
N_SAMPLES = 1024      # pad_or_trim target length (tiny stand-in for 480000)
N_FFT     = 64
HOP       = 32
N_MELS    = 16
N_FRAMES  = N_SAMPLES // HOP          # 32 mel frames
D_MODEL   = 32
N_HEADS   = 4
D_HEAD    = D_MODEL // N_HEADS        # 8
N_AUDIO_CTX = N_FRAMES // 2           # 16 (conv2 has stride 2)
VOCAB     = 64
N_TEXT_CTX = 8
SOT_TOKEN = 1
N_DECODE  = 4
LANES     = 128                       # lane-dense slab width
ATTN_SCALE = float(D_HEAD) ** -0.5

# ------------------- const-slab row layout (shared static) -------------------
# rows 0..5  : packed biases (see init_params; all-zero Whisper-style init)
#   row 0: enc_b_qkv(0:96)  | enc_b_o(96:128)
#   row 1: enc_b_fc1(0:128)
#   row 2: enc_b_fc2(0:32)  | cross_b_q(32:64) | cross_b_kv(64:128)
#   row 3: dec_b_qkv(0:96)  | dec_b_o(96:128)
#   row 4: dec_b_fc1(0:128)
#   row 5: dec_b_fc2(0:32)  | cross_b_o(32:64) | conv1_b(64:96) | conv2_b(96:128)
C_BIAS    = 0     # 6 rows
C_ENC_LN  = 8     # 6 rows  (g,b) x 3, lanes 0:32
C_DEC_LN  = 16    # 8 rows  (g,b) x 4, lanes 0:32
C_ENC_POS = 24    # 16 rows, lanes 0:32
C_DEC_POS = 40    # 8 rows,  lanes 0:32
C_CAUSAL  = 48    # 8 rows,  lanes 0:8   (0 / -1e9)
C_SEL     = 56    # 16 rows, lanes 0:96  (conv2 im2col selection, 3 x [16,32])
C_HMASK   = 72    # 4 rows,  lanes 0:32  (per-head lane masks)
C_X0      = 80    # 8 rows,  lanes 0:32  (initial decoder embeddings + pos)
C_ROWS    = 88


# --------------------------- in-kernel building blocks -----------------------
def _layer_norm(x, g, b, eps=1e-5):
    m = jnp.mean(x, axis=-1, keepdims=True)
    v = jnp.mean((x - m) ** 2, axis=-1, keepdims=True)
    return (x - m) * jax.lax.rsqrt(v + eps) * g + b


def _mha(q_scaled, k, v, head_mask, bias=None):
    """Multi-head attention with heads stacked along sublanes.

    q_scaled:[T,D] (scale pre-folded), k/v:[S,D], head_mask:[N_HEADS,D],
    bias (optional):[N_HEADS*T,S].  Two MXU contractions total and a single
    max/exp/sum/reciprocal pass for all heads.
    """
    t = q_scaled.shape[0]
    qs = jnp.concatenate([q_scaled * head_mask[h:h + 1] for h in range(N_HEADS)],
                         axis=0)                                               # [H*T,D]
    s = jax.lax.dot_general(qs, k, (((1,), (1,)), ((), ())),
                            preferred_element_type=jnp.float32)                # [H*T,S]
    if bias is not None:
        s = s + bias
    s = s - jnp.max(s, axis=-1, keepdims=True)
    p = jnp.exp(s)
    p = p * pl.reciprocal(jnp.sum(p, axis=-1, keepdims=True), approx=True)
    o = jnp.dot(p, v, preferred_element_type=jnp.float32)                      # [H*T,D]
    out = o[0:t] * head_mask[0:1]
    for h in range(1, N_HEADS):
        out = out + o[h * t:(h + 1) * t] * head_mask[h:h + 1]
    return out                                                                 # [T,D]


# ----------------------- single fused encoder+decode kernel ------------------
def _whisper_kernel(p1_ref, wa_ref, wb_ref, c_ref, tok_ref):
    f32 = jnp.float32

    # ================================ encoder ================================
    # conv1 (k=3, s=1): host-side im2col patches (lane-padded) x padded weight.
    # TODO(synk): jax.nn.gelu defaults to tanh approx; Whisper uses exact erf GELU.
    y1 = jax.nn.gelu(
        jnp.dot(p1_ref[...], wb_ref[:, 64:96], preferred_element_type=f32)
        + c_ref[5:6, 64:96])                                                   # [32,32]

    # conv2 (k=3, s=2, pad=1) via precomputed 0/1 selection matmuls.
    sel = c_ref[C_SEL:C_SEL + N_AUDIO_CTX, 0:3 * N_FRAMES]                     # [16,96]
    patches2 = jnp.concatenate(
        [jnp.dot(sel[:, kk * N_FRAMES:(kk + 1) * N_FRAMES], y1,
                 preferred_element_type=f32) for kk in range(3)], axis=1)      # [16,96]
    x = jax.nn.gelu(
        jnp.dot(patches2, wb_ref[0:3 * D_MODEL, 96:128], preferred_element_type=f32)
        + c_ref[5:6, 96:128])
    x = x + c_ref[C_ENC_POS:C_ENC_POS + N_AUDIO_CTX, 0:D_MODEL]                # [16,32]

    hm = c_ref[C_HMASK:C_HMASK + N_HEADS, 0:D_MODEL]                           # [4,32]
    eln = c_ref[C_ENC_LN:C_ENC_LN + 6, 0:D_MODEL]                              # [6,32]

    # self-attention (pre-norm), fused QKV projection
    h = _layer_norm(x, eln[0:1], eln[1:2])
    qkv = jnp.dot(h, wa_ref[0:32, 0:96], preferred_element_type=f32) + c_ref[0:1, 0:96]
    a = _mha(qkv[:, 0:32] * ATTN_SCALE, qkv[:, 32:64], qkv[:, 64:96], hm)
    x = x + jnp.dot(a, wa_ref[0:32, 96:128], preferred_element_type=f32) + c_ref[0:1, 96:128]

    # MLP
    h = _layer_norm(x, eln[2:3], eln[3:4])
    mid = jax.nn.gelu(jnp.dot(h, wa_ref[32:64, :], preferred_element_type=f32)
                      + c_ref[1:2, :])
    x = x + jnp.dot(mid, wb_ref[:, 0:32], preferred_element_type=f32) + c_ref[2:3, 0:32]
    enc = _layer_norm(x, eln[4:5], eln[5:6])                                   # [16,32]

    # cross-attention K/V computed ONCE; stays resident for all decode steps
    kv = jnp.dot(enc, wa_ref[64:96, 32:96], preferred_element_type=f32) + c_ref[2:3, 64:128]
    k_cross = kv[:, 0:D_MODEL]
    v_cross = kv[:, D_MODEL:2 * D_MODEL]

    # ===================== greedy decode (in-kernel, unrolled) ================
    dln = c_ref[C_DEC_LN:C_DEC_LN + 8, 0:D_MODEL]                              # [8,32]
    dec_pos = c_ref[C_DEC_POS:C_DEC_POS + N_TEXT_CTX, 0:D_MODEL]               # [8,32]
    causal = jnp.concatenate(
        [c_ref[C_CAUSAL:C_CAUSAL + N_TEXT_CTX, 0:N_TEXT_CTX]] * N_HEADS, axis=0)  # [32,8]
    w_tied = wa_ref[160:192, :]                                                # [32,128]

    lane_i = jax.lax.broadcasted_iota(jnp.int32, (1, LANES), 1)
    lane_f = lane_i.astype(f32)
    row_i = jax.lax.broadcasted_iota(jnp.int32, (N_TEXT_CTX, 1), 0)

    xd = c_ref[C_X0:C_X0 + N_TEXT_CTX, 0:D_MODEL]                              # [8,32]
    tok = jnp.broadcast_to(jnp.where(row_i == 0, float(SOT_TOKEN), 0.0),
                           (N_TEXT_CTX, LANES))                                # token ids (f32)

    for i in range(1, N_DECODE + 1):
        # masked self-attention, fused QKV
        h = _layer_norm(xd, dln[0:1], dln[1:2])
        qkv = jnp.dot(h, wa_ref[96:128, 0:96], preferred_element_type=f32) + c_ref[3:4, 0:96]
        a = _mha(qkv[:, 0:32] * ATTN_SCALE, qkv[:, 32:64], qkv[:, 64:96], hm, bias=causal)
        xi = xd + jnp.dot(a, wa_ref[96:128, 96:128], preferred_element_type=f32) + c_ref[3:4, 96:128]

        # cross-attention (K/V precomputed by the encoder section above)
        h = _layer_norm(xi, dln[2:3], dln[3:4])
        qc = (jnp.dot(h, wa_ref[64:96, 0:32], preferred_element_type=f32)
              + c_ref[2:3, 32:64]) * ATTN_SCALE
        a = _mha(qc, k_cross, v_cross, hm)
        xi = xi + jnp.dot(a, wa_ref[64:96, 96:128], preferred_element_type=f32) + c_ref[5:6, 32:64]

        # MLP
        h = _layer_norm(xi, dln[4:5], dln[5:6])
        mid = jax.nn.gelu(jnp.dot(h, wa_ref[128:160, :], preferred_element_type=f32)
                          + c_ref[4:5, :])
        xi = xi + jnp.dot(mid, wb_ref[:, 32:64], preferred_element_type=f32) + c_ref[5:6, 0:32]

        # final LN + tied logits for the ONE row that matters (static slice)
        xlast = _layer_norm(xi[i - 1:i, :], dln[6:7], dln[7:8])                # [1,32]
        logits = jnp.dot(xlast, w_tied, preferred_element_type=f32)            # [1,128]
        logits = jnp.where(lane_i < VOCAB, logits, -1e30)

        # greedy argmax in-kernel (first max index, like jnp.argmax)
        maxv = jnp.max(logits, axis=-1, keepdims=True)
        nxt = jnp.min(jnp.where(logits >= maxv, lane_f, float(LANES)),
                      axis=-1, keepdims=True)                                  # [1,1] token id

        # token-embedding gather via one-hot contraction against the tied weight
        onehot = (lane_f == nxt).astype(f32)                                   # [1,128]
        emb = jax.lax.dot_general(onehot, w_tied, (((1,), (1,)), ((), ())),
                                  preferred_element_type=f32)                  # [1,32]

        upd = row_i == i                                                       # [8,1]
        xd = jnp.where(upd, emb + dec_pos, xd)
        tok = jnp.where(upd, nxt, tok)

    tok_ref[...] = tok.astype(jnp.int32)


# ------------------------------ pallas_call wrapper ---------------------------
def _whisper_pallas(patches1, w_a, w_b, const_slab):
    # No grid: single invocation, every slab fully resident in VMEM (no
    # pipeline scaffolding, no input double-buffering).
    return pl.pallas_call(
        _whisper_kernel,
        out_shape=jax.ShapeDtypeStruct((N_TEXT_CTX, LANES), jnp.int32),
        in_specs=[pl.BlockSpec(memory_space=pltpu.MemorySpace.VMEM)] * 4,
        out_specs=pl.BlockSpec(memory_space=pltpu.MemorySpace.VMEM),
    )(patches1, w_a, w_b, const_slab)


# ------------------------------- JAX glue -----------------------------------
def whisper_forward(params, audio_samples):
    # ---- whisper.pad_or_trim ----
    audio = audio_samples.reshape(-1).astype(jnp.float32)
    audio = audio[:N_SAMPLES]
    audio = jnp.pad(audio, (0, N_SAMPLES - audio.shape[0]))

    # ---- whisper.log_mel_spectrogram ----
    # TODO(synk): STFT + log-mel stay in plain JAX (no Pallas FFT primitive and the
    # 16x33x32 mel matmul is pure launch overhead as a kernel); XLA fuses the epilogue.
    pad = N_FFT // 2
    padded = jnp.pad(audio, (pad, pad), mode='reflect')
    n_total = 1 + (padded.shape[0] - N_FFT) // HOP
    idx = jnp.arange(n_total)[:, None] * HOP + jnp.arange(N_FFT)[None, :]
    hann = 0.5 * (1.0 - jnp.cos(2.0 * jnp.pi * jnp.arange(N_FFT) / N_FFT))
    frames = padded[idx] * hann[None, :]
    spec = jnp.fft.rfft(frames, axis=-1).T[:, :-1]             # [F, T], drop last frame
    power = jnp.real(spec) ** 2 + jnp.imag(spec) ** 2
    mel = params['mel_filters'] @ power
    log_spec = jnp.log10(jnp.maximum(mel, 1e-10))
    log_spec = jnp.maximum(log_spec, jnp.max(log_spec) - 8.0)
    mels = (log_spec + 4.0) / 4.0                              # [n_mels, n_frames]

    # conv1 im2col (kernel=3, stride=1, pad=1): cheap JAX gather, lane-padded
    mel_fm = mels.T                                            # [frames, n_mels]
    xp = jnp.pad(mel_fm, ((1, 1), (0, 0)))
    gidx = jnp.arange(N_FRAMES)[:, None] + jnp.arange(3)[None, :]
    patches1 = xp[gidx].reshape(N_FRAMES, 3 * N_MELS)          # [32,48]
    patches1 = jnp.pad(patches1, ((0, 0), (0, LANES - 3 * N_MELS)))  # [32,128] lane-dense

    # ---- whisper.decode (synthetic tiny model, greedy) ----
    # TODO(synk): whisper's beam search / suppression / tokenizer / checkpoint weights
    # are replaced by a deterministic synthetic model with greedy argmax decode.
    tok_pack = _whisper_pallas(patches1, params['w_a'], params['w_b'], params['const'])
    tokens = tok_pack[:, 0]                                    # [8] int32
    return tokens, mels


# --------------------------- deterministic params ---------------------------
def make_mel_filters(n_mels, n_freq):
    # simple deterministic triangular filterbank (stand-in for whisper mel filters)
    pts = np.linspace(0, n_freq - 1, n_mels + 2)
    f = np.arange(n_freq, dtype=np.float32)
    filt = np.zeros((n_mels, n_freq), np.float32)
    for m in range(n_mels):
        l, c, r = pts[m], pts[m + 1], pts[m + 2]
        up = (f - l) / max(c - l, 1e-6)
        dn = (r - f) / max(r - c, 1e-6)
        filt[m] = np.maximum(0.0, np.minimum(up, dn))
    return jnp.asarray(filt)


def sinusoids(length, channels, max_timescale=10000.0):
    inc = np.log(max_timescale) / (channels // 2 - 1)
    inv = np.exp(-inc * np.arange(channels // 2))
    t = np.arange(length)[:, None] * inv[None, :]
    return jnp.asarray(np.concatenate([np.sin(t), np.cos(t)], axis=1), jnp.float32)


def init_params(key):
    keys = iter(jax.random.split(key, 128))

    def w(shape, scale=0.02):
        return scale * jax.random.normal(next(keys), shape, jnp.float32)

    def fused_qkv():
        return jnp.concatenate([w((D_MODEL, D_MODEL)) for _ in range(3)], axis=1)

    p = {'mel_filters': make_mel_filters(N_MELS, N_FFT // 2 + 1)}

    # raw synthetic weights (im2col layouts for the conv stem)
    conv1_w = w((3 * N_MELS, D_MODEL))
    conv2_w = w((3 * D_MODEL, D_MODEL))
    enc_pos = sinusoids(N_AUDIO_CTX, D_MODEL)
    enc_w_qkv = fused_qkv();        enc_w_o = w((D_MODEL, D_MODEL))
    enc_w_fc1 = w((D_MODEL, 4 * D_MODEL)); enc_w_fc2 = w((4 * D_MODEL, D_MODEL))
    tok_emb = w((VOCAB, D_MODEL));  dec_pos = w((N_TEXT_CTX, D_MODEL))
    dec_w_qkv = fused_qkv();        dec_w_o = w((D_MODEL, D_MODEL))
    cross_w_q = w((D_MODEL, D_MODEL))
    cross_w_kv = jnp.concatenate([w((D_MODEL, D_MODEL)), w((D_MODEL, D_MODEL))], axis=1)
    cross_w_o = w((D_MODEL, D_MODEL))
    dec_w_fc1 = w((D_MODEL, 4 * D_MODEL)); dec_w_fc2 = w((4 * D_MODEL, D_MODEL))
    w_tied = jnp.concatenate(
        [tok_emb.T, jnp.zeros((D_MODEL, LANES - VOCAB), jnp.float32)], axis=1)  # [32,128]

    # ---- packed weight slab A [192,128]: 32-row blocks, lane-dense ----
    wa = jnp.zeros((192, LANES), jnp.float32)
    wa = wa.at[0:32, 0:96].set(enc_w_qkv).at[0:32, 96:128].set(enc_w_o)
    wa = wa.at[32:64, :].set(enc_w_fc1)
    wa = (wa.at[64:96, 0:32].set(cross_w_q)
            .at[64:96, 32:96].set(cross_w_kv)
            .at[64:96, 96:128].set(cross_w_o))
    wa = wa.at[96:128, 0:96].set(dec_w_qkv).at[96:128, 96:128].set(dec_w_o)
    wa = wa.at[128:160, :].set(dec_w_fc1)
    wa = wa.at[160:192, :].set(w_tied)

    # ---- packed weight slab B [128,128]: fc2s + (zero-padded) conv weights ----
    wb = jnp.zeros((128, LANES), jnp.float32)
    wb = wb.at[:, 0:32].set(enc_w_fc2)
    wb = wb.at[:, 32:64].set(dec_w_fc2)
    wb = wb.at[0:3 * N_MELS, 64:96].set(conv1_w)        # rows 48:128 zero (patch pad)
    wb = wb.at[0:3 * D_MODEL, 96:128].set(conv2_w)

    # ---- constants slab [88,128] ----
    c = jnp.zeros((C_ROWS, LANES), jnp.float32)
    # rows 0..5: biases stay zero (Whisper-style zero-init biases in this synthetic model)
    for r in (C_ENC_LN, C_ENC_LN + 2, C_ENC_LN + 4,
              C_DEC_LN, C_DEC_LN + 2, C_DEC_LN + 4, C_DEC_LN + 6):
        c = c.at[r, 0:D_MODEL].set(1.0)                  # LN gammas (betas zero)
    c = c.at[C_ENC_POS:C_ENC_POS + N_AUDIO_CTX, 0:D_MODEL].set(enc_pos)
    c = c.at[C_DEC_POS:C_DEC_POS + N_TEXT_CTX, 0:D_MODEL].set(dec_pos)

    ti = np.arange(N_TEXT_CTX)[:, None]; si = np.arange(N_TEXT_CTX)[None, :]
    causal = np.where(si <= ti, 0.0, -1e9).astype(np.float32)
    c = c.at[C_CAUSAL:C_CAUSAL + N_TEXT_CTX, 0:N_TEXT_CTX].set(jnp.asarray(causal))

    t2 = np.arange(N_AUDIO_CTX)[:, None]; r2 = np.arange(N_FRAMES)[None, :]
    sel = np.concatenate(
        [(r2 == (2 * t2 + kk - 1)).astype(np.float32) for kk in range(3)], axis=1)  # [16,96]
    c = c.at[C_SEL:C_SEL + N_AUDIO_CTX, 0:3 * N_FRAMES].set(jnp.asarray(sel))

    d_i = np.arange(D_MODEL)[None, :]
    hmask = np.concatenate(
        [((d_i >= h * D_HEAD) & (d_i < (h + 1) * D_HEAD)).astype(np.float32)
         for h in range(N_HEADS)], axis=0)                                           # [4,32]
    c = c.at[C_HMASK:C_HMASK + N_HEADS, 0:D_MODEL].set(jnp.asarray(hmask))

    tok0 = jnp.zeros((N_TEXT_CTX,), jnp.int32).at[0].set(SOT_TOKEN)
    x0 = tok_emb[tok0] + dec_pos                                                     # [8,32]
    c = c.at[C_X0:C_X0 + N_TEXT_CTX, 0:D_MODEL].set(x0)

    p['w_a'] = wa
    p['w_b'] = wb
    p['const'] = c
    return p


# ----------------------------------- main ------------------------------------
if __name__ == "__main__":
    key = jax.random.PRNGKey(0)
    pkey, dkey = jax.random.split(key)
    params = init_params(pkey)

    # raw audio samples (flattened inside forward, like `audio_samples.flatten()`)
    audio_samples = jax.random.normal(dkey, (2, 512), jnp.float32)

    run = jax.jit(whisper_forward)
    tokens, mels = run(params, audio_samples)
    jax.block_until_ready((tokens, mels))
    print("KERNEL_OK")
</pallas_src>

<mosaic_0001>
module attributes {stable_mosaic.version = 11 : i64} {
  func.func @_whisper_kernel(%arg0: memref<32x128xf32, #tpu.memory_space<vmem>>, %arg1: memref<192x128xf32, #tpu.memory_space<vmem>>, %arg2: memref<128x128xf32, #tpu.memory_space<vmem>>, %arg3: memref<88x128xf32, #tpu.memory_space<vmem>>, %arg4: memref<8x128xi32, #tpu.memory_space<vmem>>) attributes {dimension_semantics = [], scalar_prefetch = 0 : i64, scratch_operands = 0 : i64, tpu.core_type = #tpu.core_type<tc>} {
    %c0 = arith.constant 0 : index
    %c0_0 = arith.constant 0 : index
    %0 = vector.load %arg0[%c0, %c0_0] : memref<32x128xf32, #tpu.memory_space<vmem>>, vector<32x128xf32>
    %c0_1 = arith.constant 0 : index
    %c64 = arith.constant 64 : index
    %1 = vector.load %arg2[%c0_1, %c64] : memref<128x128xf32, #tpu.memory_space<vmem>>, vector<128x32xf32>
    %cst = arith.constant dense<0.000000e+00> : vector<32x32xf32>
    %2 = tpu.matmul %0, %1, %cst {dimension_numbers = #tpu.dot_dimension_numbers<[1], [0], [0], [1], [0, 0, 1, 1], [], []>} : vector<32x128xf32>, vector<128x32xf32>, vector<32x32xf32> -> vector<32x32xf32>
    %c5 = arith.constant 5 : index
    %c64_2 = arith.constant 64 : index
    %3 = vector.load %arg3[%c5, %c64_2] : memref<88x128xf32, #tpu.memory_space<vmem>>, vector<1x32xf32>
    %4 = vector.broadcast %3 : vector<1x32xf32> to vector<32x32xf32>
    %5 = arith.addf %2, %4 : vector<32x32xf32>
    %6 = arith.mulf %5, %5 : vector<32x32xf32>
    %7 = arith.mulf %5, %6 : vector<32x32xf32>
    %cst_3 = arith.constant 4.471500e-02 : f32
    %8 = vector.broadcast %cst_3 : f32 to vector<32x32xf32>
    %9 = arith.mulf %8, %7 : vector<32x32xf32>
    %10 = arith.addf %5, %9 : vector<32x32xf32>
    %cst_4 = arith.constant 0.797884583 : f32
    %11 = vector.broadcast %cst_4 : f32 to vector<32x32xf32>
    %12 = arith.mulf %11, %10 : vector<32x32xf32>
    %13 = math.tanh %12 : vector<32x32xf32>
    %cst_5 = arith.constant 1.000000e+00 : f32
    %14 = vector.broadcast %cst_5 : f32 to vector<32x32xf32>
    %15 = arith.addf %14, %13 : vector<32x32xf32>
    %cst_6 = arith.constant 5.000000e-01 : f32
    %16 = vector.broadcast %cst_6 : f32 to vector<32x32xf32>
    %17 = arith.mulf %16, %15 : vector<32x32xf32>
    %18 = arith.mulf %5, %17 : vector<32x32xf32>
    %c56 = arith.constant 56 : index
    %c0_7 = arith.constant 0 : index
    %19 = vector.load %arg3[%c56, %c0_7] : memref<88x128xf32, #tpu.memory_space<vmem>>, vector<16x96xf32>
    %20 = vector.extract_strided_slice %19 {offsets = [0, 0], sizes = [16, 32], strides = [1, 1]} : vector<16x96xf32> to vector<16x32xf32>
    %cst_8 = arith.constant dense<0.000000e+00> : vector<16x32xf32>
    %21 = tpu.matmul %20, %18, %cst_8 {dimension_numbers = #tpu.dot_dimension_numbers<[1], [0], [0], [1], [0, 0, 1, 1], [], []>} : vector<16x32xf32>, vector<32x32xf32>, vector<16x32xf32> -> vector<16x32xf32>
    %22 = vector.extract_strided_slice %19 {offsets = [0, 32], sizes = [16, 32], strides = [1, 1]} : vector<16x96xf32> to vector<16x32xf32>
    %cst_9 = arith.constant dense<0.000000e+00> : vector<16x32xf32>
    %23 = tpu.matmul %22, %18, %cst_9 {dimension_numbers = #tpu.dot_dimension_numbers<[1], [0], [0], [1], [0, 0, 1, 1], [], []>} : vector<16x32xf32>, vector<32x32xf32>, vector<16x32xf32> -> vector<16x32xf32>
    %24 = vector.extract_strided_slice %19 {offsets = [0, 64], sizes = [16, 32], strides = [1, 1]} : vector<16x96xf32> to vector<16x32xf32>
    %cst_10 = arith.constant dense<0.000000e+00> : vector<16x32xf32>
    %25 = tpu.matmul %24, %18, %cst_10 {dimension_numbers = #tpu.dot_dimension_numbers<[1], [0], [0], [1], [0, 0, 1, 1], [], []>} : vector<16x32xf32>, vector<32x32xf32>, vector<16x32xf32> -> vector<16x32xf32>
    %26 = tpu.concatenate %21, %23, %25 in 1 : vector<16x32xf32>, vector<16x32xf32>, vector<16x32xf32> -> vector<16x96xf32>
    %c0_11 = arith.constant 0 : index
    %c96 = arith.constant 96 : index
    %27 = vector.load %arg2[%c0_11, %c96] : memref<128x128xf32, #tpu.memory_space<vmem>>, vector<96x32xf32>
    %cst_12 = arith.constant dense<0.000000e+00> : vector<16x32xf32>
    %28 = tpu.matmul %26, %27, %cst_12 {dimension_numbers = #tpu.dot_dimension_numbers<[1], [0], [0], [1], [0, 0, 1, 1], [], []>} : vector<16x96xf32>, vector<96x32xf32>, vector<16x32xf32> -> vector<16x32xf32>
    %c5_13 = arith.constant 5 : index
    %c96_14 = arith.constant 96 : index
    %29 = vector.load %arg3[%c5_13, %c96_14] : memref<88x128xf32, #tpu.memory_space<vmem>>, vector<1x32xf32>
    %30 = vector.broadcast %29 : vector<1x32xf32> to vector<16x32xf32>
    %31 = arith.addf %28, %30 : vector<16x32xf32>
    %32 = arith.mulf %31, %31 : vector<16x32xf32>
    %33 = arith.mulf %31, %32 : vector<16x32xf32>
    %cst_15 = arith.constant 4.471500e-02 : f32
    %34 = vector.broadcast %cst_15 : f32 to vector<16x32xf32>
    %35 = arith.mulf %34, %33 : vector<16x32xf32>
    %36 = arith.addf %31, %35 : vector<16x32xf32>
    %cst_16 = arith.constant 0.797884583 : f32
    %37 = vector.broadcast %cst_16 : f32 to vector<16x32xf32>
    %38 = arith.mulf %37, %36 : vector<16x32xf32>
    %39 = math.tanh %38 : vector<16x32xf32>
    %cst_17 = arith.constant 1.000000e+00 : f32
    %40 = vector.broadcast %cst_17 : f32 to vector<16x32xf32>
    %41 = arith.addf %40, %39 : vector<16x32xf32>
    %cst_18 = arith.constant 5.000000e-01 : f32
    %42 = vector.broadcast %cst_18 : f32 to vector<16x32xf32>
    %43 = arith.mulf %42, %41 : vector<16x32xf32>
    %44 = arith.mulf %31, %43 : vector<16x32xf32>
    %c24 = arith.constant 24 : index
    %c0_19 = arith.constant 0 : index
    %45 = vector.load %arg3[%c24, %c0_19] : memref<88x128xf32, #tpu.memory_space<vmem>>, vector<16x32xf32>
    %46 = arith.addf %44, %45 : vector<16x32xf32>
    %c72 = arith.constant 72 : index
    %c0_20 = arith.constant 0 : index
    %47 = vector.load %arg3[%c72, %c0_20] : memref<88x128xf32, #tpu.memory_space<vmem>>, vector<4x32xf32>
    %c8 = arith.constant 8 : index
    %c0_21 = arith.constant 0 : index
    %48 = vector.load %arg3[%c8, %c0_21] : memref<88x128xf32, #tpu.memory_space<vmem>>, vector<6x32xf32>
    %49 = vector.extract_strided_slice %48 {offsets = [0, 0], sizes = [1, 32], strides = [1, 1]} : vector<6x32xf32> to vector<1x32xf32>
    %50 = vector.extract_strided_slice %48 {offsets = [1, 0], sizes = [1, 32], strides = [1, 1]} : vector<6x32xf32> to vector<1x32xf32>
    %cst_22 = arith.constant dense<0.000000e+00> : vector<16xf32>
    %51 = vector.multi_reduction <add>, %46, %cst_22 [1] : vector<16x32xf32> to vector<16xf32>
    %52 = vector.shape_cast %51 : vector<16xf32> to vector<16x1xf32>
    %cst_23 = arith.constant 3.200000e+01 : f32
    %53 = vector.broadcast %cst_23 : f32 to vector<16x1xf32>
    %54 = arith.divf %52, %53 : vector<16x1xf32>
    %55 = vector.broadcast %54 : vector<16x1xf32> to vector<16x32xf32>
    %56 = arith.subf %46, %55 : vector<16x32xf32>
    %57 = arith.mulf %56, %56 : vector<16x32xf32>
    %cst_24 = arith.constant dense<0.000000e+00> : vector<16xf32>
    %58 = vector.multi_reduction <add>, %57, %cst_24 [1] : vector<16x32xf32> to vector<16xf32>
    %59 = vector.shape_cast %58 : vector<16xf32> to vector<16x1xf32>
    %cst_25 = arith.constant 3.200000e+01 : f32
    %60 = vector.broadcast %cst_25 : f32 to vector<16x1xf32>
    %61 = arith.divf %59, %60 : vector<16x1xf32>
    %62 = vector.broadcast %54 : vector<16x1xf32> to vector<16x32xf32>
    %63 = arith.subf %46, %62 : vector<16x32xf32>
    %cst_26 = arith.constant 9.99999974E-6 : f32
    %64 = vector.broadcast %cst_26 : f32 to vector<16x1xf32>
    %65 = arith.addf %61, %64 : vector<16x1xf32>
    %66 = math.rsqrt %65 : vector<16x1xf32>
    %67 = vector.broadcast %66 : vector<16x1xf32> to vector<16x32xf32>
    %68 = arith.mulf %63, %67 : vector<16x32xf32>
    %69 = vector.broadcast %49 : vector<1x32xf32> to vector<16x32xf32>
    %70 = arith.mulf %68, %69 : vector<16x32xf32>
    %71 = vector.broadcast %50 : vector<1x32xf32> to vector<16x32xf32>
    %72 = arith.addf %70, %71 : vector<16x32xf32>
    %c0_27 = arith.constant 0 : index
    %c0_28 = arith.constant 0 : index
    %73 = vector.load %arg1[%c0_27, %c0_28] : memref<192x128xf32, #tpu.memory_space<vmem>>, vector<32x96xf32>
    %cst_29 = arith.constant dense<0.000000e+00> : vector<16x96xf32>
    %74 = tpu.matmul %72, %73, %cst_29 {dimension_numbers = #tpu.dot_dimension_numbers<[1], [0], [0], [1], [0, 0, 1, 1], [], []>} : vector<16x32xf32>, vector<32x96xf32>, vector<16x96xf32> -> vector<16x96xf32>
    %c0_30 = arith.constant 0 : index
    %c0_31 = arith.constant 0 : index
    %75 = vector.load %arg3[%c0_30, %c0_31] : memref<88x128xf32, #tpu.memory_space<vmem>>, vector<1x96xf32>
    %76 = vector.broadcast %75 : vector<1x96xf32> to vector<16x96xf32>
    %77 = arith.addf %74, %76 : vector<16x96xf32>
    %78 = vector.extract_strided_slice %77 {offsets = [0, 0], sizes = [16, 32], strides = [1, 1]} : vector<16x96xf32> to vector<16x32xf32>
    %cst_32 = arith.constant 0.353553385 : f32
    %79 = vector.broadcast %cst_32 : f32 to vector<16x32xf32>
    %80 = arith.mulf %78, %79 : vector<16x32xf32>
    %81 = vector.extract_strided_slice %77 {offsets = [0, 32], sizes = [16, 32], strides = [1, 1]} : vector<16x96xf32> to vector<16x32xf32>
    %82 = vector.extract_strided_slice %77 {offsets = [0, 64], sizes = [16, 32], strides = [1, 1]} : vector<16x96xf32> to vector<16x32xf32>
    %83 = vector.extract_strided_slice %47 {offsets = [0, 0], sizes = [1, 32], strides = [1, 1]} : vector<4x32xf32> to vector<1x32xf32>
    %84 = vector.broadcast %83 : vector<1x32xf32> to vector<16x32xf32>
    %85 = arith.mulf %80, %84 : vector<16x32xf32>
    %86 = vector.extract_strided_slice %47 {offsets = [1, 0], sizes = [1, 32], strides = [1, 1]} : vector<4x32xf32> to vector<1x32xf32>
    %87 = vector.broadcast %86 : vector<1x32xf32> to vector<16x32xf32>
    %88 = arith.mulf %80, %87 : vector<16x32xf32>
    %89 = vector.extract_strided_slice %47 {offsets = [2, 0], sizes = [1, 32], strides = [1, 1]} : vector<4x32xf32> to vector<1x32xf32>
    %90 = vector.broadcast %89 : vector<1x32xf32> to vector<16x32xf32>
    %91 = arith.mulf %80, %90 : vector<16x32xf32>
    %92 = vector.extract_strided_slice %47 {offsets = [3, 0], sizes = [1, 32], strides = [1, 1]} : vector<4x32xf32> to vector<1x32xf32>
    %93 = vector.broadcast %92 : vector<1x32xf32> to vector<16x32xf32>
    %94 = arith.mulf %80, %93 : vector<16x32xf32>
    %95 = tpu.concatenate %85, %88, %91, %94 in 0 : vector<16x32xf32>, vector<16x32xf32>, vector<16x32xf32>, vector<16x32xf32> -> vector<64x32xf32>
    %cst_33 = arith.constant dense<0.000000e+00> : vector<64x16xf32>
    %96 = tpu.matmul %95, %81, %cst_33 {dimension_numbers = #tpu.dot_dimension_numbers<[1], [1], [0], [0], [0, 0, 1, 0], [], []>} : vector<64x32xf32>, vector<16x32xf32>, vector<64x16xf32> -> vector<64x16xf32>
    %cst_34 = arith.constant dense<0xFF800000> : vector<64xf32>
    %97 = vector.multi_reduction <maximumf>, %96, %cst_34 [1] : vector<64x16xf32> to vector<64xf32>
    %98 = vector.shape_cast %97 : vector<64xf32> to vector<64x1xf32>
    %99 = vector.broadcast %98 : vector<64x1xf32> to vector<64x16xf32>
    %100 = arith.subf %96, %99 : vector<64x16xf32>
    %101 = math.exp %100 : vector<64x16xf32>
    %cst_35 = arith.constant dense<0.000000e+00> : vector<64xf32>
    %102 = vector.multi_reduction <add>, %101, %cst_35 [1] : vector<64x16xf32> to vector<64xf32>
    %103 = vector.shape_cast %102 : vector<64xf32> to vector<64x1xf32>
    %104 = tpu.reciprocal %103 {approx = true} : vector<64x1xf32> -> vector<64x1xf32>
    %105 = vector.broadcast %104 : vector<64x1xf32> to vector<64x16xf32>
    %106 = arith.mulf %101, %105 : vector<64x16xf32>
    %cst_36 = arith.constant dense<0.000000e+00> : vector<64x32xf32>
    %107 = tpu.matmul %106, %82, %cst_36 {dimension_numbers = #tpu.dot_dimension_numbers<[1], [0], [0], [1], [0, 0, 1, 1], [], []>} : vector<64x16xf32>, vector<16x32xf32>, vector<64x32xf32> -> vector<64x32xf32>
    %108 = vector.extract_strided_slice %107 {offsets = [0, 0], sizes = [16, 32], strides = [1, 1]} : vector<64x32xf32> to vector<16x32xf32>
    %109 = vector.extract_strided_slice %47 {offsets = [0, 0], sizes = [1, 32], strides = [1, 1]} : vector<4x32xf32> to vector<1x32xf32>
    %110 = vector.broadcast %109 : vector<1x32xf32> to vector<16x32xf32>
    %111 = arith.mulf %108, %110 : vector<16x32xf32>
    %112 = vector.extract_strided_slice %107 {offsets = [16, 0], sizes = [16, 32], strides = [1, 1]} : vector<64x32xf32> to vector<16x32xf32>
    %113 = vector.extract_strided_slice %47 {offsets = [1, 0], sizes = [1, 32], strides = [1, 1]} : vector<4x32xf32> to vector<1x32xf32>
    %114 = vector.broadcast %113 : vector<1x32xf32> to vector<16x32xf32>
    %115 = arith.mulf %112, %114 : vector<16x32xf32>
    %116 = arith.addf %111, %115 : vector<16x32xf32>
    %117 = vector.extract_strided_slice %107 {offsets = [32, 0], sizes = [16, 32], strides = [1, 1]} : vector<64x32xf32> to vector<16x32xf32>
    %118 = vector.extract_strided_slice %47 {offsets = [2, 0], sizes = [1, 32], strides = [1, 1]} : vector<4x32xf32> to vector<1x32xf32>
    %119 = vector.broadcast %118 : vector<1x32xf32> to vector<16x32xf32>
    %120 = arith.mulf %117, %119 : vector<16x32xf32>
    %121 = arith.addf %116, %120 : vector<16x32xf32>
    %122 = vector.extract_strided_slice %107 {offsets = [48, 0], sizes = [16, 32], strides = [1, 1]} : vector<64x32xf32> to vector<16x32xf32>
    %123 = vector.extract_strided_slice %47 {offsets = [3, 0], sizes = [1, 32], strides = [1, 1]} : vector<4x32xf32> to vector<1x32xf32>
    %124 = vector.broadcast %123 : vector<1x32xf32> to vector<16x32xf32>
    %125 = arith.mulf %122, %124 : vector<16x32xf32>
    %126 = arith.addf %121, %125 : vector<16x32xf32>
    %c0_37 = arith.constant 0 : index
    %c96_38 = arith.constant 96 : index
    %127 = vector.load %arg1[%c0_37, %c96_38] : memref<192x128xf32, #tpu.memory_space<vmem>>, vector<32x32xf32>
    %cst_39 = arith.constant dense<0.000000e+00> : vector<16x32xf32>
    %128 = tpu.matmul %126, %127, %cst_39 {dimension_numbers = #tpu.dot_dimension_numbers<[1], [0], [0], [1], [0, 0, 1, 1], [], []>} : vector<16x32xf32>, vector<32x32xf32>, vector<16x32xf32> -> vector<16x32xf32>
    %129 = arith.addf %46, %128 : vector<16x32xf32>
    %c0_40 = arith.constant 0 : index
    %c96_41 = arith.constant 96 : index
    %130 = vector.load %arg3[%c0_40, %c96_41] : memref<88x128xf32, #tpu.memory_space<vmem>>, vector<1x32xf32>
    %131 = vector.broadcast %130 : vector<1x32xf32> to vector<16x32xf32>
    %132 = arith.addf %129, %131 : vector<16x32xf32>
    %133 = vector.extract_strided_slice %48 {offsets = [2, 0], sizes = [1, 32], strides = [1, 1]} : vector<6x32xf32> to vector<1x32xf32>
    %134 = vector.extract_strided_slice %48 {offsets = [3, 0], sizes = [1, 32], strides = [1, 1]} : vector<6x32xf32> to vector<1x32xf32>
    %cst_42 = arith.constant dense<0.000000e+00> : vector<16xf32>
    %135 = vector.multi_reduction <add>, %132, %cst_42 [1] : vector<16x32xf32> to vector<16xf32>
    %136 = vector.shape_cast %135 : vector<16xf32> to vector<16x1xf32>
    %cst_43 = arith.constant 3.200000e+01 : f32
    %137 = vector.broadcast %cst_43 : f32 to vector<16x1xf32>
    %138 = arith.divf %136, %137 : vector<16x1xf32>
    %139 = vector.broadcast %138 : vector<16x1xf32> to vector<16x32xf32>
    %140 = arith.subf %132, %139 : vector<16x32xf32>
    %141 = arith.mulf %140, %140 : vector<16x32xf32>
    %cst_44 = arith.constant dense<0.000000e+00> : vector<16xf32>
    %142 = vector.multi_reduction <add>, %141, %cst_44 [1] : vector<16x32xf32> to vector<16xf32>
    %143 = vector.shape_cast %142 : vector<16xf32> to vector<16x1xf32>
    %cst_45 = arith.constant 3.200000e+01 : f32
    %144 = vector.broadcast %cst_45 : f32 to vector<16x1xf32>
    %145 = arith.divf %143, %144 : vector<16x1xf32>
    %146 = vector.broadcast %138 : vector<16x1xf32> to vector<16x32xf32>
    %147 = arith.subf %132, %146 : vector<16x32xf32>
    %cst_46 = arith.constant 9.99999974E-6 : f32
    %148 = vector.broadcast %cst_46 : f32 to vector<16x1xf32>
    %149 = arith.addf %145, %148 : vector<16x1xf32>
    %150 = math.rsqrt %149 : vector<16x1xf32>
    %151 = vector.broadcast %150 : vector<16x1xf32> to vector<16x32xf32>
    %152 = arith.mulf %147, %151 : vector<16x32xf32>
    %153 = vector.broadcast %133 : vector<1x32xf32> to vector<16x32xf32>
    %154 = arith.mulf %152, %153 : vector<16x32xf32>
    %155 = vector.broadcast %134 : vector<1x32xf32> to vector<16x32xf32>
    %156 = arith.addf %154, %155 : vector<16x32xf32>
    %c32 = arith.constant 32 : index
    %c0_47 = arith.constant 0 : index
    %157 = vector.load %arg1[%c32, %c0_47] : memref<192x128xf32, #tpu.memory_space<vmem>>, vector<32x128xf32>
    %cst_48 = arith.constant dense<0.000000e+00> : vector<16x128xf32>
    %158 = tpu.matmul %156, %157, %cst_48 {dimension_numbers = #tpu.dot_dimension_numbers<[1], [0], [0], [1], [0, 0, 1, 1], [], []>} : vector<16x32xf32>, vector<32x128xf32>, vector<16x128xf32> -> vector<16x128xf32>
    %c1 = arith.constant 1 : index
    %c0_49 = arith.constant 0 : index
    %159 = vector.load %arg3[%c1, %c0_49] : memref<88x128xf32, #tpu.memory_space<vmem>>, vector<1x128xf32>
    %160 = vector.broadcast %159 : vector<1x128xf32> to vector<16x128xf32>
    %161 = arith.addf %158, %160 : vector<16x128xf32>
    %162 = arith.mulf %161, %161 : vector<16x128xf32>
    %163 = arith.mulf %161, %162 : vector<16x128xf32>
    %cst_50 = arith.constant 4.471500e-02 : f32
    %164 = vector.broadcast %cst_50 : f32 to vector<16x128xf32>
    %165 = arith.mulf %164, %163 : vector<16x128xf32>
    %166 = arith.addf %161, %165 : vector<16x128xf32>
    %cst_51 = arith.constant 0.797884583 : f32
    %167 = vector.broadcast %cst_51 : f32 to vector<16x128xf32>
    %168 = arith.mulf %167, %166 : vector<16x128xf32>
    %169 = math.tanh %168 : vector<16x128xf32>
    %cst_52 = arith.constant 1.000000e+00 : f32
    %170 = vector.broadcast %cst_52 : f32 to vector<16x128xf32>
    %171 = arith.addf %170, %169 : vector<16x128xf32>
    %cst_53 = arith.constant 5.000000e-01 : f32
    %172 = vector.broadcast %cst_53 : f32 to vector<16x128xf32>
    %173 = arith.mulf %172, %171 : vector<16x128xf32>
    %174 = arith.mulf %161, %173 : vector<16x128xf32>
    %c0_54 = arith.constant 0 : index
    %c0_55 = arith.constant 0 : index
    %175 = vector.load %arg2[%c0_54, %c0_55] : memref<128x128xf32, #tpu.memory_space<vmem>>, vector<128x32xf32>
    %cst_56 = arith.constant dense<0.000000e+00> : vector<16x32xf32>
    %176 = tpu.matmul %174, %175, %cst_56 {dimension_numbers = #tpu.dot_dimension_numbers<[1], [0], [0], [1], [0, 0, 1, 1], [], []>} : vector<16x128xf32>, vector<128x32xf32>, vector<16x32xf32> -> vector<16x32xf32>
    %177 = arith.addf %132, %176 : vector<16x32xf32>
    %c2 = arith.constant 2 : index
    %c0_57 = arith.constant 0 : index
    %178 = vector.load %arg3[%c2, %c0_57] : memref<88x128xf32, #tpu.memory_space<vmem>>, vector<1x32xf32>
    %179 = vector.broadcast %178 : vector<1x32xf32> to vector<16x32xf32>
    %180 = arith.addf %177, %179 : vector<16x32xf32>
    %181 = vector.extract_strided_slice %48 {offsets = [4, 0], sizes = [1, 32], strides = [1, 1]} : vector<6x32xf32> to vector<1x32xf32>
    %182 = vector.extract_strided_slice %48 {offsets = [5, 0], sizes = [1, 32], strides = [1, 1]} : vector<6x32xf32> to vector<1x32xf32>
    %cst_58 = arith.constant dense<0.000000e+00> : vector<16xf32>
    %183 = vector.multi_reduction <add>, %180, %cst_58 [1] : vector<16x32xf32> to vector<16xf32>
    %184 = vector.shape_cast %183 : vector<16xf32> to vector<16x1xf32>
    %cst_59 = arith.constant 3.200000e+01 : f32
    %185 = vector.broadcast %cst_59 : f32 to vector<16x1xf32>
    %186 = arith.divf %184, %185 : vector<16x1xf32>
    %187 = vector.broadcast %186 : vector<16x1xf32> to vector<16x32xf32>
    %188 = arith.subf %180, %187 : vector<16x32xf32>
    %189 = arith.mulf %188, %188 : vector<16x32xf32>
    %cst_60 = arith.constant dense<0.000000e+00> : vector<16xf32>
    %190 = vector.multi_reduction <add>, %189, %cst_60 [1] : vector<16x32xf32> to vector<16xf32>
    %191 = vector.shape_cast %190 : vector<16xf32> to vector<16x1xf32>
    %cst_61 = arith.constant 3.200000e+01 : f32
    %192 = vector.broadcast %cst_61 : f32 to vector<16x1xf32>
    %193 = arith.divf %191, %192 : vector<16x1xf32>
    %194 = vector.broadcast %186 : vector<16x1xf32> to vector<16x32xf32>
    %195 = arith.subf %180, %194 : vector<16x32xf32>
    %cst_62 = arith.constant 9.99999974E-6 : f32
    %196 = vector.broadcast %cst_62 : f32 to vector<16x1xf32>
    %197 = arith.addf %193, %196 : vector<16x1xf32>
    %198 = math.rsqrt %197 : vector<16x1xf32>
    %199 = vector.broadcast %198 : vector<16x1xf32> to vector<16x32xf32>
    %200 = arith.mulf %195, %199 : vector<16x32xf32>
    %201 = vector.broadcast %181 : vector<1x32xf32> to vector<16x32xf32>
    %202 = arith.mulf %200, %201 : vector<16x32xf32>
    %203 = vector.broadcast %182 : vector<1x32xf32> to vector<16x32xf32>
    %204 = arith.addf %202, %203 : vector<16x32xf32>
    %c64_63 = arith.constant 64 : index
    %c32_64 = arith.constant 32 : index
    %205 = vector.load %arg1[%c64_63, %c32_64] : memref<192x128xf32, #tpu.memory_space<vmem>>, vector<32x64xf32>
    %cst_65 = arith.constant dense<0.000000e+00> : vector<16x64xf32>
    %206 = tpu.matmul %204, %205, %cst_65 {dimension_numbers = #tpu.dot_dimension_numbers<[1], [0], [0], [1], [0, 0, 1, 1], [], []>} : vector<16x32xf32>, vector<32x64xf32>, vector<16x64xf32> -> vector<16x64xf32>
    %c2_66 = arith.constant 2 : index
    %c64_67 = arith.constant 64 : index
    %207 = vector.load %arg3[%c2_66, %c64_67] : memref<88x128xf32, #tpu.memory_space<vmem>>, vector<1x64xf32>
    %208 = vector.broadcast %207 : vector<1x64xf32> to vector<16x64xf32>
    %209 = arith.addf %206, %208 : vector<16x64xf32>
    %210 = vector.extract_strided_slice %209 {offsets = [0, 0], sizes = [16, 32], strides = [1, 1]} : vector<16x64xf32> to vector<16x32xf32>
    %211 = vector.extract_strided_slice %209 {offsets = [0, 32], sizes = [16, 32], strides = [1, 1]} : vector<16x64xf32> to vector<16x32xf32>
    %c16 = arith.constant 16 : index
    %c0_68 = arith.constant 0 : index
    %212 = vector.load %arg3[%c16, %c0_68] : memref<88x128xf32, #tpu.memory_space<vmem>>, vector<8x32xf32>
    %c40 = arith.constant 40 : index
    %c0_69 = arith.constant 0 : index
    %213 = vector.load %arg3[%c40, %c0_69] : memref<88x128xf32, #tpu.memory_space<vmem>>, vector<8x32xf32>
    %c48 = arith.constant 48 : index
    %c0_70 = arith.constant 0 : index
    %214 = vector.load %arg3[%c48, %c0_70] : memref<88x128xf32, #tpu.memory_space<vmem>>, vector<8x8xf32>
    %215 = tpu.concatenate %214, %214, %214, %214 in 0 : vector<8x8xf32>, vector<8x8xf32>, vector<8x8xf32>, vector<8x8xf32> -> vector<32x8xf32>
    %c160 = arith.constant 160 : index
    %c0_71 = arith.constant 0 : index
    %216 = vector.load %arg1[%c160, %c0_71] : memref<192x128xf32, #tpu.memory_space<vmem>>, vector<32x128xf32>
    %217 = tpu.iota {dimensions = array<i32: 1>} : vector<1x128xi32>
    %218 = arith.sitofp %217 : vector<1x128xi32> to vector<1x128xf32>
    %219 = tpu.iota {dimensions = array<i32: 0>} : vector<8x1xi32>
    %c80 = arith.constant 80 : index
    %c0_72 = arith.constant 0 : index
    %220 = vector.load %arg3[%c80, %c0_72] : memref<88x128xf32, #tpu.memory_space<vmem>>, vector<8x32xf32>
    %c0_i32 = arith.constant 0 : i32
    %221 = vector.broadcast %c0_i32 : i32 to vector<8x1xi32>
    %222 = arith.cmpi eq, %219, %221 : vector<8x1xi32>
    %cst_73 = arith.constant 1.000000e+00 : f32
    %cst_74 = arith.constant 0.000000e+00 : f32
    %223 = vector.broadcast %cst_73 : f32 to vector<8x1xf32>
    %224 = vector.broadcast %cst_74 : f32 to vector<8x1xf32>
    %225 = arith.select %222, %223, %224 : vector<8x1xi1>, vector<8x1xf32>
    %226 = vector.shape_cast %225 : vector<8x1xf32> to vector<8x1xf32>
    %227 = vector.broadcast %226 : vector<8x1xf32> to vector<8x128xf32>
    %228 = vector.extract_strided_slice %212 {offsets = [0, 0], sizes = [1, 32], strides = [1, 1]} : vector<8x32xf32> to vector<1x32xf32>
    %229 = vector.extract_strided_slice %212 {offsets = [1, 0], sizes = [1, 32], strides = [1, 1]} : vector<8x32xf32> to vector<1x32xf32>
    %cst_75 = arith.constant dense<0.000000e+00> : vector<8xf32>
    %230 = vector.multi_reduction <add>, %220, %cst_75 [1] : vector<8x32xf32> to vector<8xf32>
    %231 = vector.shape_cast %230 : vector<8xf32> to vector<8x1xf32>
    %cst_76 = arith.constant 3.200000e+01 : f32
    %232 = vector.broadcast %cst_76 : f32 to vector<8x1xf32>
    %233 = arith.divf %231, %232 : vector<8x1xf32>
    %234 = vector.broadcast %233 : vector<8x1xf32> to vector<8x32xf32>
    %235 = arith.subf %220, %234 : vector<8x32xf32>
    %236 = arith.mulf %235, %235 : vector<8x32xf32>
    %cst_77 = arith.constant dense<0.000000e+00> : vector<8xf32>
    %237 = vector.multi_reduction <add>, %236, %cst_77 [1] : vector<8x32xf32> to vector<8xf32>
    %238 = vector.shape_cast %237 : vector<8xf32> to vector<8x1xf32>
    %cst_78 = arith.constant 3.200000e+01 : f32
    %239 = vector.broadcast %cst_78 : f32 to vector<8x1xf32>
    %240 = arith.divf %238, %239 : vector<8x1xf32>
    %241 = vector.broadcast %233 : vector<8x1xf32> to vector<8x32xf32>
    %242 = arith.subf %220, %241 : vector<8x32xf32>
    %cst_79 = arith.constant 9.99999974E-6 : f32
    %243 = vector.broadcast %cst_79 : f32 to vector<8x1xf32>
    %244 = arith.addf %240, %243 : vector<8x1xf32>
    %245 = math.rsqrt %244 : vector<8x1xf32>
    %246 = vector.broadcast %245 : vector<8x1xf32> to vector<8x32xf32>
    %247 = arith.mulf %242, %246 : vector<8x32xf32>
    %248 = vector.broadcast %228 : vector<1x32xf32> to vector<8x32xf32>
    %249 = arith.mulf %247, %248 : vector<8x32xf32>
    %250 = vector.broadcast %229 : vector<1x32xf32> to vector<8x32xf32>
    %251 = arith.addf %249, %250 : vector<8x32xf32>
    %c96_80 = arith.constant 96 : index
    %c0_81 = arith.constant 0 : index
    %252 = vector.load %arg1[%c96_80, %c0_81] : memref<192x128xf32, #tpu.memory_space<vmem>>, vector<32x96xf32>
    %cst_82 = arith.constant dense<0.000000e+00> : vector<8x96xf32>
    %253 = tpu.matmul %251, %252, %cst_82 {dimension_numbers = #tpu.dot_dimension_numbers<[1], [0], [0], [1], [0, 0, 1, 1], [], []>} : vector<8x32xf32>, vector<32x96xf32>, vector<8x96xf32> -> vector<8x96xf32>
    %c3 = arith.constant 3 : index
    %c0_83 = arith.constant 0 : index
    %254 = vector.load %arg3[%c3, %c0_83] : memref<88x128xf32, #tpu.memory_space<vmem>>, vector<1x96xf32>
    %255 = vector.broadcast %254 : vector<1x96xf32> to vector<8x96xf32>
    %256 = arith.addf %253, %255 : vector<8x96xf32>
    %257 = vector.extract_strided_slice %256 {offsets = [0, 0], sizes = [8, 32], strides = [1, 1]} : vector<8x96xf32> to vector<8x32xf32>
    %cst_84 = arith.constant 0.353553385 : f32
    %258 = vector.broadcast %cst_84 : f32 to vector<8x32xf32>
    %259 = arith.mulf %257, %258 : vector<8x32xf32>
    %260 = vector.extract_strided_slice %256 {offsets = [0, 32], sizes = [8, 32], strides = [1, 1]} : vector<8x96xf32> to vector<8x32xf32>
    %261 = vector.extract_strided_slice %256 {offsets = [0, 64], sizes = [8, 32], strides = [1, 1]} : vector<8x96xf32> to vector<8x32xf32>
    %262 = vector.extract_strided_slice %47 {offsets = [0, 0], sizes = [1, 32], strides = [1, 1]} : vector<4x32xf32> to vector<1x32xf32>
    %263 = vector.broadcast %262 : vector<1x32xf32> to vector<8x32xf32>
    %264 = arith.mulf %259, %263 : vector<8x32xf32>
    %265 = vector.extract_strided_slice %47 {offsets = [1, 0], sizes = [1, 32], strides = [1, 1]} : vector<4x32xf32> to vector<1x32xf32>
    %266 = vector.broadcast %265 : vector<1x32xf32> to vector<8x32xf32>
    %267 = arith.mulf %259, %266 : vector<8x32xf32>
    %268 = vector.extract_strided_slice %47 {offsets = [2, 0], sizes = [1, 32], strides = [1, 1]} : vector<4x32xf32> to vector<1x32xf32>
    %269 = vector.broadcast %268 : vector<1x32xf32> to vector<8x32xf32>
    %270 = arith.mulf %259, %269 : vector<8x32xf32>
    %271 = vector.extract_strided_slice %47 {offsets = [3, 0], sizes = [1, 32], strides = [1, 1]} : vector<4x32xf32> to vector<1x32xf32>
    %272 = vector.broadcast %271 : vector<1x32xf32> to vector<8x32xf32>
    %273 = arith.mulf %259, %272 : vector<8x32xf32>
    %274 = tpu.concatenate %264, %267, %270, %273 in 0 : vector<8x32xf32>, vector<8x32xf32>, vector<8x32xf32>, vector<8x32xf32> -> vector<32x32xf32>
    %cst_85 = arith.constant dense<0.000000e+00> : vector<32x8xf32>
    %275 = tpu.matmul %274, %260, %cst_85 {dimension_numbers = #tpu.dot_dimension_numbers<[1], [1], [0], [0], [0, 0, 1, 0], [], []>} : vector<32x32xf32>, vector<8x32xf32>, vector<32x8xf32> -> vector<32x8xf32>
    %276 = arith.addf %275, %215 : vector<32x8xf32>
    %cst_86 = arith.constant dense<0xFF800000> : vector<32xf32>
    %277 = vector.multi_reduction <maximumf>, %276, %cst_86 [1] : vector<32x8xf32> to vector<32xf32>
    %278 = vector.shape_cast %277 : vector<32xf32> to vector<32x1xf32>
    %279 = vector.broadcast %278 : vector<32x1xf32> to vector<32x8xf32>
    %280 = arith.subf %276, %279 : vector<32x8xf32>
    %281 = math.exp %280 : vector<32x8xf32>
    %cst_87 = arith.constant dense<0.000000e+00> : vector<32xf32>
    %282 = vector.multi_reduction <add>, %281, %cst_87 [1] : vector<32x8xf32> to vector<32xf32>
    %283 = vector.shape_cast %282 : vector<32xf32> to vector<32x1xf32>
    %284 = tpu.reciprocal %283 {approx = true} : vector<32x1xf32> -> vector<32x1xf32>
    %285 = vector.broadcast %284 : vector<32x1xf32> to vector<32x8xf32>
    %286 = arith.mulf %281, %285 : vector<32x8xf32>
    %cst_88 = arith.constant dense<0.000000e+00> : vector<32x32xf32>
    %287 = tpu.matmul %286, %261, %cst_88 {dimension_numbers = #tpu.dot_dimension_numbers<[1], [0], [0], [1], [0, 0, 1, 1], [], []>} : vector<32x8xf32>, vector<8x32xf32>, vector<32x32xf32> -> vector<32x32xf32>
    %288 = vector.extract_strided_slice %287 {offsets = [0, 0], sizes = [8, 32], strides = [1, 1]} : vector<32x32xf32> to vector<8x32xf32>
    %289 = vector.extract_strided_slice %47 {offsets = [0, 0], sizes = [1, 32], strides = [1, 1]} : vector<4x32xf32> to vector<1x32xf32>
    %290 = vector.broadcast %289 : vector<1x32xf32> to vector<8x32xf32>
    %291 = arith.mulf %288, %290 : vector<8x32xf32>
    %292 = vector.extract_strided_slice %287 {offsets = [8, 0], sizes = [8, 32], strides = [1, 1]} : vector<32x32xf32> to vector<8x32xf32>
    %293 = vector.extract_strided_slice %47 {offsets = [1, 0], sizes = [1, 32], strides = [1, 1]} : vector<4x32xf32> to vector<1x32xf32>
    %294 = vector.broadcast %293 : vector<1x32xf32> to vector<8x32xf32>
    %295 = arith.mulf %292, %294 : vector<8x32xf32>
    %296 = arith.addf %291, %295 : vector<8x32xf32>
    %297 = vector.extract_strided_slice %287 {offsets = [16, 0], sizes = [8, 32], strides = [1, 1]} : vector<32x32xf32> to vector<8x32xf32>
    %298 = vector.extract_strided_slice %47 {offsets = [2, 0], sizes = [1, 32], strides = [1, 1]} : vector<4x32xf32> to vector<1x32xf32>
    %299 = vector.broadcast %298 : vector<1x32xf32> to vector<8x32xf32>
    %300 = arith.mulf %297, %299 : vector<8x32xf32>
    %301 = arith.addf %296, %300 : vector<8x32xf32>
    %302 = vector.extract_strided_slice %287 {offsets = [24, 0], sizes = [8, 32], strides = [1, 1]} : vector<32x32xf32> to vector<8x32xf32>
    %303 = vector.extract_strided_slice %47 {offsets = [3, 0], sizes = [1, 32], strides = [1, 1]} : vector<4x32xf32> to vector<1x32xf32>
    %304 = vector.broadcast %303 : vector<1x32xf32> to vector<8x32xf32>
    %305 = arith.mulf %302, %304 : vector<8x32xf32>
    %306 = arith.addf %301, %305 : vector<8x32xf32>
    %c96_89 = arith.constant 96 : index
    %c96_90 = arith.constant 96 : index
    %307 = vector.load %arg1[%c96_89, %c96_90] : memref<192x128xf32, #tpu.memory_space<vmem>>, vector<32x32xf32>
    %cst_91 = arith.constant dense<0.000000e+00> : vector<8x32xf32>
    %308 = tpu.matmul %306, %307, %cst_91 {dimension_numbers = #tpu.dot_dimension_numbers<[1], [0], [0], [1], [0, 0, 1, 1], [], []>} : vector<8x32xf32>, vector<32x32xf32>, vector<8x32xf32> -> vector<8x32xf32>
    %309 = arith.addf %220, %308 : vector<8x32xf32>
    %c3_92 = arith.constant 3 : index
    %c96_93 = arith.constant 96 : index
    %310 = vector.load %arg3[%c3_92, %c96_93] : memref<88x128xf32, #tpu.memory_space<vmem>>, vector<1x32xf32>
    %311 = vector.broadcast %310 : vector<1x32xf32> to vector<8x32xf32>
    %312 = arith.addf %309, %311 : vector<8x32xf32>
    %313 = vector.extract_strided_slice %212 {offsets = [2, 0], sizes = [1, 32], strides = [1, 1]} : vector<8x32xf32> to vector<1x32xf32>
    %314 = vector.extract_strided_slice %212 {offsets = [3, 0], sizes = [1, 32], strides = [1, 1]} : vector<8x32xf32> to vector<1x32xf32>
    %cst_94 = arith.constant dense<0.000000e+00> : vector<8xf32>
    %315 = vector.multi_reduction <add>, %312, %cst_94 [1] : vector<8x32xf32> to vector<8xf32>
    %316 = vector.shape_cast %315 : vector<8xf32> to vector<8x1xf32>
    %cst_95 = arith.constant 3.200000e+01 : f32
    %317 = vector.broadcast %cst_95 : f32 to vector<8x1xf32>
    %318 = arith.divf %316, %317 : vector<8x1xf32>
    %319 = vector.broadcast %318 : vector<8x1xf32> to vector<8x32xf32>
    %320 = arith.subf %312, %319 : vector<8x32xf32>
    %321 = arith.mulf %320, %320 : vector<8x32xf32>
    %cst_96 = arith.constant dense<0.000000e+00> : vector<8xf32>
    %322 = vector.multi_reduction <add>, %321, %cst_96 [1] : vector<8x32xf32> to vector<8xf32>
    %323 = vector.shape_cast %322 : vector<8xf32> to vector<8x1xf32>
    %cst_97 = arith.constant 3.200000e+01 : f32
    %324 = vector.broadcast %cst_97 : f32 to vector<8x1xf32>
    %325 = arith.divf %323, %324 : vector<8x1xf32>
    %326 = vector.broadcast %318 : vector<8x1xf32> to vector<8x32xf32>
    %327 = arith.subf %312, %326 : vector<8x32xf32>
    %cst_98 = arith.constant 9.99999974E-6 : f32
    %328 = vector.broadcast %cst_98 : f32 to vector<8x1xf32>
    %329 = arith.addf %325, %328 : vector<8x1xf32>
    %330 = math.rsqrt %329 : vector<8x1xf32>
    %331 = vector.broadcast %330 : vector<8x1xf32> to vector<8x32xf32>
    %332 = arith.mulf %327, %331 : vector<8x32xf32>
    %333 = vector.broadcast %313 : vector<1x32xf32> to vector<8x32xf32>
    %334 = arith.mulf %332, %333 : vector<8x32xf32>
    %335 = vector.broadcast %314 : vector<1x32xf32> to vector<8x32xf32>
    %336 = arith.addf %334, %335 : vector<8x32xf32>
    %c64_99 = arith.constant 64 : index
    %c0_100 = arith.constant 0 : index
    %337 = vector.load %arg1[%c64_99, %c0_100] : memref<192x128xf32, #tpu.memory_space<vmem>>, vector<32x32xf32>
    %cst_101 = arith.constant dense<0.000000e+00> : vector<8x32xf32>
    %338 = tpu.matmul %336, %337, %cst_101 {dimension_numbers = #tpu.dot_dimension_numbers<[1], [0], [0], [1], [0, 0, 1, 1], [], []>} : vector<8x32xf32>, vector<32x32xf32>, vector<8x32xf32> -> vector<8x32xf32>
    %c2_102 = arith.constant 2 : index
    %c32_103 = arith.constant 32 : index
    %339 = vector.load %arg3[%c2_102, %c32_103] : memref<88x128xf32, #tpu.memory_space<vmem>>, vector<1x32xf32>
    %340 = vector.broadcast %339 : vector<1x32xf32> to vector<8x32xf32>
    %341 = arith.addf %338, %340 : vector<8x32xf32>
    %cst_104 = arith.constant 0.353553385 : f32
    %342 = vector.broadcast %cst_104 : f32 to vector<8x32xf32>
    %343 = arith.mulf %341, %342 : vector<8x32xf32>
    %344 = vector.extract_strided_slice %47 {offsets = [0, 0], sizes = [1, 32], strides = [1, 1]} : vector<4x32xf32> to vector<1x32xf32>
    %345 = vector.broadcast %344 : vector<1x32xf32> to vector<8x32xf32>
    %346 = arith.mulf %343, %345 : vector<8x32xf32>
    %347 = vector.extract_strided_slice %47 {offsets = [1, 0], sizes = [1, 32], strides = [1, 1]} : vector<4x32xf32> to vector<1x32xf32>
    %348 = vector.broadcast %347 : vector<1x32xf32> to vector<8x32xf32>
    %349 = arith.mulf %343, %348 : vector<8x32xf32>
    %350 = vector.extract_strided_slice %47 {offsets = [2, 0], sizes = [1, 32], strides = [1, 1]} : vector<4x32xf32> to vector<1x32xf32>
    %351 = vector.broadcast %350 : vector<1x32xf32> to vector<8x32xf32>
    %352 = arith.mulf %343, %351 : vector<8x32xf32>
    %353 = vector.extract_strided_slice %47 {offsets = [3, 0], sizes = [1, 32], strides = [1, 1]} : vector<4x32xf32> to vector<1x32xf32>
    %354 = vector.broadcast %353 : vector<1x32xf32> to vector<8x32xf32>
    %355 = arith.mulf %343, %354 : vector<8x32xf32>
    %356 = tpu.concatenate %346, %349, %352, %355 in 0 : vector<8x32xf32>, vector<8x32xf32>, vector<8x32xf32>, vector<8x32xf32> -> vector<32x32xf32>
    %cst_105 = arith.constant dense<0.000000e+00> : vector<32x16xf32>
    %357 = tpu.matmul %356, %210, %cst_105 {dimension_numbers = #tpu.dot_dimension_numbers<[1], [1], [0], [0], [0, 0, 1, 0], [], []>} : vector<32x32xf32>, vector<16x32xf32>, vector<32x16xf32> -> vector<32x16xf32>
    %cst_106 = arith.constant dense<0xFF800000> : vector<32xf32>
    %358 = vector.multi_reduction <maximumf>, %357, %cst_106 [1] : vector<32x16xf32> to vector<32xf32>
    %359 = vector.shape_cast %358 : vector<32xf32> to vector<32x1xf32>
    %360 = vector.broadcast %359 : vector<32x1xf32> to vector<32x16xf32>
    %361 = arith.subf %357, %360 : vector<32x16xf32>
    %362 = math.exp %361 : vector<32x16xf32>
    %cst_107 = arith.constant dense<0.000000e+00> : vector<32xf32>
    %363 = vector.multi_reduction <add>, %362, %cst_107 [1] : vector<32x16xf32> to vector<32xf32>
    %364 = vector.shape_cast %363 : vector<32xf32> to vector<32x1xf32>
    %365 = tpu.reciprocal %364 {approx = true} : vector<32x1xf32> -> vector<32x1xf32>
    %366 = vector.broadcast %365 : vector<32x1xf32> to vector<32x16xf32>
    %367 = arith.mulf %362, %366 : vector<32x16xf32>
    %cst_108 = arith.constant dense<0.000000e+00> : vector<32x32xf32>
    %368 = tpu.matmul %367, %211, %cst_108 {dimension_numbers = #tpu.dot_dimension_numbers<[1], [0], [0], [1], [0, 0, 1, 1], [], []>} : vector<32x16xf32>, vector<16x32xf32>, vector<32x32xf32> -> vector<32x32xf32>
    %369 = vector.extract_strided_slice %368 {offsets = [0, 0], sizes = [8, 32], strides = [1, 1]} : vector<32x32xf32> to vector<8x32xf32>
    %370 = vector.extract_strided_slice %47 {offsets = [0, 0], sizes = [1, 32], strides = [1, 1]} : vector<4x32xf32> to vector<1x32xf32>
    %371 = vector.broadcast %370 : vector<1x32xf32> to vector<8x32xf32>
    %372 = arith.mulf %369, %371 : vector<8x32xf32>
    %373 = vector.extract_strided_slice %368 {offsets = [8, 0], sizes = [8, 32], strides = [1, 1]} : vector<32x32xf32> to vector<8x32xf32>
    %374 = vector.extract_strided_slice %47 {offsets = [1, 0], sizes = [1, 32], strides = [1, 1]} : vector<4x32xf32> to vector<1x32xf32>
    %375 = vector.broadcast %374 : vector<1x32xf32> to vector<8x32xf32>
    %376 = arith.mulf %373, %375 : vector<8x32xf32>
    %377 = arith.addf %372, %376 : vector<8x32xf32>
    %378 = vector.extract_strided_slice %368 {offsets = [16, 0], sizes = [8, 32], strides = [1, 1]} : vector<32x32xf32> to vector<8x32xf32>
    %379 = vector.extract_strided_slice %47 {offsets = [2, 0], sizes = [1, 32], strides = [1, 1]} : vector<4x32xf32> to vector<1x32xf32>
    %380 = vector.broadcast %379 : vector<1x32xf32> to vector<8x32xf32>
    %381 = arith.mulf %378, %380 : vector<8x32xf32>
    %382 = arith.addf %377, %381 : vector<8x32xf32>
    %383 = vector.extract_strided_slice %368 {offsets = [24, 0], sizes = [8, 32], strides = [1, 1]} : vector<32x32xf32> to vector<8x32xf32>
    %384 = vector.extract_strided_slice %47 {offsets = [3, 0], sizes = [1, 32], strides = [1, 1]} : vector<4x32xf32> to vector<1x32xf32>
    %385 = vector.broadcast %384 : vector<1x32xf32> to vector<8x32xf32>
    %386 = arith.mulf %383, %385 : vector<8x32xf32>
    %387 = arith.addf %382, %386 : vector<8x32xf32>
    %c64_109 = arith.constant 64 : index
    %c96_110 = arith.constant 96 : index
    %388 = vector.load %arg1[%c64_109, %c96_110] : memref<192x128xf32, #tpu.memory_space<vmem>>, vector<32x32xf32>
    %cst_111 = arith.constant dense<0.000000e+00> : vector<8x32xf32>
    %389 = tpu.matmul %387, %388, %cst_111 {dimension_numbers = #tpu.dot_dimension_numbers<[1], [0], [0], [1], [0, 0, 1, 1], [], []>} : vector<8x32xf32>, vector<32x32xf32>, vector<8x32xf32> -> vector<8x32xf32>
    %390 = arith.addf %312, %389 : vector<8x32xf32>
    %c5_112 = arith.constant 5 : index
    %c32_113 = arith.constant 32 : index
    %391 = vector.load %arg3[%c5_112, %c32_113] : memref<88x128xf32, #tpu.memory_space<vmem>>, vector<1x32xf32>
    %392 = vector.broadcast %391 : vector<1x32xf32> to vector<8x32xf32>
    %393 = arith.addf %390, %392 : vector<8x32xf32>
    %394 = vector.extract_strided_slice %212 {offsets = [4, 0], sizes = [1, 32], strides = [1, 1]} : vector<8x32xf32> to vector<1x32xf32>
    %395 = vector.extract_strided_slice %212 {offsets = [5, 0], sizes = [1, 32], strides = [1, 1]} : vector<8x32xf32> to vector<1x32xf32>
    %cst_114 = arith.constant dense<0.000000e+00> : vector<8xf32>
    %396 = vector.multi_reduction <add>, %393, %cst_114 [1] : vector<8x32xf32> to vector<8xf32>
    %397 = vector.shape_cast %396 : vector<8xf32> to vector<8x1xf32>
    %cst_115 = arith.constant 3.200000e+01 : f32
    %398 = vector.broadcast %cst_115 : f32 to vector<8x1xf32>
    %399 = arith.divf %397, %398 : vector<8x1xf32>
    %400 = vector.broadcast %399 : vector<8x1xf32> to vector<8x32xf32>
    %401 = arith.subf %393, %400 : vector<8x32xf32>
    %402 = arith.mulf %401, %401 : vector<8x32xf32>
    %cst_116 = arith.constant dense<0.000000e+00> : vector<8xf32>
    %403 = vector.multi_reduction <add>, %402, %cst_116 [1] : vector<8x32xf32> to vector<8xf32>
    %404 = vector.shape_cast %403 : vector<8xf32> to vector<8x1xf32>
    %cst_117 = arith.constant 3.200000e+01 : f32
    %405 = vector.broadcast %cst_117 : f32 to vector<8x1xf32>
    %406 = arith.divf %404, %405 : vector<8x1xf32>
    %407 = vector.broadcast %399 : vector<8x1xf32> to vector<8x32xf32>
    %408 = arith.subf %393, %407 : vector<8x32xf32>
    %cst_118 = arith.constant 9.99999974E-6 : f32
    %409 = vector.broadcast %cst_118 : f32 to vector<8x1xf32>
    %410 = arith.addf %406, %409 : vector<8x1xf32>
    %411 = math.rsqrt %410 : vector<8x1xf32>
    %412 = vector.broadcast %411 : vector<8x1xf32> to vector<8x32xf32>
    %413 = arith.mulf %408, %412 : vector<8x32xf32>
    %414 = vector.broadcast %394 : vector<1x32xf32> to vector<8x32xf32>
    %415 = arith.mulf %413, %414 : vector<8x32xf32>
    %416 = vector.broadcast %395 : vector<1x32xf32> to vector<8x32xf32>
    %417 = arith.addf %415, %416 : vector<8x32xf32>
    %c128 = arith.constant 128 : index
    %c0_119 = arith.constant 0 : index
    %418 = vector.load %arg1[%c128, %c0_119] : memref<192x128xf32, #tpu.memory_space<vmem>>, vector<32x128xf32>
    %cst_120 = arith.constant dense<0.000000e+00> : vector<8x128xf32>
    %419 = tpu.matmul %417, %418, %cst_120 {dimension_numbers = #tpu.dot_dimension_numbers<[1], [0], [0], [1], [0, 0, 1, 1], [], []>} : vector<8x32xf32>, vector<32x128xf32>, vector<8x128xf32> -> vector<8x128xf32>
    %c4 = arith.constant 4 : index
    %c0_121 = arith.constant 0 : index
    %420 = vector.load %arg3[%c4, %c0_121] : memref<88x128xf32, #tpu.memory_space<vmem>>, vector<1x128xf32>
    %421 = vector.broadcast %420 : vector<1x128xf32> to vector<8x128xf32>
    %422 = arith.addf %419, %421 : vector<8x128xf32>
    %423 = arith.mulf %422, %422 : vector<8x128xf32>
    %424 = arith.mulf %422, %423 : vector<8x128xf32>
    %cst_122 = arith.constant 4.471500e-02 : f32
    %425 = vector.broadcast %cst_122 : f32 to vector<8x128xf32>
    %426 = arith.mulf %425, %424 : vector<8x128xf32>
    %427 = arith.addf %422, %426 : vector<8x128xf32>
    %cst_123 = arith.constant 0.797884583 : f32
    %428 = vector.broadcast %cst_123 : f32 to vector<8x128xf32>
    %429 = arith.mulf %428, %427 : vector<8x128xf32>
    %430 = math.tanh %429 : vector<8x128xf32>
    %cst_124 = arith.constant 1.000000e+00 : f32
    %431 = vector.broadcast %cst_124 : f32 to vector<8x128xf32>
    %432 = arith.addf %431, %430 : vector<8x128xf32>
    %cst_125 = arith.constant 5.000000e-01 : f32
    %433 = vector.broadcast %cst_125 : f32 to vector<8x128xf32>
    %434 = arith.mulf %433, %432 : vector<8x128xf32>
    %435 = arith.mulf %422, %434 : vector<8x128xf32>
    %c0_126 = arith.constant 0 : index
    %c32_127 = arith.constant 32 : index
    %436 = vector.load %arg2[%c0_126, %c32_127] : memref<128x128xf32, #tpu.memory_space<vmem>>, vector<128x32xf32>
    %cst_128 = arith.constant dense<0.000000e+00> : vector<8x32xf32>
    %437 = tpu.matmul %435, %436, %cst_128 {dimension_numbers = #tpu.dot_dimension_numbers<[1], [0], [0], [1], [0, 0, 1, 1], [], []>} : vector<8x128xf32>, vector<128x32xf32>, vector<8x32xf32> -> vector<8x32xf32>
    %438 = arith.addf %393, %437 : vector<8x32xf32>
    %c5_129 = arith.constant 5 : index
    %c0_130 = arith.constant 0 : index
    %439 = vector.load %arg3[%c5_129, %c0_130] : memref<88x128xf32, #tpu.memory_space<vmem>>, vector<1x32xf32>
    %440 = vector.broadcast %439 : vector<1x32xf32> to vector<8x32xf32>
    %441 = arith.addf %438, %440 : vector<8x32xf32>
    %442 = vector.extract_strided_slice %441 {offsets = [0, 0], sizes = [1, 32], strides = [1, 1]} : vector<8x32xf32> to vector<1x32xf32>
    %443 = vector.extract_strided_slice %212 {offsets = [6, 0], sizes = [1, 32], strides = [1, 1]} : vector<8x32xf32> to vector<1x32xf32>
    %444 = vector.extract_strided_slice %212 {offsets = [7, 0], sizes = [1, 32], strides = [1, 1]} : vector<8x32xf32> to vector<1x32xf32>
    %cst_131 = arith.constant dense<0.000000e+00> : vector<1xf32>
    %445 = vector.multi_reduction <add>, %442, %cst_131 [1] : vector<1x32xf32> to vector<1xf32>
    %446 = vector.shape_cast %445 : vector<1xf32> to vector<1x1xf32>
    %cst_132 = arith.constant 3.200000e+01 : f32
    %447 = vector.broadcast %cst_132 : f32 to vector<1x1xf32>
    %448 = arith.divf %446, %447 : vector<1x1xf32>
    %449 = vector.broadcast %448 : vector<1x1xf32> to vector<1x32xf32>
    %450 = arith.subf %442, %449 : vector<1x32xf32>
    %451 = arith.mulf %450, %450 : vector<1x32xf32>
    %cst_133 = arith.constant dense<0.000000e+00> : vector<1xf32>
    %452 = vector.multi_reduction <add>, %451, %cst_133 [1] : vector<1x32xf32> to vector<1xf32>
    %453 = vector.shape_cast %452 : vector<1xf32> to vector<1x1xf32>
    %cst_134 = arith.constant 3.200000e+01 : f32
    %454 = vector.broadcast %cst_134 : f32 to vector<1x1xf32>
    %455 = arith.divf %453, %454 : vector<1x1xf32>
    %456 = vector.broadcast %448 : vector<1x1xf32> to vector<1x32xf32>
    %457 = arith.subf %442, %456 : vector<1x32xf32>
    %cst_135 = arith.constant 9.99999974E-6 : f32
    %458 = vector.broadcast %cst_135 : f32 to vector<1x1xf32>
    %459 = arith.addf %455, %458 : vector<1x1xf32>
    %460 = math.rsqrt %459 : vector<1x1xf32>
    %461 = vector.broadcast %460 : vector<1x1xf32> to vector<1x32xf32>
    %462 = arith.mulf %457, %461 : vector<1x32xf32>
    %463 = arith.mulf %462, %443 : vector<1x32xf32>
    %464 = arith.addf %463, %444 : vector<1x32xf32>
    %cst_136 = arith.constant dense<0.000000e+00> : vector<1x128xf32>
    %465 = tpu.matmul %464, %216, %cst_136 {dimension_numbers = #tpu.dot_dimension_numbers<[1], [0], [0], [1], [0, 0, 1, 1], [], []>} : vector<1x32xf32>, vector<32x128xf32>, vector<1x128xf32> -> vector<1x128xf32>
    %c64_i32 = arith.constant 64 : i32
    %466 = vector.broadcast %c64_i32 : i32 to vector<1x128xi32>
    %467 = arith.cmpi slt, %217, %466 : vector<1x128xi32>
    %cst_137 = arith.constant -1.000000e+30 : f32
    %468 = vector.broadcast %cst_137 : f32 to vector<1x128xf32>
    %469 = arith.select %467, %465, %468 : vector<1x128xi1>, vector<1x128xf32>
    %cst_138 = arith.constant dense<0xFF800000> : vector<1xf32>
    %470 = vector.multi_reduction <maximumf>, %469, %cst_138 [1] : vector<1x128xf32> to vector<1xf32>
    %471 = vector.shape_cast %470 : vector<1xf32> to vector<1x1xf32>
    %472 = vector.broadcast %471 : vector<1x1xf32> to vector<1x128xf32>
    %473 = arith.cmpf oge, %469, %472 : vector<1x128xf32>
    %cst_139 = arith.constant 1.280000e+02 : f32
    %474 = vector.broadcast %cst_139 : f32 to vector<1x128xf32>
    %475 = arith.select %473, %218, %474 : vector<1x128xi1>, vector<1x128xf32>
    %cst_140 = arith.constant dense<0x7F800000> : vector<1xf32>
    %476 = vector.multi_reduction <minimumf>, %475, %cst_140 [1] : vector<1x128xf32> to vector<1xf32>
    %477 = vector.shape_cast %476 : vector<1xf32> to vector<1x1xf32>
    %478 = vector.broadcast %477 : vector<1x1xf32> to vector<1x128xf32>
    %479 = arith.cmpf oeq, %218, %478 : vector<1x128xf32>
    %480 = arith.extui %479 : vector<1x128xi1> to vector<1x128xi32>
    %481 = arith.sitofp %480 : vector<1x128xi32> to vector<1x128xf32>
    %cst_141 = arith.constant dense<0.000000e+00> : vector<1x32xf32>
    %482 = tpu.matmul %481, %216, %cst_141 {dimension_numbers = #tpu.dot_dimension_numbers<[1], [1], [0], [0], [0, 0, 1, 0], [], []>} : vector<1x128xf32>, vector<32x128xf32>, vector<1x32xf32> -> vector<1x32xf32>
    %c1_i32 = arith.constant 1 : i32
    %483 = vector.broadcast %c1_i32 : i32 to vector<8x1xi32>
    %484 = arith.cmpi eq, %219, %483 : vector<8x1xi32>
    %485 = vector.broadcast %482 : vector<1x32xf32> to vector<8x32xf32>
    %486 = arith.addf %485, %213 : vector<8x32xf32>
    %487 = vector.shape_cast %484 : vector<8x1xi1> to vector<8x1xi1>
    %488 = vector.broadcast %487 : vector<8x1xi1> to vector<8x32xi1>
    %489 = arith.select %488, %486, %220 : vector<8x32xi1>, vector<8x32xf32>
    %490 = vector.shape_cast %484 : vector<8x1xi1> to vector<8x1xi1>
    %491 = vector.broadcast %490 : vector<8x1xi1> to vector<8x128xi1>
    %492 = vector.shape_cast %477 : vector<1x1xf32> to vector<1x1xf32>
    %493 = vector.broadcast %492 : vector<1x1xf32> to vector<8x128xf32>
    %494 = arith.select %491, %493, %227 : vector<8x128xi1>, vector<8x128xf32>
    %495 = vector.extract_strided_slice %212 {offsets = [0, 0], sizes = [1, 32], strides = [1, 1]} : vector<8x32xf32> to vector<1x32xf32>
    %496 = vector.extract_strided_slice %212 {offsets = [1, 0], sizes = [1, 32], strides = [1, 1]} : vector<8x32xf32> to vector<1x32xf32>
    %cst_142 = arith.constant dense<0.000000e+00> : vector<8xf32>
    %497 = vector.multi_reduction <add>, %489, %cst_142 [1] : vector<8x32xf32> to vector<8xf32>
    %498 = vector.shape_cast %497 : vector<8xf32> to vector<8x1xf32>
    %cst_143 = arith.constant 3.200000e+01 : f32
    %499 = vector.broadcast %cst_143 : f32 to vector<8x1xf32>
    %500 = arith.divf %498, %499 : vector<8x1xf32>
    %501 = vector.broadcast %500 : vector<8x1xf32> to vector<8x32xf32>
    %502 = arith.subf %489, %501 : vector<8x32xf32>
    %503 = arith.mulf %502, %502 : vector<8x32xf32>
    %cst_144 = arith.constant dense<0.000000e+00> : vector<8xf32>
    %504 = vector.multi_reduction <add>, %503, %cst_144 [1] : vector<8x32xf32> to vector<8xf32>
    %505 = vector.shape_cast %504 : vector<8xf32> to vector<8x1xf32>
    %cst_145 = arith.constant 3.200000e+01 : f32
    %506 = vector.broadcast %cst_145 : f32 to vector<8x1xf32>
    %507 = arith.divf %505, %506 : vector<8x1xf32>
    %508 = vector.broadcast %500 : vector<8x1xf32> to vector<8x32xf32>
    %509 = arith.subf %489, %508 : vector<8x32xf32>
    %cst_146 = arith.constant 9.99999974E-6 : f32
    %510 = vector.broadcast %cst_146 : f32 to vector<8x1xf32>
    %511 = arith.addf %507, %510 : vector<8x1xf32>
    %512 = math.rsqrt %511 : vector<8x1xf32>
    %513 = vector.broadcast %512 : vector<8x1xf32> to vector<8x32xf32>
    %514 = arith.mulf %509, %513 : vector<8x32xf32>
    %515 = vector.broadcast %495 : vector<1x32xf32> to vector<8x32xf32>
    %516 = arith.mulf %514, %515 : vector<8x32xf32>
    %517 = vector.broadcast %496 : vector<1x32xf32> to vector<8x32xf32>
    %518 = arith.addf %516, %517 : vector<8x32xf32>
    %c96_147 = arith.constant 96 : index
    %c0_148 = arith.constant 0 : index
    %519 = vector.load %arg1[%c96_147, %c0_148] : memref<192x128xf32, #tpu.memory_space<vmem>>, vector<32x96xf32>
    %cst_149 = arith.constant dense<0.000000e+00> : vector<8x96xf32>
    %520 = tpu.matmul %518, %519, %cst_149 {dimension_numbers = #tpu.dot_dimension_numbers<[1], [0], [0], [1], [0, 0, 1, 1], [], []>} : vector<8x32xf32>, vector<32x96xf32>, vector<8x96xf32> -> vector<8x96xf32>
    %c3_150 = arith.constant 3 : index
    %c0_151 = arith.constant 0 : index
    %521 = vector.load %arg3[%c3_150, %c0_151] : memref<88x128xf32, #tpu.memory_space<vmem>>, vector<1x96xf32>
    %522 = vector.broadcast %521 : vector<1x96xf32> to vector<8x96xf32>
    %523 = arith.addf %520, %522 : vector<8x96xf32>
    %524 = vector.extract_strided_slice %523 {offsets = [0, 0], sizes = [8, 32], strides = [1, 1]} : vector<8x96xf32> to vector<8x32xf32>
    %cst_152 = arith.constant 0.353553385 : f32
    %525 = vector.broadcast %cst_152 : f32 to vector<8x32xf32>
    %526 = arith.mulf %524, %525 : vector<8x32xf32>
    %527 = vector.extract_strided_slice %523 {offsets = [0, 32], sizes = [8, 32], strides = [1, 1]} : vector<8x96xf32> to vector<8x32xf32>
    %528 = vector.extract_strided_slice %523 {offsets = [0, 64], sizes = [8, 32], strides = [1, 1]} : vector<8x96xf32> to vector<8x32xf32>
    %529 = vector.extract_strided_slice %47 {offsets = [0, 0], sizes = [1, 32], strides = [1, 1]} : vector<4x32xf32> to vector<1x32xf32>
    %530 = vector.broadcast %529 : vector<1x32xf32> to vector<8x32xf32>
    %531 = arith.mulf %526, %530 : vector<8x32xf32>
    %532 = vector.extract_strided_slice %47 {offsets = [1, 0], sizes = [1, 32], strides = [1, 1]} : vector<4x32xf32> to vector<1x32xf32>
    %533 = vector.broadcast %532 : vector<1x32xf32> to vector<8x32xf32>
    %534 = arith.mulf %526, %533 : vector<8x32xf32>
    %535 = vector.extract_strided_slice %47 {offsets = [2, 0], sizes = [1, 32], strides = [1, 1]} : vector<4x32xf32> to vector<1x32xf32>
    %536 = vector.broadcast %535 : vector<1x32xf32> to vector<8x32xf32>
    %537 = arith.mulf %526, %536 : vector<8x32xf32>
    %538 = vector.extract_strided_slice %47 {offsets = [3, 0], sizes = [1, 32], strides = [1, 1]} : vector<4x32xf32> to vector<1x32xf32>
    %539 = vector.broadcast %538 : vector<1x32xf32> to vector<8x32xf32>
    %540 = arith.mulf %526, %539 : vector<8x32xf32>
    %541 = tpu.concatenate %531, %534, %537, %540 in 0 : vector<8x32xf32>, vector<8x32xf32>, vector<8x32xf32>, vector<8x32xf32> -> vector<32x32xf32>
    %cst_153 = arith.constant dense<0.000000e+00> : vector<32x8xf32>
    %542 = tpu.matmul %541, %527, %cst_153 {dimension_numbers = #tpu.dot_dimension_numbers<[1], [1], [0], [0], [0, 0, 1, 0], [], []>} : vector<32x32xf32>, vector<8x32xf32>, vector<32x8xf32> -> vector<32x8xf32>
    %543 = arith.addf %542, %215 : vector<32x8xf32>
    %cst_154 = arith.constant dense<0xFF800000> : vector<32xf32>
    %544 = vector.multi_reduction <maximumf>, %543, %cst_154 [1] : vector<32x8xf32> to vector<32xf32>
    %545 = vector.shape_cast %544 : vector<32xf32> to vector<32x1xf32>
    %546 = vector.broadcast %545 : vector<32x1xf32> to vector<32x8xf32>
    %547 = arith.subf %543, %546 : vector<32x8xf32>
    %548 = math.exp %547 : vector<32x8xf32>
    %cst_155 = arith.constant dense<0.000000e+00> : vector<32xf32>
    %549 = vector.multi_reduction <add>, %548, %cst_155 [1] : vector<32x8xf32> to vector<32xf32>
    %550 = vector.shape_cast %549 : vector<32xf32> to vector<32x1xf32>
    %551 = tpu.reciprocal %550 {approx = true} : vector<32x1xf32> -> vector<32x1xf32>
    %552 = vector.broadcast %551 : vector<32x1xf32> to vector<32x8xf32>
    %553 = arith.mulf %548, %552 : vector<32x8xf32>
    %cst_156 = arith.constant dense<0.000000e+00> : vector<32x32xf32>
    %554 = tpu.matmul %553, %528, %cst_156 {dimension_numbers = #tpu.dot_dimension_numbers<[1], [0], [0], [1], [0, 0, 1, 1], [], []>} : vector<32x8xf32>, vector<8x32xf32>, vector<32x32xf32> -> vector<32x32xf32>
    %555 = vector.extract_strided_slice %554 {offsets = [0, 0], sizes = [8, 32], strides = [1, 1]} : vector<32x32xf32> to vector<8x32xf32>
    %556 = vector.extract_strided_slice %47 {offsets = [0, 0], sizes = [1, 32], strides = [1, 1]} : vector<4x32xf32> to vector<1x32xf32>
    %557 = vector.broadcast %556 : vector<1x32xf32> to vector<8x32xf32>
    %558 = arith.mulf %555, %557 : vector<8x32xf32>
    %559 = vector.extract_strided_slice %554 {offsets = [8, 0], sizes = [8, 32], strides = [1, 1]} : vector<32x32xf32> to vector<8x32xf32>
    %560 = vector.extract_strided_slice %47 {offsets = [1, 0], sizes = [1, 32], strides = [1, 1]} : vector<4x32xf32> to vector<1x32xf32>
    %561 = vector.broadcast %560 : vector<1x32xf32> to vector<8x32xf32>
    %562 = arith.mulf %559, %561 : vector<8x32xf32>
    %563 = arith.addf %558, %562 : vector<8x32xf32>
    %564 = vector.extract_strided_slice %554 {offsets = [16, 0], sizes = [8, 32], strides = [1, 1]} : vector<32x32xf32> to vector<8x32xf32>
    %565 = vector.extract_strided_slice %47 {offsets = [2, 0], sizes = [1, 32], strides = [1, 1]} : vector<4x32xf32> to vector<1x32xf32>
    %566 = vector.broadcast %565 : vector<1x32xf32> to vector<8x32xf32>
    %567 = arith.mulf %564, %566 : vector<8x32xf32>
    %568 = arith.addf %563, %567 : vector<8x32xf32>
    %569 = vector.extract_strided_slice %554 {offsets = [24, 0], sizes = [8, 32], strides = [1, 1]} : vector<32x32xf32> to vector<8x32xf32>
    %570 = vector.extract_strided_slice %47 {offsets = [3, 0], sizes = [1, 32], strides = [1, 1]} : vector<4x32xf32> to vector<1x32xf32>
    %571 = vector.broadcast %570 : vector<1x32xf32> to vector<8x32xf32>
    %572 = arith.mulf %569, %571 : vector<8x32xf32>
    %573 = arith.addf %568, %572 : vector<8x32xf32>
    %c96_157 = arith.constant 96 : index
    %c96_158 = arith.constant 96 : index
    %574 = vector.load %arg1[%c96_157, %c96_158] : memref<192x128xf32, #tpu.memory_space<vmem>>, vector<32x32xf32>
    %cst_159 = arith.constant dense<0.000000e+00> : vector<8x32xf32>
    %575 = tpu.matmul %573, %574, %cst_159 {dimension_numbers = #tpu.dot_dimension_numbers<[1], [0], [0], [1], [0, 0, 1, 1], [], []>} : vector<8x32xf32>, vector<32x32xf32>, vector<8x32xf32> -> vector<8x32xf32>
    %576 = arith.addf %489, %575 : vector<8x32xf32>
    %c3_160 = arith.constant 3 : index
    %c96_161 = arith.constant 96 : index
    %577 = vector.load %arg3[%c3_160, %c96_161] : memref<88x128xf32, #tpu.memory_space<vmem>>, vector<1x32xf32>
    %578 = vector.broadcast %577 : vector<1x32xf32> to vector<8x32xf32>
    %579 = arith.addf %576, %578 : vector<8x32xf32>
    %580 = vector.extract_strided_slice %212 {offsets = [2, 0], sizes = [1, 32], strides = [1, 1]} : vector<8x32xf32> to vector<1x32xf32>
    %581 = vector.extract_strided_slice %212 {offsets = [3, 0], sizes = [1, 32], strides = [1, 1]} : vector<8x32xf32> to vector<1x32xf32>
    %cst_162 = arith.constant dense<0.000000e+00> : vector<8xf32>
    %582 = vector.multi_reduction <add>, %579, %cst_162 [1] : vector<8x32xf32> to vector<8xf32>
    %583 = vector.shape_cast %582 : vector<8xf32> to vector<8x1xf32>
    %cst_163 = arith.constant 3.200000e+01 : f32
    %584 = vector.broadcast %cst_163 : f32 to vector<8x1xf32>
    %585 = arith.divf %583, %584 : vector<8x1xf32>
    %586 = vector.broadcast %585 : vector<8x1xf32> to vector<8x32xf32>
    %587 = arith.subf %579, %586 : vector<8x32xf32>
    %588 = arith.mulf %587, %587 : vector<8x32xf32>
    %cst_164 = arith.constant dense<0.000000e+00> : vector<8xf32>
    %589 = vector.multi_reduction <add>, %588, %cst_164 [1] : vector<8x32xf32> to vector<8xf32>
    %590 = vector.shape_cast %589 : vector<8xf32> to vector<8x1xf32>
    %cst_165 = arith.constant 3.200000e+01 : f32
    %591 = vector.broadcast %cst_165 : f32 to vector<8x1xf32>
    %592 = arith.divf %590, %591 : vector<8x1xf32>
    %593 = vector.broadcast %585 : vector<8x1xf32> to vector<8x32xf32>
    %594 = arith.subf %579, %593 : vector<8x32xf32>
    %cst_166 = arith.constant 9.99999974E-6 : f32
    %595 = vector.broadcast %cst_166 : f32 to vector<8x1xf32>
    %596 = arith.addf %592, %595 : vector<8x1xf32>
    %597 = math.rsqrt %596 : vector<8x1xf32>
    %598 = vector.broadcast %597 : vector<8x1xf32> to vector<8x32xf32>
    %599 = arith.mulf %594, %598 : vector<8x32xf32>
    %600 = vector.broadcast %580 : vector<1x32xf32> to vector<8x32xf32>
    %601 = arith.mulf %599, %600 : vector<8x32xf32>
    %602 = vector.broadcast %581 : vector<1x32xf32> to vector<8x32xf32>
    %603 = arith.addf %601, %602 : vector<8x32xf32>
    %c64_167 = arith.constant 64 : index
    %c0_168 = arith.constant 0 : index
    %604 = vector.load %arg1[%c64_167, %c0_168] : memref<192x128xf32, #tpu.memory_space<vmem>>, vector<32x32xf32>
    %cst_169 = arith.constant dense<0.000000e+00> : vector<8x32xf32>
    %605 = tpu.matmul %603, %604, %cst_169 {dimension_numbers = #tpu.dot_dimension_numbers<[1], [0], [0], [1], [0, 0, 1, 1], [], []>} : vector<8x32xf32>, vector<32x32xf32>, vector<8x32xf32> -> vector<8x32xf32>
    %c2_170 = arith.constant 2 : index
    %c32_171 = arith.constant 32 : index
    %606 = vector.load %arg3[%c2_170, %c32_171] : memref<88x128xf32, #tpu.memory_space<vmem>>, vector<1x32xf32>
    %607 = vector.broadcast %606 : vector<1x32xf32> to vector<8x32xf32>
    %608 = arith.addf %605, %607 : vector<8x32xf32>
    %cst_172 = arith.constant 0.353553385 : f32
    %609 = vector.broadcast %cst_172 : f32 to vector<8x32xf32>
    %610 = arith.mulf %608, %609 : vector<8x32xf32>
    %611 = vector.extract_strided_slice %47 {offsets = [0, 0], sizes = [1, 32], strides = [1, 1]} : vector<4x32xf32> to vector<1x32xf32>
    %612 = vector.broadcast %611 : vector<1x32xf32> to vector<8x32xf32>
    %613 = arith.mulf %610, %612 : vector<8x32xf32>
    %614 = vector.extract_strided_slice %47 {offsets = [1, 0], sizes = [1, 32], strides = [1, 1]} : vector<4x32xf32> to vector<1x32xf32>
    %615 = vector.broadcast %614 : vector<1x32xf32> to vector<8x32xf32>
    %616 = arith.mulf %610, %615 : vector<8x32xf32>
    %617 = vector.extract_strided_slice %47 {offsets = [2, 0], sizes = [1, 32], strides = [1, 1]} : vector<4x32xf32> to vector<1x32xf32>
    %618 = vector.broadcast %617 : vector<1x32xf32> to vector<8x32xf32>
    %619 = arith.mulf %610, %618 : vector<8x32xf32>
    %620 = vector.extract_strided_slice %47 {offsets = [3, 0], sizes = [1, 32], strides = [1, 1]} : vector<4x32xf32> to vector<1x32xf32>
    %621 = vector.broadcast %620 : vector<1x32xf32> to vector<8x32xf32>
    %622 = arith.mulf %610, %621 : vector<8x32xf32>
    %623 = tpu.concatenate %613, %616, %619, %622 in 0 : vector<8x32xf32>, vector<8x32xf32>, vector<8x32xf32>, vector<8x32xf32> -> vector<32x32xf32>
    %cst_173 = arith.constant dense<0.000000e+00> : vector<32x16xf32>
    %624 = tpu.matmul %623, %210, %cst_173 {dimension_numbers = #tpu.dot_dimension_numbers<[1], [1], [0], [0], [0, 0, 1, 0], [], []>} : vector<32x32xf32>, vector<16x32xf32>, vector<32x16xf32> -> vector<32x16xf32>
    %cst_174 = arith.constant dense<0xFF800000> : vector<32xf32>
    %625 = vector.multi_reduction <maximumf>, %624, %cst_174 [1] : vector<32x16xf32> to vector<32xf32>
    %626 = vector.shape_cast %625 : vector<32xf32> to vector<32x1xf32>
    %627 = vector.broadcast %626 : vector<32x1xf32> to vector<32x16xf32>
    %628 = arith.subf %624, %627 : vector<32x16xf32>
    %629 = math.exp %628 : vector<32x16xf32>
    %cst_175 = arith.constant dense<0.000000e+00> : vector<32xf32>
    %630 = vector.multi_reduction <add>, %629, %cst_175 [1] : vector<32x16xf32> to vector<32xf32>
    %631 = vector.shape_cast %630 : vector<32xf32> to vector<32x1xf32>
    %632 = tpu.reciprocal %631 {approx = true} : vector<32x1xf32> -> vector<32x1xf32>
    %633 = vector.broadcast %632 : vector<32x1xf32> to vector<32x16xf32>
    %634 = arith.mulf %629, %633 : vector<32x16xf32>
    %cst_176 = arith.constant dense<0.000000e+00> : vector<32x32xf32>
    %635 = tpu.matmul %634, %211, %cst_176 {dimension_numbers = #tpu.dot_dimension_numbers<[1], [0], [0], [1], [0, 0, 1, 1], [], []>} : vector<32x16xf32>, vector<16x32xf32>, vector<32x32xf32> -> vector<32x32xf32>
    %636 = vector.extract_strided_slice %635 {offsets = [0, 0], sizes = [8, 32], strides = [1, 1]} : vector<32x32xf32> to vector<8x32xf32>
    %637 = vector.extract_strided_slice %47 {offsets = [0, 0], sizes = [1, 32], strides = [1, 1]} : vector<4x32xf32> to vector<1x32xf32>
    %638 = vector.broadcast %637 : vector<1x32xf32> to vector<8x32xf32>
    %639 = arith.mulf %636, %638 : vector<8x32xf32>
    %640 = vector.extract_strided_slice %635 {offsets = [8, 0], sizes = [8, 32], strides = [1, 1]} : vector<32x32xf32> to vector<8x32xf32>
    %641 = vector.extract_strided_slice %47 {offsets = [1, 0], sizes = [1, 32], strides = [1, 1]} : vector<4x32xf32> to vector<1x32xf32>
    %642 = vector.broadcast %641 : vector<1x32xf32> to vector<8x32xf32>
    %643 = arith.mulf %640, %642 : vector<8x32xf32>
    %644 = arith.addf %639, %643 : vector<8x32xf32>
    %645 = vector.extract_strided_slice %635 {offsets = [16, 0], sizes = [8, 32], strides = [1, 1]} : vector<32x32xf32> to vector<8x32xf32>
    %646 = vector.extract_strided_slice %47 {offsets = [2, 0], sizes = [1, 32], strides = [1, 1]} : vector<4x32xf32> to vector<1x32xf32>
    %647 = vector.broadcast %646 : vector<1x32xf32> to vector<8x32xf32>
    %648 = arith.mulf %645, %647 : vector<8x32xf32>
    %649 = arith.addf %644, %648 : vector<8x32xf32>
    %650 = vector.extract_strided_slice %635 {offsets = [24, 0], sizes = [8, 32], strides = [1, 1]} : vector<32x32xf32> to vector<8x32xf32>
    %651 = vector.extract_strided_slice %47 {offsets = [3, 0], sizes = [1, 32], strides = [1, 1]} : vector<4x32xf32> to vector<1x32xf32>
    %652 = vector.broadcast %651 : vector<1x32xf32> to vector<8x32xf32>
    %653 = arith.mulf %650, %652 : vector<8x32xf32>
    %654 = arith.addf %649, %653 : vector<8x32xf32>
    %c64_177 = arith.constant 64 : index
    %c96_178 = arith.constant 96 : index
    %655 = vector.load %arg1[%c64_177, %c96_178] : memref<192x128xf32, #tpu.memory_space<vmem>>, vector<32x32xf32>
    %cst_179 = arith.constant dense<0.000000e+00> : vector<8x32xf32>
    %656 = tpu.matmul %654, %655, %cst_179 {dimension_numbers = #tpu.dot_dimension_numbers<[1], [0], [0], [1], [0, 0, 1, 1], [], []>} : vector<8x32xf32>, vector<32x32xf32>, vector<8x32xf32> -> vector<8x32xf32>
    %657 = arith.addf %579, %656 : vector<8x32xf32>
    %c5_180 = arith.constant 5 : index
    %c32_181 = arith.constant 32 : index
    %658 = vector.load %arg3[%c5_180, %c32_181] : memref<88x128xf32, #tpu.memory_space<vmem>>, vector<1x32xf32>
    %659 = vector.broadcast %658 : vector<1x32xf32> to vector<8x32xf32>
    %660 = arith.addf %657, %659 : vector<8x32xf32>
    %661 = vector.extract_strided_slice %212 {offsets = [4, 0], sizes = [1, 32], strides = [1, 1]} : vector<8x32xf32> to vector<1x32xf32>
    %662 = vector.extract_strided_slice %212 {offsets = [5, 0], sizes = [1, 32], strides = [1, 1]} : vector<8x32xf32> to vector<1x32xf32>
    %cst_182 = arith.constant dense<0.000000e+00> : vector<8xf32>
    %663 = vector.multi_reduction <add>, %660, %cst_182 [1] : vector<8x32xf32> to vector<8xf32>
    %664 = vector.shape_cast %663 : vector<8xf32> to vector<8x1xf32>
    %cst_183 = arith.constant 3.200000e+01 : f32
    %665 = vector.broadcast %cst_183 : f32 to vector<8x1xf32>
    %666 = arith.divf %664, %665 : vector<8x1xf32>
    %667 = vector.broadcast %666 : vector<8x1xf32> to vector<8x32xf32>
    %668 = arith.subf %660, %667 : vector<8x32xf32>
    %669 = arith.mulf %668, %668 : vector<8x32xf32>
    %cst_184 = arith.constant dense<0.000000e+00> : vector<8xf32>
    %670 = vector.multi_reduction <add>, %669, %cst_184 [1] : vector<8x32xf32> to vector<8xf32>
    %671 = vector.shape_cast %670 : vector<8xf32> to vector<8x1xf32>
    %cst_185 = arith.constant 3.200000e+01 : f32
    %672 = vector.broadcast %cst_185 : f32 to vector<8x1xf32>
    %673 = arith.divf %671, %672 : vector<8x1xf32>
    %674 = vector.broadcast %666 : vector<8x1xf32> to vector<8x32xf32>
    %675 = arith.subf %660, %674 : vector<8x32xf32>
    %cst_186 = arith.constant 9.99999974E-6 : f32
    %676 = vector.broadcast %cst_186 : f32 to vector<8x1xf32>
    %677 = arith.addf %673, %676 : vector<8x1xf32>
    %678 = math.rsqrt %677 : vector<8x1xf32>
    %679 = vector.broadcast %678 : vector<8x1xf32> to vector<8x32xf32>
    %680 = arith.mulf %675, %679 : vector<8x32xf32>
    %681 = vector.broadcast %661 : vector<1x32xf32> to vector<8x32xf32>
    %682 = arith.mulf %680, %681 : vector<8x32xf32>
    %683 = vector.broadcast %662 : vector<1x32xf32> to vector<8x32xf32>
    %684 = arith.addf %682, %683 : vector<8x32xf32>
    %c128_187 = arith.constant 128 : index
    %c0_188 = arith.constant 0 : index
    %685 = vector.load %arg1[%c128_187, %c0_188] : memref<192x128xf32, #tpu.memory_space<vmem>>, vector<32x128xf32>
    %cst_189 = arith.constant dense<0.000000e+00> : vector<8x128xf32>
    %686 = tpu.matmul %684, %685, %cst_189 {dimension_numbers = #tpu.dot_dimension_numbers<[1], [0], [0], [1], [0, 0, 1, 1], [], []>} : vector<8x32xf32>, vector<32x128xf32>, vector<8x128xf32> -> vector<8x128xf32>
    %c4_190 = arith.constant 4 : index
    %c0_191 = arith.constant 0 : index
    %687 = vector.load %arg3[%c4_190, %c0_191] : memref<88x128xf32, #tpu.memory_space<vmem>>, vector<1x128xf32>
    %688 = vector.broadcast %687 : vector<1x128xf32> to vector<8x128xf32>
    %689 = arith.addf %686, %688 : vector<8x128xf32>
    %690 = arith.mulf %689, %689 : vector<8x128xf32>
    %691 = arith.mulf %689, %690 : vector<8x128xf32>
    %cst_192 = arith.constant 4.471500e-02 : f32
    %692 = vector.broadcast %cst_192 : f32 to vector<8x128xf32>
    %693 = arith.mulf %692, %691 : vector<8x128xf32>
    %694 = arith.addf %689, %693 : vector<8x128xf32>
    %cst_193 = arith.constant 0.797884583 : f32
    %695 = vector.broadcast %cst_193 : f32 to vector<8x128xf32>
    %696 = arith.mulf %695, %694 : vector<8x128xf32>
    %697 = math.tanh %696 : vector<8x128xf32>
    %cst_194 = arith.constant 1.000000e+00 : f32
    %698 = vector.broadcast %cst_194 : f32 to vector<8x128xf32>
    %699 = arith.addf %698, %697 : vector<8x128xf32>
    %cst_195 = arith.constant 5.000000e-01 : f32
    %700 = vector.broadcast %cst_195 : f32 to vector<8x128xf32>
    %701 = arith.mulf %700, %699 : vector<8x128xf32>
    %702 = arith.mulf %689, %701 : vector<8x128xf32>
    %c0_196 = arith.constant 0 : index
    %c32_197 = arith.constant 32 : index
    %703 = vector.load %arg2[%c0_196, %c32_197] : memref<128x128xf32, #tpu.memory_space<vmem>>, vector<128x32xf32>
    %cst_198 = arith.constant dense<0.000000e+00> : vector<8x32xf32>
    %704 = tpu.matmul %702, %703, %cst_198 {dimension_numbers = #tpu.dot_dimension_numbers<[1], [0], [0], [1], [0, 0, 1, 1], [], []>} : vector<8x128xf32>, vector<128x32xf32>, vector<8x32xf32> -> vector<8x32xf32>
    %705 = arith.addf %660, %704 : vector<8x32xf32>
    %c5_199 = arith.constant 5 : index
    %c0_200 = arith.constant 0 : index
    %706 = vector.load %arg3[%c5_199, %c0_200] : memref<88x128xf32, #tpu.memory_space<vmem>>, vector<1x32xf32>
    %707 = vector.broadcast %706 : vector<1x32xf32> to vector<8x32xf32>
    %708 = arith.addf %705, %707 : vector<8x32xf32>
    %709 = vector.extract_strided_slice %708 {offsets = [1, 0], sizes = [1, 32], strides = [1, 1]} : vector<8x32xf32> to vector<1x32xf32>
    %710 = vector.extract_strided_slice %212 {offsets = [6, 0], sizes = [1, 32], strides = [1, 1]} : vector<8x32xf32> to vector<1x32xf32>
    %711 = vector.extract_strided_slice %212 {offsets = [7, 0], sizes = [1, 32], strides = [1, 1]} : vector<8x32xf32> to vector<1x32xf32>
    %cst_201 = arith.constant dense<0.000000e+00> : vector<1xf32>
    %712 = vector.multi_reduction <add>, %709, %cst_201 [1] : vector<1x32xf32> to vector<1xf32>
    %713 = vector.shape_cast %712 : vector<1xf32> to vector<1x1xf32>
    %cst_202 = arith.constant 3.200000e+01 : f32
    %714 = vector.broadcast %cst_202 : f32 to vector<1x1xf32>
    %715 = arith.divf %713, %714 : vector<1x1xf32>
    %716 = vector.broadcast %715 : vector<1x1xf32> to vector<1x32xf32>
    %717 = arith.subf %709, %716 : vector<1x32xf32>
    %718 = arith.mulf %717, %717 : vector<1x32xf32>
    %cst_203 = arith.constant dense<0.000000e+00> : vector<1xf32>
    %719 = vector.multi_reduction <add>, %718, %cst_203 [1] : vector<1x32xf32> to vector<1xf32>
    %720 = vector.shape_cast %719 : vector<1xf32> to vector<1x1xf32>
    %cst_204 = arith.constant 3.200000e+01 : f32
    %721 = vector.broadcast %cst_204 : f32 to vector<1x1xf32>
    %722 = arith.divf %720, %721 : vector<1x1xf32>
    %723 = vector.broadcast %715 : vector<1x1xf32> to vector<1x32xf32>
    %724 = arith.subf %709, %723 : vector<1x32xf32>
    %cst_205 = arith.constant 9.99999974E-6 : f32
    %725 = vector.broadcast %cst_205 : f32 to vector<1x1xf32>
    %726 = arith.addf %722, %725 : vector<1x1xf32>
    %727 = math.rsqrt %726 : vector<1x1xf32>
    %728 = vector.broadcast %727 : vector<1x1xf32> to vector<1x32xf32>
    %729 = arith.mulf %724, %728 : vector<1x32xf32>
    %730 = arith.mulf %729, %710 : vector<1x32xf32>
    %731 = arith.addf %730, %711 : vector<1x32xf32>
    %cst_206 = arith.constant dense<0.000000e+00> : vector<1x128xf32>
    %732 = tpu.matmul %731, %216, %cst_206 {dimension_numbers = #tpu.dot_dimension_numbers<[1], [0], [0], [1], [0, 0, 1, 1], [], []>} : vector<1x32xf32>, vector<32x128xf32>, vector<1x128xf32> -> vector<1x128xf32>
    %c64_i32_207 = arith.constant 64 : i32
    %733 = vector.broadcast %c64_i32_207 : i32 to vector<1x128xi32>
    %734 = arith.cmpi slt, %217, %733 : vector<1x128xi32>
    %cst_208 = arith.constant -1.000000e+30 : f32
    %735 = vector.broadcast %cst_208 : f32 to vector<1x128xf32>
    %736 = arith.select %734, %732, %735 : vector<1x128xi1>, vector<1x128xf32>
    %cst_209 = arith.constant dense<0xFF800000> : vector<1xf32>
    %737 = vector.multi_reduction <maximumf>, %736, %cst_209 [1] : vector<1x128xf32> to vector<1xf32>
    %738 = vector.shape_cast %737 : vector<1xf32> to vector<1x1xf32>
    %739 = vector.broadcast %738 : vector<1x1xf32> to vector<1x128xf32>
    %740 = arith.cmpf oge, %736, %739 : vector<1x128xf32>
    %cst_210 = arith.constant 1.280000e+02 : f32
    %741 = vector.broadcast %cst_210 : f32 to vector<1x128xf32>
    %742 = arith.select %740, %218, %741 : vector<1x128xi1>, vector<1x128xf32>
    %cst_211 = arith.constant dense<0x7F800000> : vector<1xf32>
    %743 = vector.multi_reduction <minimumf>, %742, %cst_211 [1] : vector<1x128xf32> to vector<1xf32>
    %744 = vector.shape_cast %743 : vector<1xf32> to vector<1x1xf32>
    %745 = vector.broadcast %744 : vector<1x1xf32> to vector<1x128xf32>
    %746 = arith.cmpf oeq, %218, %745 : vector<1x128xf32>
    %747 = arith.extui %746 : vector<1x128xi1> to vector<1x128xi32>
    %748 = arith.sitofp %747 : vector<1x128xi32> to vector<1x128xf32>
    %cst_212 = arith.constant dense<0.000000e+00> : vector<1x32xf32>
    %749 = tpu.matmul %748, %216, %cst_212 {dimension_numbers = #tpu.dot_dimension_numbers<[1], [1], [0], [0], [0, 0, 1, 0], [], []>} : vector<1x128xf32>, vector<32x128xf32>, vector<1x32xf32> -> vector<1x32xf32>
    %c2_i32 = arith.constant 2 : i32
    %750 = vector.broadcast %c2_i32 : i32 to vector<8x1xi32>
    %751 = arith.cmpi eq, %219, %750 : vector<8x1xi32>
    %752 = vector.broadcast %749 : vector<1x32xf32> to vector<8x32xf32>
    %753 = arith.addf %752, %213 : vector<8x32xf32>
    %754 = vector.shape_cast %751 : vector<8x1xi1> to vector<8x1xi1>
    %755 = vector.broadcast %754 : vector<8x1xi1> to vector<8x32xi1>
    %756 = arith.select %755, %753, %489 : vector<8x32xi1>, vector<8x32xf32>
    %757 = vector.shape_cast %751 : vector<8x1xi1> to vector<8x1xi1>
    %758 = vector.broadcast %757 : vector<8x1xi1> to vector<8x128xi1>
    %759 = vector.shape_cast %744 : vector<1x1xf32> to vector<1x1xf32>
    %760 = vector.broadcast %759 : vector<1x1xf32> to vector<8x128xf32>
    %761 = arith.select %758, %760, %494 : vector<8x128xi1>, vector<8x128xf32>
    %762 = vector.extract_strided_slice %212 {offsets = [0, 0], sizes = [1, 32], strides = [1, 1]} : vector<8x32xf32> to vector<1x32xf32>
    %763 = vector.extract_strided_slice %212 {offsets = [1, 0], sizes = [1, 32], strides = [1, 1]} : vector<8x32xf32> to vector<1x32xf32>
    %cst_213 = arith.constant dense<0.000000e+00> : vector<8xf32>
    %764 = vector.multi_reduction <add>, %756, %cst_213 [1] : vector<8x32xf32> to vector<8xf32>
    %765 = vector.shape_cast %764 : vector<8xf32> to vector<8x1xf32>
    %cst_214 = arith.constant 3.200000e+01 : f32
    %766 = vector.broadcast %cst_214 : f32 to vector<8x1xf32>
    %767 = arith.divf %765, %766 : vector<8x1xf32>
    %768 = vector.broadcast %767 : vector<8x1xf32> to vector<8x32xf32>
    %769 = arith.subf %756, %768 : vector<8x32xf32>
    %770 = arith.mulf %769, %769 : vector<8x32xf32>
    %cst_215 = arith.constant dense<0.000000e+00> : vector<8xf32>
    %771 = vector.multi_reduction <add>, %770, %cst_215 [1] : vector<8x32xf32> to vector<8xf32>
    %772 = vector.shape_cast %771 : vector<8xf32> to vector<8x1xf32>
    %cst_216 = arith.constant 3.200000e+01 : f32
    %773 = vector.broadcast %cst_216 : f32 to vector<8x1xf32>
    %774 = arith.divf %772, %773 : vector<8x1xf32>
    %775 = vector.broadcast %767 : vector<8x1xf32> to vector<8x32xf32>
    %776 = arith.subf %756, %775 : vector<8x32xf32>
    %cst_217 = arith.constant 9.99999974E-6 : f32
    %777 = vector.broadcast %cst_217 : f32 to vector<8x1xf32>
    %778 = arith.addf %774, %777 : vector<8x1xf32>
    %779 = math.rsqrt %778 : vector<8x1xf32>
    %780 = vector.broadcast %779 : vector<8x1xf32> to vector<8x32xf32>
    %781 = arith.mulf %776, %780 : vector<8x32xf32>
    %782 = vector.broadcast %762 : vector<1x32xf32> to vector<8x32xf32>
    %783 = arith.mulf %781, %782 : vector<8x32xf32>
    %784 = vector.broadcast %763 : vector<1x32xf32> to vector<8x32xf32>
    %785 = arith.addf %783, %784 : vector<8x32xf32>
    %c96_218 = arith.constant 96 : index
    %c0_219 = arith.constant 0 : index
    %786 = vector.load %arg1[%c96_218, %c0_219] : memref<192x128xf32, #tpu.memory_space<vmem>>, vector<32x96xf32>
    %cst_220 = arith.constant dense<0.000000e+00> : vector<8x96xf32>
    %787 = tpu.matmul %785, %786, %cst_220 {dimension_numbers = #tpu.dot_dimension_numbers<[1], [0], [0], [1], [0, 0, 1, 1], [], []>} : vector<8x32xf32>, vector<32x96xf32>, vector<8x96xf32> -> vector<8x96xf32>
    %c3_221 = arith.constant 3 : index
    %c0_222 = arith.constant 0 : index
    %788 = vector.load %arg3[%c3_221, %c0_222] : memref<88x128xf32, #tpu.memory_space<vmem>>, vector<1x96xf32>
    %789 = vector.broadcast %788 : vector<1x96xf32> to vector<8x96xf32>
    %790 = arith.addf %787, %789 : vector<8x96xf32>
    %791 = vector.extract_strided_slice %790 {offsets = [0, 0], sizes = [8, 32], strides = [1, 1]} : vector<8x96xf32> to vector<8x32xf32>
    %cst_223 = arith.constant 0.353553385 : f32
    %792 = vector.broadcast %cst_223 : f32 to vector<8x32xf32>
    %793 = arith.mulf %791, %792 : vector<8x32xf32>
    %794 = vector.extract_strided_slice %790 {offsets = [0, 32], sizes = [8, 32], strides = [1, 1]} : vector<8x96xf32> to vector<8x32xf32>
    %795 = vector.extract_strided_slice %790 {offsets = [0, 64], sizes = [8, 32], strides = [1, 1]} : vector<8x96xf32> to vector<8x32xf32>
    %796 = vector.extract_strided_slice %47 {offsets = [0, 0], sizes = [1, 32], strides = [1, 1]} : vector<4x32xf32> to vector<1x32xf32>
    %797 = vector.broadcast %796 : vector<1x32xf32> to vector<8x32xf32>
    %798 = arith.mulf %793, %797 : vector<8x32xf32>
    %799 = vector.extract_strided_slice %47 {offsets = [1, 0], sizes = [1, 32], strides = [1, 1]} : vector<4x32xf32> to vector<1x32xf32>
    %800 = vector.broadcast %799 : vector<1x32xf32> to vector<8x32xf32>
    %801 = arith.mulf %793, %800 : vector<8x32xf32>
    %802 = vector.extract_strided_slice %47 {offsets = [2, 0], sizes = [1, 32], strides = [1, 1]} : vector<4x32xf32> to vector<1x32xf32>
    %803 = vector.broadcast %802 : vector<1x32xf32> to vector<8x32xf32>
    %804 = arith.mulf %793, %803 : vector<8x32xf32>
    %805 = vector.extract_strided_slice %47 {offsets = [3, 0], sizes = [1, 32], strides = [1, 1]} : vector<4x32xf32> to vector<1x32xf32>
    %806 = vector.broadcast %805 : vector<1x32xf32> to vector<8x32xf32>
    %807 = arith.mulf %793, %806 : vector<8x32xf32>
    %808 = tpu.concatenate %798, %801, %804, %807 in 0 : vector<8x32xf32>, vector<8x32xf32>, vector<8x32xf32>, vector<8x32xf32> -> vector<32x32xf32>
    %cst_224 = arith.constant dense<0.000000e+00> : vector<32x8xf32>
    %809 = tpu.matmul %808, %794, %cst_224 {dimension_numbers = #tpu.dot_dimension_numbers<[1], [1], [0], [0], [0, 0, 1, 0], [], []>} : vector<32x32xf32>, vector<8x32xf32>, vector<32x8xf32> -> vector<32x8xf32>
    %810 = arith.addf %809, %215 : vector<32x8xf32>
    %cst_225 = arith.constant dense<0xFF800000> : vector<32xf32>
    %811 = vector.multi_reduction <maximumf>, %810, %cst_225 [1] : vector<32x8xf32> to vector<32xf32>
    %812 = vector.shape_cast %811 : vector<32xf32> to vector<32x1xf32>
    %813 = vector.broadcast %812 : vector<32x1xf32> to vector<32x8xf32>
    %814 = arith.subf %810, %813 : vector<32x8xf32>
    %815 = math.exp %814 : vector<32x8xf32>
    %cst_226 = arith.constant dense<0.000000e+00> : vector<32xf32>
    %816 = vector.multi_reduction <add>, %815, %cst_226 [1] : vector<32x8xf32> to vector<32xf32>
    %817 = vector.shape_cast %816 : vector<32xf32> to vector<32x1xf32>
    %818 = tpu.reciprocal %817 {approx = true} : vector<32x1xf32> -> vector<32x1xf32>
    %819 = vector.broadcast %818 : vector<32x1xf32> to vector<32x8xf32>
    %820 = arith.mulf %815, %819 : vector<32x8xf32>
    %cst_227 = arith.constant dense<0.000000e+00> : vector<32x32xf32>
    %821 = tpu.matmul %820, %795, %cst_227 {dimension_numbers = #tpu.dot_dimension_numbers<[1], [0], [0], [1], [0, 0, 1, 1], [], []>} : vector<32x8xf32>, vector<8x32xf32>, vector<32x32xf32> -> vector<32x32xf32>
    %822 = vector.extract_strided_slice %821 {offsets = [0, 0], sizes = [8, 32], strides = [1, 1]} : vector<32x32xf32> to vector<8x32xf32>
    %823 = vector.extract_strided_slice %47 {offsets = [0, 0], sizes = [1, 32], strides = [1, 1]} : vector<4x32xf32> to vector<1x32xf32>
    %824 = vector.broadcast %823 : vector<1x32xf32> to vector<8x32xf32>
    %825 = arith.mulf %822, %824 : vector<8x32xf32>
    %826 = vector.extract_strided_slice %821 {offsets = [8, 0], sizes = [8, 32], strides = [1, 1]} : vector<32x32xf32> to vector<8x32xf32>
    %827 = vector.extract_strided_slice %47 {offsets = [1, 0], sizes = [1, 32], strides = [1, 1]} : vector<4x32xf32> to vector<1x32xf32>
    %828 = vector.broadcast %827 : vector<1x32xf32> to vector<8x32xf32>
    %829 = arith.mulf %826, %828 : vector<8x32xf32>
    %830 = arith.addf %825, %829 : vector<8x32xf32>
    %831 = vector.extract_strided_slice %821 {offsets = [16, 0], sizes = [8, 32], strides = [1, 1]} : vector<32x32xf32> to vector<8x32xf32>
    %832 = vector.extract_strided_slice %47 {offsets = [2, 0], sizes = [1, 32], strides = [1, 1]} : vector<4x32xf32> to vector<1x32xf32>
    %833 = vector.broadcast %832 : vector<1x32xf32> to vector<8x32xf32>
    %834 = arith.mulf %831, %833 : vector<8x32xf32>
    %835 = arith.addf %830, %834 : vector<8x32xf32>
    %836 = vector.extract_strided_slice %821 {offsets = [24, 0], sizes = [8, 32], strides = [1, 1]} : vector<32x32xf32> to vector<8x32xf32>
    %837 = vector.extract_strided_slice %47 {offsets = [3, 0], sizes = [1, 32], strides = [1, 1]} : vector<4x32xf32> to vector<1x32xf32>
    %838 = vector.broadcast %837 : vector<1x32xf32> to vector<8x32xf32>
    %839 = arith.mulf %836, %838 : vector<8x32xf32>
    %840 = arith.addf %835, %839 : vector<8x32xf32>
    %c96_228 = arith.constant 96 : index
    %c96_229 = arith.constant 96 : index
    %841 = vector.load %arg1[%c96_228, %c96_229] : memref<192x128xf32, #tpu.memory_space<vmem>>, vector<32x32xf32>
    %cst_230 = arith.constant dense<0.000000e+00> : vector<8x32xf32>
    %842 = tpu.matmul %840, %841, %cst_230 {dimension_numbers = #tpu.dot_dimension_numbers<[1], [0], [0], [1], [0, 0, 1, 1], [], []>} : vector<8x32xf32>, vector<32x32xf32>, vector<8x32xf32> -> vector<8x32xf32>
    %843 = arith.addf %756, %842 : vector<8x32xf32>
    %c3_231 = arith.constant 3 : index
    %c96_232 = arith.constant 96 : index
    %844 = vector.load %arg3[%c3_231, %c96_232] : memref<88x128xf32, #tpu.memory_space<vmem>>, vector<1x32xf32>
    %845 = vector.broadcast %844 : vector<1x32xf32> to vector<8x32xf32>
    %846 = arith.addf %843, %845 : vector<8x32xf32>
    %847 = vector.extract_strided_slice %212 {offsets = [2, 0], sizes = [1, 32], strides = [1, 1]} : vector<8x32xf32> to vector<1x32xf32>
    %848 = vector.extract_strided_slice %212 {offsets = [3, 0], sizes = [1, 32], strides = [1, 1]} : vector<8x32xf32> to vector<1x32xf32>
    %cst_233 = arith.constant dense<0.000000e+00> : vector<8xf32>
    %849 = vector.multi_reduction <add>, %846, %cst_233 [1] : vector<8x32xf32> to vector<8xf32>
    %850 = vector.shape_cast %849 : vector<8xf32> to vector<8x1xf32>
    %cst_234 = arith.constant 3.200000e+01 : f32
    %851 = vector.broadcast %cst_234 : f32 to vector<8x1xf32>
    %852 = arith.divf %850, %851 : vector<8x1xf32>
    %853 = vector.broadcast %852 : vector<8x1xf32> to vector<8x32xf32>
    %854 = arith.subf %846, %853 : vector<8x32xf32>
    %855 = arith.mulf %854, %854 : vector<8x32xf32>
    %cst_235 = arith.constant dense<0.000000e+00> : vector<8xf32>
    %856 = vector.multi_reduction <add>, %855, %cst_235 [1] : vector<8x32xf32> to vector<8xf32>
    %857 = vector.shape_cast %856 : vector<8xf32> to vector<8x1xf32>
    %cst_236 = arith.constant 3.200000e+01 : f32
    %858 = vector.broadcast %cst_236 : f32 to vector<8x1xf32>
    %859 = arith.divf %857, %858 : vector<8x1xf32>
    %860 = vector.broadcast %852 : vector<8x1xf32> to vector<8x32xf32>
    %861 = arith.subf %846, %860 : vector<8x32xf32>
    %cst_237 = arith.constant 9.99999974E-6 : f32
    %862 = vector.broadcast %cst_237 : f32 to vector<8x1xf32>
    %863 = arith.addf %859, %862 : vector<8x1xf32>
    %864 = math.rsqrt %863 : vector<8x1xf32>
    %865 = vector.broadcast %864 : vector<8x1xf32> to vector<8x32xf32>
    %866 = arith.mulf %861, %865 : vector<8x32xf32>
    %867 = vector.broadcast %847 : vector<1x32xf32> to vector<8x32xf32>
    %868 = arith.mulf %866, %867 : vector<8x32xf32>
    %869 = vector.broadcast %848 : vector<1x32xf32> to vector<8x32xf32>
    %870 = arith.addf %868, %869 : vector<8x32xf32>
    %c64_238 = arith.constant 64 : index
    %c0_239 = arith.constant 0 : index
    %871 = vector.load %arg1[%c64_238, %c0_239] : memref<192x128xf32, #tpu.memory_space<vmem>>, vector<32x32xf32>
    %cst_240 = arith.constant dense<0.000000e+00> : vector<8x32xf32>
    %872 = tpu.matmul %870, %871, %cst_240 {dimension_numbers = #tpu.dot_dimension_numbers<[1], [0], [0], [1], [0, 0, 1, 1], [], []>} : vector<8x32xf32>, vector<32x32xf32>, vector<8x32xf32> -> vector<8x32xf32>
    %c2_241 = arith.constant 2 : index
    %c32_242 = arith.constant 32 : index
    %873 = vector.load %arg3[%c2_241, %c32_242] : memref<88x128xf32, #tpu.memory_space<vmem>>, vector<1x32xf32>
    %874 = vector.broadcast %873 : vector<1x32xf32> to vector<8x32xf32>
    %875 = arith.addf %872, %874 : vector<8x32xf32>
    %cst_243 = arith.constant 0.353553385 : f32
    %876 = vector.broadcast %cst_243 : f32 to vector<8x32xf32>
    %877 = arith.mulf %875, %876 : vector<8x32xf32>
    %878 = vector.extract_strided_slice %47 {offsets = [0, 0], sizes = [1, 32], strides = [1, 1]} : vector<4x32xf32> to vector<1x32xf32>
    %879 = vector.broadcast %878 : vector<1x32xf32> to vector<8x32xf32>
    %880 = arith.mulf %877, %879 : vector<8x32xf32>
    %881 = vector.extract_strided_slice %47 {offsets = [1, 0], sizes = [1, 32], strides = [1, 1]} : vector<4x32xf32> to vector<1x32xf32>
    %882 = vector.broadcast %881 : vector<1x32xf32> to vector<8x32xf32>
    %883 = arith.mulf %877, %882 : vector<8x32xf32>
    %884 = vector.extract_strided_slice %47 {offsets = [2, 0], sizes = [1, 32], strides = [1, 1]} : vector<4x32xf32> to vector<1x32xf32>
    %885 = vector.broadcast %884 : vector<1x32xf32> to vector<8x32xf32>
    %886 = arith.mulf %877, %885 : vector<8x32xf32>
    %887 = vector.extract_strided_slice %47 {offsets = [3, 0], sizes = [1, 32], strides = [1, 1]} : vector<4x32xf32> to vector<1x32xf32>
    %888 = vector.broadcast %887 : vector<1x32xf32> to vector<8x32xf32>
    %889 = arith.mulf %877, %888 : vector<8x32xf32>
    %890 = tpu.concatenate %880, %883, %886, %889 in 0 : vector<8x32xf32>, vector<8x32xf32>, vector<8x32xf32>, vector<8x32xf32> -> vector<32x32xf32>
    %cst_244 = arith.constant dense<0.000000e+00> : vector<32x16xf32>
    %891 = tpu.matmul %890, %210, %cst_244 {dimension_numbers = #tpu.dot_dimension_numbers<[1], [1], [0], [0], [0, 0, 1, 0], [], []>} : vector<32x32xf32>, vector<16x32xf32>, vector<32x16xf32> -> vector<32x16xf32>
    %cst_245 = arith.constant dense<0xFF800000> : vector<32xf32>
    %892 = vector.multi_reduction <maximumf>, %891, %cst_245 [1] : vector<32x16xf32> to vector<32xf32>
    %893 = vector.shape_cast %892 : vector<32xf32> to vector<32x1xf32>
    %894 = vector.broadcast %893 : vector<32x1xf32> to vector<32x16xf32>
    %895 = arith.subf %891, %894 : vector<32x16xf32>
    %896 = math.exp %895 : vector<32x16xf32>
    %cst_246 = arith.constant dense<0.000000e+00> : vector<32xf32>
    %897 = vector.multi_reduction <add>, %896, %cst_246 [1] : vector<32x16xf32> to vector<32xf32>
    %898 = vector.shape_cast %897 : vector<32xf32> to vector<32x1xf32>
    %899 = tpu.reciprocal %898 {approx = true} : vector<32x1xf32> -> vector<32x1xf32>
    %900 = vector.broadcast %899 : vector<32x1xf32> to vector<32x16xf32>
    %901 = arith.mulf %896, %900 : vector<32x16xf32>
    %cst_247 = arith.constant dense<0.000000e+00> : vector<32x32xf32>
    %902 = tpu.matmul %901, %211, %cst_247 {dimension_numbers = #tpu.dot_dimension_numbers<[1], [0], [0], [1], [0, 0, 1, 1], [], []>} : vector<32x16xf32>, vector<16x32xf32>, vector<32x32xf32> -> vector<32x32xf32>
    %903 = vector.extract_strided_slice %902 {offsets = [0, 0], sizes = [8, 32], strides = [1, 1]} : vector<32x32xf32> to vector<8x32xf32>
    %904 = vector.extract_strided_slice %47 {offsets = [0, 0], sizes = [1, 32], strides = [1, 1]} : vector<4x32xf32> to vector<1x32xf32>
    %905 = vector.broadcast %904 : vector<1x32xf32> to vector<8x32xf32>
    %906 = arith.mulf %903, %905 : vector<8x32xf32>
    %907 = vector.extract_strided_slice %902 {offsets = [8, 0], sizes = [8, 32], strides = [1, 1]} : vector<32x32xf32> to vector<8x32xf32>
    %908 = vector.extract_strided_slice %47 {offsets = [1, 0], sizes = [1, 32], strides = [1, 1]} : vector<4x32xf32> to vector<1x32xf32>
    %909 = vector.broadcast %908 : vector<1x32xf32> to vector<8x32xf32>
    %910 = arith.mulf %907, %909 : vector<8x32xf32>
    %911 = arith.addf %906, %910 : vector<8x32xf32>
    %912 = vector.extract_strided_slice %902 {offsets = [16, 0], sizes = [8, 32], strides = [1, 1]} : vector<32x32xf32> to vector<8x32xf32>
    %913 = vector.extract_strided_slice %47 {offsets = [2, 0], sizes = [1, 32], strides = [1, 1]} : vector<4x32xf32> to vector<1x32xf32>
    %914 = vector.broadcast %913 : vector<1x32xf32> to vector<8x32xf32>
    %915 = arith.mulf %912, %914 : vector<8x32xf32>
    %916 = arith.addf %911, %915 : vector<8x32xf32>
    %917 = vector.extract_strided_slice %902 {offsets = [24, 0], sizes = [8, 32], strides = [1, 1]} : vector<32x32xf32> to vector<8x32xf32>
    %918 = vector.extract_strided_slice %47 {offsets = [3, 0], sizes = [1, 32], strides = [1, 1]} : vector<4x32xf32> to vector<1x32xf32>
    %919 = vector.broadcast %918 : vector<1x32xf32> to vector<8x32xf32>
    %920 = arith.mulf %917, %919 : vector<8x32xf32>
    %921 = arith.addf %916, %920 : vector<8x32xf32>
    %c64_248 = arith.constant 64 : index
    %c96_249 = arith.constant 96 : index
    %922 = vector.load %arg1[%c64_248, %c96_249] : memref<192x128xf32, #tpu.memory_space<vmem>>, vector<32x32xf32>
    %cst_250 = arith.constant dense<0.000000e+00> : vector<8x32xf32>
    %923 = tpu.matmul %921, %922, %cst_250 {dimension_numbers = #tpu.dot_dimension_numbers<[1], [0], [0], [1], [0, 0, 1, 1], [], []>} : vector<8x32xf32>, vector<32x32xf32>, vector<8x32xf32> -> vector<8x32xf32>
    %924 = arith.addf %846, %923 : vector<8x32xf32>
    %c5_251 = arith.constant 5 : index
    %c32_252 = arith.constant 32 : index
    %925 = vector.load %arg3[%c5_251, %c32_252] : memref<88x128xf32, #tpu.memory_space<vmem>>, vector<1x32xf32>
    %926 = vector.broadcast %925 : vector<1x32xf32> to vector<8x32xf32>
    %927 = arith.addf %924, %926 : vector<8x32xf32>
    %928 = vector.extract_strided_slice %212 {offsets = [4, 0], sizes = [1, 32], strides = [1, 1]} : vector<8x32xf32> to vector<1x32xf32>
    %929 = vector.extract_strided_slice %212 {offsets = [5, 0], sizes = [1, 32], strides = [1, 1]} : vector<8x32xf32> to vector<1x32xf32>
    %cst_253 = arith.constant dense<0.000000e+00> : vector<8xf32>
    %930 = vector.multi_reduction <add>, %927, %cst_253 [1] : vector<8x32xf32> to vector<8xf32>
    %931 = vector.shape_cast %930 : vector<8xf32> to vector<8x1xf32>
    %cst_254 = arith.constant 3.200000e+01 : f32
    %932 = vector.broadcast %cst_254 : f32 to vector<8x1xf32>
    %933 = arith.divf %931, %932 : vector<8x1xf32>
    %934 = vector.broadcast %933 : vector<8x1xf32> to vector<8x32xf32>
    %935 = arith.subf %927, %934 : vector<8x32xf32>
    %936 = arith.mulf %935, %935 : vector<8x32xf32>
    %cst_255 = arith.constant dense<0.000000e+00> : vector<8xf32>
    %937 = vector.multi_reduction <add>, %936, %cst_255 [1] : vector<8x32xf32> to vector<8xf32>
    %938 = vector.shape_cast %937 : vector<8xf32> to vector<8x1xf32>
    %cst_256 = arith.constant 3.200000e+01 : f32
    %939 = vector.broadcast %cst_256 : f32 to vector<8x1xf32>
    %940 = arith.divf %938, %939 : vector<8x1xf32>
    %941 = vector.broadcast %933 : vector<8x1xf32> to vector<8x32xf32>
    %942 = arith.subf %927, %941 : vector<8x32xf32>
    %cst_257 = arith.constant 9.99999974E-6 : f32
    %943 = vector.broadcast %cst_257 : f32 to vector<8x1xf32>
    %944 = arith.addf %940, %943 : vector<8x1xf32>
    %945 = math.rsqrt %944 : vector<8x1xf32>
    %946 = vector.broadcast %945 : vector<8x1xf32> to vector<8x32xf32>
    %947 = arith.mulf %942, %946 : vector<8x32xf32>
    %948 = vector.broadcast %928 : vector<1x32xf32> to vector<8x32xf32>
    %949 = arith.mulf %947, %948 : vector<8x32xf32>
    %950 = vector.broadcast %929 : vector<1x32xf32> to vector<8x32xf32>
    %951 = arith.addf %949, %950 : vector<8x32xf32>
    %c128_258 = arith.constant 128 : index
    %c0_259 = arith.constant 0 : index
    %952 = vector.load %arg1[%c128_258, %c0_259] : memref<192x128xf32, #tpu.memory_space<vmem>>, vector<32x128xf32>
    %cst_260 = arith.constant dense<0.000000e+00> : vector<8x128xf32>
    %953 = tpu.matmul %951, %952, %cst_260 {dimension_numbers = #tpu.dot_dimension_numbers<[1], [0], [0], [1], [0, 0, 1, 1], [], []>} : vector<8x32xf32>, vector<32x128xf32>, vector<8x128xf32> -> vector<8x128xf32>
    %c4_261 = arith.constant 4 : index
    %c0_262 = arith.constant 0 : index
    %954 = vector.load %arg3[%c4_261, %c0_262] : memref<88x128xf32, #tpu.memory_space<vmem>>, vector<1x128xf32>
    %955 = vector.broadcast %954 : vector<1x128xf32> to vector<8x128xf32>
    %956 = arith.addf %953, %955 : vector<8x128xf32>
    %957 = arith.mulf %956, %956 : vector<8x128xf32>
    %958 = arith.mulf %956, %957 : vector<8x128xf32>
    %cst_263 = arith.constant 4.471500e-02 : f32
    %959 = vector.broadcast %cst_263 : f32 to vector<8x128xf32>
    %960 = arith.mulf %959, %958 : vector<8x128xf32>
    %961 = arith.addf %956, %960 : vector<8x128xf32>
    %cst_264 = arith.constant 0.797884583 : f32
    %962 = vector.broadcast %cst_264 : f32 to vector<8x128xf32>
    %963 = arith.mulf %962, %961 : vector<8x128xf32>
    %964 = math.tanh %963 : vector<8x128xf32>
    %cst_265 = arith.constant 1.000000e+00 : f32
    %965 = vector.broadcast %cst_265 : f32 to vector<8x128xf32>
    %966 = arith.addf %965, %964 : vector<8x128xf32>
    %cst_266 = arith.constant 5.000000e-01 : f32
    %967 = vector.broadcast %cst_266 : f32 to vector<8x128xf32>
    %968 = arith.mulf %967, %966 : vector<8x128xf32>
    %969 = arith.mulf %956, %968 : vector<8x128xf32>
    %c0_267 = arith.constant 0 : index
    %c32_268 = arith.constant 32 : index
    %970 = vector.load %arg2[%c0_267, %c32_268] : memref<128x128xf32, #tpu.memory_space<vmem>>, vector<128x32xf32>
    %cst_269 = arith.constant dense<0.000000e+00> : vector<8x32xf32>
    %971 = tpu.matmul %969, %970, %cst_269 {dimension_numbers = #tpu.dot_dimension_numbers<[1], [0], [0], [1], [0, 0, 1, 1], [], []>} : vector<8x128xf32>, vector<128x32xf32>, vector<8x32xf32> -> vector<8x32xf32>
    %972 = arith.addf %927, %971 : vector<8x32xf32>
    %c5_270 = arith.constant 5 : index
    %c0_271 = arith.constant 0 : index
    %973 = vector.load %arg3[%c5_270, %c0_271] : memref<88x128xf32, #tpu.memory_space<vmem>>, vector<1x32xf32>
    %974 = vector.broadcast %973 : vector<1x32xf32> to vector<8x32xf32>
    %975 = arith.addf %972, %974 : vector<8x32xf32>
    %976 = vector.extract_strided_slice %975 {offsets = [2, 0], sizes = [1, 32], strides = [1, 1]} : vector<8x32xf32> to vector<1x32xf32>
    %977 = vector.extract_strided_slice %212 {offsets = [6, 0], sizes = [1, 32], strides = [1, 1]} : vector<8x32xf32> to vector<1x32xf32>
    %978 = vector.extract_strided_slice %212 {offsets = [7, 0], sizes = [1, 32], strides = [1, 1]} : vector<8x32xf32> to vector<1x32xf32>
    %cst_272 = arith.constant dense<0.000000e+00> : vector<1xf32>
    %979 = vector.multi_reduction <add>, %976, %cst_272 [1] : vector<1x32xf32> to vector<1xf32>
    %980 = vector.shape_cast %979 : vector<1xf32> to vector<1x1xf32>
    %cst_273 = arith.constant 3.200000e+01 : f32
    %981 = vector.broadcast %cst_273 : f32 to vector<1x1xf32>
    %982 = arith.divf %980, %981 : vector<1x1xf32>
    %983 = vector.broadcast %982 : vector<1x1xf32> to vector<1x32xf32>
    %984 = arith.subf %976, %983 : vector<1x32xf32>
    %985 = arith.mulf %984, %984 : vector<1x32xf32>
    %cst_274 = arith.constant dense<0.000000e+00> : vector<1xf32>
    %986 = vector.multi_reduction <add>, %985, %cst_274 [1] : vector<1x32xf32> to vector<1xf32>
    %987 = vector.shape_cast %986 : vector<1xf32> to vector<1x1xf32>
    %cst_275 = arith.constant 3.200000e+01 : f32
    %988 = vector.broadcast %cst_275 : f32 to vector<1x1xf32>
    %989 = arith.divf %987, %988 : vector<1x1xf32>
    %990 = vector.broadcast %982 : vector<1x1xf32> to vector<1x32xf32>
    %991 = arith.subf %976, %990 : vector<1x32xf32>
    %cst_276 = arith.constant 9.99999974E-6 : f32
    %992 = vector.broadcast %cst_276 : f32 to vector<1x1xf32>
    %993 = arith.addf %989, %992 : vector<1x1xf32>
    %994 = math.rsqrt %993 : vector<1x1xf32>
    %995 = vector.broadcast %994 : vector<1x1xf32> to vector<1x32xf32>
    %996 = arith.mulf %991, %995 : vector<1x32xf32>
    %997 = arith.mulf %996, %977 : vector<1x32xf32>
    %998 = arith.addf %997, %978 : vector<1x32xf32>
    %cst_277 = arith.constant dense<0.000000e+00> : vector<1x128xf32>
    %999 = tpu.matmul %998, %216, %cst_277 {dimension_numbers = #tpu.dot_dimension_numbers<[1], [0], [0], [1], [0, 0, 1, 1], [], []>} : vector<1x32xf32>, vector<32x128xf32>, vector<1x128xf32> -> vector<1x128xf32>
    %c64_i32_278 = arith.constant 64 : i32
    %1000 = vector.broadcast %c64_i32_278 : i32 to vector<1x128xi32>
    %1001 = arith.cmpi slt, %217, %1000 : vector<1x128xi32>
    %cst_279 = arith.constant -1.000000e+30 : f32
    %1002 = vector.broadcast %cst_279 : f32 to vector<1x128xf32>
    %1003 = arith.select %1001, %999, %1002 : vector<1x128xi1>, vector<1x128xf32>
    %cst_280 = arith.constant dense<0xFF800000> : vector<1xf32>
    %1004 = vector.multi_reduction <maximumf>, %1003, %cst_280 [1] : vector<1x128xf32> to vector<1xf32>
    %1005 = vector.shape_cast %1004 : vector<1xf32> to vector<1x1xf32>
    %1006 = vector.broadcast %1005 : vector<1x1xf32> to vector<1x128xf32>
    %1007 = arith.cmpf oge, %1003, %1006 : vector<1x128xf32>
    %cst_281 = arith.constant 1.280000e+02 : f32
    %1008 = vector.broadcast %cst_281 : f32 to vector<1x128xf32>
    %1009 = arith.select %1007, %218, %1008 : vector<1x128xi1>, vector<1x128xf32>
    %cst_282 = arith.constant dense<0x7F800000> : vector<1xf32>
    %1010 = vector.multi_reduction <minimumf>, %1009, %cst_282 [1] : vector<1x128xf32> to vector<1xf32>
    %1011 = vector.shape_cast %1010 : vector<1xf32> to vector<1x1xf32>
    %1012 = vector.broadcast %1011 : vector<1x1xf32> to vector<1x128xf32>
    %1013 = arith.cmpf oeq, %218, %1012 : vector<1x128xf32>
    %1014 = arith.extui %1013 : vector<1x128xi1> to vector<1x128xi32>
    %1015 = arith.sitofp %1014 : vector<1x128xi32> to vector<1x128xf32>
    %cst_283 = arith.constant dense<0.000000e+00> : vector<1x32xf32>
    %1016 = tpu.matmul %1015, %216, %cst_283 {dimension_numbers = #tpu.dot_dimension_numbers<[1], [1], [0], [0], [0, 0, 1, 0], [], []>} : vector<1x128xf32>, vector<32x128xf32>, vector<1x32xf32> -> vector<1x32xf32>
    %c3_i32 = arith.constant 3 : i32
    %1017 = vector.broadcast %c3_i32 : i32 to vector<8x1xi32>
    %1018 = arith.cmpi eq, %219, %1017 : vector<8x1xi32>
    %1019 = vector.broadcast %1016 : vector<1x32xf32> to vector<8x32xf32>
    %1020 = arith.addf %1019, %213 : vector<8x32xf32>
    %1021 = vector.shape_cast %1018 : vector<8x1xi1> to vector<8x1xi1>
    %1022 = vector.broadcast %1021 : vector<8x1xi1> to vector<8x32xi1>
    %1023 = arith.select %1022, %1020, %756 : vector<8x32xi1>, vector<8x32xf32>
    %1024 = vector.shape_cast %1018 : vector<8x1xi1> to vector<8x1xi1>
    %1025 = vector.broadcast %1024 : vector<8x1xi1> to vector<8x128xi1>
    %1026 = vector.shape_cast %1011 : vector<1x1xf32> to vector<1x1xf32>
    %1027 = vector.broadcast %1026 : vector<1x1xf32> to vector<8x128xf32>
    %1028 = arith.select %1025, %1027, %761 : vector<8x128xi1>, vector<8x128xf32>
    %1029 = vector.extract_strided_slice %212 {offsets = [0, 0], sizes = [1, 32], strides = [1, 1]} : vector<8x32xf32> to vector<1x32xf32>
    %1030 = vector.extract_strided_slice %212 {offsets = [1, 0], sizes = [1, 32], strides = [1, 1]} : vector<8x32xf32> to vector<1x32xf32>
    %cst_284 = arith.constant dense<0.000000e+00> : vector<8xf32>
    %1031 = vector.multi_reduction <add>, %1023, %cst_284 [1] : vector<8x32xf32> to vector<8xf32>
    %1032 = vector.shape_cast %1031 : vector<8xf32> to vector<8x1xf32>
    %cst_285 = arith.constant 3.200000e+01 : f32
    %1033 = vector.broadcast %cst_285 : f32 to vector<8x1xf32>
    %1034 = arith.divf %1032, %1033 : vector<8x1xf32>
    %1035 = vector.broadcast %1034 : vector<8x1xf32> to vector<8x32xf32>
    %1036 = arith.subf %1023, %1035 : vector<8x32xf32>
    %1037 = arith.mulf %1036, %1036 : vector<8x32xf32>
    %cst_286 = arith.constant dense<0.000000e+00> : vector<8xf32>
    %1038 = vector.multi_reduction <add>, %1037, %cst_286 [1] : vector<8x32xf32> to vector<8xf32>
    %1039 = vector.shape_cast %1038 : vector<8xf32> to vector<8x1xf32>
    %cst_287 = arith.constant 3.200000e+01 : f32
    %1040 = vector.broadcast %cst_287 : f32 to vector<8x1xf32>
    %1041 = arith.divf %1039, %1040 : vector<8x1xf32>
    %1042 = vector.broadcast %1034 : vector<8x1xf32> to vector<8x32xf32>
    %1043 = arith.subf %1023, %1042 : vector<8x32xf32>
    %cst_288 = arith.constant 9.99999974E-6 : f32
    %1044 = vector.broadcast %cst_288 : f32 to vector<8x1xf32>
    %1045 = arith.addf %1041, %1044 : vector<8x1xf32>
    %1046 = math.rsqrt %1045 : vector<8x1xf32>
    %1047 = vector.broadcast %1046 : vector<8x1xf32> to vector<8x32xf32>
    %1048 = arith.mulf %1043, %1047 : vector<8x32xf32>
    %1049 = vector.broadcast %1029 : vector<1x32xf32> to vector<8x32xf32>
    %1050 = arith.mulf %1048, %1049 : vector<8x32xf32>
    %1051 = vector.broadcast %1030 : vector<1x32xf32> to vector<8x32xf32>
    %1052 = arith.addf %1050, %1051 : vector<8x32xf32>
    %c96_289 = arith.constant 96 : index
    %c0_290 = arith.constant 0 : index
    %1053 = vector.load %arg1[%c96_289, %c0_290] : memref<192x128xf32, #tpu.memory_space<vmem>>, vector<32x96xf32>
    %cst_291 = arith.constant dense<0.000000e+00> : vector<8x96xf32>
    %1054 = tpu.matmul %1052, %1053, %cst_291 {dimension_numbers = #tpu.dot_dimension_numbers<[1], [0], [0], [1], [0, 0, 1, 1], [], []>} : vector<8x32xf32>, vector<32x96xf32>, vector<8x96xf32> -> vector<8x96xf32>
    %c3_292 = arith.constant 3 : index
    %c0_293 = arith.constant 0 : index
    %1055 = vector.load %arg3[%c3_292, %c0_293] : memref<88x128xf32, #tpu.memory_space<vmem>>, vector<1x96xf32>
    %1056 = vector.broadcast %1055 : vector<1x96xf32> to vector<8x96xf32>
    %1057 = arith.addf %1054, %1056 : vector<8x96xf32>
    %1058 = vector.extract_strided_slice %1057 {offsets = [0, 0], sizes = [8, 32], strides = [1, 1]} : vector<8x96xf32> to vector<8x32xf32>
    %cst_294 = arith.constant 0.353553385 : f32
    %1059 = vector.broadcast %cst_294 : f32 to vector<8x32xf32>
    %1060 = arith.mulf %1058, %1059 : vector<8x32xf32>
    %1061 = vector.extract_strided_slice %1057 {offsets = [0, 32], sizes = [8, 32], strides = [1, 1]} : vector<8x96xf32> to vector<8x32xf32>
    %1062 = vector.extract_strided_slice %1057 {offsets = [0, 64], sizes = [8, 32], strides = [1, 1]} : vector<8x96xf32> to vector<8x32xf32>
    %1063 = vector.extract_strided_slice %47 {offsets = [0, 0], sizes = [1, 32], strides = [1, 1]} : vector<4x32xf32> to vector<1x32xf32>
    %1064 = vector.broadcast %1063 : vector<1x32xf32> to vector<8x32xf32>
    %1065 = arith.mulf %1060, %1064 : vector<8x32xf32>
    %1066 = vector.extract_strided_slice %47 {offsets = [1, 0], sizes = [1, 32], strides = [1, 1]} : vector<4x32xf32> to vector<1x32xf32>
    %1067 = vector.broadcast %1066 : vector<1x32xf32> to vector<8x32xf32>
    %1068 = arith.mulf %1060, %1067 : vector<8x32xf32>
    %1069 = vector.extract_strided_slice %47 {offsets = [2, 0], sizes = [1, 32], strides = [1, 1]} : vector<4x32xf32> to vector<1x32xf32>
    %1070 = vector.broadcast %1069 : vector<1x32xf32> to vector<8x32xf32>
    %1071 = arith.mulf %1060, %1070 : vector<8x32xf32>
    %1072 = vector.extract_strided_slice %47 {offsets = [3, 0], sizes = [1, 32], strides = [1, 1]} : vector<4x32xf32> to vector<1x32xf32>
    %1073 = vector.broadcast %1072 : vector<1x32xf32> to vector<8x32xf32>
    %1074 = arith.mulf %1060, %1073 : vector<8x32xf32>
    %1075 = tpu.concatenate %1065, %1068, %1071, %1074 in 0 : vector<8x32xf32>, vector<8x32xf32>, vector<8x32xf32>, vector<8x32xf32> -> vector<32x32xf32>
    %cst_295 = arith.constant dense<0.000000e+00> : vector<32x8xf32>
    %1076 = tpu.matmul %1075, %1061, %cst_295 {dimension_numbers = #tpu.dot_dimension_numbers<[1], [1], [0], [0], [0, 0, 1, 0], [], []>} : vector<32x32xf32>, vector<8x32xf32>, vector<32x8xf32> -> vector<32x8xf32>
    %1077 = arith.addf %1076, %215 : vector<32x8xf32>
    %cst_296 = arith.constant dense<0xFF800000> : vector<32xf32>
    %1078 = vector.multi_reduction <maximumf>, %1077, %cst_296 [1] : vector<32x8xf32> to vector<32xf32>
    %1079 = vector.shape_cast %1078 : vector<32xf32> to vector<32x1xf32>
    %1080 = vector.broadcast %1079 : vector<32x1xf32> to vector<32x8xf32>
    %1081 = arith.subf %1077, %1080 : vector<32x8xf32>
    %1082 = math.exp %1081 : vector<32x8xf32>
    %cst_297 = arith.constant dense<0.000000e+00> : vector<32xf32>
    %1083 = vector.multi_reduction <add>, %1082, %cst_297 [1] : vector<32x8xf32> to vector<32xf32>
    %1084 = vector.shape_cast %1083 : vector<32xf32> to vector<32x1xf32>
    %1085 = tpu.reciprocal %1084 {approx = true} : vector<32x1xf32> -> vector<32x1xf32>
    %1086 = vector.broadcast %1085 : vector<32x1xf32> to vector<32x8xf32>
    %1087 = arith.mulf %1082, %1086 : vector<32x8xf32>
    %cst_298 = arith.constant dense<0.000000e+00> : vector<32x32xf32>
    %1088 = tpu.matmul %1087, %1062, %cst_298 {dimension_numbers = #tpu.dot_dimension_numbers<[1], [0], [0], [1], [0, 0, 1, 1], [], []>} : vector<32x8xf32>, vector<8x32xf32>, vector<32x32xf32> -> vector<32x32xf32>
    %1089 = vector.extract_strided_slice %1088 {offsets = [0, 0], sizes = [8, 32], strides = [1, 1]} : vector<32x32xf32> to vector<8x32xf32>
    %1090 = vector.extract_strided_slice %47 {offsets = [0, 0], sizes = [1, 32], strides = [1, 1]} : vector<4x32xf32> to vector<1x32xf32>
    %1091 = vector.broadcast %1090 : vector<1x32xf32> to vector<8x32xf32>
    %1092 = arith.mulf %1089, %1091 : vector<8x32xf32>
    %1093 = vector.extract_strided_slice %1088 {offsets = [8, 0], sizes = [8, 32], strides = [1, 1]} : vector<32x32xf32> to vector<8x32xf32>
    %1094 = vector.extract_strided_slice %47 {offsets = [1, 0], sizes = [1, 32], strides = [1, 1]} : vector<4x32xf32> to vector<1x32xf32>
    %1095 = vector.broadcast %1094 : vector<1x32xf32> to vector<8x32xf32>
    %1096 = arith.mulf %1093, %1095 : vector<8x32xf32>
    %1097 = arith.addf %1092, %1096 : vector<8x32xf32>
    %1098 = vector.extract_strided_slice %1088 {offsets = [16, 0], sizes = [8, 32], strides = [1, 1]} : vector<32x32xf32> to vector<8x32xf32>
    %1099 = vector.extract_strided_slice %47 {offsets = [2, 0], sizes = [1, 32], strides = [1, 1]} : vector<4x32xf32> to vector<1x32xf32>
    %1100 = vector.broadcast %1099 : vector<1x32xf32> to vector<8x32xf32>
    %1101 = arith.mulf %1098, %1100 : vector<8x32xf32>
    %1102 = arith.addf %1097, %1101 : vector<8x32xf32>
    %1103 = vector.extract_strided_slice %1088 {offsets = [24, 0], sizes = [8, 32], strides = [1, 1]} : vector<32x32xf32> to vector<8x32xf32>
    %1104 = vector.extract_strided_slice %47 {offsets = [3, 0], sizes = [1, 32], strides = [1, 1]} : vector<4x32xf32> to vector<1x32xf32>
    %1105 = vector.broadcast %1104 : vector<1x32xf32> to vector<8x32xf32>
    %1106 = arith.mulf %1103, %1105 : vector<8x32xf32>
    %1107 = arith.addf %1102, %1106 : vector<8x32xf32>
    %c96_299 = arith.constant 96 : index
    %c96_300 = arith.constant 96 : index
    %1108 = vector.load %arg1[%c96_299, %c96_300] : memref<192x128xf32, #tpu.memory_space<vmem>>, vector<32x32xf32>
    %cst_301 = arith.constant dense<0.000000e+00> : vector<8x32xf32>
    %1109 = tpu.matmul %1107, %1108, %cst_301 {dimension_numbers = #tpu.dot_dimension_numbers<[1], [0], [0], [1], [0, 0, 1, 1], [], []>} : vector<8x32xf32>, vector<32x32xf32>, vector<8x32xf32> -> vector<8x32xf32>
    %1110 = arith.addf %1023, %1109 : vector<8x32xf32>
    %c3_302 = arith.constant 3 : index
    %c96_303 = arith.constant 96 : index
    %1111 = vector.load %arg3[%c3_302, %c96_303] : memref<88x128xf32, #tpu.memory_space<vmem>>, vector<1x32xf32>
    %1112 = vector.broadcast %1111 : vector<1x32xf32> to vector<8x32xf32>
    %1113 = arith.addf %1110, %1112 : vector<8x32xf32>
    %1114 = vector.extract_strided_slice %212 {offsets = [2, 0], sizes = [1, 32], strides = [1, 1]} : vector<8x32xf32> to vector<1x32xf32>
    %1115 = vector.extract_strided_slice %212 {offsets = [3, 0], sizes = [1, 32], strides = [1, 1]} : vector<8x32xf32> to vector<1x32xf32>
    %cst_304 = arith.constant dense<0.000000e+00> : vector<8xf32>
    %1116 = vector.multi_reduction <add>, %1113, %cst_304 [1] : vector<8x32xf32> to vector<8xf32>
    %1117 = vector.shape_cast %1116 : vector<8xf32> to vector<8x1xf32>
    %cst_305 = arith.constant 3.200000e+01 : f32
    %1118 = vector.broadcast %cst_305 : f32 to vector<8x1xf32>
    %1119 = arith.divf %1117, %1118 : vector<8x1xf32>
    %1120 = vector.broadcast %1119 : vector<8x1xf32> to vector<8x32xf32>
    %1121 = arith.subf %1113, %1120 : vector<8x32xf32>
    %1122 = arith.mulf %1121, %1121 : vector<8x32xf32>
    %cst_306 = arith.constant dense<0.000000e+00> : vector<8xf32>
    %1123 = vector.multi_reduction <add>, %1122, %cst_306 [1] : vector<8x32xf32> to vector<8xf32>
    %1124 = vector.shape_cast %1123 : vector<8xf32> to vector<8x1xf32>
    %cst_307 = arith.constant 3.200000e+01 : f32
    %1125 = vector.broadcast %cst_307 : f32 to vector<8x1xf32>
    %1126 = arith.divf %1124, %1125 : vector<8x1xf32>
    %1127 = vector.broadcast %1119 : vector<8x1xf32> to vector<8x32xf32>
    %1128 = arith.subf %1113, %1127 : vector<8x32xf32>
    %cst_308 = arith.constant 9.99999974E-6 : f32
    %1129 = vector.broadcast %cst_308 : f32 to vector<8x1xf32>
    %1130 = arith.addf %1126, %1129 : vector<8x1xf32>
    %1131 = math.rsqrt %1130 : vector<8x1xf32>
    %1132 = vector.broadcast %1131 : vector<8x1xf32> to vector<8x32xf32>
    %1133 = arith.mulf %1128, %1132 : vector<8x32xf32>
    %1134 = vector.broadcast %1114 : vector<1x32xf32> to vector<8x32xf32>
    %1135 = arith.mulf %1133, %1134 : vector<8x32xf32>
    %1136 = vector.broadcast %1115 : vector<1x32xf32> to vector<8x32xf32>
    %1137 = arith.addf %1135, %1136 : vector<8x32xf32>
    %c64_309 = arith.constant 64 : index
    %c0_310 = arith.constant 0 : index
    %1138 = vector.load %arg1[%c64_309, %c0_310] : memref<192x128xf32, #tpu.memory_space<vmem>>, vector<32x32xf32>
    %cst_311 = arith.constant dense<0.000000e+00> : vector<8x32xf32>
    %1139 = tpu.matmul %1137, %1138, %cst_311 {dimension_numbers = #tpu.dot_dimension_numbers<[1], [0], [0], [1], [0, 0, 1, 1], [], []>} : vector<8x32xf32>, vector<32x32xf32>, vector<8x32xf32> -> vector<8x32xf32>
    %c2_312 = arith.constant 2 : index
    %c32_313 = arith.constant 32 : index
    %1140 = vector.load %arg3[%c2_312, %c32_313] : memref<88x128xf32, #tpu.memory_space<vmem>>, vector<1x32xf32>
    %1141 = vector.broadcast %1140 : vector<1x32xf32> to vector<8x32xf32>
    %1142 = arith.addf %1139, %1141 : vector<8x32xf32>
    %cst_314 = arith.constant 0.353553385 : f32
    %1143 = vector.broadcast %cst_314 : f32 to vector<8x32xf32>
    %1144 = arith.mulf %1142, %1143 : vector<8x32xf32>
    %1145 = vector.extract_strided_slice %47 {offsets = [0, 0], sizes = [1, 32], strides = [1, 1]} : vector<4x32xf32> to vector<1x32xf32>
    %1146 = vector.broadcast %1145 : vector<1x32xf32> to vector<8x32xf32>
    %1147 = arith.mulf %1144, %1146 : vector<8x32xf32>
    %1148 = vector.extract_strided_slice %47 {offsets = [1, 0], sizes = [1, 32], strides = [1, 1]} : vector<4x32xf32> to vector<1x32xf32>
    %1149 = vector.broadcast %1148 : vector<1x32xf32> to vector<8x32xf32>
    %1150 = arith.mulf %1144, %1149 : vector<8x32xf32>
    %1151 = vector.extract_strided_slice %47 {offsets = [2, 0], sizes = [1, 32], strides = [1, 1]} : vector<4x32xf32> to vector<1x32xf32>
    %1152 = vector.broadcast %1151 : vector<1x32xf32> to vector<8x32xf32>
    %1153 = arith.mulf %1144, %1152 : vector<8x32xf32>
    %1154 = vector.extract_strided_slice %47 {offsets = [3, 0], sizes = [1, 32], strides = [1, 1]} : vector<4x32xf32> to vector<1x32xf32>
    %1155 = vector.broadcast %1154 : vector<1x32xf32> to vector<8x32xf32>
    %1156 = arith.mulf %1144, %1155 : vector<8x32xf32>
    %1157 = tpu.concatenate %1147, %1150, %1153, %1156 in 0 : vector<8x32xf32>, vector<8x32xf32>, vector<8x32xf32>, vector<8x32xf32> -> vector<32x32xf32>
    %cst_315 = arith.constant dense<0.000000e+00> : vector<32x16xf32>
    %1158 = tpu.matmul %1157, %210, %cst_315 {dimension_numbers = #tpu.dot_dimension_numbers<[1], [1], [0], [0], [0, 0, 1, 0], [], []>} : vector<32x32xf32>, vector<16x32xf32>, vector<32x16xf32> -> vector<32x16xf32>
    %cst_316 = arith.constant dense<0xFF800000> : vector<32xf32>
    %1159 = vector.multi_reduction <maximumf>, %1158, %cst_316 [1] : vector<32x16xf32> to vector<32xf32>
    %1160 = vector.shape_cast %1159 : vector<32xf32> to vector<32x1xf32>
    %1161 = vector.broadcast %1160 : vector<32x1xf32> to vector<32x16xf32>
    %1162 = arith.subf %1158, %1161 : vector<32x16xf32>
    %1163 = math.exp %1162 : vector<32x16xf32>
    %cst_317 = arith.constant dense<0.000000e+00> : vector<32xf32>
    %1164 = vector.multi_reduction <add>, %1163, %cst_317 [1] : vector<32x16xf32> to vector<32xf32>
    %1165 = vector.shape_cast %1164 : vector<32xf32> to vector<32x1xf32>
    %1166 = tpu.reciprocal %1165 {approx = true} : vector<32x1xf32> -> vector<32x1xf32>
    %1167 = vector.broadcast %1166 : vector<32x1xf32> to vector<32x16xf32>
    %1168 = arith.mulf %1163, %1167 : vector<32x16xf32>
    %cst_318 = arith.constant dense<0.000000e+00> : vector<32x32xf32>
    %1169 = tpu.matmul %1168, %211, %cst_318 {dimension_numbers = #tpu.dot_dimension_numbers<[1], [0], [0], [1], [0, 0, 1, 1], [], []>} : vector<32x16xf32>, vector<16x32xf32>, vector<32x32xf32> -> vector<32x32xf32>
    %1170 = vector.extract_strided_slice %1169 {offsets = [0, 0], sizes = [8, 32], strides = [1, 1]} : vector<32x32xf32> to vector<8x32xf32>
    %1171 = vector.extract_strided_slice %47 {offsets = [0, 0], sizes = [1, 32], strides = [1, 1]} : vector<4x32xf32> to vector<1x32xf32>
    %1172 = vector.broadcast %1171 : vector<1x32xf32> to vector<8x32xf32>
    %1173 = arith.mulf %1170, %1172 : vector<8x32xf32>
    %1174 = vector.extract_strided_slice %1169 {offsets = [8, 0], sizes = [8, 32], strides = [1, 1]} : vector<32x32xf32> to vector<8x32xf32>
    %1175 = vector.extract_strided_slice %47 {offsets = [1, 0], sizes = [1, 32], strides = [1, 1]} : vector<4x32xf32> to vector<1x32xf32>
    %1176 = vector.broadcast %1175 : vector<1x32xf32> to vector<8x32xf32>
    %1177 = arith.mulf %1174, %1176 : vector<8x32xf32>
    %1178 = arith.addf %1173, %1177 : vector<8x32xf32>
    %1179 = vector.extract_strided_slice %1169 {offsets = [16, 0], sizes = [8, 32], strides = [1, 1]} : vector<32x32xf32> to vector<8x32xf32>
    %1180 = vector.extract_strided_slice %47 {offsets = [2, 0], sizes = [1, 32], strides = [1, 1]} : vector<4x32xf32> to vector<1x32xf32>
    %1181 = vector.broadcast %1180 : vector<1x32xf32> to vector<8x32xf32>
    %1182 = arith.mulf %1179, %1181 : vector<8x32xf32>
    %1183 = arith.addf %1178, %1182 : vector<8x32xf32>
    %1184 = vector.extract_strided_slice %1169 {offsets = [24, 0], sizes = [8, 32], strides = [1, 1]} : vector<32x32xf32> to vector<8x32xf32>
    %1185 = vector.extract_strided_slice %47 {offsets = [3, 0], sizes = [1, 32], strides = [1, 1]} : vector<4x32xf32> to vector<1x32xf32>
    %1186 = vector.broadcast %1185 : vector<1x32xf32> to vector<8x32xf32>
    %1187 = arith.mulf %1184, %1186 : vector<8x32xf32>
    %1188 = arith.addf %1183, %1187 : vector<8x32xf32>
    %c64_319 = arith.constant 64 : index
    %c96_320 = arith.constant 96 : index
    %1189 = vector.load %arg1[%c64_319, %c96_320] : memref<192x128xf32, #tpu.memory_space<vmem>>, vector<32x32xf32>
    %cst_321 = arith.constant dense<0.000000e+00> : vector<8x32xf32>
    %1190 = tpu.matmul %1188, %1189, %cst_321 {dimension_numbers = #tpu.dot_dimension_numbers<[1], [0], [0], [1], [0, 0, 1, 1], [], []>} : vector<8x32xf32>, vector<32x32xf32>, vector<8x32xf32> -> vector<8x32xf32>
    %1191 = arith.addf %1113, %1190 : vector<8x32xf32>
    %c5_322 = arith.constant 5 : index
    %c32_323 = arith.constant 32 : index
    %1192 = vector.load %arg3[%c5_322, %c32_323] : memref<88x128xf32, #tpu.memory_space<vmem>>, vector<1x32xf32>
    %1193 = vector.broadcast %1192 : vector<1x32xf32> to vector<8x32xf32>
    %1194 = arith.addf %1191, %1193 : vector<8x32xf32>
    %1195 = vector.extract_strided_slice %212 {offsets = [4, 0], sizes = [1, 32], strides = [1, 1]} : vector<8x32xf32> to vector<1x32xf32>
    %1196 = vector.extract_strided_slice %212 {offsets = [5, 0], sizes = [1, 32], strides = [1, 1]} : vector<8x32xf32> to vector<1x32xf32>
    %cst_324 = arith.constant dense<0.000000e+00> : vector<8xf32>
    %1197 = vector.multi_reduction <add>, %1194, %cst_324 [1] : vector<8x32xf32> to vector<8xf32>
    %1198 = vector.shape_cast %1197 : vector<8xf32> to vector<8x1xf32>
    %cst_325 = arith.constant 3.200000e+01 : f32
    %1199 = vector.broadcast %cst_325 : f32 to vector<8x1xf32>
    %1200 = arith.divf %1198, %1199 : vector<8x1xf32>
    %1201 = vector.broadcast %1200 : vector<8x1xf32> to vector<8x32xf32>
    %1202 = arith.subf %1194, %1201 : vector<8x32xf32>
    %1203 = arith.mulf %1202, %1202 : vector<8x32xf32>
    %cst_326 = arith.constant dense<0.000000e+00> : vector<8xf32>
    %1204 = vector.multi_reduction <add>, %1203, %cst_326 [1] : vector<8x32xf32> to vector<8xf32>
    %1205 = vector.shape_cast %1204 : vector<8xf32> to vector<8x1xf32>
    %cst_327 = arith.constant 3.200000e+01 : f32
    %1206 = vector.broadcast %cst_327 : f32 to vector<8x1xf32>
    %1207 = arith.divf %1205, %1206 : vector<8x1xf32>
    %1208 = vector.broadcast %1200 : vector<8x1xf32> to vector<8x32xf32>
    %1209 = arith.subf %1194, %1208 : vector<8x32xf32>
    %cst_328 = arith.constant 9.99999974E-6 : f32
    %1210 = vector.broadcast %cst_328 : f32 to vector<8x1xf32>
    %1211 = arith.addf %1207, %1210 : vector<8x1xf32>
    %1212 = math.rsqrt %1211 : vector<8x1xf32>
    %1213 = vector.broadcast %1212 : vector<8x1xf32> to vector<8x32xf32>
    %1214 = arith.mulf %1209, %1213 : vector<8x32xf32>
    %1215 = vector.broadcast %1195 : vector<1x32xf32> to vector<8x32xf32>
    %1216 = arith.mulf %1214, %1215 : vector<8x32xf32>
    %1217 = vector.broadcast %1196 : vector<1x32xf32> to vector<8x32xf32>
    %1218 = arith.addf %1216, %1217 : vector<8x32xf32>
    %c128_329 = arith.constant 128 : index
    %c0_330 = arith.constant 0 : index
    %1219 = vector.load %arg1[%c128_329, %c0_330] : memref<192x128xf32, #tpu.memory_space<vmem>>, vector<32x128xf32>
    %cst_331 = arith.constant dense<0.000000e+00> : vector<8x128xf32>
    %1220 = tpu.matmul %1218, %1219, %cst_331 {dimension_numbers = #tpu.dot_dimension_numbers<[1], [0], [0], [1], [0, 0, 1, 1], [], []>} : vector<8x32xf32>, vector<32x128xf32>, vector<8x128xf32> -> vector<8x128xf32>
    %c4_332 = arith.constant 4 : index
    %c0_333 = arith.constant 0 : index
    %1221 = vector.load %arg3[%c4_332, %c0_333] : memref<88x128xf32, #tpu.memory_space<vmem>>, vector<1x128xf32>
    %1222 = vector.broadcast %1221 : vector<1x128xf32> to vector<8x128xf32>
    %1223 = arith.addf %1220, %1222 : vector<8x128xf32>
    %1224 = arith.mulf %1223, %1223 : vector<8x128xf32>
    %1225 = arith.mulf %1223, %1224 : vector<8x128xf32>
    %cst_334 = arith.constant 4.471500e-02 : f32
    %1226 = vector.broadcast %cst_334 : f32 to vector<8x128xf32>
    %1227 = arith.mulf %1226, %1225 : vector<8x128xf32>
    %1228 = arith.addf %1223, %1227 : vector<8x128xf32>
    %cst_335 = arith.constant 0.797884583 : f32
    %1229 = vector.broadcast %cst_335 : f32 to vector<8x128xf32>
    %1230 = arith.mulf %1229, %1228 : vector<8x128xf32>
    %1231 = math.tanh %1230 : vector<8x128xf32>
    %cst_336 = arith.constant 1.000000e+00 : f32
    %1232 = vector.broadcast %cst_336 : f32 to vector<8x128xf32>
    %1233 = arith.addf %1232, %1231 : vector<8x128xf32>
    %cst_337 = arith.constant 5.000000e-01 : f32
    %1234 = vector.broadcast %cst_337 : f32 to vector<8x128xf32>
    %1235 = arith.mulf %1234, %1233 : vector<8x128xf32>
    %1236 = arith.mulf %1223, %1235 : vector<8x128xf32>
    %c0_338 = arith.constant 0 : index
    %c32_339 = arith.constant 32 : index
    %1237 = vector.load %arg2[%c0_338, %c32_339] : memref<128x128xf32, #tpu.memory_space<vmem>>, vector<128x32xf32>
    %cst_340 = arith.constant dense<0.000000e+00> : vector<8x32xf32>
    %1238 = tpu.matmul %1236, %1237, %cst_340 {dimension_numbers = #tpu.dot_dimension_numbers<[1], [0], [0], [1], [0, 0, 1, 1], [], []>} : vector<8x128xf32>, vector<128x32xf32>, vector<8x32xf32> -> vector<8x32xf32>
    %1239 = arith.addf %1194, %1238 : vector<8x32xf32>
    %c5_341 = arith.constant 5 : index
    %c0_342 = arith.constant 0 : index
    %1240 = vector.load %arg3[%c5_341, %c0_342] : memref<88x128xf32, #tpu.memory_space<vmem>>, vector<1x32xf32>
    %1241 = vector.broadcast %1240 : vector<1x32xf32> to vector<8x32xf32>
    %1242 = arith.addf %1239, %1241 : vector<8x32xf32>
    %1243 = vector.extract_strided_slice %1242 {offsets = [3, 0], sizes = [1, 32], strides = [1, 1]} : vector<8x32xf32> to vector<1x32xf32>
    %1244 = vector.extract_strided_slice %212 {offsets = [6, 0], sizes = [1, 32], strides = [1, 1]} : vector<8x32xf32> to vector<1x32xf32>
    %1245 = vector.extract_strided_slice %212 {offsets = [7, 0], sizes = [1, 32], strides = [1, 1]} : vector<8x32xf32> to vector<1x32xf32>
    %cst_343 = arith.constant dense<0.000000e+00> : vector<1xf32>
    %1246 = vector.multi_reduction <add>, %1243, %cst_343 [1] : vector<1x32xf32> to vector<1xf32>
    %1247 = vector.shape_cast %1246 : vector<1xf32> to vector<1x1xf32>
    %cst_344 = arith.constant 3.200000e+01 : f32
    %1248 = vector.broadcast %cst_344 : f32 to vector<1x1xf32>
    %1249 = arith.divf %1247, %1248 : vector<1x1xf32>
    %1250 = vector.broadcast %1249 : vector<1x1xf32> to vector<1x32xf32>
    %1251 = arith.subf %1243, %1250 : vector<1x32xf32>
    %1252 = arith.mulf %1251, %1251 : vector<1x32xf32>
    %cst_345 = arith.constant dense<0.000000e+00> : vector<1xf32>
    %1253 = vector.multi_reduction <add>, %1252, %cst_345 [1] : vector<1x32xf32> to vector<1xf32>
    %1254 = vector.shape_cast %1253 : vector<1xf32> to vector<1x1xf32>
    %cst_346 = arith.constant 3.200000e+01 : f32
    %1255 = vector.broadcast %cst_346 : f32 to vector<1x1xf32>
    %1256 = arith.divf %1254, %1255 : vector<1x1xf32>
    %1257 = vector.broadcast %1249 : vector<1x1xf32> to vector<1x32xf32>
    %1258 = arith.subf %1243, %1257 : vector<1x32xf32>
    %cst_347 = arith.constant 9.99999974E-6 : f32
    %1259 = vector.broadcast %cst_347 : f32 to vector<1x1xf32>
    %1260 = arith.addf %1256, %1259 : vector<1x1xf32>
    %1261 = math.rsqrt %1260 : vector<1x1xf32>
    %1262 = vector.broadcast %1261 : vector<1x1xf32> to vector<1x32xf32>
    %1263 = arith.mulf %1258, %1262 : vector<1x32xf32>
    %1264 = arith.mulf %1263, %1244 : vector<1x32xf32>
    %1265 = arith.addf %1264, %1245 : vector<1x32xf32>
    %cst_348 = arith.constant dense<0.000000e+00> : vector<1x128xf32>
    %1266 = tpu.matmul %1265, %216, %cst_348 {dimension_numbers = #tpu.dot_dimension_numbers<[1], [0], [0], [1], [0, 0, 1, 1], [], []>} : vector<1x32xf32>, vector<32x128xf32>, vector<1x128xf32> -> vector<1x128xf32>
    %c64_i32_349 = arith.constant 64 : i32
    %1267 = vector.broadcast %c64_i32_349 : i32 to vector<1x128xi32>
    %1268 = arith.cmpi slt, %217, %1267 : vector<1x128xi32>
    %cst_350 = arith.constant -1.000000e+30 : f32
    %1269 = vector.broadcast %cst_350 : f32 to vector<1x128xf32>
    %1270 = arith.select %1268, %1266, %1269 : vector<1x128xi1>, vector<1x128xf32>
    %cst_351 = arith.constant dense<0xFF800000> : vector<1xf32>
    %1271 = vector.multi_reduction <maximumf>, %1270, %cst_351 [1] : vector<1x128xf32> to vector<1xf32>
    %1272 = vector.shape_cast %1271 : vector<1xf32> to vector<1x1xf32>
    %1273 = vector.broadcast %1272 : vector<1x1xf32> to vector<1x128xf32>
    %1274 = arith.cmpf oge, %1270, %1273 : vector<1x128xf32>
    %cst_352 = arith.constant 1.280000e+02 : f32
    %1275 = vector.broadcast %cst_352 : f32 to vector<1x128xf32>
    %1276 = arith.select %1274, %218, %1275 : vector<1x128xi1>, vector<1x128xf32>
    %cst_353 = arith.constant dense<0x7F800000> : vector<1xf32>
    %1277 = vector.multi_reduction <minimumf>, %1276, %cst_353 [1] : vector<1x128xf32> to vector<1xf32>
    %1278 = vector.shape_cast %1277 : vector<1xf32> to vector<1x1xf32>
    %c4_i32 = arith.constant 4 : i32
    %1279 = vector.broadcast %c4_i32 : i32 to vector<8x1xi32>
    %1280 = arith.cmpi eq, %219, %1279 : vector<8x1xi32>
    %1281 = vector.shape_cast %1280 : vector<8x1xi1> to vector<8x1xi1>
    %1282 = vector.broadcast %1281 : vector<8x1xi1> to vector<8x128xi1>
    %1283 = vector.shape_cast %1278 : vector<1x1xf32> to vector<1x1xf32>
    %1284 = vector.broadcast %1283 : vector<1x1xf32> to vector<8x128xf32>
    %1285 = arith.select %1282, %1284, %1028 : vector<8x128xi1>, vector<8x128xf32>
    %1286 = arith.fptosi %1285 : vector<8x128xf32> to vector<8x128xi32>
    %c0_354 = arith.constant 0 : index
    %c0_355 = arith.constant 0 : index
    %1287 = vector.load %arg4[%c0_354, %c0_355] : memref<8x128xi32, #tpu.memory_space<vmem>>, vector<8x128xi32>
    tpu.vector_store %arg4[%c0_354, %c0_355], %1286 {strides = array<i32>} : memref<8x128xi32, #tpu.memory_space<vmem>>, vector<8x128xi32>,
    return
  }
}

</mosaic_0001>

<bundles_post_ra>
// kernel: whisper_forward.1
= control target key start
LH: loop header
LB: loop body
LE: loop exit
PB: predicated region body
PF: predicated region fallthrough
CT: control target
= control target key end

     0   :  { %s8155_s19 = smov 64   ;;  %s8156_s29 = smov 96   ;;  %vm233_vm0 = vcmask 261120   ;;  %vm499_vm1 = vcmask 523264   ;;  %vm565_vm2 = vcmask 785408   ;;  %vm965_vm3 = vcmask 130048   ;;  %s9995_s2 = inlined_call_operand.vmem [shape: f32[128,128], index: 2, kind: input, shape index: {}]   ;;  %s9996_s0 = inlined_call_operand.vmem [shape: f32[32,128], index: 0, kind: input, shape index: {}]   ;;  %s9997_s3 = inlined_call_operand.vmem [shape: f32[88,128], index: 3, kind: input, shape index: {}]   ;;  %s9998_s1 = inlined_call_operand.vmem [shape: f32[192,128], index: 1, kind: input, shape index: {}]   ;;  %s9999_s4 = inlined_call_operand.vmem [shape: s32[8,128], index: 4, kind: output, shape index: {}]  }
   0x1   :  { %v8189_v0 = vld [vmem:[%s9995_s2 + $0x78] sm:$0xff]  ;;  %v8194_v1 = vld [vmem:[%s9995_s2 + $0x68] sm:$0xff]  ;;  %v8203_v2 = vld [vmem:[%s9995_s2 + $0x70] sm:$0xff]  ;;  %s8157_s12 = smov 32   ;;  %vm8159_vm4 = vmmov 0   ;;  %vm1908_vm5 = vcmask 64512  }
   0x2   :  { %88 = vrot.lane.b32.xlu0 %v8189_v0, %s8155_s19  ;;  %84 = vrot.lane.b32.xlu1 %v8194_v1, %s8155_s19  ;;  %v8208_v3 = vld [vmem:[%s9995_s2 + $0x60] sm:$0xff]  ;;  %v8217_v4 = vld [vmem:[%s9995_s2 + $0x58] sm:$0xff]  ;;  %vm2840_vm6 = vcmask 253952   ;;  %vm2936_vm8 = vcmask 1040384   ;;  %vm4035_vm12 = vcmask 254977  }
   0x3   :  { %v8222_v5 = vld [vmem:[%s9995_s2 + $0x50] sm:$0xff]  ;;  %v8231_v6 = vld [vmem:[%s9995_s2 + $0x48] sm:$0xff]  ;;  %v8236_v7 = vld [vmem:[%s9995_s2 + $0x40] sm:$0xff] }
   0x4   :  { %v8245_v8 = vld [vmem:[%s9995_s2 + $0x38] sm:$0xff]  ;;  %v8250_v9 = vld [vmem:[%s9995_s2 + $0x30] sm:$0xff]  ;;  %v8259_v10 = vld [vmem:[%s9995_s2 + $0x28] sm:$0xff] }
   0x5   :  { %v8264_v11 = vld [vmem:[%s9995_s2 + $0x20] sm:$0xff]  ;;  %v8276_v13 = vld [vmem:[%s9995_s2 + $0x18] sm:$0xff]  ;;  %v8281_v14 = vld [vmem:[%s9995_s2 + $0x10] sm:$0xff] }
   0x6   :  { %86 = vrot.lane.b32.xlu0 %v8203_v2, %s8155_s19  ;;  %82 = vrot.lane.b32.xlu1 %v8208_v3, %s8155_s19  ;;  %v17_v12 = vld [vmem:[%s9996_s0] sm:$0xff]  ;;  %v8290_v15 = vld [vmem:[%s9995_s2 + $0x8] sm:$0xff] }
   0x7   :  { %7115 = vmatprep.mubr.f32.mxu0 %v17_v12  ;;  %v8295_v16 = vld [vmem:[%s9995_s2] sm:$0xff]  ;;  %v8309_v18 = vld [vmem:[%s9997_s3 + $0x38] sm:$0xff]  ;;  %v18_v36 = vld [vmem:[%s9996_s0 + $0x8] sm:$0xff] }
   0x8   :  { %v8304_v17 = vld [vmem:[%s9997_s3 + $0x5] ss:$0 sm:$0xff]  ;;  %v19_v37 = vld [vmem:[%s9996_s0 + $0x10] sm:$0xff]  ;;  %v20_v38 = vld [vmem:[%s9996_s0 + $0x18] sm:$0xff]  ;;  %7129 = vmatprep.mubr.msk.f32.mxu1 %vm233_vm0, %v8309_v18 }
   0x9   :  { %v8318_v19 = vld [vmem:[%s9997_s3 + $0x40] sm:$0xff] }
   0xa   :  { %80 = vrot.lane.b32.xlu0 %v8217_v4, %s8155_s19  ;;  %78 = vrot.lane.b32.xlu1 %v8222_v5, %s8155_s19 }
   0xe   :  { %76 = vrot.lane.b32.xlu0 %v8231_v6, %s8155_s19  ;;  %74 = vrot.lane.b32.xlu1 %v8236_v7, %s8155_s19 }
  0x12   :  { %72 = vrot.lane.b32.xlu0 %v8245_v8, %s8155_s19  ;;  %70 = vrot.lane.b32.xlu1 %v8250_v9, %s8155_s19 }
  0x16   :  { %68 = vrot.lane.b32.xlu0 %v8259_v10, %s8155_s19  ;;  %66 = vrot.lane.b32.xlu1 %v8264_v11, %s8155_s19 }
  0x1a   :  { %64 = vrot.lane.b32.xlu0 %v8276_v13, %s8155_s19  ;;  %62 = vrot.lane.b32.xlu1 %v8281_v14, %s8155_s19 }
  0x1e   :  { %60 = vrot.lane.b32.xlu0 %v8290_v15, %s8155_s19  ;;  %58 = vrot.lane.b32.xlu1 %v8295_v16, %s8155_s19 }
  0x22   :  { %107 = vrot.lane.b32.xlu0 %v8304_v17, %s8155_s19  ;;  %315 = vrot.lane.b32.xlu1 %v8309_v18, %s8156_s29 }
  0x26   :  { %317 = vrot.lane.b32.xlu0 %v8318_v19, %s8156_s29  ;;  %398 = vrot.lane.b32.xlu1 %v8309_v18, %s8155_s19 }
  0x2a   :  { %400 = vrot.lane.b32.xlu0 %v8318_v19, %s8155_s19  ;;  %548 = vrot.lane.b32.xlu1 %v8217_v4, %s8157_s12 }
  0x2e   :  { %546 = vrot.lane.b32.xlu0 %v8222_v5, %s8157_s12  ;;  %544 = vrot.lane.b32.xlu1 %v8231_v6, %s8157_s12 }
  0x32   :  { %542 = vrot.lane.b32.xlu0 %v8236_v7, %s8157_s12  ;;  %540 = vrot.lane.b32.xlu1 %v8245_v8, %s8157_s12 }
  0x36   :  { %538 = vrot.lane.b32.xlu0 %v8250_v9, %s8157_s12  ;;  %536 = vrot.lane.b32.xlu1 %v8259_v10, %s8157_s12 }
  0x3a   :  { %534 = vrot.lane.b32.xlu0 %v8264_v11, %s8157_s12  ;;  %532 = vrot.lane.b32.xlu1 %v8276_v13, %s8157_s12 }
  0x3e   :  { %530 = vrot.lane.b32.xlu0 %v8281_v14, %s8157_s12  ;;  %528 = vrot.lane.b32.xlu1 %v8290_v15, %s8157_s12 }
  0x74   :  { %v89_v20 = vpop.permute.xlu0 %88  ;;  %v85_v21 = vpop.permute.xlu1 %84 }
  0x75   :  { %7083 = vmatprep.subr.mxu0 %v89_v20 }
  0x76   :  { %7084 = vmatpush3.msra.mxu0 %v89_v20 }
  0x78   :  { %v87_v22 = vpop.permute.xlu0 %86  ;;  %v83_v23 = vpop.permute.xlu1 %82 }
  0x79   :  { %7085 = vmatprep.subr.mxu0 %v87_v22 }
  0x7a   :  { %7086 = vmatpush3.msra.mxu0 %v87_v22 }
  0x7b   :  { %7087 = vmatprep.subr.mxu0 %v85_v21 }
  0x7c   :  { %7088 = vmatpush3.msra.mxu0 %v85_v21  ;;  %v81_v24 = vpop.permute.xlu0 %80  ;;  %v79_v25 = vpop.permute.xlu1 %78 }
  0x7d   :  { %7089 = vmatprep.subr.mxu0 %v83_v23 }
  0x7e   :  { %7090 = vmatpush3.msra.mxu0 %v83_v23 }
  0x7f   :  { %7091 = vmatprep.subr.mxu0 %v81_v24 }
  0x80   :  { %7092 = vmatpush3.msra.mxu0 %v81_v24  ;;  %v77_v26 = vpop.permute.xlu0 %76  ;;  %v75_v27 = vpop.permute.xlu1 %74 }
  0x81   :  { %7093 = vmatprep.subr.mxu0 %v79_v25 }
  0x82   :  { %7094 = vmatpush3.msra.mxu0 %v79_v25 }
  0x83   :  { %7095 = vmatprep.subr.mxu0 %v77_v26 }
  0x84   :  { %7096 = vmatpush3.msra.mxu0 %v77_v26  ;;  %v73_v28 = vpop.permute.xlu0 %72  ;;  %v71_v29 = vpop.permute.xlu1 %70 }
  0x85   :  { %7097 = vmatprep.subr.mxu0 %v75_v27 }
  0x86   :  { %7098 = vmatpush3.msra.mxu0 %v75_v27 }
  0x87   :  { %7099 = vmatprep.subr.mxu0 %v73_v28 }
  0x88   :  { %7100 = vmatpush3.msra.mxu0 %v73_v28  ;;  %v69_v30 = vpop.permute.xlu0 %68  ;;  %v67_v31 = vpop.permute.xlu1 %66 }
  0x89   :  { %7101 = vmatprep.subr.mxu0 %v71_v29 }
  0x8a   :  { %7102 = vmatpush3.msra.mxu0 %v71_v29 }
  0x8b   :  { %7103 = vmatprep.subr.mxu0 %v69_v30 }
  0x8c   :  { %7104 = vmatpush3.msra.mxu0 %v69_v30  ;;  %v65_v32 = vpop.permute.xlu0 %64  ;;  %v63_v33 = vpop.permute.xlu1 %62 }
  0x8d   :  { %7105 = vmatprep.subr.mxu0 %v67_v31 }
  0x8e   :  { %7106 = vmatpush3.msra.mxu0 %v67_v31 }
  0x8f   :  { %7107 = vmatprep.subr.mxu0 %v65_v32 }
  0x90   :  { %7108 = vmatpush3.msra.mxu0 %v65_v32  ;;  %v61_v34 = vpop.permute.xlu0 %60  ;;  %v59_v35 = vpop.permute.xlu1 %58 }
  0x91   :  { %7109 = vmatprep.subr.mxu0 %v63_v33 }
  0x92   :  { %7110 = vmatpush3.msra.mxu0 %v63_v33 }
  0x93   :  { %7111 = vmatprep.subr.mxu0 %v61_v34 }
  0x94   :  { %7112 = vmatpush3.msra.mxu0 %v61_v34  ;;  %v108_v39 = vpop.permute.xlu0 %107 }
  0x95   :  { %7113 = vmatprep.subr.mxu0 %v59_v35 }
  0x96   :  { %7114 = vmatpush3.msra.mxu0 %v59_v35 }
  0x97   :  { %7116 = vmatmul.mubr.f32.vlgmr.msra.gmra.mxu0 %v18_v36 }
  0x98   :  { %7118 = vmatprep.mubr.f32.mxu0 %v19_v37 }
  0x9b   :  { %7119 = vmatmul.mubr.f32.gmra.mxu0 %v20_v38  ;;  %v316_v38 = vpop.permute.xlu1 %315 }
 0x157   :  { %v7117_v40 = vpop.f32.mrf.mxu0 }
 0x158   :  { %v182_v41 = vadd.f32 %v7117_v40, %v108_v39  ;;  %v399_v40 = vpop.permute.xlu1 %398 }
 0x159   :  { %v176_v42 = vpop.f32.mrf.mxu0 }
 0x15a   :  { %v196_v43 = vmul.f32 %v182_v41, %v182_v41  ;;  %v177_v44 = vadd.f32 %v176_v42, %v108_v39 }
 0x15b   :  { %v7120_v45 = vpop.f32.mrf.mxu0 }
 0x15c   :  { %v200_v46 = vmul.f32 %v196_v43, %v182_v41  ;;  %v195_v47 = vmul.f32 %v177_v44, %v177_v44  ;;  %v192_v48 = vadd.f32 %v7120_v45, %v108_v39 }
 0x15d   :  { %v186_v49 = vpop.f32.mrf.mxu0 }
 0x15e   :  { %v204_v50 = vmul.f32 0.044715, %v200_v46  ;;  %v199_v51 = vmul.f32 %v195_v47, %v177_v44  ;;  %v198_v52 = vmul.f32 %v192_v48, %v192_v48  ;;  %v187_v53 = vadd.f32 %v186_v49, %v108_v39  ;;  %v318_v39 = vpop.permute.xlu0 %317 }
 0x160   :  { %v208_v54 = vadd.f32 %v204_v50, %v182_v41  ;;  %v203_v55 = vmul.f32 0.044715, %v199_v51  ;;  %v202_v56 = vmul.f32 %v198_v52, %v192_v48  ;;  %v197_v57 = vmul.f32 %v187_v53, %v187_v53 }
 0x162   :  { %v212_v58 = vmul.f32 0.7978846, %v208_v54  ;;  %v207_v59 = vadd.f32 %v203_v55, %v177_v44  ;;  %v206_v60 = vmul.f32 0.044715, %v202_v56  ;;  %v201_v61 = vmul.f32 %v197_v57, %v187_v53 }
 0x164   :  { %v211_v62 = vmul.f32 0.7978846, %v207_v59  ;;  %v210_v63 = vadd.f32 %v206_v60, %v192_v48  ;;  %v205_v12 = vmul.f32 0.044715, %v201_v61  ;;  %7881 = vtanh.f32 %v212_v58 }
 0x166   :  { %v214_v18 = vmul.f32 0.7978846, %v210_v63  ;;  %v209_v20 = vadd.f32 %v205_v12, %v187_v53  ;;  %7883 = vtanh.f32 %v211_v62 }
 0x168   :  { %7885 = vtanh.f32 %v214_v18  ;;  %v213_v21 = vmul.f32 0.7978846, %v209_v20 }
 0x16a   :  { %7887 = vtanh.f32 %v213_v21 }
 0x171   :  { %v7882_v22 = vpop.eup %7881 }
 0x172   :  { %v220_v25 = vadd.f32 1.0, %v7882_v22 }
 0x173   :  { %v7884_v23 = vpop.eup %7883 }
 0x174   :  { %v219_v28 = vadd.f32 1.0, %v7884_v23  ;;  %v224_v31 = vmul.f32 0.5, %v220_v25 }
 0x175   :  { %v7886_v24 = vpop.eup %7885 }
 0x176   :  { %v222_v26 = vadd.f32 1.0, %v7886_v24  ;;  %v223_v34 = vmul.f32 0.5, %v219_v28  ;;  %v228_v36 = vmul.f32 %v224_v31, %v182_v41  ;;  %v549_v41 = vpop.permute.xlu1 %548 }
 0x177   :  { %v7888_v27 = vpop.eup %7887 }
 0x178   :  { %v226_v29 = vmul.f32 0.5, %v222_v26  ;;  %v221_v30 = vadd.f32 1.0, %v7888_v27  ;;  %v227_v37 = vmul.f32 %v223_v34, %v177_v44 }
 0x17a   :  { %v230_v32 = vmul.f32 %v226_v29, %v192_v48  ;;  %v225_v33 = vmul.f32 0.5, %v221_v30  ;;  %v545_v43 = vpop.permute.xlu1 %544 }
 0x17c   :  { %v229_v35 = vmul.f32 %v225_v33, %v187_v53  ;;  %7121 = vmatprep.subr.mxu1 %v230_v32 }
 0x17d   :  { %7122 = vmatpush3.msra.mxu1 %v230_v32 }
 0x17e   :  { %7123 = vmatprep.subr.mxu1 %v229_v35  ;;  %v541_v45 = vpop.permute.xlu1 %540 }
 0x17f   :  { %7124 = vmatpush3.msra.mxu1 %v229_v35 }
 0x180   :  { %7125 = vmatprep.subr.mxu1 %v228_v36 }
 0x181   :  { %7126 = vmatpush3.msra.mxu1 %v228_v36 }
 0x182   :  { %7127 = vmatprep.subr.mxu1 %v227_v37  ;;  %v537_v47 = vpop.permute.xlu1 %536 }
 0x183   :  { %7128 = vmatpush3.msra.mxu1 %v227_v37 }
 0x184   :  { %7130 = vmatmul.mubr.msk.f32.vlgmr.msra.gmra.mxu1 %vm233_vm0, %v8318_v19  ;;  %7132 = vmatprep.subr.mxu1 %v230_v32  ;;  %v401_v19 = vpop.permute.xlu0 %400 }
 0x185   :  { %7133 = vmatpush3.msra.mxu1 %v230_v32  ;;  %7140 = vmatprep.mubr.msk.f32.mxu1 %vm233_vm0, %v316_v38 }
 0x186   :  { %7134 = vmatprep.subr.mxu1 %v229_v35  ;;  %v533_v49 = vpop.permute.xlu1 %532 }
 0x187   :  { %7135 = vmatpush3.msra.mxu1 %v229_v35 }
 0x188   :  { %7136 = vmatprep.subr.mxu1 %v228_v36  ;;  %v547_v42 = vpop.permute.xlu0 %546 }
 0x189   :  { %7137 = vmatpush3.msra.mxu1 %v228_v36 }
 0x18a   :  { %7138 = vmatprep.subr.mxu1 %v227_v37  ;;  %v529_v51 = vpop.permute.xlu1 %528 }
 0x18b   :  { %7139 = vmatpush3.msra.mxu1 %v227_v37 }
 0x18c   :  { %7141 = vmatmul.mubr.msk.f32.vlgmr.msra.gmra.mxu1 %vm233_vm0, %v318_v39  ;;  %7143 = vmatprep.subr.mxu1 %v230_v32  ;;  %v543_v44 = vpop.permute.xlu0 %542 }
 0x18d   :  { %7144 = vmatpush3.msra.mxu1 %v230_v32  ;;  %7151 = vmatprep.mubr.msk.f32.mxu1 %vm233_vm0, %v399_v40  ;;  %v666_v40 = vld [vmem:[%s9997_s3 + $0x20] sm:$0xff] }
 0x18e   :  { %7145 = vmatprep.subr.mxu1 %v229_v35 }
 0x18f   :  { %7146 = vmatpush3.msra.mxu1 %v229_v35 }
 0x190   :  { %7147 = vmatprep.subr.mxu1 %v228_v36  ;;  %v539_v46 = vpop.permute.xlu0 %538 }
 0x191   :  { %7148 = vmatpush3.msra.mxu1 %v228_v36 }
 0x192   :  { %7149 = vmatprep.subr.mxu1 %v227_v37 }
 0x193   :  { %7150 = vmatpush3.msra.mxu1 %v227_v37 }
 0x194   :  { %7152 = vmatmul.mubr.msk.f32.vlgmr.msra.gmra.mxu1 %vm233_vm0, %v401_v19  ;;  %7154 = vmatprep.subr.mxu1 %v549_v41  ;;  %v535_v48 = vpop.permute.xlu0 %534 }
 0x195   :  { %7155 = vmatpush3.msra.mxu1 %v549_v41 }
 0x196   :  { %7156 = vmatprep.subr.mxu1 %v547_v42 }
 0x197   :  { %7157 = vmatpush3.msra.mxu1 %v547_v42  ;;  %v665_v42 = vld [vmem:[%s9997_s3 + $0x18] sm:$0xff] }
 0x198   :  { %7158 = vmatprep.subr.mxu1 %v545_v43  ;;  %v531_v50 = vpop.permute.xlu0 %530 }
 0x199   :  { %7159 = vmatpush3.msra.mxu1 %v545_v43 }
 0x19a   :  { %7160 = vmatprep.subr.mxu1 %v543_v44 }
 0x19b   :  { %7161 = vmatpush3.msra.mxu1 %v543_v44 }
 0x19c   :  { %7162 = vmatprep.subr.mxu1 %v541_v45 }
 0x19d   :  { %7163 = vmatpush3.msra.mxu1 %v541_v45 }
 0x19e   :  { %7164 = vmatprep.subr.mxu1 %v539_v46 }
 0x19f   :  { %7165 = vmatpush3.msra.mxu1 %v539_v46 }
 0x1a0   :  { %7166 = vmatprep.subr.mxu1 %v537_v47 }
 0x1a1   :  { %7167 = vmatpush3.msra.mxu1 %v537_v47 }
 0x1a2   :  { %7168 = vmatprep.subr.mxu1 %v535_v48 }
 0x1a3   :  { %7169 = vmatpush3.msra.mxu1 %v535_v48 }
 0x1a4   :  { %7170 = vmatprep.subr.mxu1 %v533_v49 }
 0x1a5   :  { %7171 = vmatpush3.msra.mxu1 %v533_v49 }
 0x1a6   :  { %7172 = vmatprep.subr.mxu1 %v531_v50 }
 0x1a7   :  { %7173 = vmatpush3.msra.mxu1 %v531_v50 }
 0x1a8   :  { %7174 = vmatprep.subr.mxu1 %v529_v51 }
 0x1a9   :  { %7175 = vmatpush3.msra.mxu1 %v529_v51 }
 0x244   :  { %v7131_v52 = vpop.f32.mrf.mxu1 }
 0x246   :  { %v306_v53 = vpop.f32.mrf.mxu1 }
 0x24c   :  { %v7142_v54 = vpop.f32.mrf.mxu1 }
 0x24d   :  { %485 = vrot.lane.b32.xlu1 %v7142_v54, %s8157_s12 }
 0x24e   :  { %v389_v55 = vpop.f32.mrf.mxu1 }
 0x24f   :  { %483 = vrot.lane.b32.xlu0 %v389_v55, %s8157_s12 }
 0x251   :  { %526 = vrot.lane.b32.xlu1 %v8295_v16, %s8157_s12 }
 0x254   :  { %v7153_v56 = vpop.f32.mrf.mxu1 }
 0x255   :  { %562 = vrot.lane.b32.xlu1 %v8304_v17, %s8157_s12 }
 0x256   :  { %v472_v57 = vpop.f32.mrf.mxu1 }
 0x257   :  { %491 = vrot.lane.b32.xlu0 %v472_v57, %s8155_s19 }
 0x25b   :  { %493 = vrot.lane.b32.xlu0 %v7153_v56, %s8155_s19 }
 0x2bf   :  { %v486_v58 = vpop.permute.xlu1 %485 }
 0x2c0   :  { %v498_v12 = vsel %vm233_vm0, %v7131_v52, %v486_v58  ;;  %v8396_v58 = vld [vmem:[%s9998_s1 + $0x18] sm:$0xff] }
 0x2c1   :  { %v484_v60 = vpop.permute.xlu0 %483  ;;  %7181 = vmatprep.subr.mxu0 %v8396_v58 }
 0x2c2   :  { %v497_v61 = vsel %vm233_vm0, %v306_v53, %v484_v60  ;;  %7182 = vmatpush3.msra.mxu0 %v8396_v58  ;;  %v8408_v60 = vld [vmem:[%s9998_s1 + $0x8] sm:$0xff] }
 0x2c3   :  { %v527_v59 = vpop.permute.xlu1 %526 }
 0x2c4   :  { %7176 = vmatprep.subr.mxu1 %v527_v59 }
 0x2c5   :  { %7177 = vmatpush3.msra.mxu1 %v527_v59  ;;  %v8401_v59 = vld [vmem:[%s9998_s1 + $0x10] sm:$0xff] }
 0x2c6   :  { %7183 = vmatprep.subr.mxu0 %v8401_v59 }
 0x2c7   :  { %v563_v20 = vpop.permute.xlu1 %562  ;;  %7184 = vmatpush3.msra.mxu0 %v8401_v59 }
 0x2c8   :  { %7185 = vmatprep.subr.mxu0 %v8408_v60 }
 0x2c9   :  { %v492_v62 = vpop.permute.xlu0 %491  ;;  %7186 = vmatpush3.msra.mxu0 %v8408_v60 }
 0x2ca   :  { %v500_v63 = vsel %vm499_vm1, %v497_v61, %v492_v62  ;;  %v10000_v61 = vlaneseq }
 0x2cb   :  { %7178 = vmatprep.mubr.msk.f32.mxu1 %vm565_vm2, %v500_v63  ;;  %v669_v63 = vld [vmem:[%s9997_s3 + $0x48] sm:$0xf] }
 0x2cc   :  { %v8415_v62 = vshrl.u32 %v10000_v61, 7 }
 0x2cd   :  { %v494_v17 = vpop.permute.xlu0 %493 }
 0x2ce   :  { %v501_v18 = vsel %vm499_vm1, %v498_v12, %v494_v17  ;;  %10050 = vst [vmem:[#allocation2_spill] sm:$0xff] %v8415_v62  ;;  %v8421_v12 = vsub.s32 1, %v8415_v62  ;;  %v8426_v17 = vld [vmem:[%s9998_s1] sm:$0xff]  ;;  %vm3018_vm11 = vcmp.eq.s32.totalorder %v8415_v62, 1  ;;  %vm4209_vm15 = vcmp.eq.s32.totalorder %v8415_v62, 2 }
 0x2cf   :  { %7179 = vmatmul.mubr.msk.f32.vlgmr.msra.gmra.mxu1 %vm565_vm2, %v501_v18  ;;  %7187 = vmatprep.subr.mxu0 %v8426_v17  ;;  %vm5226_vm1 = vcmask 256002  }
 0x2d0   :  { %v8429_v18 = vrot.slane %v669_v63, %v8421_v12  ;;  %7188 = vmatpush3.msra.mxu0 %v8426_v17 }
 0x38f   :  { %v7180_v21 = vpop.f32.mrf.mxu1 }
 0x390   :  { %v644_v22 = vadd.f32 %v7180_v21, %v563_v20 }
 0x391   :  { %v638_v23 = vpop.f32.mrf.mxu1 }
 0x392   :  { %v648_v24 = vmul.f32 %v644_v22, %v644_v22  ;;  %v639_v25 = vadd.f32 %v638_v23, %v563_v20 }
 0x394   :  { %v650_v26 = vmul.f32 %v648_v24, %v644_v22  ;;  %v647_v27 = vmul.f32 %v639_v25, %v639_v25 }
 0x396   :  { %v652_v28 = vmul.f32 0.044715, %v650_v26  ;;  %v649_v29 = vmul.f32 %v647_v27, %v639_v25  ;;  %v8434_v26 = vsub.s32 0, %v8415_v62  ;;  %v8439_v27 = vld [vmem:[%s9997_s3 + $0x8] sm:$0x3f] }
 0x398   :  { %v654_v30 = vadd.f32 %v652_v28, %v644_v22  ;;  %v651_v31 = vmul.f32 0.044715, %v649_v29  ;;  %10051 = vst [vmem:[#allocation3_spill] sm:$0xff] %v8434_v26  ;;  %v701_v28 = vrot.slane %v8439_v27, %v8434_v26 }
 0x39a   :  { %v656_v32 = vmul.f32 0.7978846, %v654_v30  ;;  %v653_v33 = vadd.f32 %v651_v31, %v639_v25  ;;  %v707_v31 = vrot.slane %v8439_v27, %v8421_v12 }
 0x39c   :  { %7889 = vtanh.f32 %v656_v32  ;;  %v655_v34 = vmul.f32 0.7978846, %v653_v33 }
 0x39e   :  { %7891 = vtanh.f32 %v655_v34 }
 0x3a9   :  { %v7890_v35 = vpop.eup %7889 }
 0x3aa   :  { %v660_v36 = vadd.f32 1.0, %v7890_v35 }
 0x3ab   :  { %v7892_v37 = vpop.eup %7891 }
 0x3ac   :  { %v662_v38 = vmul.f32 0.5, %v660_v36  ;;  %v659_v39 = vadd.f32 1.0, %v7892_v37 }
 0x3ae   :  { %v664_v19 = vmul.f32 %v662_v38, %v644_v22  ;;  %v661_v41 = vmul.f32 0.5, %v659_v39  ;;  %v8450_v38 = vld [vmem:[%s9997_s3] ss:$0 sm:$0xff] }
 0x3b0   :  { %v8381_v43 = vadd.f32 %v666_v40, %v664_v19  ;;  %v663_v44 = vmul.f32 %v661_v41, %v639_v25 }
 0x3b2   :  { %v674_v45 = vsel %vm233_vm0, %v8381_v43, 0.0  ;;  %v8385_v46 = vadd.f32 %v665_v42, %v663_v44  ;;  %v8461_v42 = vrot.slane %v669_v63, %v8434_v26 }
 0x3b3   :  { %675 = vadd.xlane.f32.xlu1 %v674_v45 }
 0x3b4   :  { %v671_v47 = vsel %vm233_vm0, %v8385_v46, 0.0 }
 0x3b5   :  { %672 = vadd.xlane.f32.xlu0 %v671_v47 }
 0x43c   :  { %v676_v48 = vpop.xlane.xlu1 %675 }
 0x43d   :  { %v679_v49 = vmul.f32 0.03125, %v676_v48 }
 0x43e   :  { %v673_v50 = vpop.xlane.xlu0 %672 }
 0x43f   :  { %v678_v51 = vmul.f32 0.03125, %v673_v50  ;;  %v681_v52 = vsub.f32 %v8381_v43, %v679_v49  ;;  %v8473_v50 = vsub.s32 2, %v8415_v62 }
 0x441   :  { %v680_v53 = vsub.f32 %v8385_v46, %v678_v51  ;;  %v683_v56 = vmul.f32 %v681_v52, %v681_v52 }
 0x443   :  { %v682_v54 = vmul.f32 %v680_v53, %v680_v53  ;;  %v687_v57 = vsel %vm233_vm0, %v683_v56, 0.0 }
 0x445   :  { %v684_v55 = vsel %vm233_vm0, %v682_v54, 0.0  ;;  %v8484_v54 = vsub.s32 3, %v8415_v62 }
 0x446   :  { %685 = vadd.xlane.f32.xlu0 %v684_v55 }
 0x44a   :  { %688 = vadd.xlane.f32.xlu0 %v687_v57  ;;  %v8495_v57 = vrot.slane %v669_v63, %v8484_v54 }
 0x4cf   :  { %v686_v20 = vpop.xlane.xlu0 %685 }
 0x4d0   :  { %v690_v21 = vmul.f32 0.03125, %v686_v20 }
 0x4d2   :  { %v692_v22 = vadd.f32 1e-05, %v690_v21 }
 0x4d3   :  { %v689_v23 = vpop.xlane.xlu0 %688 }
 0x4d4   :  { %7893 = vrsqrt.f32 %v692_v22  ;;  %v691_v24 = vmul.f32 0.03125, %v689_v23 }
 0x4d6   :  { %v693_v25 = vadd.f32 1e-05, %v691_v24 }
 0x4d8   :  { %7895 = vrsqrt.f32 %v693_v25 }
 0x4e1   :  { %v7894_v29 = vpop.eup %7893 }
 0x4e2   :  { %v696_v30 = vmul.f32 %v7894_v29, %v680_v53  ;;  %v8481_v53 = vrot.slane %v669_v63, %v8473_v50 }
 0x4e4   :  { %v702_v32 = vmul.f32 %v701_v28, %v696_v30 }
 0x4e5   :  { %v7896_v33 = vpop.eup %7895 }
 0x4e6   :  { %v697_v34 = vmul.f32 %v7896_v33, %v681_v52  ;;  %v708_v35 = vadd.f32 %v707_v31, %v702_v32 }
 0x4e8   :  { %v703_v36 = vmul.f32 %v701_v28, %v697_v34  ;;  %7189 = vmatprep.mubr.msk.f32.mxu0 %vm233_vm0, %v708_v35 }
 0x4ea   :  { %v709_v37 = vadd.f32 %v707_v31, %v703_v36 }
 0x4ec   :  { %7190 = vmatmul.mubr.msk.f32.vlgmr.msra.gmra.mxu0 %vm233_vm0, %v709_v37 }
 0x5ac   :  { %v7191_v39 = vpop.f32.mrf.mxu0 }
 0x5ad   :  { %v8453_v40 = vadd.f32 %v7191_v39, %v8450_v38 }
 0x5ae   :  { %v791_v19 = vpop.f32.mrf.mxu0 }
 0x5af   :  { %v8456_v41 = vadd.f32 %v8450_v38, %v791_v19  ;;  %830 = vrot.lane.b32.xlu1 %v8453_v40, %s8156_s29  ;;  %v801_v49 = vmul.f32 0.35355338, %v8453_v40 }
 0x5b1   :  { %v800_v44 = vmul.f32 0.35355338, %v8456_v41  ;;  %828 = vrot.lane.b32.xlu0 %v8456_v41, %s8156_s29  ;;  %v807_v51 = vmul.f32 %v8461_v42, %v801_v49  ;;  %v813_v55 = vmul.f32 %v8429_v18, %v801_v49 }
 0x5b3   :  { %v806_v45 = vmul.f32 %v8461_v42, %v800_v44  ;;  %v812_v52 = vmul.f32 %v8429_v18, %v800_v44  ;;  %v818_v56 = vmul.f32 %v8481_v53, %v800_v44  ;;  %v824_v20 = vmul.f32 %v8495_v57, %v800_v44 }
 0x5b5   :  { %7196 = vmatprep.mubr.msk.f32.mxu0 %vm233_vm0, %v806_v45 }
 0x621   :  { %v831_v47 = vpop.permute.xlu1 %830 }
 0x622   :  { %7192 = vmatprep.subr.msk.mxu0 %vm233_vm0, %v831_v47 }
 0x623   :  { %7193 = vmatpush3.xpose.msk.msra.mxu0 %vm233_vm0, %v831_v47  ;;  %v829_v48 = vpop.permute.xlu0 %828 }
 0x624   :  { %7194 = vmatprep.subr.msk.mxu0 %vm233_vm0, %v829_v48 }
 0x627   :  { %7195 = vmatpush3.xpose.msk.msra.mxu0 %vm233_vm0, %v829_v48 }
 0x628   :  { %7246 = vmatprep.subr.mxu0 %v8189_v0 }
 0x62a   :  { %7197 = vmatmul.mubr.msk.f32.vlgmr.msra.gmra.mxu0 %vm233_vm0, %v807_v51 }
 0x62b   :  { %7199 = vmatprep.mubr.msk.f32.mxu0 %vm233_vm0, %v812_v52  ;;  %7247 = vmatpush3.msra.mxu0 %v8189_v0  ;;  %v819_v0 = vmul.f32 %v8481_v53, %v801_v49 }
 0x62c   :  { %7248 = vmatprep.subr.mxu0 %v8203_v2 }
 0x62d   :  { %7249 = vmatpush3.msra.mxu0 %v8203_v2  ;;  %v825_v2 = vmul.f32 %v8495_v57, %v801_v49 }
 0x62e   :  { %7200 = vmatmul.mubr.msk.f32.gmra.mxu0 %vm233_vm0, %v813_v55  ;;  %7250 = vmatprep.subr.mxu0 %v8194_v1 }
 0x62f   :  { %7202 = vmatprep.mubr.msk.f32.mxu0 %vm233_vm0, %v818_v56  ;;  %7251 = vmatpush3.msra.mxu0 %v8194_v1 }
 0x630   :  { %7252 = vmatprep.subr.mxu0 %v8208_v3 }
 0x631   :  { %7253 = vmatpush3.msra.mxu0 %v8208_v3 }
 0x632   :  { %7203 = vmatmul.mubr.msk.f32.gmra.mxu0 %vm233_vm0, %v819_v0  ;;  %7254 = vmatprep.subr.mxu0 %v8217_v4 }
 0x633   :  { %7205 = vmatprep.mubr.msk.f32.mxu0 %vm233_vm0, %v824_v20  ;;  %7255 = vmatpush3.msra.mxu0 %v8217_v4 }
 0x634   :  { %7256 = vmatprep.subr.mxu0 %v8222_v5 }
 0x635   :  { %7257 = vmatpush3.msra.mxu0 %v8222_v5 }
 0x636   :  { %7206 = vmatmul.mubr.msk.f32.gmra.mxu0 %vm233_vm0, %v825_v2  ;;  %7258 = vmatprep.subr.mxu0 %v8231_v6 }
 0x637   :  { %7259 = vmatpush3.msra.mxu0 %v8231_v6 }
 0x638   :  { %7260 = vmatprep.subr.mxu0 %v8236_v7 }
 0x639   :  { %7261 = vmatpush3.msra.mxu0 %v8236_v7 }
 0x63a   :  { %7262 = vmatprep.subr.mxu0 %v8245_v8 }
 0x63b   :  { %7263 = vmatpush3.msra.mxu0 %v8245_v8 }
 0x63c   :  { %7264 = vmatprep.subr.mxu0 %v8250_v9 }
 0x63d   :  { %7265 = vmatpush3.msra.mxu0 %v8250_v9 }
 0x63e   :  { %7266 = vmatprep.subr.mxu0 %v8259_v10 }
 0x63f   :  { %7267 = vmatpush3.msra.mxu0 %v8259_v10 }
 0x640   :  { %7268 = vmatprep.subr.mxu0 %v8264_v11 }
 0x641   :  { %7269 = vmatpush3.msra.mxu0 %v8264_v11 }
 0x642   :  { %7270 = vmatprep.subr.mxu0 %v8276_v13 }
 0x643   :  { %7271 = vmatpush3.msra.mxu0 %v8276_v13 }
 0x644   :  { %7272 = vmatprep.subr.mxu0 %v8281_v14 }
 0x645   :  { %7273 = vmatpush3.msra.mxu0 %v8281_v14 }
 0x646   :  { %7274 = vmatprep.subr.mxu0 %v8290_v15 }
 0x647   :  { %7275 = vmatpush3.msra.mxu0 %v8290_v15 }
 0x648   :  { %7276 = vmatprep.subr.mxu0 %v8295_v16 }
 0x649   :  { %7277 = vmatpush3.msra.mxu0 %v8295_v16 }
 0x6ea   :  { %v7198_v1 = vpop.f32.mrf.mxu0 }
 0x6eb   :  { %v969_v3 = vsel %vm965_vm3, %v7198_v1, -inf }
 0x6ec   :  { %970 = vmax.xlane.f32.xlu0 %v969_v3  ;;  %v926_v4 = vpop.f32.mrf.mxu0 }
 0x6ed   :  { %v966_v5 = vsel %vm965_vm3, %v926_v4, -inf }
 0x6ee   :  { %967 = vmax.xlane.f32.xlu1 %v966_v5  ;;  %v7201_v6 = vpop.f32.mrf.mxu0 }
 0x6ef   :  { %v975_v7 = vsel %vm965_vm3, %v7201_v6, -inf }
 0x6f0   :  { %976 = vmax.xlane.f32.xlu0 %v975_v7  ;;  %v936_v8 = vpop.f32.mrf.mxu0 }
 0x6f1   :  { %v972_v9 = vsel %vm965_vm3, %v936_v8, -inf }
 0x6f2   :  { %973 = vmax.xlane.f32.xlu1 %v972_v9  ;;  %v7204_v10 = vpop.f32.mrf.mxu0 }
 0x6f3   :  { %v981_v11 = vsel %vm965_vm3, %v7204_v10, -inf }
 0x6f4   :  { %982 = vmax.xlane.f32.xlu0 %v981_v11  ;;  %v946_v13 = vpop.f32.mrf.mxu0 }
 0x6f5   :  { %v978_v14 = vsel %vm965_vm3, %v946_v13, -inf }
 0x6f6   :  { %979 = vmax.xlane.f32.xlu1 %v978_v14  ;;  %v7207_v15 = vpop.f32.mrf.mxu0 }
 0x6f7   :  { %v987_v16 = vsel %vm965_vm3, %v7207_v15, -inf }
 0x6f8   :  { %988 = vmax.xlane.f32.xlu0 %v987_v16  ;;  %v956_v63 = vpop.f32.mrf.mxu0 }
 0x6f9   :  { %v984_v21 = vsel %vm965_vm3, %v956_v63, -inf }
 0x6fa   :  { %985 = vmax.xlane.f32.xlu1 %v984_v21 }
 0x775   :  { %v971_v22 = vpop.xlane.xlu0 %970 }
 0x776   :  { %v991_v23 = vsub.f32 %v7198_v1, %v971_v22 }
 0x777   :  { %v968_v24 = vpop.xlane.xlu1 %967 }
 0x778   :  { %v1000_v25 = vmul.f32 1.442695, %v991_v23  ;;  %v990_v28 = vsub.f32 %v926_v4, %v968_v24 }
 0x779   :  { %v977_v29 = vpop.xlane.xlu0 %976 }
 0x77a   :  { %7897 = vpow2.f32 %v1000_v25  ;;  %v998_v30 = vmul.f32 1.442695, %v990_v28  ;;  %v993_v31 = vsub.f32 %v7201_v6, %v977_v29 }
 0x77b   :  { %v974_v32 = vpop.xlane.xlu1 %973 }
 0x77c   :  { %7899 = vpow2.f32 %v998_v30  ;;  %v1004_v33 = vmul.f32 1.442695, %v993_v31  ;;  %v992_v34 = vsub.f32 %v936_v8, %v974_v32 }
 0x77d   :  { %v983_v35 = vpop.xlane.xlu0 %982 }
 0x77e   :  { %7901 = vpow2.f32 %v1004_v33  ;;  %v1002_v36 = vmul.f32 1.442695, %v992_v34  ;;  %v995_v37 = vsub.f32 %v7204_v10, %v983_v35 }
 0x77f   :  { %v980_v39 = vpop.xlane.xlu1 %979 }
 0x780   :  { %7903 = vpow2.f32 %v1002_v36  ;;  %v1008_v19 = vmul.f32 1.442695, %v995_v37  ;;  %v994_v44 = vsub.f32 %v946_v13, %v980_v39 }
 0x781   :  { %v989_v45 = vpop.xlane.xlu0 %988 }
 0x782   :  { %7905 = vpow2.f32 %v1008_v19  ;;  %v1006_v47 = vmul.f32 1.442695, %v994_v44  ;;  %v997_v48 = vsub.f32 %v7207_v15, %v989_v45 }
 0x783   :  { %v986_v49 = vpop.xlane.xlu1 %985 }
 0x784   :  { %7907 = vpow2.f32 %v1006_v47  ;;  %v1012_v51 = vmul.f32 1.442695, %v997_v48  ;;  %v996_v52 = vsub.f32 %v956_v63, %v986_v49 }
 0x786   :  { %7909 = vpow2.f32 %v1012_v51  ;;  %v1010_v55 = vmul.f32 1.442695, %v996_v52 }
 0x787   :  { %v7898_v56 = vpop.eup %7897 }
 0x788   :  { %7911 = vpow2.f32 %v1010_v55  ;;  %v1017_v0 = vsel %vm965_vm3, %v7898_v56, 0.0 }
 0x789   :  { %v7900_v20 = vpop.eup %7899  ;;  %1018 = vadd.xlane.f32.xlu0 %v1017_v0 }
 0x78a   :  { %v1014_v2 = vsel %vm965_vm3, %v7900_v20, 0.0 }
 0x78b   :  { %v7902_v1 = vpop.eup %7901  ;;  %1015 = vadd.xlane.f32.xlu1 %v1014_v2 }
 0x78c   :  { %v1023_v3 = vsel %vm965_vm3, %v7902_v1, 0.0 }
 0x78d   :  { %v7904_v4 = vpop.eup %7903  ;;  %1024 = vadd.xlane.f32.xlu0 %v1023_v3 }
 0x78e   :  { %v1020_v5 = vsel %vm965_vm3, %v7904_v4, 0.0 }
 0x78f   :  { %v7906_v6 = vpop.eup %7905  ;;  %1021 = vadd.xlane.f32.xlu1 %v1020_v5 }
 0x790   :  { %v1029_v7 = vsel %vm965_vm3, %v7906_v6, 0.0 }
 0x791   :  { %v7908_v8 = vpop.eup %7907  ;;  %1030 = vadd.xlane.f32.xlu0 %v1029_v7 }
 0x792   :  { %v1026_v9 = vsel %vm965_vm3, %v7908_v8, 0.0 }
 0x793   :  { %v7910_v10 = vpop.eup %7909  ;;  %1027 = vadd.xlane.f32.xlu1 %v1026_v9 }
 0x794   :  { %v1035_v11 = vsel %vm965_vm3, %v7910_v10, 0.0 }
 0x795   :  { %v7912_v13 = vpop.eup %7911  ;;  %1036 = vadd.xlane.f32.xlu0 %v1035_v11 }
 0x796   :  { %v1032_v14 = vsel %vm965_vm3, %v7912_v13, 0.0 }
 0x797   :  { %1033 = vadd.xlane.f32.xlu1 %v1032_v14 }
 0x7a8   :  { %1056 = vrot.lane.b32.xlu1 %v8453_v40, %s8155_s19 }
 0x7ab   :  { %1054 = vrot.lane.b32.xlu0 %v8456_v41, %s8155_s19 }
 0x7ac   :  { %1213 = vrot.lane.b32.xlu1 %v8396_v58, %s8157_s12 }
 0x7af   :  { %1209 = vrot.lane.b32.xlu0 %v8408_v60, %s8157_s12 }
 0x7b0   :  { %1211 = vrot.lane.b32.xlu1 %v8401_v59, %s8157_s12 }
 0x7b3   :  { %1303 = vrot.lane.b32.xlu0 %v8450_v38, %s8157_s12 }
 0x7b4   :  { %1207 = vrot.lane.b32.xlu1 %v8426_v17, %s8157_s12 }
 0x812   :  { %v1019_v15 = vpop.xlane.xlu0 %1018 }
 0x814   :  { %v1016_v40 = vpop.xlane.xlu1 %1015 }
 0x815   :  { %7913 = vrcp.f32 %v1016_v40 }
 0x816   :  { %v1025_v16 = vpop.xlane.xlu0 %1024  ;;  %7915 = vrcp.f32 %v1019_v15 }
 0x818   :  { %v1022_v41 = vpop.xlane.xlu1 %1021 }
 0x819   :  { %7917 = vrcp.f32 %v1022_v41 }
 0x81a   :  { %v1031_v58 = vpop.xlane.xlu0 %1030  ;;  %7919 = vrcp.f32 %v1025_v16 }
 0x81c   :  { %v1028_v63 = vpop.xlane.xlu1 %1027 }
 0x81d   :  { %7921 = vrcp.f32 %v1028_v63 }
 0x81e   :  { %7923 = vrcp.f32 %v1031_v58  ;;  %v1037_v60 = vpop.xlane.xlu0 %1036 }
 0x820   :  { %v1034_v59 = vpop.xlane.xlu1 %1033 }
 0x821   :  { %7925 = vrcp.f32 %v1034_v59 }
 0x822   :  { %v7914_v21 = vpop.eup %7913  ;;  %7927 = vrcp.f32 %v1037_v60  ;;  %v1055_v24 = vpop.permute.xlu0 %1054 }
 0x823   :  { %v1046_v38 = vmul.f32 %v7914_v21, %v7900_v20  ;;  %v7916_v22 = vpop.eup %7915 }
 0x824   :  { %v1057_v17 = vpop.permute.xlu1 %1056  ;;  %v1047_v25 = vmul.f32 %v7916_v22, %v7898_v56 }
 0x825   :  { %7208 = vmatprep.subr.mxu1 %v1057_v17  ;;  %7212 = vmatprep.mubr.msk.f32.mxu1 %vm965_vm3, %v1046_v38 }
 0x826   :  { %v7918_v23 = vpop.eup %7917  ;;  %7209 = vmatpush3.msra.mxu1 %v1057_v17  ;;  %v1210_v45 = vpop.permute.xlu0 %1209 }
 0x827   :  { %7210 = vmatprep.subr.mxu1 %v1055_v24  ;;  %v1048_v28 = vmul.f32 %v7918_v23, %v7904_v4  ;;  %v7920_v29 = vpop.eup %7919 }
 0x828   :  { %7211 = vmatpush3.msra.mxu1 %v1055_v24  ;;  %v1049_v31 = vmul.f32 %v7920_v29, %v7902_v1  ;;  %v1214_v19 = vpop.permute.xlu1 %1213 }
 0x829   :  { %7213 = vmatmul.mubr.msk.f32.vlgmr.msra.gmra.mxu1 %vm965_vm3, %v1047_v25  ;;  %7224 = vmatprep.subr.mxu1 %v1214_v19 }
 0x82a   :  { %v7922_v30 = vpop.eup %7921  ;;  %7215 = vmatprep.mubr.msk.f32.mxu1 %vm965_vm3, %v1048_v28  ;;  %7225 = vmatpush3.msra.mxu1 %v1214_v19  ;;  %v1304_v16 = vpop.permute.xlu0 %1303 }
 0x82b   :  { %v1050_v32 = vmul.f32 %v7922_v30, %v7908_v8  ;;  %v7924_v33 = vpop.eup %7923 }
 0x82c   :  { %v1051_v35 = vmul.f32 %v7924_v33, %v7906_v6  ;;  %v1212_v44 = vpop.permute.xlu1 %1211  ;;  %v1347_v33 = vld [vmem:[%s9998_s1 + $0x28] sm:$0xff] }
 0x82d   :  { %7216 = vmatmul.mubr.msk.f32.gmra.mxu1 %vm965_vm3, %v1049_v31  ;;  %7226 = vmatprep.subr.mxu1 %v1212_v44  ;;  %v1349_v31 = vld [vmem:[%s9998_s1 + $0x38] sm:$0xff] }
 0x82e   :  { %v7926_v34 = vpop.eup %7925  ;;  %7218 = vmatprep.mubr.msk.f32.mxu1 %vm965_vm3, %v1050_v32  ;;  %7227 = vmatpush3.msra.mxu1 %v1212_v44  ;;  %v1348_v32 = vld [vmem:[%s9998_s1 + $0x30] sm:$0xff] }
 0x82f   :  { %v1052_v36 = vmul.f32 %v7926_v34, %v7912_v13  ;;  %v7928_v37 = vpop.eup %7927  ;;  %7228 = vmatprep.subr.mxu1 %v1210_v45  ;;  %v1346_v34 = vld [vmem:[%s9998_s1 + $0x20] sm:$0xff] }
 0x830   :  { %v1053_v39 = vmul.f32 %v7928_v37, %v7910_v10  ;;  %7229 = vmatpush3.msra.mxu1 %v1210_v45  ;;  %v1208_v47 = vpop.permute.xlu1 %1207 }
 0x831   :  { %7219 = vmatmul.mubr.msk.f32.gmra.mxu1 %vm965_vm3, %v1051_v35  ;;  %7230 = vmatprep.subr.mxu1 %v1208_v47 }
 0x832   :  { %7221 = vmatprep.mubr.msk.f32.mxu1 %vm965_vm3, %v1052_v36  ;;  %7231 = vmatpush3.msra.mxu1 %v1208_v47  ;;  %v1337_v47 = vrot.slane %v8439_v27, %v8473_v50 }
 0x833   :  { %7235 = vmatprep.subr.mxu1 %v1349_v31 }
 0x835   :  { %7222 = vmatmul.mubr.msk.f32.gmra.mxu1 %vm965_vm3, %v1053_v39 }
 0x8e9   :  { %v7214_v48 = vpop.f32.mrf.mxu1 }
 0x8ea   :  { %v1190_v3 = vmul.f32 %v7214_v48, %v8461_v42 }
 0x8eb   :  { %v1150_v49 = vpop.f32.mrf.mxu1 }
 0x8ec   :  { %v1189_v2 = vmul.f32 %v1150_v49, %v8461_v42 }
 0x8ed   :  { %v7217_v51 = vpop.f32.mrf.mxu1 }
 0x8ee   :  { %v1192_v0 = vmul.f32 %v7217_v51, %v8429_v18 }
 0x8ef   :  { %v1160_v52 = vpop.f32.mrf.mxu1 }
 0x8f0   :  { %v1191_v56 = vmul.f32 %v1160_v52, %v8429_v18  ;;  %v1194_v7 = vadd.f32 %v1192_v0, %v1190_v3 }
 0x8f1   :  { %v7220_v55 = vpop.f32.mrf.mxu1 }
 0x8f2   :  { %v1196_v4 = vmul.f32 %v7220_v55, %v8481_v53  ;;  %v1193_v6 = vadd.f32 %v1191_v56, %v1189_v2  ;;  %v1343_v55 = vrot.slane %v8439_v27, %v8484_v54  ;;  %v6564_v2 = vld [vmem:[%s9997_s3 + $0x1] ss:$0 sm:$0xff] }
 0x8f3   :  { %v1170_v20 = vpop.f32.mrf.mxu1 }
 0x8f4   :  { %v1195_v1 = vmul.f32 %v1170_v20, %v8481_v53  ;;  %v1198_v13 = vadd.f32 %v1196_v4, %v1194_v7 }
 0x8f5   :  { %v7223_v5 = vpop.f32.mrf.mxu1 }
 0x8f6   :  { %v1200_v8 = vmul.f32 %v7223_v5, %v8495_v57  ;;  %v1197_v10 = vadd.f32 %v1195_v1, %v1193_v6 }
 0x8f7   :  { %v1180_v9 = vpop.f32.mrf.mxu1 }
 0x8f8   :  { %v1199_v11 = vmul.f32 %v1180_v9, %v8495_v57  ;;  %v1202_v15 = vadd.f32 %v1200_v8, %v1198_v13 }
 0x8fa   :  { %v1201_v14 = vadd.f32 %v1199_v11, %v1197_v10 }
 0x8fc   :  { %7232 = vmatprep.mubr.msk.f32.mxu1 %vm233_vm0, %v1201_v14 }
 0x8fd   :  { %7233 = vmatmul.mubr.msk.f32.vlgmr.msra.gmra.mxu1 %vm233_vm0, %v1202_v15 }
 0x8fe   :  { %7236 = vmatpush3.msra.mxu1 %v1349_v31  ;;  %v8627_v31 = vld [vmem:[%s9997_s3 + $0x50] sm:$0xff] }
 0x8ff   :  { %7237 = vmatprep.subr.mxu1 %v1348_v32 }
 0x900   :  { %7238 = vmatpush3.msra.mxu1 %v1348_v32 }
 0x901   :  { %7239 = vmatprep.subr.mxu1 %v1347_v33 }
 0x902   :  { %7240 = vmatpush3.msra.mxu1 %v1347_v33 }
 0x903   :  { %7241 = vmatprep.subr.mxu1 %v1346_v34 }
 0x904   :  { %7242 = vmatpush3.msra.mxu1 %v1346_v34 }
 0x9bd   :  { %v7234_v40 = vpop.f32.mrf.mxu1 }
 0x9be   :  { %v1301_v41 = vadd.f32 %v7234_v40, %v8381_v43 }
 0x9bf   :  { %v1291_v58 = vpop.f32.mrf.mxu1 }
 0x9c0   :  { %v8580_v63 = vadd.f32 %v1304_v16, %v1301_v41  ;;  %v1300_v60 = vadd.f32 %v1291_v58, %v8385_v46 }
 0x9c2   :  { %v8583_v59 = vadd.f32 %v1304_v16, %v1300_v60  ;;  %v1311_v21 = vsel %vm233_vm0, %v8580_v63, 0.0 }
 0x9c3   :  { %1312 = vadd.xlane.f32.xlu0 %v1311_v21 }
 0x9c4   :  { %v1308_v38 = vsel %vm233_vm0, %v8583_v59, 0.0 }
 0x9c5   :  { %1309 = vadd.xlane.f32.xlu1 %v1308_v38 }
 0xa4c   :  { %v1313_v22 = vpop.xlane.xlu0 %1312 }
 0xa4d   :  { %v1315_v17 = vmul.f32 0.03125, %v1313_v22 }
 0xa4e   :  { %v1310_v23 = vpop.xlane.xlu1 %1309 }
 0xa4f   :  { %v1317_v43 = vsub.f32 %v8580_v63, %v1315_v17  ;;  %v1314_v24 = vmul.f32 0.03125, %v1310_v23 }
 0xa51   :  { %v1316_v25 = vsub.f32 %v8583_v59, %v1314_v24  ;;  %v1319_v28 = vmul.f32 %v1317_v43, %v1317_v43 }
 0xa53   :  { %v1323_v46 = vsel %vm233_vm0, %v1319_v28, 0.0  ;;  %v1318_v29 = vmul.f32 %v1316_v25, %v1316_v25 }
 0xa54   :  { %1324 = vadd.xlane.f32.xlu1 %v1323_v46 }
 0xa55   :  { %v1320_v30 = vsel %vm233_vm0, %v1318_v29, 0.0 }
 0xa56   :  { %1321 = vadd.xlane.f32.xlu0 %v1320_v30 }
 0xadd   :  { %v1325_v35 = vpop.xlane.xlu1 %1324 }
 0xade   :  { %v1327_v36 = vmul.f32 0.03125, %v1325_v35 }
 0xadf   :  { %v1322_v37 = vpop.xlane.xlu0 %1321 }
 0xae0   :  { %v1329_v39 = vadd.f32 1e-05, %v1327_v36  ;;  %v1326_v19 = vmul.f32 0.03125, %v1322_v37 }
 0xae2   :  { %7929 = vrsqrt.f32 %v1329_v39  ;;  %v1328_v44 = vadd.f32 1e-05, %v1326_v19 }
 0xae4   :  { %7931 = vrsqrt.f32 %v1328_v44 }
 0xaef   :  { %v7930_v45 = vpop.eup %7929 }
 0xaf0   :  { %v1333_v48 = vmul.f32 %v7930_v45, %v1317_v43  ;;  %v8617_v43 = vld [vmem:[%s9997_s3 + $0x2] ss:$0 sm:$0xff] }
 0xaf1   :  { %v7932_v49 = vpop.eup %7931 }
 0xaf2   :  { %v1332_v51 = vmul.f32 %v7932_v49, %v1316_v25  ;;  %v1339_v52 = vmul.f32 %v1337_v47, %v1333_v48  ;;  %v8638_v48 = vld [vmem:[%s9998_s1 + $0x58] sm:$0xff]  ;;  %v8643_v49 = vld [vmem:[%s9998_s1 + $0x50] sm:$0xff] }
 0xaf4   :  { %v1338_v56 = vmul.f32 %v1337_v47, %v1332_v51  ;;  %v1345_v20 = vadd.f32 %v1343_v55, %v1339_v52  ;;  %v8652_v51 = vld [vmem:[%s9998_s1 + $0x40] sm:$0xff] }
 0xaf6   :  { %v1344_v0 = vadd.f32 %v1343_v55, %v1338_v56 }
 0xaf8   :  { %7243 = vmatprep.mubr.msk.f32.mxu1 %vm233_vm0, %v1344_v0 }
 0xaf9   :  { %7244 = vmatmul.mubr.msk.f32.vlgmr.msra.gmra.mxu1 %vm233_vm0, %v1345_v20  ;;  %v8660_v20 = vld [vmem:[%s9998_s1 + $0x48] sm:$0xff] }
 0xbb9   :  { %v7245_v1 = vpop.f32.mrf.mxu1 }
 0xbba   :  { %v1433_v3 = vadd.f32 %v7245_v1, %v6564_v2 }
 0xbbb   :  { %v1427_v4 = vpop.f32.mrf.mxu1 }
 0xbbc   :  { %v1437_v5 = vmul.f32 %v1433_v3, %v1433_v3  ;;  %v1428_v6 = vadd.f32 %v6564_v2, %v1427_v4  ;;  %v10009_v2 = vmov 0.0  }
 0xbbd   :  { %7319 = vmatprep.subr.mxu0 %v10009_v2 }
 0xbbe   :  { %v1439_v7 = vmul.f32 %v1437_v5, %v1433_v3  ;;  %v1436_v8 = vmul.f32 %v1428_v6, %v1428_v6 }
 0xbc0   :  { %v1441_v9 = vmul.f32 0.044715, %v1439_v7  ;;  %v1438_v10 = vmul.f32 %v1436_v8, %v1428_v6 }
 0xbc2   :  { %v1443_v11 = vadd.f32 %v1441_v9, %v1433_v3  ;;  %v1440_v13 = vmul.f32 0.044715, %v1438_v10 }
 0xbc4   :  { %v1445_v14 = vmul.f32 0.7978846, %v1443_v11  ;;  %v1442_v15 = vadd.f32 %v1440_v13, %v1428_v6 }
 0xbc6   :  { %7933 = vtanh.f32 %v1445_v14  ;;  %v1444_v40 = vmul.f32 0.7978846, %v1442_v15 }
 0xbc8   :  { %7935 = vtanh.f32 %v1444_v40  ;;  %v1566_v40 = vsub.s32 4, %v8415_v62 }
 0xbd3   :  { %v7934_v16 = vpop.eup %7933 }
 0xbd4   :  { %v1449_v41 = vadd.f32 1.0, %v7934_v16 }
 0xbd5   :  { %v7936_v58 = vpop.eup %7935 }
 0xbd6   :  { %v1448_v60 = vadd.f32 1.0, %v7936_v58  ;;  %v1451_v21 = vmul.f32 0.5, %v1449_v41  ;;  %v1567_v58 = vrot.slane %v8439_v27, %v1566_v40 }
 0xbd8   :  { %v1450_v38 = vmul.f32 0.5, %v1448_v60  ;;  %v1453_v17 = vmul.f32 %v1451_v21, %v1433_v3  ;;  %v1572_v60 = vsub.s32 5, %v8415_v62 }
 0xbda   :  { %v1452_v22 = vmul.f32 %v1450_v38, %v1428_v6 }
 0xbdc   :  { %7278 = vmatprep.mubr.f32.mxu0 %v1452_v22 }
 0xbdd   :  { %7279 = vmatmul.mubr.f32.vlgmr.msra.gmra.mxu0 %v1453_v17  ;;  %v1573_v17 = vrot.slane %v8439_v27, %v1572_v60  ;;  %v8695_v27 = vld [vmem:[%s9998_s1 + $0x70] sm:$0xff] }
 0xbde   :  { %7327 = vmatprep.mubr.msk.f32.mxu0 %vm8159_vm4, %v10009_v2 }
 0xc9d   :  { %v7280_v23 = vpop.f32.mrf.mxu0 }
 0xc9e   :  { %v1530_v24 = vadd.f32 %v7280_v23, %v8580_v63  ;;  %v1696_v63 = vsel %vm233_vm0, %v8627_v31, 0.0 }
 0xc9f   :  { %v1520_v25 = vpop.f32.mrf.mxu0 }
 0xca0   :  { %v1529_v28 = vadd.f32 %v1520_v25, %v8583_v59  ;;  %v1537_v46 = vadd.f32 %v8617_v43, %v1530_v24  ;;  %v8679_v24 = vld [vmem:[%s9997_s3 + $0x10] sm:$0xff] }
 0xca2   :  { %v1541_v29 = vsel %vm233_vm0, %v1537_v46, 0.0  ;;  %v1536_v30 = vadd.f32 %v8617_v43, %v1529_v28 }
 0xca3   :  { %1542 = vadd.xlane.f32.xlu1 %v1541_v29  ;;  %v8684_v29 = vld [vmem:[%s9998_s1 + $0x78] sm:$0xff] }
 0xca4   :  { %v1538_v32 = vsel %vm233_vm0, %v1536_v30, 0.0 }
 0xca5   :  { %1539 = vadd.xlane.f32.xlu0 %v1538_v32  ;;  %v8688_v32 = vrot.slane %v8679_v24, %v8434_v26 }
 0xca7   :  { %10052 = vst [vmem:[#allocation4_spill] sm:$0xff] %v8688_v32 }
 0xca9   :  { %1697 = vadd.xlane.f32.xlu0 %v1696_v63  ;;  %v8702_v63 = vrot.slane %v8679_v24, %v8421_v12 }
 0xcab   :  { %10053 = vst [vmem:[#allocation5_spill] sm:$0xff] %v8702_v63 }
 0xd2c   :  { %v1543_v59 = vpop.xlane.xlu1 %1542 }
 0xd2d   :  { %v1545_v33 = vmul.f32 0.03125, %v1543_v59  ;;  %v8708_v59 = vld [vmem:[%s9998_s1 + $0x68] sm:$0xff] }
 0xd2e   :  { %v1540_v34 = vpop.xlane.xlu0 %1539 }
 0xd2f   :  { %v1547_v35 = vsub.f32 %v1537_v46, %v1545_v33  ;;  %v1544_v52 = vmul.f32 0.03125, %v1540_v34  ;;  %v8716_v34 = vld [vmem:[%s9998_s1 + $0x60] sm:$0xff] }
 0xd31   :  { %v1549_v36 = vmul.f32 %v1547_v35, %v1547_v35  ;;  %v1546_v55 = vsub.f32 %v1536_v30, %v1544_v52 }
 0xd32   :  { %v1698_v37 = vpop.xlane.xlu0 %1697 }
 0xd33   :  { %v1699_v39 = vmul.f32 0.03125, %v1698_v37  ;;  %v1553_v19 = vsel %vm233_vm0, %v1549_v36, 0.0  ;;  %v1548_v56 = vmul.f32 %v1546_v55, %v1546_v55  ;;  %v8730_v37 = vld [vmem:[%s9997_s3 + $0x3] ss:$0 sm:$0xff] }
 0xd34   :  { %1554 = vadd.xlane.f32.xlu0 %v1553_v19 }
 0xd35   :  { %v1700_v44 = vsub.f32 %v8627_v31, %v1699_v39  ;;  %v1550_v0 = vsel %vm233_vm0, %v1548_v56, 0.0 }
 0xd37   :  { %v1701_v45 = vmul.f32 %v1700_v44, %v1700_v44 }
 0xd39   :  { %v1702_v47 = vsel %vm233_vm0, %v1701_v45, 0.0 }
 0xd3a   :  { %1703 = vadd.xlane.f32.xlu1 %v1702_v47 }
 0xd4a   :  { %1590 = vrot.lane.b32.xlu0 %v8638_v48, %s8156_s29 }
 0xd4b   :  { %1588 = vrot.lane.b32.xlu1 %v8643_v49, %s8156_s29 }
 0xd4e   :  { %1584 = vrot.lane.b32.xlu0 %v8652_v51, %s8156_s29 }
 0xd6f   :  { %1551 = vadd.xlane.f32.xlu1 %v1550_v0 }
 0xd80   :  { %1586 = vrot.lane.b32.xlu1 %v8660_v20, %s8156_s29 }
 0xdbd   :  { %v1555_v1 = vpop.xlane.xlu0 %1554 }
 0xdbe   :  { %v1557_v6 = vmul.f32 0.03125, %v1555_v1  ;;  %v8747_v1 = vld [vmem:[%s9997_s3 + $0x30] sm:$0xff] }
 0xdc0   :  { %v1559_v7 = vadd.f32 1e-05, %v1557_v6 }
 0xdc1   :  { %v1591_v3 = vpop.permute.xlu0 %1590 }
 0xdc2   :  { %7281 = vmatprep.subr.mxu1 %v1591_v3  ;;  %7937 = vrsqrt.f32 %v1559_v7 }
 0xdc3   :  { %v1704_v4 = vpop.xlane.xlu1 %1703  ;;  %7282 = vmatpush3.msra.mxu1 %v1591_v3 }
 0xdc4   :  { %v1705_v8 = vmul.f32 0.03125, %v1704_v4 }
 0xdc5   :  { %v1585_v15 = vpop.permute.xlu0 %1584 }
 0xdc6   :  { %v1706_v13 = vadd.f32 1e-05, %v1705_v8 }
 0xdc7   :  { %v1589_v5 = vpop.permute.xlu1 %1588 }
 0xdc8   :  { %7283 = vmatprep.subr.mxu1 %v1589_v5 }
 0xdc9   :  { %7284 = vmatpush3.msra.mxu1 %v1589_v5 }
 0xdcf   :  { %v7938_v16 = vpop.eup %7937 }
 0xdd0   :  { %v1563_v41 = vmul.f32 %v7938_v16, %v1547_v35 }
 0xdd2   :  { %v1569_v22 = vmul.f32 %v1567_v58, %v1563_v41 }
 0xdd4   :  { %v1575_v46 = vadd.f32 %v1573_v17, %v1569_v22 }
 0xdf8   :  { %v1552_v9 = vpop.xlane.xlu1 %1551 }
 0xdf9   :  { %v1556_v10 = vmul.f32 0.03125, %v1552_v9 }
 0xdfb   :  { %v1558_v11 = vadd.f32 1e-05, %v1556_v10 }
 0xdfc   :  { %v1587_v14 = vpop.permute.xlu1 %1586 }
 0xdfd   :  { %7939 = vrsqrt.f32 %v1558_v11  ;;  %7285 = vmatprep.subr.mxu1 %v1587_v14 }
 0xdfe   :  { %7286 = vmatpush3.msra.mxu1 %v1587_v14  ;;  %7941 = vrsqrt.f32 %v1706_v13 }
 0xdff   :  { %7287 = vmatprep.subr.mxu1 %v1585_v15 }
 0xe00   :  { %7288 = vmatpush3.msra.mxu1 %v1585_v15 }
 0xe01   :  { %7292 = vmatprep.subr.mxu1 %v10009_v2 }
 0xe0a   :  { %v7940_v21 = vpop.eup %7939 }
 0xe0b   :  { %v1562_v38 = vmul.f32 %v7940_v21, %v1546_v55  ;;  %v7942_v23 = vpop.eup %7941 }
 0xe0c   :  { %v1708_v30 = vmul.f32 %v7942_v23, %v1700_v44 }
 0xe0d   :  { %v1568_v25 = vmul.f32 %v1567_v58, %v1562_v38 }
 0xe0e   :  { %v1713_v33 = vmul.f32 %v8688_v32, %v1708_v30 }
 0xe0f   :  { %v1574_v28 = vadd.f32 %v1573_v17, %v1568_v25 }
 0xe10   :  { %v1718_v12 = vadd.f32 %v8702_v63, %v1713_v33 }
 0xe11   :  { %7289 = vmatprep.mubr.msk.f32.mxu1 %vm233_vm0, %v1574_v28 }
 0xe12   :  { %7290 = vmatmul.mubr.msk.f32.vlgmr.msra.gmra.mxu1 %vm233_vm0, %v1575_v46 }
 0xe13   :  { %7293 = vmatpush3.msra.mxu1 %v8684_v29  ;;  %7300 = vmatprep.mubr.msk.f32.mxu1 %vm8159_vm4, %v10009_v2 }
 0xe14   :  { %7294 = vmatprep.subr.mxu1 %v10009_v2 }
 0xe15   :  { %7295 = vmatpush3.msra.mxu1 %v8695_v27 }
 0xe16   :  { %7296 = vmatprep.subr.mxu1 %v10009_v2 }
 0xe17   :  { %7297 = vmatpush3.msra.mxu1 %v8708_v59 }
 0xe18   :  { %7298 = vmatprep.subr.mxu1 %v10009_v2 }
 0xe19   :  { %7299 = vmatpush3.msra.mxu1 %v8716_v34 }
 0xe1a   :  { %7301 = vmatmul.mubr.msk.f32.vlgmr.msra.gmra.mxu1 %vm233_vm0, %v1718_v12 }
 0xed2   :  { %v8723_v35 = vpop.f32.mrf.mxu1 }
 0xed4   :  { %v8725_v36 = vpop.f32.mrf.mxu1 }
 0xeda   :  { %v1797_v39 = vpop.f32.mrf.mxu1 }
 0xedb   :  { %v1798_v19 = vadd.f32 %v8730_v37, %v1797_v39 }
 0xedc   :  { %v7302_v44 = vpop.f32.mrf.mxu1 }
 0xedd   :  { %v1801_v45 = vmul.f32 0.35355338, %v1798_v19  ;;  %1807 = vrot.lane.b32.xlu1 %v1798_v19, %s8156_s29 }
 0xedf   :  { %v1802_v47 = vmul.f32 %v1801_v45, %v8461_v42  ;;  %v1803_v55 = vmul.f32 %v1801_v45, %v8429_v18  ;;  %v1804_v56 = vmul.f32 %v1801_v45, %v8481_v53  ;;  %v1805_v0 = vmul.f32 %v1801_v45, %v8495_v57 }
 0xee1   :  { %7305 = vmatprep.mubr.msk.f32.mxu1 %vm233_vm0, %v1802_v47 }
 0xf4f   :  { %v1808_v52 = vpop.permute.xlu1 %1807 }
 0xf50   :  { %7303 = vmatprep.subr.msk.mxu1 %vm233_vm0, %v1808_v52 }
 0xf51   :  { %7304 = vmatpush3.xpose.msk.msra.mxu1 %vm233_vm0, %v1808_v52 }
 0xf54   :  { %7306 = vmatmul.mubr.msk.f32.vlgmr.msra.gmra.mxu1 %vm233_vm0, %v1803_v55 }
 0xf55   :  { %7308 = vmatprep.mubr.msk.f32.mxu1 %vm233_vm0, %v1804_v56 }
 0xf58   :  { %7309 = vmatmul.mubr.msk.f32.gmra.mxu1 %vm233_vm0, %v1805_v0 }
0x1014   :  { %v7307_v3 = vpop.f32.mrf.mxu1 }
0x1015   :  { %v1895_v4 = vadd.f32 %v7307_v3, %v8747_v1 }
0x1016   :  { %v1889_v5 = vpop.f32.mrf.mxu1 }
0x1017   :  { %v1890_v6 = vadd.f32 %v1889_v5, %v8747_v1  ;;  %v1912_v7 = vsel %vm1908_vm5, %v1895_v4, -inf }
0x1018   :  { %1913 = vmax.xlane.f32.xlu1 %v1912_v7  ;;  %v7310_v8 = vpop.f32.mrf.mxu1 }
0x1019   :  { %v1909_v9 = vsel %vm1908_vm5, %v1890_v6, -inf  ;;  %v1905_v13 = vadd.f32 %v7310_v8, %v8747_v1 }
0x101a   :  { %v1899_v10 = vpop.f32.mrf.mxu1  ;;  %1910 = vmax.xlane.f32.xlu0 %v1909_v9 }
0x101b   :  { %v1900_v11 = vadd.f32 %v1899_v10, %v8747_v1  ;;  %v1918_v15 = vsel %vm1908_vm5, %v1905_v13, -inf }
0x101d   :  { %v1915_v14 = vsel %vm1908_vm5, %v1900_v11, -inf }
0x101e   :  { %1916 = vmax.xlane.f32.xlu0 %v1915_v14 }
0x1022   :  { %1919 = vmax.xlane.f32.xlu0 %v1918_v15 }
0x10a1   :  { %v1914_v16 = vpop.xlane.xlu1 %1913 }
0x10a2   :  { %v1922_v41 = vsub.f32 %v1895_v4, %v1914_v16 }
0x10a3   :  { %v1911_v58 = vpop.xlane.xlu0 %1910 }
0x10a4   :  { %v1927_v21 = vmul.f32 1.442695, %v1922_v41  ;;  %v1921_v38 = vsub.f32 %v1890_v6, %v1911_v58 }
0x10a6   :  { %7943 = vpow2.f32 %v1927_v21  ;;  %v1925_v22 = vmul.f32 1.442695, %v1921_v38 }
0x10a7   :  { %v1917_v17 = vpop.xlane.xlu0 %1916 }
0x10a8   :  { %7945 = vpow2.f32 %v1925_v22  ;;  %v1923_v23 = vsub.f32 %v1900_v11, %v1917_v17 }
0x10aa   :  { %v1929_v25 = vmul.f32 1.442695, %v1923_v23 }
0x10ab   :  { %v1920_v28 = vpop.xlane.xlu0 %1919 }
0x10ac   :  { %7947 = vpow2.f32 %v1929_v25  ;;  %v1924_v46 = vsub.f32 %v1905_v13, %v1920_v28 }
0x10ae   :  { %v1931_v30 = vmul.f32 1.442695, %v1924_v46 }
0x10b0   :  { %7949 = vpow2.f32 %v1931_v30 }
0x10b3   :  { %v7944_v33 = vpop.eup %7943 }
0x10b4   :  { %v1936_v12 = vsel %vm1908_vm5, %v7944_v33, 0.0 }
0x10b5   :  { %v7946_v39 = vpop.eup %7945  ;;  %1937 = vadd.xlane.f32.xlu0 %v1936_v12 }
0x10b6   :  { %v1933_v44 = vsel %vm1908_vm5, %v7946_v39, 0.0 }
0x10b7   :  { %1934 = vadd.xlane.f32.xlu1 %v1933_v44 }
0x10b9   :  { %v7948_v45 = vpop.eup %7947 }
0x10ba   :  { %v1939_v47 = vsel %vm1908_vm5, %v7948_v45, 0.0 }
0x10bb   :  { %1940 = vadd.xlane.f32.xlu1 %v1939_v47 }
0x10bd   :  { %v7950_v52 = vpop.eup %7949 }
0x10be   :  { %v1942_v55 = vsel %vm1908_vm5, %v7950_v52, 0.0 }
0x10bf   :  { %1943 = vadd.xlane.f32.xlu0 %v1942_v55 }
0x10cc   :  { %1953 = vrot.lane.b32.xlu1 %v1798_v19, %s8155_s19 }
0x10d0   :  { %2068 = vrot.lane.b32.xlu1 %v8695_v27, %s8157_s12 }
0x10d4   :  { %2066 = vrot.lane.b32.xlu1 %v8708_v59, %s8157_s12 }
0x10d5   :  { %2070 = vrot.lane.b32.xlu0 %v8684_v29, %s8157_s12 }
0x10d8   :  { %2151 = vrot.lane.b32.xlu1 %v8730_v37, %s8157_s12 }
0x10d9   :  { %2064 = vrot.lane.b32.xlu0 %v8716_v34, %s8157_s12 }
0x113e   :  { %v1938_v56 = vpop.xlane.xlu0 %1937 }
0x113f   :  { %7951 = vrcp.f32 %v1938_v56 }
0x1140   :  { %v1935_v0 = vpop.xlane.xlu1 %1934 }
0x1141   :  { %7953 = vrcp.f32 %v1935_v0 }
0x1144   :  { %v1941_v19 = vpop.xlane.xlu1 %1940 }
0x1145   :  { %7955 = vrcp.f32 %v1941_v19 }
0x1148   :  { %v1954_v3 = vpop.permute.xlu1 %1953  ;;  %v1944_v4 = vpop.xlane.xlu0 %1943 }
0x1149   :  { %7957 = vrcp.f32 %v1944_v4  ;;  %7311 = vmatprep.subr.mxu1 %v1954_v3 }
0x114a   :  { %7312 = vmatpush3.msra.mxu1 %v1954_v3 }
0x114b   :  { %7330 = vmatprep.subr.mxu1 %v10009_v2 }
0x114c   :  { %v7952_v5 = vpop.eup %7951  ;;  %v8786_v14 = vpop.permute.xlu0 %2070 }
0x114d   :  { %v1950_v8 = vmul.f32 %v7952_v5, %v7944_v33  ;;  %10054 = vst [vmem:[#allocation6_spill] sm:$0xff] %v8786_v14  ;;  %7320 = vmatpush3.msra.mxu0 %v8786_v14  ;;  %v8790_v15 = vpop.permute.xlu1 %2068 }
0x114e   :  { %v7954_v6 = vpop.eup %7953  ;;  %7321 = vmatprep.subr.mxu0 %v10009_v2  ;;  %10055 = vst [vmem:[#allocation7_spill] sm:$0xff] %v8790_v15 }
0x114f   :  { %v1949_v7 = vmul.f32 %v7954_v6, %v7946_v39  ;;  %7322 = vmatpush3.msra.mxu0 %v8790_v15 }
0x1150   :  { %7323 = vmatprep.subr.mxu0 %v10009_v2  ;;  %v8798_v41 = vpop.permute.xlu0 %2064 }
0x1151   :  { %7313 = vmatprep.mubr.msk.f32.mxu1 %vm1908_vm5, %v1949_v7  ;;  %v8794_v16 = vpop.permute.xlu1 %2066  ;;  %10057 = vst [vmem:[#allocation9_spill] sm:$0xff] %v8798_v41  ;;  %v8837_v7 = vrot.slane %v8679_v24, %v8473_v50 }
0x1152   :  { %v7956_v9 = vpop.eup %7955  ;;  %7314 = vmatmul.mubr.msk.f32.vlgmr.msra.gmra.mxu1 %vm1908_vm5, %v1950_v8  ;;  %10056 = vst [vmem:[#allocation8_spill] sm:$0xff] %v8794_v16  ;;  %7324 = vmatpush3.msra.mxu0 %v8794_v16 }
0x1153   :  { %v1951_v10 = vmul.f32 %v7956_v9, %v7948_v45  ;;  %7331 = vmatpush3.msra.mxu1 %v8638_v48  ;;  %7325 = vmatprep.subr.mxu0 %v10009_v2 }
0x1154   :  { %7332 = vmatprep.subr.mxu1 %v10009_v2  ;;  %7326 = vmatpush3.msra.mxu0 %v8798_v41 }
0x1155   :  { %7316 = vmatprep.mubr.msk.f32.mxu1 %vm1908_vm5, %v1951_v10  ;;  %7333 = vmatpush3.msra.mxu1 %v8643_v49  ;;  %v8806_v39 = vpop.permute.xlu1 %2151  ;;  %v8841_v10 = vrot.slane %v8679_v24, %v8484_v54 }
0x1156   :  { %v7958_v11 = vpop.eup %7957  ;;  %7334 = vmatprep.subr.mxu1 %v10009_v2 }
0x1157   :  { %v1952_v13 = vmul.f32 %v7958_v11, %v7950_v52  ;;  %7335 = vmatpush3.msra.mxu1 %v8660_v20 }
0x1158   :  { %7336 = vmatprep.subr.mxu1 %v10009_v2 }
0x1159   :  { %7317 = vmatmul.mubr.msk.f32.gmra.mxu1 %vm1908_vm5, %v1952_v13 }
0x115a   :  { %7337 = vmatpush3.msra.mxu1 %v8652_v51  ;;  %7338 = vmatprep.mubr.msk.f32.mxu1 %vm8159_vm4, %v10009_v2 }
0x1212   :  { %v7315_v58 = vpop.f32.mrf.mxu1 }
0x1213   :  { %v2054_v17 = vmul.f32 %v7315_v58, %v8429_v18 }
0x1214   :  { %v2034_v21 = vpop.f32.mrf.mxu1 }
0x1215   :  { %v2053_v38 = vmul.f32 %v2034_v21, %v8461_v42 }
0x1217   :  { %v2055_v25 = vadd.f32 %v2054_v17, %v2053_v38 }
0x1219   :  { %v7318_v22 = vpop.f32.mrf.mxu1 }
0x121a   :  { %v2058_v46 = vmul.f32 %v7318_v22, %v8495_v57 }
0x121b   :  { %v2044_v23 = vpop.f32.mrf.mxu1 }
0x121c   :  { %v2056_v28 = vmul.f32 %v2044_v23, %v8481_v53 }
0x121e   :  { %v2057_v30 = vadd.f32 %v2056_v28, %v2055_v25 }
0x1220   :  { %v2059_v33 = vadd.f32 %v2058_v46, %v2057_v30 }
0x1222   :  { %7328 = vmatmul.mubr.msk.f32.vlgmr.msra.gmra.mxu0 %vm233_vm0, %v2059_v33 }
0x12e2   :  { %v2145_v12 = vpop.f32.mrf.mxu0 }
0x12e3   :  { %v2149_v44 = vadd.f32 %v2145_v12, %v8627_v31 }
0x12e4   :  { %v7329_v45 = vpop.f32.mrf.mxu0 }
0x12e5   :  { %v8810_v47 = vadd.f32 %v8806_v39, %v2149_v44 }
0x12e7   :  { %v2155_v52 = vsel %vm233_vm0, %v8810_v47, 0.0 }
0x12e8   :  { %2156 = vadd.xlane.f32.xlu0 %v2155_v52 }
0x12fe   :  { %1597 = vrot.lane.b32.xlu0 %v8617_v43, %s8155_s19 }
0x1371   :  { %v2157_v55 = vpop.xlane.xlu0 %2156 }
0x1372   :  { %v2158_v56 = vmul.f32 0.03125, %v2157_v55 }
0x1374   :  { %v2159_v0 = vsub.f32 %v8810_v47, %v2158_v56 }
0x1375   :  { %v1598_v19 = vpop.permute.xlu0 %1597 }
0x1376   :  { %v8818_v3 = vadd.f32 %v8723_v35, %v1598_v19  ;;  %v2160_v31 = vmul.f32 %v2159_v0, %v2159_v0  ;;  %v8821_v4 = vadd.f32 %v8725_v36, %v1598_v19 }
0x1378   :  { %7341 = vmatprep.subr.msk.mxu0 %vm233_vm0, %v8818_v3  ;;  %v2161_v5 = vsel %vm233_vm0, %v2160_v31, 0.0 }
0x1379   :  { %2162 = vadd.xlane.f32.xlu1 %v2161_v5  ;;  %7342 = vmatpush3.xpose.msk.msra.mxu0 %vm233_vm0, %v8818_v3 }
0x137a   :  { %7343 = vmatprep.subr.msk.mxu0 %vm233_vm0, %v8821_v4 }
0x137d   :  { %7344 = vmatpush3.xpose.msk.msra.mxu0 %vm233_vm0, %v8821_v4 }
0x137e   :  { %7372 = vmatprep.subr.mxu0 %v10009_v2 }
0x138a   :  { %2178 = vrot.lane.b32.xlu1 %v8617_v43, %s8156_s29 }
0x1402   :  { %v2163_v35 = vpop.xlane.xlu1 %2162 }
0x1403   :  { %v2164_v36 = vmul.f32 0.03125, %v2163_v35 }
0x1405   :  { %v2165_v6 = vadd.f32 1e-05, %v2164_v36 }
0x1406   :  { %v8846_v43 = vpop.permute.xlu1 %2178 }
0x1407   :  { %7959 = vrsqrt.f32 %v2165_v6 }
0x1414   :  { %v7960_v8 = vpop.eup %7959 }
0x1415   :  { %v2167_v9 = vmul.f32 %v7960_v8, %v2159_v0 }
0x1417   :  { %v2172_v11 = vmul.f32 %v8837_v7, %v2167_v9 }
0x1419   :  { %v2177_v13 = vadd.f32 %v8841_v10, %v2172_v11 }
0x141b   :  { %7339 = vmatmul.mubr.msk.f32.vlgmr.msra.gmra.mxu1 %vm233_vm0, %v2177_v13 }
0x14db   :  { %v2250_v58 = vpop.f32.mrf.mxu1 }
0x14dc   :  { %v2251_v21 = vadd.f32 %v2250_v58, %v8846_v43 }
0x14dd   :  { %v7340_v38 = vpop.f32.mrf.mxu1 }
0x14de   :  { %v2254_v50 = vmul.f32 0.35355338, %v2251_v21 }
0x14e0   :  { %v2255_v22 = vmul.f32 %v2254_v50, %v8461_v42  ;;  %v2256_v17 = vmul.f32 %v2254_v50, %v8429_v18  ;;  %v2257_v54 = vmul.f32 %v2254_v50, %v8481_v53  ;;  %v2258_v23 = vmul.f32 %v2254_v50, %v8495_v57 }
0x14e2   :  { %7345 = vmatprep.mubr.msk.f32.mxu0 %vm233_vm0, %v2255_v22 }
0x14e3   :  { %7346 = vmatmul.mubr.msk.f32.vlgmr.msra.gmra.mxu0 %vm233_vm0, %v2256_v17 }
0x14e4   :  { %7348 = vmatprep.mubr.msk.f32.mxu0 %vm233_vm0, %v2257_v54  ;;  %v8882_v54 = vld [vmem:[%s9997_s3 + $0x5] ss:$0 sm:$0xff] }
0x14e7   :  { %7349 = vmatmul.mubr.msk.f32.gmra.mxu0 %vm233_vm0, %v2258_v23 }
0x14e8   :  { %7380 = vmatprep.mubr.msk.f32.mxu0 %vm8159_vm4, %v10009_v2 }
0x15a3   :  { %v7347_v25 = vpop.f32.mrf.mxu0 }
0x15a4   :  { %v2365_v28 = vsel %vm965_vm3, %v7347_v25, -inf }
0x15a5   :  { %2366 = vmax.xlane.f32.xlu1 %v2365_v28  ;;  %v2343_v46 = vpop.f32.mrf.mxu0 }
0x15a6   :  { %v2362_v30 = vsel %vm965_vm3, %v2343_v46, -inf }
0x15a7   :  { %2363 = vmax.xlane.f32.xlu0 %v2362_v30  ;;  %v7350_v33 = vpop.f32.mrf.mxu0 }
0x15a8   :  { %v2371_v45 = vsel %vm965_vm3, %v7350_v33, -inf }
0x15a9   :  { %v2353_v12 = vpop.f32.mrf.mxu0 }
0x15aa   :  { %v2368_v44 = vsel %vm965_vm3, %v2353_v12, -inf }
0x15ab   :  { %2369 = vmax.xlane.f32.xlu0 %v2368_v44 }
0x15af   :  { %2372 = vmax.xlane.f32.xlu0 %v2371_v45 }
0x162e   :  { %v2367_v52 = vpop.xlane.xlu1 %2366 }
0x162f   :  { %v2375_v55 = vsub.f32 %v7347_v25, %v2367_v52 }
0x1630   :  { %v2364_v56 = vpop.xlane.xlu0 %2363 }
0x1631   :  { %v2380_v0 = vmul.f32 1.442695, %v2375_v55  ;;  %v2374_v19 = vsub.f32 %v2343_v46, %v2364_v56 }
0x1633   :  { %7961 = vpow2.f32 %v2380_v0  ;;  %v2378_v31 = vmul.f32 1.442695, %v2374_v19 }
0x1634   :  { %v2370_v5 = vpop.xlane.xlu0 %2369 }
0x1635   :  { %7963 = vpow2.f32 %v2378_v31  ;;  %v2376_v35 = vsub.f32 %v2353_v12, %v2370_v5 }
0x1637   :  { %v2382_v36 = vmul.f32 1.442695, %v2376_v35 }
0x1638   :  { %v2373_v6 = vpop.xlane.xlu0 %2372 }
0x1639   :  { %7965 = vpow2.f32 %v2382_v36  ;;  %v2377_v8 = vsub.f32 %v7350_v33, %v2373_v6 }
0x163b   :  { %v2384_v9 = vmul.f32 1.442695, %v2377_v8 }
0x163d   :  { %7967 = vpow2.f32 %v2384_v9 }
0x1640   :  { %v7962_v11 = vpop.eup %7961 }
0x1641   :  { %v2389_v13 = vsel %vm965_vm3, %v7962_v11, 0.0 }
0x1642   :  { %v7964_v58 = vpop.eup %7963  ;;  %2390 = vadd.xlane.f32.xlu0 %v2389_v13 }
0x1643   :  { %v2386_v21 = vsel %vm965_vm3, %v7964_v58, 0.0 }
0x1644   :  { %2387 = vadd.xlane.f32.xlu1 %v2386_v21 }
0x1646   :  { %v7966_v38 = vpop.eup %7965 }
0x1647   :  { %v2392_v50 = vsel %vm965_vm3, %v7966_v38, 0.0 }
0x1648   :  { %2393 = vadd.xlane.f32.xlu1 %v2392_v50 }
0x164a   :  { %v7968_v22 = vpop.eup %7967 }
0x164b   :  { %v2395_v17 = vsel %vm965_vm3, %v7968_v22, 0.0 }
0x164c   :  { %2396 = vadd.xlane.f32.xlu0 %v2395_v17 }
0x1659   :  { %2408 = vrot.lane.b32.xlu1 %v8818_v3, %s8156_s29 }
0x165d   :  { %2522 = vrot.lane.b32.xlu1 %v8638_v48, %s8157_s12 }
0x1661   :  { %2520 = vrot.lane.b32.xlu1 %v8643_v49, %s8157_s12 }
0x1662   :  { %2406 = vrot.lane.b32.xlu0 %v8821_v4, %s8156_s29 }
0x1665   :  { %2516 = vrot.lane.b32.xlu1 %v8652_v51, %s8157_s12 }
0x1666   :  { %2518 = vrot.lane.b32.xlu0 %v8660_v20, %s8157_s12 }
0x166a   :  { %2602 = vrot.lane.b32.xlu0 %v8882_v54, %s8156_s29 }
0x16cb   :  { %v2391_v48 = vpop.xlane.xlu0 %2390 }
0x16cc   :  { %7969 = vrcp.f32 %v2391_v48 }
0x16cd   :  { %v2388_v49 = vpop.xlane.xlu1 %2387 }
0x16ce   :  { %7971 = vrcp.f32 %v2388_v49 }
0x16d1   :  { %v2394_v23 = vpop.xlane.xlu1 %2393 }
0x16d2   :  { %7973 = vrcp.f32 %v2394_v23  ;;  %v8110_v23 = vld [vmem:[%s9995_s2 + $0x70] sm:$0xff] }
0x16d5   :  { %v8886_v25 = vpop.permute.xlu1 %2408  ;;  %v2397_v51 = vpop.xlane.xlu0 %2396 }
0x16d6   :  { %7975 = vrcp.f32 %v2397_v51  ;;  %7351 = vmatprep.subr.mxu1 %v8886_v25  ;;  %v8111_v51 = vld [vmem:[%s9995_s2 + $0x68] sm:$0xff] }
0x16d7   :  { %7352 = vmatpush3.msra.mxu1 %v8886_v25 }
0x16d9   :  { %v8890_v20 = vpop.permute.xlu0 %2406  ;;  %v7970_v28 = vpop.eup %7969 }
0x16da   :  { %7353 = vmatprep.subr.mxu1 %v8890_v20  ;;  %v2403_v33 = vmul.f32 %v7970_v28, %v7962_v11  ;;  %v8901_v55 = vpop.permute.xlu1 %2522  ;;  %v8113_v28 = vld [vmem:[%s9995_s2 + $0x48] sm:$0xff] }
0x16db   :  { %v7972_v46 = vpop.eup %7971  ;;  %7354 = vmatpush3.msra.mxu1 %v8890_v20 }
0x16dc   :  { %v2402_v30 = vmul.f32 %v7972_v46, %v7964_v58  ;;  %7361 = vmatprep.subr.mxu1 %v10009_v2  ;;  %v8114_v46 = vld [vmem:[%s9995_s2 + $0x38] sm:$0xff] }
0x16dd   :  { %v8909_v0 = vpop.permute.xlu0 %2518 }
0x16de   :  { %7355 = vmatprep.mubr.msk.f32.mxu1 %vm965_vm3, %v2402_v30  ;;  %v8905_v56 = vpop.permute.xlu1 %2520  ;;  %v8115_v30 = vld [vmem:[%s9995_s2 + $0x28] sm:$0xff] }
0x16df   :  { %v7974_v12 = vpop.eup %7973  ;;  %7356 = vmatmul.mubr.msk.f32.vlgmr.msra.gmra.mxu1 %vm965_vm3, %v2403_v33  ;;  %v8116_v33 = vld [vmem:[%s9995_s2 + $0x18] sm:$0xff] }
0x16e0   :  { %v2404_v44 = vmul.f32 %v7974_v12, %v7966_v38  ;;  %7362 = vmatpush3.msra.mxu1 %v8901_v55  ;;  %v8117_v12 = vld [vmem:[%s9995_s2 + $0x8] sm:$0xff] }
0x16e1   :  { %7363 = vmatprep.subr.mxu1 %v10009_v2  ;;  %v8924_v50 = vpop.permute.xlu0 %2602 }
0x16e2   :  { %7358 = vmatprep.mubr.msk.f32.mxu1 %vm965_vm3, %v2404_v44  ;;  %7364 = vmatpush3.msra.mxu1 %v8905_v56  ;;  %v8912_v19 = vpop.permute.xlu1 %2516  ;;  %10058 = vst [vmem:[#allocation10_spill] sm:$0xff] %v8924_v50 }
0x16e3   :  { %v7976_v45 = vpop.eup %7975  ;;  %7365 = vmatprep.subr.mxu1 %v10009_v2 }
0x16e4   :  { %v2405_v52 = vmul.f32 %v7976_v45, %v7968_v22  ;;  %7366 = vmatpush3.msra.mxu1 %v8909_v0 }
0x16e5   :  { %7367 = vmatprep.subr.mxu1 %v10009_v2 }
0x16e6   :  { %7359 = vmatmul.mubr.msk.f32.gmra.mxu1 %vm965_vm3, %v2405_v52 }
0x16e7   :  { %7369 = vmatprep.mubr.msk.f32.mxu1 %vm8159_vm4, %v10009_v2  ;;  %7368 = vmatpush3.msra.mxu1 %v8912_v19 }
0x16e8   :  { %7383 = vmatprep.subr.mxu1 %v10009_v2 }
0x179f   :  { %v7357_v31 = vpop.f32.mrf.mxu1 }
0x17a0   :  { %v2510_v6 = vmul.f32 %v7357_v31, %v8429_v18 }
0x17a1   :  { %v2490_v5 = vpop.f32.mrf.mxu1 }
0x17a2   :  { %v2509_v35 = vmul.f32 %v2490_v5, %v8461_v42 }
0x17a4   :  { %v2511_v9 = vadd.f32 %v2510_v6, %v2509_v35  ;;  %v8118_v35 = vld [vmem:[%s9995_s2 + $0x78] sm:$0xff]  ;;  %v8119_v6 = vld [vmem:[%s9995_s2 + $0x60] sm:$0xff] }
0x17a6   :  { %v7360_v36 = vpop.f32.mrf.mxu1 }
0x17a7   :  { %v2514_v13 = vmul.f32 %v7360_v36, %v8495_v57  ;;  %v8973_v36 = vld [vmem:[%s9998_s1 + $0x98] sm:$0xff] }
0x17a8   :  { %v2500_v8 = vpop.f32.mrf.mxu1  ;;  %7373 = vmatpush3.msra.mxu0 %v8973_v36 }
0x17a9   :  { %v2512_v11 = vmul.f32 %v2500_v8, %v8481_v53  ;;  %7374 = vmatprep.subr.mxu0 %v10009_v2  ;;  %v8984_v8 = vld [vmem:[%s9998_s1 + $0x90] sm:$0xff] }
0x17aa   :  { %7375 = vmatpush3.msra.mxu0 %v8984_v8 }
0x17ab   :  { %v2513_v58 = vadd.f32 %v2512_v11, %v2511_v9  ;;  %7376 = vmatprep.subr.mxu0 %v10009_v2  ;;  %v8991_v9 = vld [vmem:[%s9998_s1 + $0x88] sm:$0xff]  ;;  %v8996_v11 = vld [vmem:[%s9998_s1 + $0x80] sm:$0xff] }
0x17ac   :  { %7377 = vmatpush3.msra.mxu0 %v8991_v9 }
0x17ad   :  { %v2515_v21 = vadd.f32 %v2514_v13, %v2513_v58  ;;  %v8120_v13 = vld [vmem:[%s9995_s2 + $0x50] sm:$0xff]  ;;  %7378 = vmatprep.subr.mxu0 %v10009_v2  ;;  %v8121_v58 = vld [vmem:[%s9995_s2 + $0x40] sm:$0xff] }
0x17ae   :  { %7379 = vmatpush3.msra.mxu0 %v8996_v11 }
0x17af   :  { %7370 = vmatmul.mubr.msk.f32.vlgmr.msra.gmra.mxu1 %vm233_vm0, %v2515_v21  ;;  %7418 = vmatprep.subr.mxu0 %v10009_v2  ;;  %v8122_v21 = vld [vmem:[%s9995_s2 + $0x30] sm:$0xff] }
0x17b0   :  { %7415 = vmatprep.mubr.msk.f32.mxu1 %vm8159_vm4, %v10009_v2 }
0x186f   :  { %v2597_v38 = vpop.f32.mrf.mxu1 }
0x1870   :  { %v2601_v22 = vadd.f32 %v2597_v38, %v8810_v47  ;;  %v8112_v47 = vld [vmem:[%s9995_s2 + $0x58] sm:$0xff]  ;;  %v8123_v38 = vld [vmem:[%s9995_s2 + $0x20] sm:$0xff] }
0x1871   :  { %v7371_v17 = vpop.f32.mrf.mxu1 }
0x1872   :  { %v8928_v48 = vadd.f32 %v8924_v50, %v2601_v22  ;;  %v8124_v22 = vld [vmem:[%s9995_s2 + $0x10] sm:$0xff]  ;;  %v8125_v17 = vld [vmem:[%s9995_s2] sm:$0xff] }
0x1874   :  { %v2606_v49 = vsel %vm233_vm0, %v8928_v48, 0.0 }
0x1875   :  { %2607 = vadd.xlane.f32.xlu1 %v2606_v49 }
0x1886   :  { %2748 = vrot.lane.b32.xlu1 %v8110_v23, %s8156_s29 }
0x188a   :  { %2746 = vrot.lane.b32.xlu1 %v8111_v51, %s8156_s29 }
0x188e   :  { %2742 = vrot.lane.b32.xlu1 %v8112_v47, %s8156_s29 }
0x1892   :  { %2738 = vrot.lane.b32.xlu1 %v8113_v28, %s8156_s29  ;;  %v9033_v28 = vrot.slane %v8679_v24, %v1566_v40 }
0x1894   :  { %10059 = vst [vmem:[#allocation11_spill] sm:$0xff] %v9033_v28 }
0x1896   :  { %2734 = vrot.lane.b32.xlu1 %v8114_v46, %s8156_s29 }
0x189a   :  { %2730 = vrot.lane.b32.xlu1 %v8115_v30, %s8156_s29  ;;  %v9038_v30 = vrot.slane %v8679_v24, %v1572_v60 }
0x189c   :  { %10060 = vst [vmem:[#allocation12_spill] sm:$0xff] %v9038_v30 }
0x189e   :  { %2726 = vrot.lane.b32.xlu1 %v8116_v33, %s8156_s29 }
0x18a2   :  { %2722 = vrot.lane.b32.xlu1 %v8117_v12, %s8156_s29 }
0x18fe   :  { %v2608_v44 = vpop.xlane.xlu1 %2607 }
0x18ff   :  { %v2609_v45 = vmul.f32 0.03125, %v2608_v44 }
0x1901   :  { %v2610_v52 = vsub.f32 %v8928_v48, %v2609_v45 }
0x1902   :  { %v9045_v45 = vpop.permute.xlu1 %2748 }
0x1903   :  { %v2611_v31 = vmul.f32 %v2610_v52, %v2610_v52 }
0x1905   :  { %v2612_v5 = vsel %vm233_vm0, %v2611_v31, 0.0 }
0x1906   :  { %2613 = vadd.xlane.f32.xlu0 %v2612_v5  ;;  %v9049_v40 = vpop.permute.xlu1 %2746 }
0x191c   :  { %2750 = vrot.lane.b32.xlu0 %v8118_v35, %s8156_s29 }
0x1920   :  { %2744 = vrot.lane.b32.xlu0 %v8119_v6, %s8156_s29 }
0x1924   :  { %2740 = vrot.lane.b32.xlu0 %v8120_v13, %s8156_s29 }
0x1928   :  { %2736 = vrot.lane.b32.xlu0 %v8121_v58, %s8156_s29 }
0x192c   :  { %2732 = vrot.lane.b32.xlu0 %v8122_v21, %s8156_s29 }
0x1930   :  { %2728 = vrot.lane.b32.xlu0 %v8123_v38, %s8156_s29 }
0x1934   :  { %2724 = vrot.lane.b32.xlu0 %v8124_v22, %s8156_s29 }
0x1938   :  { %2720 = vrot.lane.b32.xlu0 %v8125_v17, %s8156_s29 }
0x198f   :  { %v2614_v49 = vpop.xlane.xlu0 %2613 }
0x1990   :  { %v2615_v23 = vmul.f32 0.03125, %v2614_v49 }
0x1992   :  { %v2616_v51 = vadd.f32 1e-05, %v2615_v23  ;;  %v9107_v23 = vld [vmem:[%s9997_s3 + $0x4] ss:$0 sm:$0xff] }
0x1993   :  { %v9026_v47 = vpop.permute.xlu0 %2750 }
0x1994   :  { %7977 = vrsqrt.f32 %v2616_v51  ;;  %7384 = vmatpush3.msra.mxu1 %v9026_v47 }
0x1995   :  { %7385 = vmatprep.subr.mxu1 %v10009_v2 }
0x1996   :  { %7386 = vmatpush3.msra.mxu1 %v9045_v45 }
0x1997   :  { %7387 = vmatprep.subr.mxu1 %v10009_v2  ;;  %v9052_v60 = vpop.permute.xlu0 %2744 }
0x1998   :  { %7388 = vmatpush3.msra.mxu1 %v9049_v40 }
0x1999   :  { %7389 = vmatprep.subr.mxu1 %v10009_v2 }
0x199a   :  { %7390 = vmatpush3.msra.mxu1 %v9052_v60 }
0x199b   :  { %7391 = vmatprep.subr.mxu1 %v10009_v2  ;;  %v9060_v31 = vpop.permute.xlu0 %2740 }
0x199f   :  { %v9068_v35 = vpop.permute.xlu0 %2736 }
0x19a1   :  { %v7978_v46 = vpop.eup %7977 }
0x19a2   :  { %v2618_v33 = vmul.f32 %v7978_v46, %v2610_v52  ;;  %v9057_v52 = vpop.permute.xlu1 %2742 }
0x19a3   :  { %7392 = vmatpush3.msra.mxu1 %v9057_v52  ;;  %v9076_v13 = vpop.permute.xlu0 %2732 }
0x19a4   :  { %v2623_v12 = vmul.f32 %v9033_v28, %v2618_v33  ;;  %7393 = vmatprep.subr.mxu1 %v10009_v2 }
0x19a5   :  { %7394 = vmatpush3.msra.mxu1 %v9060_v31 }
0x19a6   :  { %v2628_v44 = vadd.f32 %v9038_v30, %v2623_v12  ;;  %7395 = vmatprep.subr.mxu1 %v10009_v2  ;;  %v9065_v5 = vpop.permute.xlu1 %2738 }
0x19a7   :  { %7396 = vmatpush3.msra.mxu1 %v9065_v5  ;;  %v9084_v21 = vpop.permute.xlu0 %2728 }
0x19a8   :  { %7381 = vmatmul.mubr.msk.f32.vlgmr.msra.gmra.mxu0 %vm233_vm0, %v2628_v44  ;;  %7397 = vmatprep.subr.mxu1 %v10009_v2  ;;  %10062 = vst [vmem:[#allocation14_spill] sm:$0xff] %v9084_v21 }
0x19a9   :  { %7426 = vmatprep.mubr.msk.f32.mxu0 %vm8159_vm4, %v10009_v2  ;;  %7398 = vmatpush3.msra.mxu1 %v9068_v35 }
0x19aa   :  { %7399 = vmatprep.subr.mxu1 %v10009_v2  ;;  %v9073_v6 = vpop.permute.xlu1 %2734 }
0x19ab   :  { %7400 = vmatpush3.msra.mxu1 %v9073_v6  ;;  %v9092_v22 = vpop.permute.xlu0 %2724 }
0x19ac   :  { %7401 = vmatprep.subr.mxu1 %v10009_v2  ;;  %10064 = vst [vmem:[#allocation16_spill] sm:$0xff] %v9092_v22 }
0x19ad   :  { %7402 = vmatpush3.msra.mxu1 %v9076_v13 }
0x19ae   :  { %7403 = vmatprep.subr.mxu1 %v10009_v2  ;;  %v9081_v58 = vpop.permute.xlu1 %2730 }
0x19af   :  { %10061 = vst [vmem:[#allocation13_spill] sm:$0xff] %v9081_v58  ;;  %7404 = vmatpush3.msra.mxu1 %v9081_v58  ;;  %v9100_v49 = vpop.permute.xlu0 %2720 }
0x19b0   :  { %7405 = vmatprep.subr.mxu1 %v10009_v2  ;;  %10066 = vst [vmem:[#allocation18_spill] sm:$0xff] %v9100_v49 }
0x19b1   :  { %7406 = vmatpush3.msra.mxu1 %v9084_v21 }
0x19b2   :  { %7407 = vmatprep.subr.mxu1 %v10009_v2  ;;  %v9089_v38 = vpop.permute.xlu1 %2726 }
0x19b3   :  { %10063 = vst [vmem:[#allocation15_spill] sm:$0xff] %v9089_v38  ;;  %7408 = vmatpush3.msra.mxu1 %v9089_v38 }
0x19b4   :  { %7409 = vmatprep.subr.mxu1 %v10009_v2 }
0x19b5   :  { %7410 = vmatpush3.msra.mxu1 %v9092_v22 }
0x19b6   :  { %7411 = vmatprep.subr.mxu1 %v10009_v2  ;;  %v9097_v17 = vpop.permute.xlu1 %2722 }
0x19b7   :  { %10065 = vst [vmem:[#allocation17_spill] sm:$0xff] %v9097_v17  ;;  %7412 = vmatpush3.msra.mxu1 %v9097_v17 }
0x19b8   :  { %7413 = vmatprep.subr.mxu1 %v10009_v2 }
0x19b9   :  { %7414 = vmatpush3.msra.mxu1 %v9100_v49 }
0x1a68   :  { %v2707_v51 = vpop.f32.mrf.mxu0 }
0x1a69   :  { %v2708_v46 = vadd.f32 %v9107_v23, %v2707_v51 }
0x1a6a   :  { %v7382_v33 = vpop.f32.mrf.mxu0 }
0x1a6b   :  { %v2711_v12 = vmul.f32 %v2708_v46, %v2708_v46 }
0x1a6d   :  { %v2712_v44 = vmul.f32 %v2711_v12, %v2708_v46 }
0x1a6f   :  { %v2713_v61 = vmul.f32 0.044715, %v2712_v44 }
0x1a71   :  { %v2714_v30 = vadd.f32 %v2713_v61, %v2708_v46 }
0x1a73   :  { %v2715_v28 = vmul.f32 0.7978846, %v2714_v30 }
0x1a75   :  { %7979 = vtanh.f32 %v2715_v28  ;;  %v9134_v28 = vld [vmem:[%s9998_s1 + $0xa0] sm:$0xff] }
0x1a82   :  { %v7980_v50 = vpop.eup %7979 }
0x1a83   :  { %v2717_v17 = vadd.f32 1.0, %v7980_v50  ;;  %v10067_v50 = vmov 0.0  }
0x1a85   :  { %v2718_v2 = vmul.f32 0.5, %v2717_v17 }
0x1a87   :  { %v2719_v22 = vmul.f32 %v2718_v2, %v2708_v46  ;;  %v9115_v2 = vld [vmem:[%s9998_s1 + $0xb8] sm:$0xff]  ;;  %v2858_v46 = vrot.slane %v8679_v24, 7 }
0x1a88   :  { %7419 = vmatpush3.msra.mxu0 %v9115_v2 }
0x1a89   :  { %7416 = vmatmul.mubr.f32.vlgmr.msra.gmra.mxu1 %v2719_v22  ;;  %7420 = vmatprep.subr.mxu0 %v10067_v50  ;;  %v10023_v22 = vrot.slane %v8679_v24, 6 }
0x1b49   :  { %v2834_v49 = vpop.f32.mrf.mxu1 }
0x1b4a   :  { %v2838_v38 = vadd.f32 %v2834_v49, %v8928_v48  ;;  %v9127_v48 = vld [vmem:[%s9998_s1 + $0xa8] sm:$0xff] }
0x1b4b   :  { %v7417_v21 = vpop.f32.mrf.mxu1 }
0x1b4c   :  { %v2839_v58 = vadd.f32 %v8882_v54, %v2838_v38  ;;  %v9122_v54 = vld [vmem:[%s9998_s1 + $0xb0] sm:$0xff] }
0x1b4d   :  { %7421 = vmatpush3.msra.mxu0 %v9122_v54 }
0x1b4e   :  { %v2841_v51 = vsel %vm2840_vm6, %v2839_v58, 0.0  ;;  %7422 = vmatprep.subr.mxu0 %v10067_v50 }
0x1b4f   :  { %2842 = vadd.xlane.f32.xlu1 %v2841_v51  ;;  %7423 = vmatpush3.msra.mxu0 %v9127_v48 }
0x1b50   :  { %7424 = vmatprep.subr.mxu0 %v10067_v50 }
0x1b51   :  { %7425 = vmatpush3.msra.mxu0 %v9134_v28 }
0x1b52   :  { %7429 = vmatprep.subr.mxu0 %v10067_v50 }
0x1bd8   :  { %v2843_v33 = vpop.xlane.xlu1 %2842 }
0x1bd9   :  { %v2844_v12 = vmul.f32 0.03125, %v2843_v33 }
0x1bdb   :  { %v2845_v44 = vsub.f32 %v2839_v58, %v2844_v12  ;;  %v10068_v12 = vlaneseq }
0x1bdd   :  { %v2846_v61 = vmul.f32 %v2845_v44, %v2845_v44 }
0x1bdf   :  { %v2847_v30 = vsel %vm2840_vm6, %v2846_v61, 0.0 }
0x1be0   :  { %2848 = vadd.xlane.f32.xlu0 %v2847_v30 }
0x1c69   :  { %v2849_v58 = vpop.xlane.xlu0 %2848 }
0x1c6a   :  { %v2850_v21 = vmul.f32 0.03125, %v2849_v58 }
0x1c6c   :  { %v2851_v38 = vadd.f32 1e-05, %v2850_v21 }
0x1c6e   :  { %7981 = vrsqrt.f32 %v2851_v38 }
0x1c7b   :  { %v7982_v17 = vpop.eup %7981 }
0x1c7c   :  { %v2853_v49 = vmul.f32 %v7982_v17, %v2845_v44  ;;  %v9156_v44 = vand.u32 127, %v10068_v12  ;;  %v9184_v12 = vld [vmem:[%s9997_s3 + $0x28] sm:$0xff] }
0x1c7e   :  { %v2857_v51 = vmul.f32 %v10023_v22, %v2853_v49  ;;  %vm2934_vm7 = vcmp.lt.s32.totalorder %v9156_v44, 64  ;;  %v9163_v38 = vcvt.s32.f32 %v9156_v44 }
0x1c80   :  { %v2860_v33 = vadd.f32 %v2858_v46, %v2857_v51 }
0x1c82   :  { %7427 = vmatmul.mubr.msk.f32.vlgmr.msra.gmra.mxu0 %vm233_vm0, %v2860_v33  ;;  %v10021_v33 = vmov 1.0  }
0x1c83   :  { %7430 = vmatpush3.xpose.msra.mxu0 %v9115_v2  ;;  %7437 = vmatprep.mubr.msk.f32.mxu0 %vm8159_vm4, %v10067_v50 }
0x1c84   :  { %7431 = vmatprep.subr.mxu0 %v10067_v50 }
0x1c87   :  { %7432 = vmatpush3.xpose.msra.mxu0 %v9122_v54 }
0x1c88   :  { %7433 = vmatprep.subr.mxu0 %v10067_v50 }
0x1c8b   :  { %7434 = vmatpush3.xpose.msra.mxu0 %v9127_v48 }
0x1c8c   :  { %7435 = vmatprep.subr.mxu0 %v10067_v50 }
0x1c8f   :  { %7436 = vmatpush3.xpose.msra.mxu0 %v9134_v28 }
0x1c90   :  { %7440 = vmatprep.subr.mxu0 %v10067_v50 }
0x1d42   :  { %v2930_v61 = vpop.f32.mrf.mxu0 }
0x1d43   :  { %v2935_v30 = vsel %vm2934_vm7, %v2930_v61, -1e+30 }
0x1d44   :  { %v2937_v58 = vsel %vm2936_vm8, %v2935_v30, -inf  ;;  %v7428_v21 = vpop.f32.mrf.mxu0 }
0x1d45   :  { %2938 = vmax.xlane.f32.xlu0 %v2937_v58 }
0x1dce   :  { %v2939_v17 = vpop.xlane.xlu0 %2938 }
0x1dcf   :  { %vm2940_vm9 = vcmp.ge.f32.partialorder %v2935_v30, %v2939_v17 }
0x1dd0   :  { %v2941_v49 = vsel %vm2940_vm9, %v9163_v38, 128.0 }
0x1dd1   :  { %v2942_v46 = vsel %vm2936_vm8, %v2941_v49, inf }
0x1dd2   :  { %2943 = vmin.xlane.f32.xlu1 %v2942_v46 }
0x1e5b   :  { %v9167_v51 = vpop.xlane.xlu1 %2943 }
0x1e5c   :  { %10069 = vst [vmem:[#allocation19_spill] sm:$0xff] %v9167_v51  ;;  %vm2945_vm10 = vcmp.eq.f32.partialorder %v9163_v38, %v9167_v51 }
0x1e5d   :  { %7438 = vmatmul.mubr.msk.f32.vlgmr.msra.gmra.mxu0 %vm2945_vm10, %v10021_v33 }
0x1e5e   :  { %7441 = vmatpush3.msra.mxu0 %v8684_v29  ;;  %7448 = vmatprep.mubr.msk.f32.mxu0 %vm8159_vm4, %v10067_v50 }
0x1e5f   :  { %7442 = vmatprep.subr.mxu0 %v10067_v50 }
0x1e60   :  { %7443 = vmatpush3.msra.mxu0 %v8695_v27  ;;  %v8126_v27 = vld [vmem:[%s9997_s3 + $0x50] sm:$0xff] }
0x1e61   :  { %7444 = vmatprep.subr.mxu0 %v10067_v50 }
0x1e62   :  { %7445 = vmatpush3.msra.mxu0 %v8708_v59 }
0x1e63   :  { %7446 = vmatprep.subr.mxu0 %v10067_v50 }
0x1e64   :  { %7447 = vmatpush3.msra.mxu0 %v8716_v34 }
0x1f1d   :  { %v3014_v29 = vpop.f32.mrf.mxu0 }
0x1f1e   :  { %v3022_v61 = vrot.slane %v3014_v29, %v8434_v26 }
0x1f1f   :  { %v7439_v30 = vpop.f32.mrf.mxu0 }
0x1f20   :  { %v3023_v58 = vadd.f32 %v3022_v61, %v9184_v12 }
0x1f22   :  { %v9194_v59 = vsel %vm3018_vm11, %v3023_v58, %v8126_v27 }
0x1f23   :  { %v3032_v34 = vsel %vm233_vm0, %v9194_v59, 0.0 }
0x1f24   :  { %3033 = vadd.xlane.f32.xlu0 %v3032_v34 }
0x1fad   :  { %v3034_v21 = vpop.xlane.xlu0 %3033 }
0x1fae   :  { %v3035_v17 = vmul.f32 0.03125, %v3034_v21 }
0x1fb0   :  { %v3036_v49 = vsub.f32 %v9194_v59, %v3035_v17 }
0x1fb2   :  { %v3037_v46 = vmul.f32 %v3036_v49, %v3036_v49 }
0x1fb4   :  { %v3038_v29 = vsel %vm233_vm0, %v3037_v46, 0.0 }
0x1fb5   :  { %3039 = vadd.xlane.f32.xlu1 %v3038_v29 }
0x203e   :  { %v3040_v61 = vpop.xlane.xlu1 %3039 }
0x203f   :  { %v3041_v30 = vmul.f32 0.03125, %v3040_v61 }
0x2041   :  { %v3042_v33 = vadd.f32 1e-05, %v3041_v30 }
0x2043   :  { %7983 = vrsqrt.f32 %v3042_v33 }
0x2050   :  { %v7984_v22 = vpop.eup %7983 }
0x2051   :  { %v3044_v51 = vmul.f32 %v7984_v22, %v3036_v49 }
0x2053   :  { %v3045_v58 = vmul.f32 %v3044_v51, %v8688_v32 }
0x2055   :  { %v3046_v27 = vadd.f32 %v3045_v58, %v8702_v63 }
0x2057   :  { %7449 = vmatmul.mubr.msk.f32.vlgmr.msra.gmra.mxu0 %vm233_vm0, %v3046_v27 }
0x2117   :  { %v3116_v34 = vpop.f32.mrf.mxu0 }
0x2118   :  { %v9204_v21 = vadd.f32 %v8730_v37, %v3116_v34 }
0x2119   :  { %v7450_v17 = vpop.f32.mrf.mxu0 }
0x211a   :  { %v3120_v46 = vmul.f32 0.35355338, %v9204_v21  ;;  %3126 = vrot.lane.b32.xlu0 %v9204_v21, %s8156_s29 }
0x211c   :  { %v3121_v33 = vmul.f32 %v3120_v46, %v8461_v42  ;;  %v3122_v51 = vmul.f32 %v3120_v46, %v8429_v18  ;;  %v3123_v37 = vmul.f32 %v3120_v46, %v8481_v53  ;;  %v3124_v49 = vmul.f32 %v3120_v46, %v8495_v57 }
0x211e   :  { %7453 = vmatprep.mubr.msk.f32.mxu1 %vm233_vm0, %v3121_v33 }
0x218c   :  { %v3127_v22 = vpop.permute.xlu0 %3126 }
0x218d   :  { %7451 = vmatprep.subr.msk.mxu1 %vm233_vm0, %v3127_v22 }
0x218e   :  { %7452 = vmatpush3.xpose.msk.msra.mxu1 %vm233_vm0, %v3127_v22 }
0x218f   :  { %7467 = vmatprep.subr.mxu1 %v10067_v50 }
0x2191   :  { %7454 = vmatmul.mubr.msk.f32.vlgmr.msra.gmra.mxu1 %vm233_vm0, %v3122_v51 }
0x2192   :  { %7456 = vmatprep.mubr.msk.f32.mxu1 %vm233_vm0, %v3123_v37  ;;  %7468 = vmatpush3.msra.mxu1 %v8786_v14 }
0x2193   :  { %7469 = vmatprep.subr.mxu1 %v10067_v50 }
0x2194   :  { %7470 = vmatpush3.msra.mxu1 %v8790_v15 }
0x2195   :  { %7457 = vmatmul.mubr.msk.f32.gmra.mxu1 %vm233_vm0, %v3124_v49  ;;  %7471 = vmatprep.subr.mxu1 %v10067_v50 }
0x2196   :  { %7472 = vmatpush3.msra.mxu1 %v8794_v16  ;;  %7475 = vmatprep.mubr.msk.f32.mxu1 %vm8159_vm4, %v10067_v50 }
0x2197   :  { %7473 = vmatprep.subr.mxu1 %v10067_v50 }
0x2198   :  { %7474 = vmatpush3.msra.mxu1 %v8798_v41 }
0x2199   :  { %7489 = vmatprep.subr.msk.mxu1 %vm233_vm0, %v8818_v3 }
0x2251   :  { %v7455_v29 = vpop.f32.mrf.mxu1 }
0x2252   :  { %v3214_v61 = vadd.f32 %v7455_v29, %v8747_v1 }
0x2253   :  { %v3208_v30 = vpop.f32.mrf.mxu1 }
0x2254   :  { %v3209_v58 = vadd.f32 %v3208_v30, %v8747_v1  ;;  %v3230_v27 = vsel %vm1908_vm5, %v3214_v61, -inf }
0x2255   :  { %3231 = vmax.xlane.f32.xlu1 %v3230_v27  ;;  %v7458_v34 = vpop.f32.mrf.mxu1 }
0x2256   :  { %v3227_v33 = vsel %vm1908_vm5, %v3209_v58, -inf  ;;  %v3224_v22 = vadd.f32 %v7458_v34, %v8747_v1 }
0x2257   :  { %v3218_v17 = vpop.f32.mrf.mxu1 }
0x2258   :  { %v3219_v46 = vadd.f32 %v3218_v17, %v8747_v1  ;;  %v3236_v37 = vsel %vm1908_vm5, %v3224_v22, -inf }
0x2259   :  { %3228 = vmax.xlane.f32.xlu1 %v3227_v33 }
0x225a   :  { %v3233_v51 = vsel %vm1908_vm5, %v3219_v46, -inf }
0x225d   :  { %3234 = vmax.xlane.f32.xlu1 %v3233_v51 }
0x2261   :  { %3237 = vmax.xlane.f32.xlu1 %v3236_v37 }
0x22de   :  { %v3232_v49 = vpop.xlane.xlu1 %3231 }
0x22df   :  { %v3240_v29 = vsub.f32 %v3214_v61, %v3232_v49 }
0x22e1   :  { %v3245_v30 = vmul.f32 1.442695, %v3240_v29 }
0x22e2   :  { %v3229_v41 = vpop.xlane.xlu1 %3228 }
0x22e3   :  { %7985 = vpow2.f32 %v3245_v30  ;;  %v3239_v27 = vsub.f32 %v3209_v58, %v3229_v41 }
0x22e5   :  { %v3243_v16 = vmul.f32 1.442695, %v3239_v27 }
0x22e6   :  { %v3235_v15 = vpop.xlane.xlu1 %3234 }
0x22e7   :  { %7987 = vpow2.f32 %v3243_v16  ;;  %v3241_v17 = vsub.f32 %v3219_v46, %v3235_v15 }
0x22e9   :  { %v3247_v14 = vmul.f32 1.442695, %v3241_v17 }
0x22ea   :  { %v3238_v33 = vpop.xlane.xlu1 %3237 }
0x22eb   :  { %7989 = vpow2.f32 %v3247_v14  ;;  %v3242_v1 = vsub.f32 %v3224_v22, %v3238_v33  ;;  %v9251_v33 = vld [vmem:[%s9998_s1 + $0x58] sm:$0xff] }
0x22ed   :  { %v3249_v34 = vmul.f32 1.442695, %v3242_v1 }
0x22ef   :  { %7991 = vpow2.f32 %v3249_v34  ;;  %v9258_v34 = vld [vmem:[%s9998_s1 + $0x50] sm:$0xff] }
0x22f0   :  { %v7986_v51 = vpop.eup %7985 }
0x22f1   :  { %v3254_v63 = vsel %vm1908_vm5, %v7986_v51, 0.0 }
0x22f2   :  { %3255 = vadd.xlane.f32.xlu1 %v3254_v63 }
0x22f4   :  { %v7988_v37 = vpop.eup %7987 }
0x22f5   :  { %v3251_v61 = vsel %vm1908_vm5, %v7988_v37, 0.0 }
0x22f6   :  { %3252 = vadd.xlane.f32.xlu1 %v3251_v61 }
0x22f8   :  { %v7990_v49 = vpop.eup %7989 }
0x22f9   :  { %v3257_v41 = vsel %vm1908_vm5, %v7990_v49, 0.0 }
0x22fa   :  { %3258 = vadd.xlane.f32.xlu0 %v3257_v41 }
0x22fc   :  { %v7992_v16 = vpop.eup %7991 }
0x22fd   :  { %v3260_v15 = vsel %vm1908_vm5, %v7992_v16, 0.0 }
0x22fe   :  { %3261 = vadd.xlane.f32.xlu1 %v3260_v15 }
0x230f   :  { %3271 = vrot.lane.b32.xlu1 %v9204_v21, %s8155_s19 }
0x237b   :  { %v3256_v14 = vpop.xlane.xlu1 %3255 }
0x237c   :  { %7993 = vrcp.f32 %v3256_v14 }
0x237f   :  { %v3253_v58 = vpop.xlane.xlu1 %3252 }
0x2380   :  { %7995 = vrcp.f32 %v3253_v58 }
0x2383   :  { %v3259_v63 = vpop.xlane.xlu0 %3258 }
0x2384   :  { %7997 = vrcp.f32 %v3259_v63 }
0x2387   :  { %v3262_v46 = vpop.xlane.xlu1 %3261 }
0x2388   :  { %7999 = vrcp.f32 %v3262_v46 }
0x2389   :  { %v7994_v29 = vpop.eup %7993 }
0x238a   :  { %v3268_v17 = vmul.f32 %v7994_v29, %v7986_v51 }
0x238b   :  { %v3272_v22 = vpop.permute.xlu1 %3271 }
0x238c   :  { %7459 = vmatprep.subr.mxu0 %v3272_v22 }
0x238d   :  { %v7996_v30 = vpop.eup %7995  ;;  %7460 = vmatpush3.msra.mxu0 %v3272_v22 }
0x238e   :  { %v3267_v27 = vmul.f32 %v7996_v30, %v7988_v37  ;;  %7478 = vmatprep.subr.mxu0 %v10067_v50  ;;  %v9266_v37 = vld [vmem:[%s9998_s1 + $0x48] sm:$0xff] }
0x2390   :  { %7461 = vmatprep.mubr.msk.f32.mxu0 %vm1908_vm5, %v3267_v27 }
0x2391   :  { %v7998_v21 = vpop.eup %7997  ;;  %7462 = vmatmul.mubr.msk.f32.vlgmr.msra.gmra.mxu0 %vm1908_vm5, %v3268_v17 }
0x2392   :  { %7479 = vmatpush3.msra.mxu0 %v9251_v33  ;;  %v3269_v1 = vmul.f32 %v7998_v21, %v7990_v49  ;;  %v9273_v49 = vld [vmem:[%s9998_s1 + $0x40] sm:$0xff] }
0x2393   :  { %7480 = vmatprep.subr.mxu0 %v10067_v50 }
0x2394   :  { %7481 = vmatpush3.msra.mxu0 %v9258_v34  ;;  %7464 = vmatprep.mubr.msk.f32.mxu0 %vm1908_vm5, %v3269_v1 }
0x2395   :  { %v8000_v51 = vpop.eup %7999  ;;  %7482 = vmatprep.subr.mxu0 %v10067_v50 }
0x2396   :  { %7483 = vmatpush3.msra.mxu0 %v9266_v37  ;;  %v3270_v61 = vmul.f32 %v8000_v51, %v7992_v16 }
0x2397   :  { %7484 = vmatprep.subr.mxu0 %v10067_v50 }
0x2398   :  { %7485 = vmatpush3.msra.mxu0 %v9273_v49 }
0x2399   :  { %7465 = vmatmul.mubr.msk.f32.gmra.mxu0 %vm1908_vm5, %v3270_v61  ;;  %7499 = vmatprep.subr.mxu0 %v8886_v25 }
0x239a   :  { %7486 = vmatprep.mubr.msk.f32.mxu0 %vm8159_vm4, %v10067_v50 }
0x2451   :  { %v7463_v41 = vpop.f32.mrf.mxu0 }
0x2452   :  { %v3372_v58 = vmul.f32 %v7463_v41, %v8429_v18 }
0x2453   :  { %v3352_v15 = vpop.f32.mrf.mxu0 }
0x2454   :  { %v3371_v16 = vmul.f32 %v3352_v15, %v8461_v42 }
0x2456   :  { %v3373_v46 = vadd.f32 %v3372_v58, %v3371_v16 }
0x2459   :  { %v7466_v14 = vpop.f32.mrf.mxu0 }
0x245a   :  { %v3376_v29 = vmul.f32 %v7466_v14, %v8495_v57 }
0x245b   :  { %v3362_v63 = vpop.f32.mrf.mxu0 }
0x245c   :  { %v3374_v22 = vmul.f32 %v3362_v63, %v8481_v53 }
0x245e   :  { %v3375_v30 = vadd.f32 %v3374_v22, %v3373_v46 }
0x2460   :  { %v3377_v27 = vadd.f32 %v3376_v29, %v3375_v30 }
0x2462   :  { %7476 = vmatmul.mubr.msk.f32.vlgmr.msra.gmra.mxu1 %vm233_vm0, %v3377_v27 }
0x2463   :  { %7490 = vmatpush3.xpose.msk.msra.mxu1 %vm233_vm0, %v8818_v3 }
0x2464   :  { %7491 = vmatprep.subr.msk.mxu1 %vm233_vm0, %v8821_v4 }
0x2467   :  { %7492 = vmatpush3.xpose.msk.msra.mxu1 %vm233_vm0, %v8821_v4 }
0x2468   :  { %7520 = vmatprep.subr.mxu1 %v10067_v50 }
0x2522   :  { %v3447_v17 = vpop.f32.mrf.mxu1 }
0x2523   :  { %v3451_v21 = vadd.f32 %v3447_v17, %v9194_v59 }
0x2524   :  { %v7477_v1 = vpop.f32.mrf.mxu1 }
0x2525   :  { %v9294_v51 = vadd.f32 %v3451_v21, %v8806_v39 }
0x2527   :  { %v3453_v61 = vsel %vm233_vm0, %v9294_v51, 0.0 }
0x2528   :  { %3454 = vadd.xlane.f32.xlu1 %v3453_v61 }
0x25b1   :  { %v3455_v41 = vpop.xlane.xlu1 %3454 }
0x25b2   :  { %v3456_v15 = vmul.f32 0.03125, %v3455_v41 }
0x25b4   :  { %v3457_v16 = vsub.f32 %v9294_v51, %v3456_v15 }
0x25b6   :  { %v3458_v14 = vmul.f32 %v3457_v16, %v3457_v16 }
0x25b8   :  { %v3459_v58 = vsel %vm233_vm0, %v3458_v14, 0.0 }
0x25b9   :  { %3460 = vadd.xlane.f32.xlu0 %v3459_v58 }
0x2642   :  { %v3461_v63 = vpop.xlane.xlu0 %3460 }
0x2643   :  { %v3462_v46 = vmul.f32 0.03125, %v3461_v63 }
0x2645   :  { %v3463_v22 = vadd.f32 1e-05, %v3462_v46 }
0x2647   :  { %8001 = vrsqrt.f32 %v3463_v22 }
0x2654   :  { %v8002_v29 = vpop.eup %8001 }
0x2655   :  { %v3465_v30 = vmul.f32 %v8002_v29, %v3457_v16 }
0x2657   :  { %v3466_v27 = vmul.f32 %v3465_v30, %v8837_v7 }
0x2659   :  { %v3467_v17 = vadd.f32 %v3466_v27, %v8841_v10 }
0x265b   :  { %7487 = vmatmul.mubr.msk.f32.vlgmr.msra.gmra.mxu0 %vm233_vm0, %v3467_v17 }
0x265c   :  { %7500 = vmatpush3.msra.mxu0 %v8886_v25 }
0x265d   :  { %7501 = vmatprep.subr.mxu0 %v8890_v20 }
0x265e   :  { %7502 = vmatpush3.msra.mxu0 %v8890_v20 }
0x265f   :  { %7509 = vmatprep.subr.mxu0 %v10067_v50 }
0x271b   :  { %v3537_v21 = vpop.f32.mrf.mxu0 }
0x271c   :  { %v3538_v1 = vadd.f32 %v3537_v21, %v8846_v43 }
0x271d   :  { %v7488_v61 = vpop.f32.mrf.mxu0 }
0x271e   :  { %v3541_v41 = vmul.f32 0.35355338, %v3538_v1 }
0x2720   :  { %v3543_v15 = vmul.f32 %v3541_v41, %v8429_v18  ;;  %v3542_v16 = vmul.f32 %v3541_v41, %v8461_v42  ;;  %v3544_v14 = vmul.f32 %v3541_v41, %v8481_v53  ;;  %v3545_v58 = vmul.f32 %v3541_v41, %v8495_v57 }
0x2722   :  { %7493 = vmatprep.mubr.msk.f32.mxu1 %vm233_vm0, %v3542_v16 }
0x2723   :  { %7494 = vmatmul.mubr.msk.f32.vlgmr.msra.gmra.mxu1 %vm233_vm0, %v3543_v15 }
0x2724   :  { %7496 = vmatprep.mubr.msk.f32.mxu1 %vm233_vm0, %v3544_v14  ;;  %7521 = vmatpush3.msra.mxu1 %v8973_v36 }
0x2725   :  { %7522 = vmatprep.subr.mxu1 %v10067_v50 }
0x2726   :  { %7523 = vmatpush3.msra.mxu1 %v8984_v8 }
0x2727   :  { %7497 = vmatmul.mubr.msk.f32.gmra.mxu1 %vm233_vm0, %v3545_v58  ;;  %7524 = vmatprep.subr.mxu1 %v10067_v50 }
0x2728   :  { %7525 = vmatpush3.msra.mxu1 %v8991_v9  ;;  %7528 = vmatprep.mubr.msk.f32.mxu1 %vm8159_vm4, %v10067_v50 }
0x2729   :  { %7526 = vmatprep.subr.mxu1 %v10067_v50 }
0x272a   :  { %7527 = vmatpush3.msra.mxu1 %v8996_v11 }
0x272b   :  { %7566 = vmatprep.subr.mxu1 %v10067_v50 }
0x27e3   :  { %v7495_v36 = vpop.f32.mrf.mxu1 }
0x27e4   :  { %v3646_v63 = vsel %vm965_vm3, %v7495_v36, -inf }
0x27e5   :  { %3647 = vmax.xlane.f32.xlu0 %v3646_v63  ;;  %v3624_v8 = vpop.f32.mrf.mxu1 }
0x27e6   :  { %v3643_v22 = vsel %vm965_vm3, %v3624_v8, -inf }
0x27e7   :  { %v7498_v46 = vpop.f32.mrf.mxu1 }
0x27e8   :  { %v3652_v30 = vsel %vm965_vm3, %v7498_v46, -inf }
0x27e9   :  { %3644 = vmax.xlane.f32.xlu0 %v3643_v22  ;;  %v3634_v29 = vpop.f32.mrf.mxu1 }
0x27ea   :  { %v3649_v9 = vsel %vm965_vm3, %v3634_v29, -inf }
0x27ed   :  { %3650 = vmax.xlane.f32.xlu0 %v3649_v9 }
0x27f1   :  { %3653 = vmax.xlane.f32.xlu0 %v3652_v30 }
0x286e   :  { %v3648_v27 = vpop.xlane.xlu0 %3647 }
0x286f   :  { %v3656_v11 = vsub.f32 %v7495_v36, %v3648_v27 }
0x2871   :  { %v3661_v17 = vmul.f32 1.442695, %v3656_v11 }
0x2872   :  { %v3645_v21 = vpop.xlane.xlu0 %3644 }
0x2873   :  { %8003 = vpow2.f32 %v3661_v17  ;;  %v3655_v1 = vsub.f32 %v3624_v8, %v3645_v21 }
0x2875   :  { %v3659_v61 = vmul.f32 1.442695, %v3655_v1 }
0x2876   :  { %v3651_v41 = vpop.xlane.xlu0 %3650 }
0x2877   :  { %8005 = vpow2.f32 %v3659_v61  ;;  %v3657_v15 = vsub.f32 %v3634_v29, %v3651_v41 }
0x2879   :  { %v3663_v16 = vmul.f32 1.442695, %v3657_v15 }
0x287a   :  { %v3654_v14 = vpop.xlane.xlu0 %3653 }
0x287b   :  { %8007 = vpow2.f32 %v3663_v16  ;;  %v3658_v58 = vsub.f32 %v7498_v46, %v3654_v14 }
0x287d   :  { %v3665_v63 = vmul.f32 1.442695, %v3658_v58 }
0x287f   :  { %8009 = vpow2.f32 %v3665_v63 }
0x2880   :  { %v8004_v22 = vpop.eup %8003 }
0x2881   :  { %v3670_v9 = vsel %vm965_vm3, %v8004_v22, 0.0 }
0x2882   :  { %3671 = vadd.xlane.f32.xlu0 %v3670_v9 }
0x2884   :  { %v8006_v30 = vpop.eup %8005 }
0x2885   :  { %v3667_v36 = vsel %vm965_vm3, %v8006_v30, 0.0 }
0x2886   :  { %3668 = vadd.xlane.f32.xlu0 %v3667_v36 }
0x2888   :  { %v8008_v27 = vpop.eup %8007 }
0x2889   :  { %v3673_v8 = vsel %vm965_vm3, %v8008_v27, 0.0 }
0x288a   :  { %3674 = vadd.xlane.f32.xlu0 %v3673_v8 }
0x288c   :  { %v8010_v11 = vpop.eup %8009 }
0x288d   :  { %v3676_v29 = vsel %vm965_vm3, %v8010_v11, 0.0 }
0x288e   :  { %3677 = vadd.xlane.f32.xlu1 %v3676_v29 }
0x290b   :  { %v3672_v17 = vpop.xlane.xlu0 %3671 }
0x290c   :  { %8011 = vrcp.f32 %v3672_v17 }
0x290f   :  { %v3669_v46 = vpop.xlane.xlu0 %3668 }
0x2910   :  { %8013 = vrcp.f32 %v3669_v46 }
0x2913   :  { %v3675_v21 = vpop.xlane.xlu0 %3674 }
0x2914   :  { %8015 = vrcp.f32 %v3675_v21 }
0x2917   :  { %v3678_v1 = vpop.xlane.xlu1 %3677 }
0x2918   :  { %8017 = vrcp.f32 %v3678_v1 }
0x2919   :  { %v8012_v61 = vpop.eup %8011 }
0x291a   :  { %v3684_v16 = vmul.f32 %v8012_v61, %v8004_v22  ;;  %v10070_v61 = vld [vmem:[#allocation13_spill] sm:$0xff] }
0x291d   :  { %v8014_v41 = vpop.eup %8013 }
0x291e   :  { %v3683_v15 = vmul.f32 %v8014_v41, %v8006_v30  ;;  %v10071_v41 = vld [vmem:[#allocation14_spill] sm:$0xff] }
0x2920   :  { %7503 = vmatprep.mubr.msk.f32.mxu0 %vm965_vm3, %v3683_v15  ;;  %v10072_v15 = vld [vmem:[#allocation15_spill] sm:$0xff] }
0x2921   :  { %v8016_v14 = vpop.eup %8015  ;;  %7504 = vmatmul.mubr.msk.f32.vlgmr.msra.gmra.mxu0 %vm965_vm3, %v3684_v16  ;;  %v10073_v16 = vld [vmem:[#allocation16_spill] sm:$0xff] }
0x2922   :  { %7510 = vmatpush3.msra.mxu0 %v8901_v55  ;;  %v3685_v58 = vmul.f32 %v8016_v14, %v8008_v27  ;;  %v10074_v14 = vld [vmem:[#allocation17_spill] sm:$0xff] }
0x2923   :  { %7511 = vmatprep.subr.mxu0 %v10067_v50 }
0x2924   :  { %7512 = vmatpush3.msra.mxu0 %v8905_v56  ;;  %7506 = vmatprep.mubr.msk.f32.mxu0 %vm965_vm3, %v3685_v58  ;;  %v10075_v58 = vld [vmem:[#allocation18_spill] sm:$0xff] }
0x2925   :  { %v8018_v63 = vpop.eup %8017  ;;  %7513 = vmatprep.subr.mxu0 %v10067_v50 }
0x2926   :  { %7514 = vmatpush3.msra.mxu0 %v8909_v0  ;;  %v3686_v22 = vmul.f32 %v8018_v63, %v8010_v11 }
0x2927   :  { %7515 = vmatprep.subr.mxu0 %v10067_v50 }
0x2928   :  { %7516 = vmatpush3.msra.mxu0 %v8912_v19 }
0x2929   :  { %7507 = vmatmul.mubr.msk.f32.gmra.mxu0 %vm965_vm3, %v3686_v22  ;;  %7531 = vmatprep.subr.mxu0 %v10067_v50 }
0x292a   :  { %7517 = vmatprep.mubr.msk.f32.mxu0 %vm8159_vm4, %v10067_v50 }
0x29e1   :  { %v7505_v9 = vpop.f32.mrf.mxu0 }
0x29e2   :  { %v3785_v8 = vmul.f32 %v7505_v9, %v8429_v18 }
0x29e3   :  { %v3765_v30 = vpop.f32.mrf.mxu0 }
0x29e4   :  { %v3784_v36 = vmul.f32 %v3765_v30, %v8461_v42  ;;  %v10076_v30 = vld [vmem:[#allocation10_spill] sm:$0xff] }
0x29e6   :  { %v3786_v11 = vadd.f32 %v3785_v8, %v3784_v36 }
0x29e9   :  { %v7508_v27 = vpop.f32.mrf.mxu0 }
0x29ea   :  { %v3789_v46 = vmul.f32 %v7508_v27, %v8495_v57 }
0x29eb   :  { %v3775_v29 = vpop.f32.mrf.mxu0 }
0x29ec   :  { %v3787_v17 = vmul.f32 %v3775_v29, %v8481_v53 }
0x29ee   :  { %v3788_v21 = vadd.f32 %v3787_v17, %v3786_v11 }
0x29f0   :  { %v3790_v1 = vadd.f32 %v3789_v46, %v3788_v21 }
0x29f2   :  { %7518 = vmatmul.mubr.msk.f32.vlgmr.msra.gmra.mxu0 %vm233_vm0, %v3790_v1 }
0x29f3   :  { %7532 = vmatpush3.msra.mxu0 %v9026_v47  ;;  %7563 = vmatprep.mubr.msk.f32.mxu0 %vm8159_vm4, %v10067_v50 }
0x29f4   :  { %7533 = vmatprep.subr.mxu0 %v10067_v50 }
0x29f5   :  { %7534 = vmatpush3.msra.mxu0 %v9045_v45 }
0x29f6   :  { %7535 = vmatprep.subr.mxu0 %v10067_v50 }
0x29f7   :  { %7536 = vmatpush3.msra.mxu0 %v9049_v40 }
0x29f8   :  { %7537 = vmatprep.subr.mxu0 %v10067_v50 }
0x29f9   :  { %7538 = vmatpush3.msra.mxu0 %v9052_v60 }
0x29fa   :  { %7539 = vmatprep.subr.mxu0 %v10067_v50 }
0x29fb   :  { %7540 = vmatpush3.msra.mxu0 %v9057_v52 }
0x29fc   :  { %7541 = vmatprep.subr.mxu0 %v10067_v50 }
0x29fd   :  { %7542 = vmatpush3.msra.mxu0 %v9060_v31 }
0x29fe   :  { %7543 = vmatprep.subr.mxu0 %v10067_v50 }
0x29ff   :  { %7544 = vmatpush3.msra.mxu0 %v9065_v5 }
0x2a00   :  { %7545 = vmatprep.subr.mxu0 %v10067_v50 }
0x2a01   :  { %7546 = vmatpush3.msra.mxu0 %v9068_v35 }
0x2a02   :  { %7547 = vmatprep.subr.mxu0 %v10067_v50 }
0x2a03   :  { %7548 = vmatpush3.msra.mxu0 %v9073_v6 }
0x2a04   :  { %7549 = vmatprep.subr.mxu0 %v10067_v50 }
0x2a05   :  { %7550 = vmatpush3.msra.mxu0 %v9076_v13 }
0x2a06   :  { %7551 = vmatprep.subr.mxu0 %v10067_v50 }
0x2a07   :  { %7552 = vmatpush3.msra.mxu0 %v10070_v61 }
0x2a08   :  { %7553 = vmatprep.subr.mxu0 %v10067_v50 }
0x2a09   :  { %7554 = vmatpush3.msra.mxu0 %v10071_v41 }
0x2a0a   :  { %7555 = vmatprep.subr.mxu0 %v10067_v50 }
0x2a0b   :  { %7556 = vmatpush3.msra.mxu0 %v10072_v15 }
0x2a0c   :  { %7557 = vmatprep.subr.mxu0 %v10067_v50 }
0x2a0d   :  { %7558 = vmatpush3.msra.mxu0 %v10073_v16 }
0x2a0e   :  { %7559 = vmatprep.subr.mxu0 %v10067_v50 }
0x2a0f   :  { %7560 = vmatpush3.msra.mxu0 %v10074_v14 }
0x2a10   :  { %7561 = vmatprep.subr.mxu0 %v10067_v50 }
0x2a11   :  { %7562 = vmatpush3.msra.mxu0 %v10075_v58 }
0x2ab2   :  { %v3860_v63 = vpop.f32.mrf.mxu0 }
0x2ab3   :  { %v3864_v22 = vadd.f32 %v3860_v63, %v9294_v51  ;;  %v10077_v51 = vld [vmem:[#allocation11_spill] sm:$0xff] }
0x2ab4   :  { %v7519_v9 = vpop.f32.mrf.mxu0 }
0x2ab5   :  { %v3865_v36 = vadd.f32 %v3864_v22, %v10076_v30  ;;  %v10078_v9 = vld [vmem:[#allocation12_spill] sm:$0xff] }
0x2ab7   :  { %v3866_v27 = vsel %vm233_vm0, %v3865_v36, 0.0 }
0x2ab8   :  { %3867 = vadd.xlane.f32.xlu0 %v3866_v27 }
0x2b41   :  { %v3868_v8 = vpop.xlane.xlu0 %3867 }
0x2b42   :  { %v3869_v29 = vmul.f32 0.03125, %v3868_v8 }
0x2b44   :  { %v3870_v11 = vsub.f32 %v3865_v36, %v3869_v29 }
0x2b46   :  { %v3871_v17 = vmul.f32 %v3870_v11, %v3870_v11 }
0x2b48   :  { %v3872_v46 = vsel %vm233_vm0, %v3871_v17, 0.0 }
0x2b49   :  { %3873 = vadd.xlane.f32.xlu1 %v3872_v46 }
0x2bd2   :  { %v3874_v21 = vpop.xlane.xlu1 %3873 }
0x2bd3   :  { %v3875_v1 = vmul.f32 0.03125, %v3874_v21 }
0x2bd5   :  { %v3876_v14 = vadd.f32 1e-05, %v3875_v1 }
0x2bd7   :  { %8019 = vrsqrt.f32 %v3876_v14 }
0x2be4   :  { %v8020_v58 = vpop.eup %8019 }
0x2be5   :  { %v3878_v16 = vmul.f32 %v8020_v58, %v3870_v11 }
0x2be7   :  { %v3879_v63 = vmul.f32 %v3878_v16, %v10077_v51 }
0x2be9   :  { %v3880_v22 = vadd.f32 %v3879_v63, %v10078_v9 }
0x2beb   :  { %7529 = vmatmul.mubr.msk.f32.vlgmr.msra.gmra.mxu1 %vm233_vm0, %v3880_v22 }
0x2bec   :  { %7567 = vmatpush3.msra.mxu1 %v9115_v2  ;;  %7574 = vmatprep.mubr.msk.f32.mxu1 %vm8159_vm4, %v10067_v50 }
0x2bed   :  { %7568 = vmatprep.subr.mxu1 %v10067_v50 }
0x2bee   :  { %7569 = vmatpush3.msra.mxu1 %v9122_v54 }
0x2bef   :  { %7570 = vmatprep.subr.mxu1 %v10067_v50 }
0x2bf0   :  { %7571 = vmatpush3.msra.mxu1 %v9127_v48 }
0x2bf1   :  { %7572 = vmatprep.subr.mxu1 %v10067_v50 }
0x2bf2   :  { %7573 = vmatpush3.msra.mxu1 %v9134_v28 }
0x2bf3   :  { %7577 = vmatprep.subr.mxu1 %v10067_v50 }
0x2cab   :  { %v3950_v16 = vpop.f32.mrf.mxu1 }
0x2cac   :  { %v3951_v14 = vadd.f32 %v9107_v23, %v3950_v16  ;;  %v9407_v23 = vld [vmem:[%s9997_s3 + $0x5] ss:$0 sm:$0xff] }
0x2cad   :  { %v7530_v58 = vpop.f32.mrf.mxu1 }
0x2cae   :  { %v3954_v27 = vmul.f32 %v3951_v14, %v3951_v14 }
0x2cb0   :  { %v3955_v8 = vmul.f32 %v3954_v27, %v3951_v14 }
0x2cb2   :  { %v3956_v29 = vmul.f32 0.044715, %v3955_v8 }
0x2cb4   :  { %v3957_v11 = vadd.f32 %v3956_v29, %v3951_v14 }
0x2cb6   :  { %v3958_v17 = vmul.f32 0.7978846, %v3957_v11 }
0x2cb8   :  { %8021 = vtanh.f32 %v3958_v17 }
0x2cc5   :  { %v8022_v46 = vpop.eup %8021 }
0x2cc6   :  { %v3960_v21 = vadd.f32 1.0, %v8022_v46 }
0x2cc8   :  { %v3961_v1 = vmul.f32 0.5, %v3960_v21 }
0x2cca   :  { %v3962_v63 = vmul.f32 %v3961_v1, %v3951_v14 }
0x2ccc   :  { %7564 = vmatmul.mubr.f32.vlgmr.msra.gmra.mxu0 %v3962_v63 }
0x2d8c   :  { %v4029_v22 = vpop.f32.mrf.mxu0 }
0x2d8d   :  { %v4033_v9 = vadd.f32 %v4029_v22, %v3865_v36  ;;  %v10079_v22 = vrot.slane %v8679_v24, 6 }
0x2d8e   :  { %v7565_v51 = vpop.f32.mrf.mxu0 }
0x2d8f   :  { %v4034_v16 = vadd.f32 %v9407_v23, %v4033_v9  ;;  %v9413_v51 = vld [vmem:[%s9997_s3 + $0x10] sm:$0xff] }
0x2d90   :  { %v10035_v21 = vrot.slane %v9413_v51, 5 }
0x2d91   :  { %v4036_v58 = vsel %vm4035_vm12, %v4034_v16, 0.0 }
0x2d92   :  { %4037 = vadd.xlane.f32.xlu0 %v4036_v58 }
0x2e1b   :  { %v4038_v27 = vpop.xlane.xlu0 %4037 }
0x2e1c   :  { %v4039_v8 = vmul.f32 0.03125, %v4038_v27 }
0x2e1e   :  { %v4040_v29 = vsub.f32 %v4034_v16, %v4039_v8 }
0x2e20   :  { %v4041_v11 = vmul.f32 %v4040_v29, %v4040_v29 }
0x2e22   :  { %v4042_v17 = vsel %vm4035_vm12, %v4041_v11, 0.0 }
0x2e23   :  { %4043 = vadd.xlane.f32.xlu1 %v4042_v17  ;;  %v9444_v17 = vld [vmem:[%s9998_s1 + $0x78] sm:$0xff] }
0x2eac   :  { %v4044_v14 = vpop.xlane.xlu1 %4043 }
0x2ead   :  { %v4045_v46 = vmul.f32 0.03125, %v4044_v14  ;;  %v9453_v14 = vld [vmem:[%s9998_s1 + $0x70] sm:$0xff] }
0x2eaf   :  { %v4046_v36 = vadd.f32 1e-05, %v4045_v46  ;;  %v9460_v46 = vld [vmem:[%s9998_s1 + $0x68] sm:$0xff] }
0x2eb1   :  { %8023 = vrsqrt.f32 %v4046_v36  ;;  %v9467_v36 = vld [vmem:[%s9998_s1 + $0x60] sm:$0xff] }
0x2eb2   :  { %10082 = vst [vmem:[#allocation20_spill] sm:$0xff] %v9467_v36 }
0x2ebe   :  { %v8024_v9 = vpop.eup %8023 }
0x2ebf   :  { %v4048_v1 = vmul.f32 %v8024_v9, %v4040_v29 }
0x2ec1   :  { %v4051_v63 = vmul.f32 %v10035_v21, %v4048_v1 }
0x2ec3   :  { %v4052_v16 = vadd.f32 %v4051_v63, %v10079_v22 }
0x2ec5   :  { %v4054_v58 = vrot.slane %v4052_v16, 1 }
0x2ec7   :  { %7575 = vmatmul.mubr.msk.f32.vlgmr.msra.gmra.mxu1 %vm233_vm0, %v4054_v58 }
0x2ec8   :  { %7578 = vmatpush3.xpose.msra.mxu1 %v9115_v2  ;;  %7585 = vmatprep.mubr.msk.f32.mxu1 %vm8159_vm4, %v10067_v50 }
0x2ec9   :  { %7579 = vmatprep.subr.mxu1 %v10067_v50 }
0x2ecc   :  { %7580 = vmatpush3.xpose.msra.mxu1 %v9122_v54 }
0x2ecd   :  { %7581 = vmatprep.subr.mxu1 %v10067_v50 }
0x2ed0   :  { %7582 = vmatpush3.xpose.msra.mxu1 %v9127_v48 }
0x2ed1   :  { %7583 = vmatprep.subr.mxu1 %v10067_v50 }
0x2ed4   :  { %7584 = vmatpush3.xpose.msra.mxu1 %v9134_v28  ;;  %v10081_v28 = vmov 1.0  }
0x2ed5   :  { %7588 = vmatprep.subr.mxu1 %v10067_v50 }
0x2f87   :  { %v4123_v24 = vpop.f32.mrf.mxu1 }
0x2f88   :  { %v4127_v2 = vsel %vm2934_vm7, %v4123_v24, -1e+30 }
0x2f89   :  { %v4128_v27 = vsel %vm2936_vm8, %v4127_v2, -inf  ;;  %v7576_v8 = vpop.f32.mrf.mxu1 }
0x2f8a   :  { %4129 = vmax.xlane.f32.xlu0 %v4128_v27 }
0x3013   :  { %v4130_v29 = vpop.xlane.xlu0 %4129 }
0x3014   :  { %vm4131_vm13 = vcmp.ge.f32.partialorder %v4127_v2, %v4130_v29 }
0x3015   :  { %v4132_v54 = vsel %vm4131_vm13, %v9163_v38, 128.0 }
0x3016   :  { %v4133_v48 = vsel %vm2936_vm8, %v4132_v54, inf }
0x3017   :  { %4134 = vmin.xlane.f32.xlu1 %v4133_v48 }
0x30a0   :  { %v9436_v11 = vpop.xlane.xlu1 %4134 }
0x30a1   :  { %10080 = vst [vmem:[#allocation13_spill] sm:$0xff] %v9436_v11  ;;  %vm4136_vm14 = vcmp.eq.f32.partialorder %v9163_v38, %v9436_v11 }
0x30a2   :  { %7586 = vmatmul.mubr.msk.f32.vlgmr.msra.gmra.mxu1 %vm4136_vm14, %v10081_v28 }
0x30a3   :  { %7589 = vmatpush3.msra.mxu1 %v9444_v17  ;;  %7596 = vmatprep.mubr.msk.f32.mxu1 %vm8159_vm4, %v10067_v50 }
0x30a4   :  { %7590 = vmatprep.subr.mxu1 %v10067_v50 }
0x30a5   :  { %7591 = vmatpush3.msra.mxu1 %v9453_v14 }
0x30a6   :  { %7592 = vmatprep.subr.mxu1 %v10067_v50 }
0x30a7   :  { %7593 = vmatpush3.msra.mxu1 %v9460_v46 }
0x30a8   :  { %7594 = vmatprep.subr.mxu1 %v10067_v50  ;;  %v10117_v44 = vld [vmem:[#allocation13_spill] sm:$0xff] }
0x30a9   :  { %7595 = vmatpush3.msra.mxu1 %v9467_v36 }
0x3162   :  { %v4205_v9 = vpop.f32.mrf.mxu1 }
0x3163   :  { %v4213_v1 = vrot.slane %v4205_v9, %v8434_v26 }
0x3164   :  { %v7587_v63 = vpop.f32.mrf.mxu1 }
0x3165   :  { %v4214_v22 = vadd.f32 %v4213_v1, %v9184_v12  ;;  %v10083_v63 = vld [vmem:[#allocation5_spill] sm:$0xff] }
0x3167   :  { %v9476_v16 = vsel %vm4209_vm15, %v4214_v22, %v9194_v59 }
0x3168   :  { %v4223_v58 = vsel %vm233_vm0, %v9476_v16, 0.0 }
0x3169   :  { %4224 = vadd.xlane.f32.xlu0 %v4223_v58 }
0x31f2   :  { %v4225_v24 = vpop.xlane.xlu0 %4224 }
0x31f3   :  { %v4226_v2 = vmul.f32 0.03125, %v4225_v24  ;;  %v9488_v24 = vld [vmem:[%s9997_s3 + $0x3] ss:$0 sm:$0xff] }
0x31f4   :  { %10084 = vst [vmem:[#allocation21_spill] sm:$0xff] %v9488_v24 }
0x31f5   :  { %v4227_v27 = vsub.f32 %v9476_v16, %v4226_v2 }
0x31f7   :  { %v4228_v8 = vmul.f32 %v4227_v27, %v4227_v27 }
0x31f9   :  { %v4229_v29 = vsel %vm233_vm0, %v4228_v8, 0.0 }
0x31fa   :  { %4230 = vadd.xlane.f32.xlu1 %v4229_v29 }
0x3283   :  { %v4231_v12 = vpop.xlane.xlu1 %4230 }
0x3284   :  { %v4232_v54 = vmul.f32 0.03125, %v4231_v12 }
0x3286   :  { %v4233_v48 = vadd.f32 1e-05, %v4232_v54 }
0x3288   :  { %8025 = vrsqrt.f32 %v4233_v48 }
0x3295   :  { %v8026_v9 = vpop.eup %8025 }
0x3296   :  { %v4235_v1 = vmul.f32 %v8026_v9, %v4227_v27  ;;  %v10085_v9 = vld [vmem:[#allocation6_spill] sm:$0xff] }
0x3298   :  { %v4236_v59 = vmul.f32 %v4235_v1, %v8688_v32 }
0x329a   :  { %v4237_v22 = vadd.f32 %v4236_v59, %v10083_v63  ;;  %v10086_v59 = vld [vmem:[#allocation7_spill] sm:$0xff] }
0x329c   :  { %7597 = vmatmul.mubr.msk.f32.vlgmr.msra.gmra.mxu1 %vm233_vm0, %v4237_v22  ;;  %v10087_v22 = vld [vmem:[#allocation8_spill] sm:$0xff] }
0x335c   :  { %v4307_v58 = vpop.f32.mrf.mxu1 }
0x335d   :  { %v9491_v2 = vadd.f32 %v9488_v24, %v4307_v58  ;;  %v10088_v58 = vld [vmem:[#allocation9_spill] sm:$0xff] }
0x335e   :  { %v7598_v8 = vpop.f32.mrf.mxu1 }
0x335f   :  { %v4311_v29 = vmul.f32 0.35355338, %v9491_v2  ;;  %4317 = vrot.lane.b32.xlu0 %v9491_v2, %s8156_s29 }
0x3361   :  { %v4312_v27 = vmul.f32 %v4311_v29, %v8461_v42  ;;  %v4313_v54 = vmul.f32 %v4311_v29, %v8429_v18  ;;  %v4314_v48 = vmul.f32 %v4311_v29, %v8481_v53  ;;  %v4315_v1 = vmul.f32 %v4311_v29, %v8495_v57  ;;  %v9521_v29 = vld [vmem:[%s9997_s3 + $0x30] sm:$0xff] }
0x3362   :  { %10089 = vst [vmem:[#allocation22_spill] sm:$0xff] %v9521_v29 }
0x3363   :  { %7601 = vmatprep.mubr.msk.f32.mxu0 %vm233_vm0, %v4312_v27 }
0x33d1   :  { %v4318_v12 = vpop.permute.xlu0 %4317 }
0x33d2   :  { %7599 = vmatprep.subr.msk.mxu0 %vm233_vm0, %v4318_v12 }
0x33d3   :  { %7600 = vmatpush3.xpose.msk.msra.mxu0 %vm233_vm0, %v4318_v12 }
0x33d4   :  { %7615 = vmatprep.subr.mxu0 %v10067_v50 }
0x33d6   :  { %7602 = vmatmul.mubr.msk.f32.vlgmr.msra.gmra.mxu0 %vm233_vm0, %v4313_v54 }
0x33d7   :  { %7604 = vmatprep.mubr.msk.f32.mxu0 %vm233_vm0, %v4314_v48  ;;  %7616 = vmatpush3.msra.mxu0 %v10085_v9 }
0x33d8   :  { %7617 = vmatprep.subr.mxu0 %v10067_v50 }
0x33d9   :  { %7618 = vmatpush3.msra.mxu0 %v10086_v59 }
0x33da   :  { %7605 = vmatmul.mubr.msk.f32.gmra.mxu0 %vm233_vm0, %v4315_v1  ;;  %7619 = vmatprep.subr.mxu0 %v10067_v50 }
0x33db   :  { %7620 = vmatpush3.msra.mxu0 %v10087_v22  ;;  %7623 = vmatprep.mubr.msk.f32.mxu0 %vm8159_vm4, %v10067_v50 }
0x33dc   :  { %7621 = vmatprep.subr.mxu0 %v10067_v50 }
0x33dd   :  { %7622 = vmatpush3.msra.mxu0 %v10088_v58 }
0x33de   :  { %7637 = vmatprep.subr.msk.mxu0 %vm233_vm0, %v8818_v3 }
0x3496   :  { %v7603_v8 = vpop.f32.mrf.mxu0 }
0x3497   :  { %v4405_v27 = vadd.f32 %v9521_v29, %v7603_v8 }
0x3498   :  { %v4399_v12 = vpop.f32.mrf.mxu0 }
0x3499   :  { %v4400_v54 = vadd.f32 %v9521_v29, %v4399_v12  ;;  %v4421_v48 = vsel %vm1908_vm5, %v4405_v27, -inf }
0x349a   :  { %4422 = vmax.xlane.f32.xlu1 %v4421_v48  ;;  %v7606_v1 = vpop.f32.mrf.mxu0 }
0x349b   :  { %v4418_v58 = vsel %vm1908_vm5, %v4400_v54, -inf  ;;  %v4415_v22 = vadd.f32 %v9521_v29, %v7606_v1 }
0x349c   :  { %v4409_v21 = vpop.f32.mrf.mxu0 }
0x349d   :  { %v4410_v11 = vadd.f32 %v9521_v29, %v4409_v21  ;;  %v4427_v8 = vsel %vm1908_vm5, %v4415_v22, -inf }
0x349e   :  { %4419 = vmax.xlane.f32.xlu1 %v4418_v58 }
0x349f   :  { %v4424_v59 = vsel %vm1908_vm5, %v4410_v11, -inf }
0x34a2   :  { %4425 = vmax.xlane.f32.xlu1 %v4424_v59 }
0x34a6   :  { %4428 = vmax.xlane.f32.xlu1 %v4427_v8 }
0x3523   :  { %v4423_v9 = vpop.xlane.xlu1 %4422 }
0x3524   :  { %v4431_v12 = vsub.f32 %v4405_v27, %v4423_v9 }
0x3526   :  { %v4436_v24 = vmul.f32 1.442695, %v4431_v12 }
0x3527   :  { %v4420_v63 = vpop.xlane.xlu1 %4419 }
0x3528   :  { %8027 = vpow2.f32 %v4436_v24  ;;  %v4430_v48 = vsub.f32 %v4400_v54, %v4420_v63 }
0x352a   :  { %v4434_v32 = vmul.f32 1.442695, %v4430_v48 }
0x352b   :  { %v4426_v62 = vpop.xlane.xlu1 %4425 }
0x352c   :  { %8029 = vpow2.f32 %v4434_v32  ;;  %v4432_v21 = vsub.f32 %v4410_v11, %v4426_v62 }
0x352e   :  { %v4438_v26 = vmul.f32 1.442695, %v4432_v21 }
0x352f   :  { %v4429_v58 = vpop.xlane.xlu1 %4428 }
0x3530   :  { %8031 = vpow2.f32 %v4438_v26  ;;  %v4433_v1 = vsub.f32 %v4415_v22, %v4429_v58 }
0x3532   :  { %v4440_v29 = vmul.f32 1.442695, %v4433_v1 }
0x3534   :  { %8033 = vpow2.f32 %v4440_v29 }
0x3535   :  { %v8028_v59 = vpop.eup %8027 }
0x3536   :  { %v4445_v36 = vsel %vm1908_vm5, %v8028_v59, 0.0 }
0x3537   :  { %4446 = vadd.xlane.f32.xlu1 %v4445_v36 }
0x3539   :  { %v8030_v8 = vpop.eup %8029 }
0x353a   :  { %v4442_v9 = vsel %vm1908_vm5, %v8030_v8, 0.0 }
0x353b   :  { %4443 = vadd.xlane.f32.xlu1 %v4442_v9 }
0x353d   :  { %v8032_v24 = vpop.eup %8031 }
0x353e   :  { %v4448_v63 = vsel %vm1908_vm5, %v8032_v24, 0.0 }
0x353f   :  { %4449 = vadd.xlane.f32.xlu0 %v4448_v63 }
0x3541   :  { %v8034_v32 = vpop.eup %8033 }
0x3542   :  { %v4451_v62 = vsel %vm1908_vm5, %v8034_v32, 0.0 }
0x3543   :  { %4452 = vadd.xlane.f32.xlu1 %v4451_v62 }
0x3554   :  { %4462 = vrot.lane.b32.xlu1 %v9491_v2, %s8155_s19 }
0x35c0   :  { %v4447_v26 = vpop.xlane.xlu1 %4446 }
0x35c1   :  { %8035 = vrcp.f32 %v4447_v26 }
0x35c4   :  { %v4444_v11 = vpop.xlane.xlu1 %4443 }
0x35c5   :  { %8037 = vrcp.f32 %v4444_v11 }
0x35c8   :  { %v4450_v36 = vpop.xlane.xlu0 %4449 }
0x35c9   :  { %8039 = vrcp.f32 %v4450_v36 }
0x35cc   :  { %v4453_v22 = vpop.xlane.xlu1 %4452 }
0x35cd   :  { %8041 = vrcp.f32 %v4453_v22 }
0x35ce   :  { %v8036_v27 = vpop.eup %8035 }
0x35cf   :  { %v4459_v48 = vmul.f32 %v8036_v27, %v8028_v59 }
0x35d0   :  { %v4463_v29 = vpop.permute.xlu1 %4462 }
0x35d1   :  { %7607 = vmatprep.subr.mxu1 %v4463_v29 }
0x35d2   :  { %v8038_v54 = vpop.eup %8037  ;;  %7608 = vmatpush3.msra.mxu1 %v4463_v29 }
0x35d3   :  { %v4458_v12 = vmul.f32 %v8038_v54, %v8030_v8  ;;  %7626 = vmatprep.subr.mxu1 %v10067_v50 }
0x35d5   :  { %7609 = vmatprep.mubr.msk.f32.mxu1 %vm1908_vm5, %v4458_v12 }
0x35d6   :  { %v8040_v2 = vpop.eup %8039  ;;  %7610 = vmatmul.mubr.msk.f32.vlgmr.msra.gmra.mxu1 %vm1908_vm5, %v4459_v48 }
0x35d7   :  { %7627 = vmatpush3.msra.mxu1 %v9251_v33  ;;  %v4460_v21 = vmul.f32 %v8040_v2, %v8032_v24 }
0x35d8   :  { %7628 = vmatprep.subr.mxu1 %v10067_v50 }
0x35d9   :  { %7629 = vmatpush3.msra.mxu1 %v9258_v34  ;;  %7612 = vmatprep.mubr.msk.f32.mxu1 %vm1908_vm5, %v4460_v21 }
0x35da   :  { %v8042_v58 = vpop.eup %8041  ;;  %7630 = vmatprep.subr.mxu1 %v10067_v50 }
0x35db   :  { %7631 = vmatpush3.msra.mxu1 %v9266_v37  ;;  %v4461_v1 = vmul.f32 %v8042_v58, %v8034_v32 }
0x35dc   :  { %7632 = vmatprep.subr.mxu1 %v10067_v50 }
0x35dd   :  { %7633 = vmatpush3.msra.mxu1 %v9273_v49 }
0x35de   :  { %7613 = vmatmul.mubr.msk.f32.gmra.mxu1 %vm1908_vm5, %v4461_v1  ;;  %7647 = vmatprep.subr.mxu1 %v8886_v25 }
0x35df   :  { %7634 = vmatprep.mubr.msk.f32.mxu1 %vm8159_vm4, %v10067_v50 }
0x3696   :  { %v7611_v33 = vpop.f32.mrf.mxu1 }
0x3697   :  { %v4563_v9 = vmul.f32 %v7611_v33, %v8429_v18 }
0x3698   :  { %v4543_v34 = vpop.f32.mrf.mxu1 }
0x3699   :  { %v4562_v59 = vmul.f32 %v4543_v34, %v8461_v42 }
0x369b   :  { %v4564_v24 = vadd.f32 %v4563_v9, %v4562_v59 }
0x369e   :  { %v7614_v8 = vpop.f32.mrf.mxu1 }
0x369f   :  { %v4567_v49 = vmul.f32 %v7614_v8, %v8495_v57 }
0x36a0   :  { %v4553_v37 = vpop.f32.mrf.mxu1 }
0x36a1   :  { %v4565_v63 = vmul.f32 %v4553_v37, %v8481_v53 }
0x36a3   :  { %v4566_v32 = vadd.f32 %v4565_v63, %v4564_v24 }
0x36a5   :  { %v4568_v62 = vadd.f32 %v4567_v49, %v4566_v32 }
0x36a7   :  { %7624 = vmatmul.mubr.msk.f32.vlgmr.msra.gmra.mxu0 %vm233_vm0, %v4568_v62 }
0x36a8   :  { %7638 = vmatpush3.xpose.msk.msra.mxu0 %vm233_vm0, %v8818_v3 }
0x36a9   :  { %7639 = vmatprep.subr.msk.mxu0 %vm233_vm0, %v8821_v4 }
0x36ac   :  { %7640 = vmatpush3.xpose.msk.msra.mxu0 %vm233_vm0, %v8821_v4 }
0x36ad   :  { %7668 = vmatprep.subr.mxu0 %v10067_v50 }
0x3767   :  { %v4638_v26 = vpop.f32.mrf.mxu0 }
0x3768   :  { %v4642_v11 = vadd.f32 %v4638_v26, %v9476_v16  ;;  %v9589_v26 = vld [vmem:[%s9998_s1 + $0x98] sm:$0xff] }
0x3769   :  { %v7625_v36 = vpop.f32.mrf.mxu0 }
0x376a   :  { %v9566_v22 = vadd.f32 %v4642_v11, %v8806_v39  ;;  %v9597_v36 = vld [vmem:[%s9998_s1 + $0x90] sm:$0xff] }
0x376c   :  { %v4644_v29 = vsel %vm233_vm0, %v9566_v22, 0.0 }
0x376d   :  { %4645 = vadd.xlane.f32.xlu1 %v4644_v29  ;;  %v9605_v29 = vld [vmem:[%s9998_s1 + $0x88] sm:$0xff] }
0x37f6   :  { %v4646_v27 = vpop.xlane.xlu1 %4645 }
0x37f7   :  { %v4647_v54 = vmul.f32 0.03125, %v4646_v27  ;;  %v9614_v27 = vld [vmem:[%s9998_s1 + $0x80] sm:$0xff] }
0x37f9   :  { %v4648_v12 = vsub.f32 %v9566_v22, %v4647_v54 }
0x37fb   :  { %v4649_v48 = vmul.f32 %v4648_v12, %v4648_v12 }
0x37fd   :  { %v4650_v2 = vsel %vm233_vm0, %v4649_v48, 0.0 }
0x37fe   :  { %4651 = vadd.xlane.f32.xlu0 %v4650_v2 }
0x3887   :  { %v4652_v21 = vpop.xlane.xlu0 %4651 }
0x3888   :  { %v4653_v58 = vmul.f32 0.03125, %v4652_v21 }
0x388a   :  { %v4654_v1 = vadd.f32 1e-05, %v4653_v58 }
0x388c   :  { %8043 = vrsqrt.f32 %v4654_v1 }
0x3899   :  { %v8044_v33 = vpop.eup %8043 }
0x389a   :  { %v4656_v34 = vmul.f32 %v8044_v33, %v4648_v12 }
0x389c   :  { %v4657_v59 = vmul.f32 %v4656_v34, %v8837_v7 }
0x389e   :  { %v4658_v8 = vadd.f32 %v4657_v59, %v8841_v10 }
0x38a0   :  { %7635 = vmatmul.mubr.msk.f32.vlgmr.msra.gmra.mxu1 %vm233_vm0, %v4658_v8 }
0x38a1   :  { %7648 = vmatpush3.msra.mxu1 %v8886_v25 }
0x38a2   :  { %7649 = vmatprep.subr.mxu1 %v8890_v20 }
0x38a3   :  { %7650 = vmatpush3.msra.mxu1 %v8890_v20 }
0x38a4   :  { %7657 = vmatprep.subr.mxu1 %v10067_v50 }
0x3960   :  { %v4728_v9 = vpop.f32.mrf.mxu1 }
0x3961   :  { %v4729_v37 = vadd.f32 %v4728_v9, %v8846_v43 }
0x3962   :  { %v7636_v24 = vpop.f32.mrf.mxu1 }
0x3963   :  { %v4732_v63 = vmul.f32 0.35355338, %v4729_v37 }
0x3965   :  { %v4734_v49 = vmul.f32 %v4732_v63, %v8429_v18  ;;  %v4733_v32 = vmul.f32 %v4732_v63, %v8461_v42  ;;  %v4735_v62 = vmul.f32 %v4732_v63, %v8481_v53  ;;  %v4736_v11 = vmul.f32 %v4732_v63, %v8495_v57 }
0x3967   :  { %7641 = vmatprep.mubr.msk.f32.mxu0 %vm233_vm0, %v4733_v32 }
0x3968   :  { %7642 = vmatmul.mubr.msk.f32.vlgmr.msra.gmra.mxu0 %vm233_vm0, %v4734_v49 }
0x3969   :  { %7644 = vmatprep.mubr.msk.f32.mxu0 %vm233_vm0, %v4735_v62  ;;  %7669 = vmatpush3.msra.mxu0 %v9589_v26 }
0x396a   :  { %7670 = vmatprep.subr.mxu0 %v10067_v50 }
0x396b   :  { %7671 = vmatpush3.msra.mxu0 %v9597_v36 }
0x396c   :  { %7645 = vmatmul.mubr.msk.f32.gmra.mxu0 %vm233_vm0, %v4736_v11  ;;  %7672 = vmatprep.subr.mxu0 %v10067_v50 }
0x396d   :  { %7673 = vmatpush3.msra.mxu0 %v9605_v29  ;;  %7676 = vmatprep.mubr.msk.f32.mxu0 %vm8159_vm4, %v10067_v50 }
0x396e   :  { %7674 = vmatprep.subr.mxu0 %v10067_v50 }
0x396f   :  { %7675 = vmatpush3.msra.mxu0 %v9614_v27 }
0x3970   :  { %7714 = vmatprep.subr.mxu0 %v10067_v50 }
0x3a28   :  { %v7643_v54 = vpop.f32.mrf.mxu0 }
0x3a29   :  { %v4837_v12 = vsel %vm965_vm3, %v7643_v54, -inf }
0x3a2a   :  { %4838 = vmax.xlane.f32.xlu0 %v4837_v12  ;;  %v4815_v48 = vpop.f32.mrf.mxu0 }
0x3a2b   :  { %v4834_v21 = vsel %vm965_vm3, %v4815_v48, -inf }
0x3a2c   :  { %v7646_v2 = vpop.f32.mrf.mxu0 }
0x3a2d   :  { %v4843_v33 = vsel %vm965_vm3, %v7646_v2, -inf }
0x3a2e   :  { %4835 = vmax.xlane.f32.xlu0 %v4834_v21  ;;  %v4825_v58 = vpop.f32.mrf.mxu0 }
0x3a2f   :  { %v4840_v1 = vsel %vm965_vm3, %v4825_v58, -inf }
0x3a32   :  { %4841 = vmax.xlane.f32.xlu0 %v4840_v1 }
0x3a36   :  { %4844 = vmax.xlane.f32.xlu0 %v4843_v33 }
0x3ab3   :  { %v4839_v34 = vpop.xlane.xlu0 %4838 }
0x3ab4   :  { %v4847_v59 = vsub.f32 %v7643_v54, %v4839_v34 }
0x3ab6   :  { %v4852_v8 = vmul.f32 1.442695, %v4847_v59 }
0x3ab7   :  { %v4836_v9 = vpop.xlane.xlu0 %4835 }
0x3ab8   :  { %8045 = vpow2.f32 %v4852_v8  ;;  %v4846_v37 = vsub.f32 %v4815_v48, %v4836_v9 }
0x3aba   :  { %v4850_v24 = vmul.f32 1.442695, %v4846_v37 }
0x3abb   :  { %v4842_v63 = vpop.xlane.xlu0 %4841 }
0x3abc   :  { %8047 = vpow2.f32 %v4850_v24  ;;  %v4848_v49 = vsub.f32 %v4825_v58, %v4842_v63 }
0x3abe   :  { %v4854_v32 = vmul.f32 1.442695, %v4848_v49 }
0x3abf   :  { %v4845_v62 = vpop.xlane.xlu0 %4844 }
0x3ac0   :  { %8049 = vpow2.f32 %v4854_v32  ;;  %v4849_v11 = vsub.f32 %v7646_v2, %v4845_v62 }
0x3ac2   :  { %v4856_v12 = vmul.f32 1.442695, %v4849_v11 }
0x3ac4   :  { %8051 = vpow2.f32 %v4856_v12 }
0x3ac5   :  { %v8046_v21 = vpop.eup %8045 }
0x3ac6   :  { %v4861_v1 = vsel %vm965_vm3, %v8046_v21, 0.0 }
0x3ac7   :  { %4862 = vadd.xlane.f32.xlu0 %v4861_v1 }
0x3ac9   :  { %v8048_v33 = vpop.eup %8047 }
0x3aca   :  { %v4858_v54 = vsel %vm965_vm3, %v8048_v33, 0.0 }
0x3acb   :  { %4859 = vadd.xlane.f32.xlu0 %v4858_v54 }
0x3acd   :  { %v8050_v34 = vpop.eup %8049 }
0x3ace   :  { %v4864_v48 = vsel %vm965_vm3, %v8050_v34, 0.0 }
0x3acf   :  { %4865 = vadd.xlane.f32.xlu0 %v4864_v48 }
0x3ad1   :  { %v8052_v59 = vpop.eup %8051 }
0x3ad2   :  { %v4867_v58 = vsel %vm965_vm3, %v8052_v59, 0.0 }
0x3ad3   :  { %4868 = vadd.xlane.f32.xlu1 %v4867_v58 }
0x3b50   :  { %v4863_v8 = vpop.xlane.xlu0 %4862 }
0x3b51   :  { %8053 = vrcp.f32 %v4863_v8 }
0x3b54   :  { %v4860_v2 = vpop.xlane.xlu0 %4859 }
0x3b55   :  { %8055 = vrcp.f32 %v4860_v2 }
0x3b58   :  { %v4866_v9 = vpop.xlane.xlu0 %4865 }
0x3b59   :  { %8057 = vrcp.f32 %v4866_v9 }
0x3b5c   :  { %v4869_v37 = vpop.xlane.xlu1 %4868 }
0x3b5d   :  { %8059 = vrcp.f32 %v4869_v37 }
0x3b5e   :  { %v8054_v24 = vpop.eup %8053 }
0x3b5f   :  { %v4875_v32 = vmul.f32 %v8054_v24, %v8046_v21  ;;  %v10090_v24 = vld [vmem:[#allocation16_spill] sm:$0xff] }
0x3b62   :  { %v8056_v63 = vpop.eup %8055 }
0x3b63   :  { %v4874_v49 = vmul.f32 %v8056_v63, %v8048_v33  ;;  %v10091_v63 = vld [vmem:[#allocation17_spill] sm:$0xff] }
0x3b65   :  { %7651 = vmatprep.mubr.msk.f32.mxu1 %vm965_vm3, %v4874_v49  ;;  %v10092_v49 = vld [vmem:[#allocation18_spill] sm:$0xff] }
0x3b66   :  { %v8058_v62 = vpop.eup %8057  ;;  %7652 = vmatmul.mubr.msk.f32.vlgmr.msra.gmra.mxu1 %vm965_vm3, %v4875_v32 }
0x3b67   :  { %7658 = vmatpush3.msra.mxu1 %v8901_v55  ;;  %v4876_v11 = vmul.f32 %v8058_v62, %v8050_v34 }
0x3b68   :  { %7659 = vmatprep.subr.mxu1 %v10067_v50 }
0x3b69   :  { %7660 = vmatpush3.msra.mxu1 %v8905_v56  ;;  %7654 = vmatprep.mubr.msk.f32.mxu1 %vm965_vm3, %v4876_v11 }
0x3b6a   :  { %v8060_v12 = vpop.eup %8059  ;;  %7661 = vmatprep.subr.mxu1 %v10067_v50 }
0x3b6b   :  { %7662 = vmatpush3.msra.mxu1 %v8909_v0  ;;  %v4877_v21 = vmul.f32 %v8060_v12, %v8052_v59 }
0x3b6c   :  { %7663 = vmatprep.subr.mxu1 %v10067_v50 }
0x3b6d   :  { %7664 = vmatpush3.msra.mxu1 %v8912_v19 }
0x3b6e   :  { %7655 = vmatmul.mubr.msk.f32.gmra.mxu1 %vm965_vm3, %v4877_v21  ;;  %7679 = vmatprep.subr.mxu1 %v10067_v50 }
0x3b6f   :  { %7665 = vmatprep.mubr.msk.f32.mxu1 %vm8159_vm4, %v10067_v50 }
0x3c26   :  { %v7653_v1 = vpop.f32.mrf.mxu1 }
0x3c27   :  { %v4976_v48 = vmul.f32 %v7653_v1, %v8429_v18 }
0x3c28   :  { %v4956_v33 = vpop.f32.mrf.mxu1 }
0x3c29   :  { %v4975_v54 = vmul.f32 %v4956_v33, %v8461_v42 }
0x3c2b   :  { %v4977_v59 = vadd.f32 %v4976_v48, %v4975_v54 }
0x3c2e   :  { %v7656_v34 = vpop.f32.mrf.mxu1 }
0x3c2f   :  { %v4980_v2 = vmul.f32 %v7656_v34, %v8495_v57 }
0x3c30   :  { %v4966_v58 = vpop.f32.mrf.mxu1 }
0x3c31   :  { %v4978_v8 = vmul.f32 %v4966_v58, %v8481_v53 }
0x3c33   :  { %v4979_v9 = vadd.f32 %v4978_v8, %v4977_v59 }
0x3c35   :  { %v4981_v37 = vadd.f32 %v4980_v2, %v4979_v9 }
0x3c37   :  { %7666 = vmatmul.mubr.msk.f32.vlgmr.msra.gmra.mxu1 %vm233_vm0, %v4981_v37 }
0x3c38   :  { %7680 = vmatpush3.msra.mxu1 %v9026_v47  ;;  %7711 = vmatprep.mubr.msk.f32.mxu1 %vm8159_vm4, %v10067_v50 }
0x3c39   :  { %7681 = vmatprep.subr.mxu1 %v10067_v50 }
0x3c3a   :  { %7682 = vmatpush3.msra.mxu1 %v9045_v45 }
0x3c3b   :  { %7683 = vmatprep.subr.mxu1 %v10067_v50 }
0x3c3c   :  { %7684 = vmatpush3.msra.mxu1 %v9049_v40 }
0x3c3d   :  { %7685 = vmatprep.subr.mxu1 %v10067_v50 }
0x3c3e   :  { %7686 = vmatpush3.msra.mxu1 %v9052_v60 }
0x3c3f   :  { %7687 = vmatprep.subr.mxu1 %v10067_v50 }
0x3c40   :  { %7688 = vmatpush3.msra.mxu1 %v9057_v52 }
0x3c41   :  { %7689 = vmatprep.subr.mxu1 %v10067_v50 }
0x3c42   :  { %7690 = vmatpush3.msra.mxu1 %v9060_v31 }
0x3c43   :  { %7691 = vmatprep.subr.mxu1 %v10067_v50 }
0x3c44   :  { %7692 = vmatpush3.msra.mxu1 %v9065_v5 }
0x3c45   :  { %7693 = vmatprep.subr.mxu1 %v10067_v50 }
0x3c46   :  { %7694 = vmatpush3.msra.mxu1 %v9068_v35 }
0x3c47   :  { %7695 = vmatprep.subr.mxu1 %v10067_v50 }
0x3c48   :  { %7696 = vmatpush3.msra.mxu1 %v9073_v6 }
0x3c49   :  { %7697 = vmatprep.subr.mxu1 %v10067_v50 }
0x3c4a   :  { %7698 = vmatpush3.msra.mxu1 %v9076_v13 }
0x3c4b   :  { %7699 = vmatprep.subr.mxu1 %v10067_v50 }
0x3c4c   :  { %7700 = vmatpush3.msra.mxu1 %v10070_v61 }
0x3c4d   :  { %7701 = vmatprep.subr.mxu1 %v10067_v50 }
0x3c4e   :  { %7702 = vmatpush3.msra.mxu1 %v10071_v41 }
0x3c4f   :  { %7703 = vmatprep.subr.mxu1 %v10067_v50 }
0x3c50   :  { %7704 = vmatpush3.msra.mxu1 %v10072_v15 }
0x3c51   :  { %7705 = vmatprep.subr.mxu1 %v10067_v50 }
0x3c52   :  { %7706 = vmatpush3.msra.mxu1 %v10090_v24 }
0x3c53   :  { %7707 = vmatprep.subr.mxu1 %v10067_v50 }
0x3c54   :  { %7708 = vmatpush3.msra.mxu1 %v10091_v63 }
0x3c55   :  { %7709 = vmatprep.subr.mxu1 %v10067_v50 }
0x3c56   :  { %7710 = vmatpush3.msra.mxu1 %v10092_v49 }
0x3cf7   :  { %v5051_v32 = vpop.f32.mrf.mxu1 }
0x3cf8   :  { %v5055_v62 = vadd.f32 %v5051_v32, %v9566_v22  ;;  %v10093_v22 = vld [vmem:[#allocation11_spill] sm:$0xff]  ;;  %v10094_v32 = vld [vmem:[#allocation12_spill] sm:$0xff] }
0x3cf9   :  { %v7667_v11 = vpop.f32.mrf.mxu1 }
0x3cfa   :  { %v5056_v12 = vadd.f32 %v5055_v62, %v10076_v30  ;;  %v9688_v11 = vld [vmem:[%s9998_s1 + $0xb8] sm:$0xff] }
0x3cfc   :  { %v5057_v21 = vsel %vm233_vm0, %v5056_v12, 0.0 }
0x3cfd   :  { %5058 = vadd.xlane.f32.xlu0 %v5057_v21  ;;  %v9697_v21 = vld [vmem:[%s9998_s1 + $0xb0] sm:$0xff] }
0x3d86   :  { %v5059_v1 = vpop.xlane.xlu0 %5058 }
0x3d87   :  { %v5060_v33 = vmul.f32 0.03125, %v5059_v1  ;;  %v9704_v1 = vld [vmem:[%s9998_s1 + $0xa8] sm:$0xff] }
0x3d89   :  { %v5061_v54 = vsub.f32 %v5056_v12, %v5060_v33  ;;  %v9711_v33 = vld [vmem:[%s9998_s1 + $0xa0] sm:$0xff] }
0x3d8b   :  { %v5062_v34 = vmul.f32 %v5061_v54, %v5061_v54 }
0x3d8d   :  { %v5063_v48 = vsel %vm233_vm0, %v5062_v34, 0.0  ;;  %v9718_v34 = vld [vmem:[%s9997_s3 + $0x4] ss:$0 sm:$0xff] }
0x3d8e   :  { %5064 = vadd.xlane.f32.xlu1 %v5063_v48 }
0x3e17   :  { %v5065_v58 = vpop.xlane.xlu1 %5064 }
0x3e18   :  { %v5066_v59 = vmul.f32 0.03125, %v5065_v58 }
0x3e1a   :  { %v5067_v8 = vadd.f32 1e-05, %v5066_v59 }
0x3e1c   :  { %8061 = vrsqrt.f32 %v5067_v8 }
0x3e29   :  { %v8062_v2 = vpop.eup %8061 }
0x3e2a   :  { %v5069_v9 = vmul.f32 %v8062_v2, %v5061_v54 }
0x3e2c   :  { %v5070_v37 = vmul.f32 %v5069_v9, %v10093_v22 }
0x3e2e   :  { %v5071_v62 = vadd.f32 %v5070_v37, %v10094_v32 }
0x3e30   :  { %7677 = vmatmul.mubr.msk.f32.vlgmr.msra.gmra.mxu0 %vm233_vm0, %v5071_v62 }
0x3e31   :  { %7715 = vmatpush3.msra.mxu0 %v9688_v11  ;;  %7722 = vmatprep.mubr.msk.f32.mxu0 %vm8159_vm4, %v10067_v50 }
0x3e32   :  { %7716 = vmatprep.subr.mxu0 %v10067_v50 }
0x3e33   :  { %7717 = vmatpush3.msra.mxu0 %v9697_v21 }
0x3e34   :  { %7718 = vmatprep.subr.mxu0 %v10067_v50 }
0x3e35   :  { %7719 = vmatpush3.msra.mxu0 %v9704_v1 }
0x3e36   :  { %7720 = vmatprep.subr.mxu0 %v10067_v50 }
0x3e37   :  { %7721 = vmatpush3.msra.mxu0 %v9711_v33 }
0x3e38   :  { %7725 = vmatprep.subr.mxu0 %v10067_v50 }
0x3ef0   :  { %v5141_v54 = vpop.f32.mrf.mxu0 }
0x3ef1   :  { %v5142_v48 = vadd.f32 %v9718_v34, %v5141_v54 }
0x3ef2   :  { %v7678_v58 = vpop.f32.mrf.mxu0 }
0x3ef3   :  { %v5145_v59 = vmul.f32 %v5142_v48, %v5142_v48 }
0x3ef5   :  { %v5146_v8 = vmul.f32 %v5145_v59, %v5142_v48 }
0x3ef7   :  { %v5147_v2 = vmul.f32 0.044715, %v5146_v8 }
0x3ef9   :  { %v5148_v9 = vadd.f32 %v5147_v2, %v5142_v48 }
0x3efb   :  { %v5149_v37 = vmul.f32 0.7978846, %v5148_v9 }
0x3efd   :  { %8063 = vtanh.f32 %v5149_v37 }
0x3f0a   :  { %v8064_v62 = vpop.eup %8063 }
0x3f0b   :  { %v5151_v32 = vadd.f32 1.0, %v8064_v62 }
0x3f0d   :  { %v5152_v22 = vmul.f32 0.5, %v5151_v32 }
0x3f0f   :  { %v5153_v30 = vmul.f32 %v5152_v22, %v5142_v48 }
0x3f11   :  { %7712 = vmatmul.mubr.f32.vlgmr.msra.gmra.mxu1 %v5153_v30  ;;  %v10049_v30 = vrot.slane %v9413_v51, 4 }
0x3fd1   :  { %v5220_v49 = vpop.f32.mrf.mxu1 }
0x3fd2   :  { %v5224_v63 = vadd.f32 %v5220_v49, %v5056_v12 }
0x3fd3   :  { %v7713_v24 = vpop.f32.mrf.mxu1 }
0x3fd4   :  { %v5225_v15 = vadd.f32 %v9407_v23, %v5224_v63  ;;  %v10095_v23 = vrot.slane %v9413_v51, 5 }
0x3fd6   :  { %v5227_v41 = vsel %vm5226_vm1, %v5225_v15, 0.0 }
0x3fd7   :  { %5228 = vadd.xlane.f32.xlu0 %v5227_v41 }
0x4060   :  { %v5229_v54 = vpop.xlane.xlu0 %5228 }
0x4061   :  { %v5230_v58 = vmul.f32 0.03125, %v5229_v54 }
0x4063   :  { %v5231_v59 = vsub.f32 %v5225_v15, %v5230_v58 }
0x4065   :  { %v5232_v8 = vmul.f32 %v5231_v59, %v5231_v59 }
0x4067   :  { %v5233_v2 = vsel %vm5226_vm1, %v5232_v8, 0.0 }
0x4068   :  { %5234 = vadd.xlane.f32.xlu1 %v5233_v2  ;;  %v10096_v2 = vld [vmem:[#allocation20_spill] sm:$0xff] }
0x40f1   :  { %v5235_v9 = vpop.xlane.xlu1 %5234 }
0x40f2   :  { %v5236_v37 = vmul.f32 0.03125, %v5235_v9 }
0x40f4   :  { %v5237_v62 = vadd.f32 1e-05, %v5236_v37  ;;  %v10097_v37 = vld [vmem:[#allocation3_spill] sm:$0xff] }
0x40f6   :  { %8065 = vrsqrt.f32 %v5237_v62 }
0x4103   :  { %v8066_v22 = vpop.eup %8065 }
0x4104   :  { %v5239_v49 = vmul.f32 %v8066_v22, %v5231_v59 }
0x4106   :  { %v5242_v24 = vmul.f32 %v10049_v30, %v5239_v49  ;;  %v10098_v49 = vld [vmem:[#allocation2_spill] sm:$0xff] }
0x4107   :  { %vm5400_vm9 = vcmp.eq.s32.totalorder %v10098_v49, 3 }
0x4108   :  { %v5243_v41 = vadd.f32 %v5242_v24, %v10095_v23 }
0x410a   :  { %v5245_v63 = vrot.slane %v5243_v41, 2 }
0x410c   :  { %7723 = vmatmul.mubr.msk.f32.vlgmr.msra.gmra.mxu0 %vm233_vm0, %v5245_v63 }
0x410d   :  { %7726 = vmatpush3.xpose.msra.mxu0 %v9688_v11  ;;  %7733 = vmatprep.mubr.msk.f32.mxu0 %vm8159_vm4, %v10067_v50 }
0x410e   :  { %7727 = vmatprep.subr.mxu0 %v10067_v50 }
0x4111   :  { %7728 = vmatpush3.xpose.msra.mxu0 %v9697_v21 }
0x4112   :  { %7729 = vmatprep.subr.mxu0 %v10067_v50 }
0x4115   :  { %7730 = vmatpush3.xpose.msra.mxu0 %v9704_v1 }
0x4116   :  { %7731 = vmatprep.subr.mxu0 %v10067_v50 }
0x4119   :  { %7732 = vmatpush3.xpose.msra.mxu0 %v9711_v33 }
0x411a   :  { %7736 = vmatprep.subr.mxu0 %v10067_v50 }
0x41cc   :  { %v5314_v15 = vpop.f32.mrf.mxu0 }
0x41cd   :  { %v5318_v12 = vsel %vm2934_vm7, %v5314_v15, -1e+30 }
0x41ce   :  { %v5319_v32 = vsel %vm2936_vm8, %v5318_v12, -inf  ;;  %v7724_v48 = vpop.f32.mrf.mxu0 }
0x41cf   :  { %5320 = vmax.xlane.f32.xlu0 %v5319_v32 }
0x4258   :  { %v5321_v54 = vpop.xlane.xlu0 %5320 }
0x4259   :  { %vm5322_vm2 = vcmp.ge.f32.partialorder %v5318_v12, %v5321_v54 }
0x425a   :  { %v5323_v58 = vsel %vm5322_vm2, %v9163_v38, 128.0 }
0x425b   :  { %v5324_v59 = vsel %vm2936_vm8, %v5323_v58, inf }
0x425c   :  { %5325 = vmin.xlane.f32.xlu1 %v5324_v59 }
0x42e5   :  { %v9743_v8 = vpop.xlane.xlu1 %5325 }
0x42e6   :  { %vm5327_vm6 = vcmp.eq.f32.partialorder %v9163_v38, %v9743_v8 }
0x42e7   :  { %7734 = vmatmul.mubr.msk.f32.vlgmr.msra.gmra.mxu0 %vm5327_vm6, %v10081_v28 }
0x42e8   :  { %7737 = vmatpush3.msra.mxu0 %v9444_v17  ;;  %7744 = vmatprep.mubr.msk.f32.mxu0 %vm8159_vm4, %v10067_v50  ;;  %v8148_v17 = vld [vmem:[%s9997_s3 + $0x28] sm:$0xff] }
0x42e9   :  { %7738 = vmatprep.subr.mxu0 %v10067_v50 }
0x42ea   :  { %7739 = vmatpush3.msra.mxu0 %v9453_v14 }
0x42eb   :  { %7740 = vmatprep.subr.mxu0 %v10067_v50 }
0x42ec   :  { %7741 = vmatpush3.msra.mxu0 %v9460_v46 }
0x42ed   :  { %7742 = vmatprep.subr.mxu0 %v10067_v50 }
0x42ee   :  { %7743 = vmatpush3.msra.mxu0 %v10096_v2  ;;  %v10100_v2 = vld [vmem:[#allocation5_spill] sm:$0xff] }
0x43a7   :  { %v5396_v9 = vpop.f32.mrf.mxu0 }
0x43a8   :  { %v5404_v28 = vrot.slane %v5396_v9, %v10097_v37 }
0x43a9   :  { %v7735_v62 = vpop.f32.mrf.mxu0 }
0x43aa   :  { %v5405_v22 = vadd.f32 %v8148_v17, %v5404_v28  ;;  %v10101_v62 = vld [vmem:[#allocation21_spill] sm:$0xff] }
0x43ac   :  { %v9765_v14 = vsel %vm5400_vm9, %v5405_v22, %v9476_v16  ;;  %v10099_v16 = vld [vmem:[#allocation4_spill] sm:$0xff] }
0x43ad   :  { %v5414_v46 = vsel %vm233_vm0, %v9765_v14, 0.0 }
0x43ae   :  { %5415 = vadd.xlane.f32.xlu0 %v5414_v46 }
0x4437   :  { %v5416_v24 = vpop.xlane.xlu0 %5415 }
0x4438   :  { %v5417_v23 = vmul.f32 0.03125, %v5416_v24 }
0x443a   :  { %v5418_v41 = vsub.f32 %v9765_v14, %v5417_v23 }
0x443c   :  { %v5419_v63 = vmul.f32 %v5418_v41, %v5418_v41 }
0x443e   :  { %v5420_v15 = vsel %vm233_vm0, %v5419_v63, 0.0 }
0x443f   :  { %5421 = vadd.xlane.f32.xlu1 %v5420_v15  ;;  %v10102_v15 = vld [vmem:[#allocation6_spill] sm:$0xff] }
0x44c8   :  { %v5422_v12 = vpop.xlane.xlu1 %5421 }
0x44c9   :  { %v5423_v32 = vmul.f32 0.03125, %v5422_v12 }
0x44cb   :  { %v5424_v48 = vadd.f32 1e-05, %v5423_v32  ;;  %v10103_v32 = vld [vmem:[#allocation7_spill] sm:$0xff] }
0x44cd   :  { %8067 = vrsqrt.f32 %v5424_v48  ;;  %v10104_v48 = vld [vmem:[#allocation8_spill] sm:$0xff] }
0x44da   :  { %v8068_v54 = vpop.eup %8067 }
0x44db   :  { %v5426_v58 = vmul.f32 %v8068_v54, %v5418_v41  ;;  %v10105_v54 = vld [vmem:[#allocation9_spill] sm:$0xff] }
0x44dd   :  { %v5427_v59 = vmul.f32 %v5426_v58, %v10099_v16  ;;  %v10106_v16 = vld [vmem:[#allocation22_spill] sm:$0xff] }
0x44df   :  { %v5428_v9 = vadd.f32 %v5427_v59, %v10100_v2 }
0x44e1   :  { %7745 = vmatmul.mubr.msk.f32.vlgmr.msra.gmra.mxu0 %vm233_vm0, %v5428_v9 }
0x45a1   :  { %v5498_v28 = vpop.f32.mrf.mxu0 }
0x45a2   :  { %v9775_v17 = vadd.f32 %v10101_v62, %v5498_v28 }
0x45a3   :  { %v7746_v22 = vpop.f32.mrf.mxu0 }
0x45a4   :  { %v5502_v46 = vmul.f32 0.35355338, %v9775_v17  ;;  %5508 = vrot.lane.b32.xlu0 %v9775_v17, %s8156_s29 }
0x45a6   :  { %v5503_v24 = vmul.f32 %v5502_v46, %v8461_v42  ;;  %v5504_v41 = vmul.f32 %v5502_v46, %v8429_v18  ;;  %v5505_v63 = vmul.f32 %v5502_v46, %v8481_v53  ;;  %v5506_v12 = vmul.f32 %v5502_v46, %v8495_v57 }
0x45a8   :  { %7749 = vmatprep.mubr.msk.f32.mxu1 %vm233_vm0, %v5503_v24 }
0x4616   :  { %v5509_v23 = vpop.permute.xlu0 %5508 }
0x4617   :  { %7747 = vmatprep.subr.msk.mxu1 %vm233_vm0, %v5509_v23 }
0x4618   :  { %7748 = vmatpush3.xpose.msk.msra.mxu1 %vm233_vm0, %v5509_v23 }
0x4619   :  { %7763 = vmatprep.subr.mxu1 %v10067_v50 }
0x461b   :  { %7750 = vmatmul.mubr.msk.f32.vlgmr.msra.gmra.mxu1 %vm233_vm0, %v5504_v41 }
0x461c   :  { %7752 = vmatprep.mubr.msk.f32.mxu1 %vm233_vm0, %v5505_v63  ;;  %7764 = vmatpush3.msra.mxu1 %v10102_v15 }
0x461d   :  { %7765 = vmatprep.subr.mxu1 %v10067_v50 }
0x461e   :  { %7766 = vmatpush3.msra.mxu1 %v10103_v32 }
0x461f   :  { %7753 = vmatmul.mubr.msk.f32.gmra.mxu1 %vm233_vm0, %v5506_v12  ;;  %7767 = vmatprep.subr.mxu1 %v10067_v50 }
0x4620   :  { %7768 = vmatpush3.msra.mxu1 %v10104_v48  ;;  %7771 = vmatprep.mubr.msk.f32.mxu1 %vm8159_vm4, %v10067_v50 }
0x4621   :  { %7769 = vmatprep.subr.mxu1 %v10067_v50 }
0x4622   :  { %7770 = vmatpush3.msra.mxu1 %v10105_v54 }
0x4623   :  { %7785 = vmatprep.subr.msk.mxu1 %vm233_vm0, %v8818_v3 }
0x46db   :  { %v7751_v58 = vpop.f32.mrf.mxu1 }
0x46dc   :  { %v5596_v59 = vadd.f32 %v10106_v16, %v7751_v58 }
0x46dd   :  { %v5590_v2 = vpop.f32.mrf.mxu1 }
0x46de   :  { %v5591_v9 = vadd.f32 %v10106_v16, %v5590_v2  ;;  %v5612_v28 = vsel %vm1908_vm5, %v5596_v59, -inf }
0x46df   :  { %5613 = vmax.xlane.f32.xlu1 %v5612_v28  ;;  %v7754_v62 = vpop.f32.mrf.mxu1 }
0x46e0   :  { %v5609_v24 = vsel %vm1908_vm5, %v5591_v9, -inf  ;;  %v5606_v23 = vadd.f32 %v10106_v16, %v7754_v62 }
0x46e1   :  { %v5600_v22 = vpop.f32.mrf.mxu1 }
0x46e2   :  { %v5601_v46 = vadd.f32 %v10106_v16, %v5600_v22  ;;  %v5618_v63 = vsel %vm1908_vm5, %v5606_v23, -inf }
0x46e3   :  { %5610 = vmax.xlane.f32.xlu1 %v5609_v24 }
0x46e4   :  { %v5615_v41 = vsel %vm1908_vm5, %v5601_v46, -inf }
0x46e7   :  { %5616 = vmax.xlane.f32.xlu1 %v5615_v41 }
0x46eb   :  { %5619 = vmax.xlane.f32.xlu1 %v5618_v63 }
0x4768   :  { %v5614_v15 = vpop.xlane.xlu1 %5613 }
0x4769   :  { %v5622_v12 = vsub.f32 %v5596_v59, %v5614_v15 }
0x476b   :  { %v5627_v32 = vmul.f32 1.442695, %v5622_v12 }
0x476c   :  { %v5611_v48 = vpop.xlane.xlu1 %5610 }
0x476d   :  { %8069 = vpow2.f32 %v5627_v32  ;;  %v5621_v54 = vsub.f32 %v5591_v9, %v5611_v48 }
0x476f   :  { %v5625_v58 = vmul.f32 1.442695, %v5621_v54 }
0x4770   :  { %v5617_v2 = vpop.xlane.xlu1 %5616 }
0x4771   :  { %8071 = vpow2.f32 %v5625_v58  ;;  %v5623_v28 = vsub.f32 %v5601_v46, %v5617_v2 }
0x4773   :  { %v5629_v22 = vmul.f32 1.442695, %v5623_v28 }
0x4774   :  { %v5620_v24 = vpop.xlane.xlu1 %5619 }
0x4775   :  { %8073 = vpow2.f32 %v5629_v22  ;;  %v5624_v16 = vsub.f32 %v5606_v23, %v5620_v24  ;;  %v8149_v24 = vld [vmem:[%s9998_s1 + $0x58] sm:$0xff] }
0x4777   :  { %v5631_v62 = vmul.f32 1.442695, %v5624_v16 }
0x4779   :  { %8075 = vpow2.f32 %v5631_v62  ;;  %v8150_v62 = vld [vmem:[%s9998_s1 + $0x50] sm:$0xff] }
0x477a   :  { %v8070_v41 = vpop.eup %8069 }
0x477b   :  { %v5636_v30 = vsel %vm1908_vm5, %v8070_v41, 0.0 }
0x477c   :  { %5637 = vadd.xlane.f32.xlu1 %v5636_v30 }
0x477e   :  { %v8072_v63 = vpop.eup %8071 }
0x477f   :  { %v5633_v59 = vsel %vm1908_vm5, %v8072_v63, 0.0 }
0x4780   :  { %5634 = vadd.xlane.f32.xlu1 %v5633_v59 }
0x4782   :  { %v8074_v15 = vpop.eup %8073 }
0x4783   :  { %v5639_v9 = vsel %vm1908_vm5, %v8074_v15, 0.0 }
0x4784   :  { %5640 = vadd.xlane.f32.xlu0 %v5639_v9 }
0x4786   :  { %v8076_v12 = vpop.eup %8075 }
0x4787   :  { %v5642_v46 = vsel %vm1908_vm5, %v8076_v12, 0.0 }
0x4788   :  { %5643 = vadd.xlane.f32.xlu1 %v5642_v46 }
0x4799   :  { %5653 = vrot.lane.b32.xlu1 %v9775_v17, %s8155_s19 }
0x4805   :  { %v5638_v23 = vpop.xlane.xlu1 %5637 }
0x4806   :  { %8077 = vrcp.f32 %v5638_v23 }
0x4809   :  { %v5635_v32 = vpop.xlane.xlu1 %5634 }
0x480a   :  { %8079 = vrcp.f32 %v5635_v32 }
0x480d   :  { %v5641_v30 = vpop.xlane.xlu0 %5640 }
0x480e   :  { %8081 = vrcp.f32 %v5641_v30 }
0x4811   :  { %v5644_v48 = vpop.xlane.xlu1 %5643 }
0x4812   :  { %8083 = vrcp.f32 %v5644_v48 }
0x4813   :  { %v8078_v58 = vpop.eup %8077 }
0x4814   :  { %v5650_v22 = vmul.f32 %v8078_v58, %v8070_v41 }
0x4815   :  { %v5654_v54 = vpop.permute.xlu1 %5653 }
0x4816   :  { %7755 = vmatprep.subr.mxu0 %v5654_v54 }
0x4817   :  { %v8080_v2 = vpop.eup %8079  ;;  %7756 = vmatpush3.msra.mxu0 %v5654_v54 }
0x4818   :  { %v5649_v28 = vmul.f32 %v8080_v2, %v8072_v63  ;;  %7774 = vmatprep.subr.mxu0 %v10067_v50  ;;  %v8151_v63 = vld [vmem:[%s9998_s1 + $0x48] sm:$0xff] }
0x481a   :  { %7757 = vmatprep.mubr.msk.f32.mxu0 %vm1908_vm5, %v5649_v28 }
0x481b   :  { %v8082_v17 = vpop.eup %8081  ;;  %7758 = vmatmul.mubr.msk.f32.vlgmr.msra.gmra.mxu0 %vm1908_vm5, %v5650_v22 }
0x481c   :  { %7775 = vmatpush3.msra.mxu0 %v8149_v24  ;;  %v5651_v16 = vmul.f32 %v8082_v17, %v8074_v15  ;;  %v8152_v15 = vld [vmem:[%s9998_s1 + $0x40] sm:$0xff] }
0x481d   :  { %7776 = vmatprep.subr.mxu0 %v10067_v50 }
0x481e   :  { %7777 = vmatpush3.msra.mxu0 %v8150_v62  ;;  %7760 = vmatprep.mubr.msk.f32.mxu0 %vm1908_vm5, %v5651_v16 }
0x481f   :  { %v8084_v41 = vpop.eup %8083  ;;  %7778 = vmatprep.subr.mxu0 %v10067_v50 }
0x4820   :  { %7779 = vmatpush3.msra.mxu0 %v8151_v63  ;;  %v5652_v59 = vmul.f32 %v8084_v41, %v8076_v12 }
0x4821   :  { %7780 = vmatprep.subr.mxu0 %v10067_v50 }
0x4822   :  { %7781 = vmatpush3.msra.mxu0 %v8152_v15 }
0x4823   :  { %7761 = vmatmul.mubr.msk.f32.gmra.mxu0 %vm1908_vm5, %v5652_v59  ;;  %7795 = vmatprep.subr.mxu0 %v8886_v25  ;;  %vm1694_vm5 = vcmp.eq.s32.totalorder %v10098_v49, 0 }
0x4824   :  { %7782 = vmatprep.mubr.msk.f32.mxu0 %vm8159_vm4, %v10067_v50 }
0x48db   :  { %v7759_v9 = vpop.f32.mrf.mxu0 }
0x48dc   :  { %v5754_v12 = vmul.f32 %v7759_v9, %v8429_v18 }
0x48dd   :  { %v5734_v46 = vpop.f32.mrf.mxu0 }
0x48de   :  { %v5753_v23 = vmul.f32 %v5734_v46, %v8461_v42 }
0x48e0   :  { %v5755_v48 = vadd.f32 %v5754_v12, %v5753_v23 }
0x48e3   :  { %v7762_v32 = vpop.f32.mrf.mxu0 }
0x48e4   :  { %v5758_v58 = vmul.f32 %v7762_v32, %v8495_v57 }
0x48e5   :  { %v5744_v30 = vpop.f32.mrf.mxu0 }
0x48e6   :  { %v5756_v54 = vmul.f32 %v5744_v30, %v8481_v53 }
0x48e8   :  { %v5757_v2 = vadd.f32 %v5756_v54, %v5755_v48 }
0x48ea   :  { %v5759_v28 = vadd.f32 %v5758_v58, %v5757_v2 }
0x48ec   :  { %7772 = vmatmul.mubr.msk.f32.vlgmr.msra.gmra.mxu1 %vm233_vm0, %v5759_v28 }
0x48ed   :  { %7786 = vmatpush3.xpose.msk.msra.mxu1 %vm233_vm0, %v8818_v3 }
0x48ee   :  { %7787 = vmatprep.subr.msk.mxu1 %vm233_vm0, %v8821_v4 }
0x48f1   :  { %7788 = vmatpush3.xpose.msk.msra.mxu1 %vm233_vm0, %v8821_v4 }
0x48f2   :  { %7816 = vmatprep.subr.mxu1 %v10067_v50 }
0x49ac   :  { %v5829_v22 = vpop.f32.mrf.mxu1 }
0x49ad   :  { %v5833_v17 = vadd.f32 %v5829_v22, %v9765_v14 }
0x49ae   :  { %v7773_v24 = vpop.f32.mrf.mxu1 }
0x49af   :  { %v9853_v16 = vadd.f32 %v5833_v17, %v8806_v39 }
0x49b1   :  { %v5835_v62 = vsel %vm233_vm0, %v9853_v16, 0.0 }
0x49b2   :  { %5836 = vadd.xlane.f32.xlu1 %v5835_v62 }
0x4a3b   :  { %v5837_v3 = vpop.xlane.xlu1 %5836 }
0x4a3c   :  { %v5838_v41 = vmul.f32 0.03125, %v5837_v3 }
0x4a3e   :  { %v5839_v63 = vsub.f32 %v9853_v16, %v5838_v41 }
0x4a40   :  { %v5840_v59 = vmul.f32 %v5839_v63, %v5839_v63 }
0x4a42   :  { %v5841_v4 = vsel %vm233_vm0, %v5840_v59, 0.0 }
0x4a43   :  { %5842 = vadd.xlane.f32.xlu0 %v5841_v4 }
0x4acc   :  { %v5843_v15 = vpop.xlane.xlu0 %5842 }
0x4acd   :  { %v5844_v9 = vmul.f32 0.03125, %v5843_v15 }
0x4acf   :  { %v5845_v46 = vadd.f32 1e-05, %v5844_v9 }
0x4ad1   :  { %8085 = vrsqrt.f32 %v5845_v46 }
0x4ade   :  { %v8086_v14 = vpop.eup %8085 }
0x4adf   :  { %v5847_v23 = vmul.f32 %v8086_v14, %v5839_v63 }
0x4ae1   :  { %v5848_v39 = vmul.f32 %v5847_v23, %v8837_v7 }
0x4ae3   :  { %v5849_v32 = vadd.f32 %v5848_v39, %v8841_v10 }
0x4ae5   :  { %7783 = vmatmul.mubr.msk.f32.vlgmr.msra.gmra.mxu0 %vm233_vm0, %v5849_v32 }
0x4ae6   :  { %7796 = vmatpush3.msra.mxu0 %v8886_v25 }
0x4ae7   :  { %7797 = vmatprep.subr.mxu0 %v8890_v20 }
0x4ae8   :  { %7798 = vmatpush3.msra.mxu0 %v8890_v20 }
0x4ae9   :  { %7805 = vmatprep.subr.mxu0 %v10067_v50 }
0x4ba5   :  { %v5919_v12 = vpop.f32.mrf.mxu0 }
0x4ba6   :  { %v5920_v30 = vadd.f32 %v5919_v12, %v8846_v43 }
0x4ba7   :  { %v7784_v48 = vpop.f32.mrf.mxu0 }
0x4ba8   :  { %v5923_v54 = vmul.f32 0.35355338, %v5920_v30 }
0x4baa   :  { %v5925_v58 = vmul.f32 %v5923_v54, %v8429_v18  ;;  %v5924_v7 = vmul.f32 %v5923_v54, %v8461_v42  ;;  %v5926_v10 = vmul.f32 %v5923_v54, %v8481_v53  ;;  %v5927_v25 = vmul.f32 %v5923_v54, %v8495_v57 }
0x4bac   :  { %7789 = vmatprep.mubr.msk.f32.mxu1 %vm233_vm0, %v5924_v7 }
0x4bad   :  { %7790 = vmatmul.mubr.msk.f32.vlgmr.msra.gmra.mxu1 %vm233_vm0, %v5925_v58 }
0x4bae   :  { %7792 = vmatprep.mubr.msk.f32.mxu1 %vm233_vm0, %v5926_v10  ;;  %7817 = vmatpush3.msra.mxu1 %v9589_v26 }
0x4baf   :  { %7818 = vmatprep.subr.mxu1 %v10067_v50 }
0x4bb0   :  { %7819 = vmatpush3.msra.mxu1 %v9597_v36 }
0x4bb1   :  { %7793 = vmatmul.mubr.msk.f32.gmra.mxu1 %vm233_vm0, %v5927_v25  ;;  %7820 = vmatprep.subr.mxu1 %v10067_v50 }
0x4bb2   :  { %7821 = vmatpush3.msra.mxu1 %v9605_v29  ;;  %7824 = vmatprep.mubr.msk.f32.mxu1 %vm8159_vm4, %v10067_v50 }
0x4bb3   :  { %7822 = vmatprep.subr.mxu1 %v10067_v50 }
0x4bb4   :  { %7823 = vmatpush3.msra.mxu1 %v9614_v27 }
0x4bb5   :  { %7862 = vmatprep.subr.mxu1 %v10067_v50 }
0x4c6d   :  { %v7791_v43 = vpop.f32.mrf.mxu1 }
0x4c6e   :  { %v6028_v20 = vsel %vm965_vm3, %v7791_v43, -inf }
0x4c6f   :  { %6029 = vmax.xlane.f32.xlu0 %v6028_v20  ;;  %v6006_v26 = vpop.f32.mrf.mxu1 }
0x4c70   :  { %v6025_v2 = vsel %vm965_vm3, %v6006_v26, -inf }
0x4c71   :  { %v7794_v36 = vpop.f32.mrf.mxu1 }
0x4c72   :  { %v6034_v22 = vsel %vm965_vm3, %v7794_v36, -inf }
0x4c73   :  { %6026 = vmax.xlane.f32.xlu0 %v6025_v2  ;;  %v6016_v28 = vpop.f32.mrf.mxu1 }
0x4c74   :  { %v6031_v29 = vsel %vm965_vm3, %v6016_v28, -inf }
0x4c77   :  { %6032 = vmax.xlane.f32.xlu0 %v6031_v29 }
0x4c7b   :  { %6035 = vmax.xlane.f32.xlu0 %v6034_v22 }
0x4cf8   :  { %v6030_v17 = vpop.xlane.xlu0 %6029 }
0x4cf9   :  { %v6038_v27 = vsub.f32 %v7791_v43, %v6030_v17 }
0x4cfb   :  { %v6043_v24 = vmul.f32 1.442695, %v6038_v27 }
0x4cfc   :  { %v6027_v62 = vpop.xlane.xlu0 %6026 }
0x4cfd   :  { %8087 = vpow2.f32 %v6043_v24  ;;  %v6037_v3 = vsub.f32 %v6006_v26, %v6027_v62 }
0x4cff   :  { %v6041_v41 = vmul.f32 1.442695, %v6037_v3 }
0x4d00   :  { %v6033_v63 = vpop.xlane.xlu0 %6032 }
0x4d01   :  { %8089 = vpow2.f32 %v6041_v41  ;;  %v6039_v59 = vsub.f32 %v6016_v28, %v6033_v63 }
0x4d03   :  { %v6045_v4 = vmul.f32 1.442695, %v6039_v59 }
0x4d04   :  { %v6036_v15 = vpop.xlane.xlu0 %6035 }
0x4d05   :  { %8091 = vpow2.f32 %v6045_v4  ;;  %v6040_v9 = vsub.f32 %v7794_v36, %v6036_v15 }
0x4d07   :  { %v6047_v46 = vmul.f32 1.442695, %v6040_v9 }
0x4d09   :  { %8093 = vpow2.f32 %v6047_v46 }
0x4d0a   :  { %v8088_v14 = vpop.eup %8087 }
0x4d0b   :  { %v6052_v23 = vsel %vm965_vm3, %v8088_v14, 0.0 }
0x4d0c   :  { %6053 = vadd.xlane.f32.xlu0 %v6052_v23 }
0x4d0e   :  { %v8090_v39 = vpop.eup %8089 }
0x4d0f   :  { %v6049_v32 = vsel %vm965_vm3, %v8090_v39, 0.0 }
0x4d10   :  { %6050 = vadd.xlane.f32.xlu0 %v6049_v32 }
0x4d12   :  { %v8092_v12 = vpop.eup %8091 }
0x4d13   :  { %v6055_v30 = vsel %vm965_vm3, %v8092_v12, 0.0 }
0x4d14   :  { %6056 = vadd.xlane.f32.xlu0 %v6055_v30 }
0x4d16   :  { %v8094_v48 = vpop.eup %8093 }
0x4d17   :  { %v6058_v54 = vsel %vm965_vm3, %v8094_v48, 0.0 }
0x4d18   :  { %6059 = vadd.xlane.f32.xlu1 %v6058_v54 }
0x4d95   :  { %v6054_v58 = vpop.xlane.xlu0 %6053 }
0x4d96   :  { %8095 = vrcp.f32 %v6054_v58 }
0x4d99   :  { %v6051_v7 = vpop.xlane.xlu0 %6050 }
0x4d9a   :  { %8097 = vrcp.f32 %v6051_v7 }
0x4d9d   :  { %v6057_v10 = vpop.xlane.xlu0 %6056 }
0x4d9e   :  { %8099 = vrcp.f32 %v6057_v10 }
0x4da1   :  { %v6060_v25 = vpop.xlane.xlu1 %6059 }
0x4da2   :  { %8101 = vrcp.f32 %v6060_v25 }
0x4da3   :  { %v8096_v43 = vpop.eup %8095 }
0x4da4   :  { %v6066_v36 = vmul.f32 %v8096_v43, %v8088_v14 }
0x4da7   :  { %v8098_v20 = vpop.eup %8097 }
0x4da8   :  { %v6065_v26 = vmul.f32 %v8098_v20, %v8090_v39  ;;  %v10114_v39 = vld [vmem:[#allocation12_spill] sm:$0xff] }
0x4daa   :  { %7799 = vmatprep.mubr.msk.f32.mxu0 %vm965_vm3, %v6065_v26 }
0x4dab   :  { %v8100_v2 = vpop.eup %8099  ;;  %7800 = vmatmul.mubr.msk.f32.vlgmr.msra.gmra.mxu0 %vm965_vm3, %v6066_v36 }
0x4dac   :  { %7806 = vmatpush3.msra.mxu0 %v8901_v55  ;;  %v6067_v28 = vmul.f32 %v8100_v2, %v8092_v12 }
0x4dad   :  { %7807 = vmatprep.subr.mxu0 %v10067_v50 }
0x4dae   :  { %7808 = vmatpush3.msra.mxu0 %v8905_v56  ;;  %7802 = vmatprep.mubr.msk.f32.mxu0 %vm965_vm3, %v6067_v28 }
0x4daf   :  { %v8102_v29 = vpop.eup %8101  ;;  %7809 = vmatprep.subr.mxu0 %v10067_v50 }
0x4db0   :  { %7810 = vmatpush3.msra.mxu0 %v8909_v0  ;;  %v6068_v22 = vmul.f32 %v8102_v29, %v8094_v48 }
0x4db1   :  { %7811 = vmatprep.subr.mxu0 %v10067_v50 }
0x4db2   :  { %7812 = vmatpush3.msra.mxu0 %v8912_v19 }
0x4db3   :  { %7803 = vmatmul.mubr.msk.f32.gmra.mxu0 %vm965_vm3, %v6068_v22  ;;  %7827 = vmatprep.subr.mxu0 %v10067_v50  ;;  %vm6417_vm3 = vcmask 257027  }
0x4db4   :  { %7813 = vmatprep.mubr.msk.f32.mxu0 %vm8159_vm4, %v10067_v50 }
0x4e6b   :  { %v7801_v55 = vpop.f32.mrf.mxu0 }
0x4e6c   :  { %v6167_v24 = vmul.f32 %v7801_v55, %v8429_v18  ;;  %v10107_v18 = vld [vmem:[#allocation14_spill] sm:$0xff] }
0x4e6d   :  { %v6147_v56 = vpop.f32.mrf.mxu0 }
0x4e6e   :  { %v6166_v17 = vmul.f32 %v6147_v56, %v8461_v42  ;;  %v10108_v42 = vld [vmem:[#allocation15_spill] sm:$0xff] }
0x4e70   :  { %v6168_v62 = vadd.f32 %v6167_v24, %v6166_v17 }
0x4e73   :  { %v7804_v27 = vpop.f32.mrf.mxu0 }
0x4e74   :  { %v6171_v19 = vmul.f32 %v7804_v27, %v8495_v57  ;;  %v10110_v57 = vld [vmem:[#allocation17_spill] sm:$0xff] }
0x4e75   :  { %v6157_v0 = vpop.f32.mrf.mxu0 }
0x4e76   :  { %v6169_v3 = vmul.f32 %v6157_v0, %v8481_v53  ;;  %v10109_v53 = vld [vmem:[#allocation16_spill] sm:$0xff] }
0x4e77   :  { %v8154_v0 = vld [vmem:[%s9997_s3 + $0x10] sm:$0xff] }
0x4e78   :  { %v6170_v41 = vadd.f32 %v6169_v3, %v6168_v62  ;;  %v6431_v62 = vrot.slane %v8154_v0, 3 }
0x4e7a   :  { %v6172_v63 = vadd.f32 %v6171_v19, %v6170_v41 }
0x4e7c   :  { %7814 = vmatmul.mubr.msk.f32.vlgmr.msra.gmra.mxu0 %vm233_vm0, %v6172_v63  ;;  %v10115_v63 = vrot.slane %v9413_v51, 4  ;;  %v10116_v51 = vld [vmem:[#allocation19_spill] sm:$0xff] }
0x4e7d   :  { %7828 = vmatpush3.msra.mxu0 %v9026_v47  ;;  %7859 = vmatprep.mubr.msk.f32.mxu0 %vm8159_vm4, %v10067_v50  ;;  %v10111_v47 = vld [vmem:[#allocation18_spill] sm:$0xff] }
0x4e7e   :  { %7829 = vmatprep.subr.mxu0 %v10067_v50 }
0x4e7f   :  { %7830 = vmatpush3.msra.mxu0 %v9045_v45 }
0x4e80   :  { %7831 = vmatprep.subr.mxu0 %v10067_v50 }
0x4e81   :  { %7832 = vmatpush3.msra.mxu0 %v9049_v40 }
0x4e82   :  { %7833 = vmatprep.subr.mxu0 %v10067_v50 }
0x4e83   :  { %7834 = vmatpush3.msra.mxu0 %v9052_v60 }
0x4e84   :  { %7835 = vmatprep.subr.mxu0 %v10067_v50 }
0x4e85   :  { %7836 = vmatpush3.msra.mxu0 %v9057_v52  ;;  %v10112_v52 = vld [vmem:[#allocation10_spill] sm:$0xff] }
0x4e86   :  { %7837 = vmatprep.subr.mxu0 %v10067_v50 }
0x4e87   :  { %7838 = vmatpush3.msra.mxu0 %v9060_v31 }
0x4e88   :  { %7839 = vmatprep.subr.mxu0 %v10067_v50 }
0x4e89   :  { %7840 = vmatpush3.msra.mxu0 %v9065_v5 }
0x4e8a   :  { %7841 = vmatprep.subr.mxu0 %v10067_v50 }
0x4e8b   :  { %7842 = vmatpush3.msra.mxu0 %v9068_v35 }
0x4e8c   :  { %7843 = vmatprep.subr.mxu0 %v10067_v50 }
0x4e8d   :  { %7844 = vmatpush3.msra.mxu0 %v9073_v6 }
0x4e8e   :  { %7845 = vmatprep.subr.mxu0 %v10067_v50 }
0x4e8f   :  { %7846 = vmatpush3.msra.mxu0 %v9076_v13 }
0x4e90   :  { %7847 = vmatprep.subr.mxu0 %v10067_v50 }
0x4e91   :  { %7848 = vmatpush3.msra.mxu0 %v10070_v61 }
0x4e92   :  { %7849 = vmatprep.subr.mxu0 %v10067_v50 }
0x4e93   :  { %7850 = vmatpush3.msra.mxu0 %v10107_v18 }
0x4e94   :  { %7851 = vmatprep.subr.mxu0 %v10067_v50 }
0x4e95   :  { %7852 = vmatpush3.msra.mxu0 %v10108_v42 }
0x4e96   :  { %7853 = vmatprep.subr.mxu0 %v10067_v50 }
0x4e97   :  { %7854 = vmatpush3.msra.mxu0 %v10109_v53 }
0x4e98   :  { %7855 = vmatprep.subr.mxu0 %v10067_v50 }
0x4e99   :  { %7856 = vmatpush3.msra.mxu0 %v10110_v57 }
0x4e9a   :  { %7857 = vmatprep.subr.mxu0 %v10067_v50 }
0x4e9b   :  { %7858 = vmatpush3.msra.mxu0 %v10111_v47 }
0x4f3c   :  { %v6242_v45 = vpop.f32.mrf.mxu0 }
0x4f3d   :  { %v6246_v40 = vadd.f32 %v6242_v45, %v9853_v16  ;;  %v10113_v16 = vld [vmem:[#allocation11_spill] sm:$0xff] }
0x4f3e   :  { %v7815_v60 = vpop.f32.mrf.mxu0 }
0x4f3f   :  { %v6247_v31 = vadd.f32 %v6246_v40, %v10112_v52 }
0x4f41   :  { %v6248_v5 = vsel %vm233_vm0, %v6247_v31, 0.0 }
0x4f42   :  { %6249 = vadd.xlane.f32.xlu0 %v6248_v5  ;;  %v1695_v5 = vsel %vm1694_vm5, 1.0, %v10067_v50 }
0x4fcb   :  { %v6250_v35 = vpop.xlane.xlu0 %6249 }
0x4fcc   :  { %v6251_v6 = vmul.f32 0.03125, %v6250_v35  ;;  %v4221_v35 = vrot.slane %v10117_v44, %v10097_v37 }
0x4fce   :  { %v6252_v13 = vsub.f32 %v6247_v31, %v6251_v6  ;;  %v5412_v6 = vrot.slane %v9743_v8, %v10097_v37 }
0x4fd0   :  { %v6253_v61 = vmul.f32 %v6252_v13, %v6252_v13 }
0x4fd2   :  { %v6254_v59 = vsel %vm233_vm0, %v6253_v61, 0.0 }
0x4fd3   :  { %6255 = vadd.xlane.f32.xlu1 %v6254_v59 }
0x505c   :  { %v6256_v4 = vpop.xlane.xlu1 %6255 }
0x505d   :  { %v6257_v15 = vmul.f32 0.03125, %v6256_v4 }
0x505f   :  { %v6258_v9 = vadd.f32 1e-05, %v6257_v15 }
0x5061   :  { %8103 = vrsqrt.f32 %v6258_v9 }
0x506e   :  { %v8104_v46 = vpop.eup %8103 }
0x506f   :  { %v6260_v14 = vmul.f32 %v8104_v46, %v6252_v13 }
0x5071   :  { %v6261_v23 = vmul.f32 %v6260_v14, %v10113_v16 }
0x5073   :  { %v6262_v32 = vadd.f32 %v6261_v23, %v10114_v39 }
0x5075   :  { %7825 = vmatmul.mubr.msk.f32.vlgmr.msra.gmra.mxu1 %vm233_vm0, %v6262_v32 }
0x5076   :  { %7863 = vmatpush3.msra.mxu1 %v9688_v11  ;;  %7870 = vmatprep.mubr.msk.f32.mxu1 %vm8159_vm4, %v10067_v50 }
0x5077   :  { %7864 = vmatprep.subr.mxu1 %v10067_v50 }
0x5078   :  { %7865 = vmatpush3.msra.mxu1 %v9697_v21 }
0x5079   :  { %7866 = vmatprep.subr.mxu1 %v10067_v50 }
0x507a   :  { %7867 = vmatpush3.msra.mxu1 %v9704_v1 }
0x507b   :  { %7868 = vmatprep.subr.mxu1 %v10067_v50 }
0x507c   :  { %7869 = vmatpush3.msra.mxu1 %v9711_v33  ;;  %v8153_v33 = vld [vmem:[%s9997_s3 + $0x5] ss:$0 sm:$0xff] }
0x5135   :  { %v6332_v12 = vpop.f32.mrf.mxu1 }
0x5136   :  { %v6333_v30 = vadd.f32 %v9718_v34, %v6332_v12 }
0x5137   :  { %v7826_v48 = vpop.f32.mrf.mxu1 }
0x5138   :  { %v6336_v11 = vmul.f32 %v6333_v30, %v6333_v30 }
0x513a   :  { %v6337_v54 = vmul.f32 %v6336_v11, %v6333_v30 }
0x513c   :  { %v6338_v58 = vmul.f32 0.044715, %v6337_v54 }
0x513e   :  { %v6339_v7 = vadd.f32 %v6338_v58, %v6333_v30 }
0x5140   :  { %v6340_v10 = vmul.f32 0.7978846, %v6339_v7 }
0x5142   :  { %8105 = vtanh.f32 %v6340_v10 }
0x514f   :  { %v8106_v25 = vpop.eup %8105 }
0x5150   :  { %v6342_v21 = vadd.f32 1.0, %v8106_v25 }
0x5152   :  { %v6343_v43 = vmul.f32 0.5, %v6342_v21 }
0x5154   :  { %v6344_v20 = vmul.f32 %v6343_v43, %v6333_v30 }
0x5156   :  { %7860 = vmatmul.mubr.f32.vlgmr.msra.gmra.mxu0 %v6344_v20 }
0x5216   :  { %v6411_v1 = vpop.f32.mrf.mxu0 }
0x5217   :  { %v6415_v26 = vadd.f32 %v6411_v1, %v6247_v31  ;;  %v3030_v31 = vrot.slane %v10116_v51, %v10097_v37 }
0x5218   :  { %v7861_v36 = vpop.f32.mrf.mxu0 }
0x5219   :  { %v6416_v34 = vadd.f32 %v8153_v33, %v6415_v26  ;;  %v3031_v13 = vsel %vm3018_vm11, %v3030_v31, %v1695_v5 }
0x521a   :  { %v4222_v61 = vsel %vm4209_vm15, %v4221_v35, %v3031_v13 }
0x521b   :  { %v6418_v2 = vsel %vm6417_vm3, %v6416_v34, 0.0  ;;  %v5413_v50 = vsel %vm5400_vm9, %v5412_v6, %v4222_v61 }
0x521c   :  { %6419 = vadd.xlane.f32.xlu0 %v6418_v2 }
0x52a5   :  { %v6420_v28 = vpop.xlane.xlu0 %6419 }
0x52a6   :  { %v6421_v29 = vmul.f32 0.03125, %v6420_v28 }
0x52a8   :  { %v6422_v22 = vsub.f32 %v6416_v34, %v6421_v29 }
0x52aa   :  { %v6423_v55 = vmul.f32 %v6422_v22, %v6422_v22 }
0x52ac   :  { %v6424_v56 = vsel %vm6417_vm3, %v6423_v55, 0.0 }
0x52ad   :  { %6425 = vadd.xlane.f32.xlu1 %v6424_v56 }
0x5336   :  { %v6426_v17 = vpop.xlane.xlu1 %6425 }
0x5337   :  { %v6427_v27 = vmul.f32 0.03125, %v6426_v17 }
0x5339   :  { %v6428_v24 = vadd.f32 1e-05, %v6427_v27 }
0x533b   :  { %8107 = vrsqrt.f32 %v6428_v24 }
0x5348   :  { %v8108_v3 = vpop.eup %8107 }
0x5349   :  { %v6430_v19 = vmul.f32 %v8108_v3, %v6422_v22 }
0x534b   :  { %v6433_v41 = vmul.f32 %v6431_v62, %v6430_v19 }
0x534d   :  { %v6434_v18 = vadd.f32 %v6433_v41, %v10115_v63 }
0x534f   :  { %v6436_v42 = vrot.slane %v6434_v18, 3 }
0x5351   :  { %7871 = vmatmul.mubr.msk.f32.vlgmr.msra.gmra.mxu1 %vm233_vm0, %v6436_v42  ;;  %vm6518_vm0 = vcmp.eq.s32.totalorder %v10098_v49, 4 }
0x5411   :  { %v6505_v53 = vpop.f32.mrf.mxu1 }
0x5412   :  { %v6509_v57 = vsel %vm2934_vm7, %v6505_v53, -1e+30 }
0x5413   :  { %v6510_v47 = vsel %vm2936_vm8, %v6509_v57, -inf  ;;  %v7872_v45 = vpop.f32.mrf.mxu1 }
0x5414   :  { %6511 = vmax.xlane.f32.xlu0 %v6510_v47 }
0x549d   :  { %v6512_v40 = vpop.xlane.xlu0 %6511 }
0x549e   :  { %vm6513_vm4 = vcmp.ge.f32.partialorder %v6509_v57, %v6512_v40 }
0x549f   :  { %v6514_v60 = vsel %vm6513_vm4, %v9163_v38, 128.0 }
0x54a0   :  { %v6515_v52 = vsel %vm2936_vm8, %v6514_v60, inf }
0x54a1   :  { %6516 = vmin.xlane.f32.xlu1 %v6515_v52 }
0x552a   :  { %v6517_v38 = vpop.xlane.xlu1 %6516 }
0x552b   :  { %v6524_v59 = vrot.slane %v6517_v38, %v10097_v37 }
0x552d   :  { %v6525_v4 = vsel %vm6518_vm0, %v6524_v59, %v5413_v50 }
0x552e   :  { %v7873_v15 = vtrunc.f32 %v6525_v4 }
0x5530   :  { %v7874_v9 = vcvt.f32.s32 %v7873_v15 }
0x5532   :  { %6527 = vst [vmem:[%s9999_s4] sm:$0xff] %v7874_v9 }

</bundles_post_ra>
